<compile_context>
chip_gen: v7x
topology: tpu7x:2x2x1
jax: 0.10.0
libtpu: 0.0.40
codegen_flags: <defaults>
</compile_context>

<pallas_src>
import functools

import numpy as np
import jax
import jax.numpy as jnp
from jax.experimental import pallas as pl
from jax.experimental.pallas import tpu as pltpu

SQRT2 = float(np.sqrt(2.0))
LRELU_SLOPE = 0.2


def _round_up(x, m):
    return ((x + m - 1) // m) * m


def _lrelu_scaled(y):
    # fused_leaky_relu: lrelu(0.2) * sqrt(2)   (f32 elementwise, VPU)
    return jnp.where(y >= 0.0, y, LRELU_SLOPE * y) * SQRT2


# --------------------------------------------------------------------------
# Kernels
# --------------------------------------------------------------------------
def _mapping_kernel(z_ref, mw_ref, mb_ref, sw_ref, sb_ref, o_ref,
                    *, n_layers, c_real):
    """PixelNorm + n_layers EqualLinear(+fused lrelu) + to_stylemap, fused."""
    x = z_ref[...].astype(jnp.float32)                   # (B, 128) lane-padded
    # PixelNorm over the *real* latent channels (padding lanes are zero).
    x = x * jax.lax.rsqrt(jnp.sum(x * x, axis=-1, keepdims=True) / c_real
                          + 1e-8)
    for l in range(n_layers):                            # static unroll
        y = jnp.dot(x.astype(jnp.bfloat16), mw_ref[l],
                    preferred_element_type=jnp.float32) + mb_ref[l]
        x = _lrelu_scaled(y)
    o_ref[...] = jnp.dot(x.astype(jnp.bfloat16), sw_ref[...],
                         preferred_element_type=jnp.float32) + sb_ref[...]


def _decoder_kernel(sm_ref, const_ref, gbw_ref, gbb_ref, cw_ref, cb_ref,
                    rgbw_ref, rgbb_ref, *rest, S, size, CP, DP, n_levels):
    """Whole decoder for one batch sample (grid axis = batch).

    rest = (up_ref_0 .. up_ref_{L-2}, o_ref, feat_ref, pad_ref)
    """
    f32, bf16 = jnp.float32, jnp.bfloat16
    n_up = n_levels - 1
    up_refs = rest[:n_up]
    o_ref = rest[n_up]
    feat_ref = rest[n_up + 1]
    pad_ref = rest[n_up + 2]

    # Zero the padded bf16 conv-input scratch once; the 1-pixel border stays
    # zero for every level (interiors only grow monotonically across levels).
    pad_ref[...] = jnp.zeros_like(pad_ref)
    # feat carried across levels through VMEM scratch (bounds live ranges).
    feat_ref[0:S * S, :] = const_ref[...]

    sm = sm_ref[0]                                       # (S*S, CP) f32
    q = S                                                # modulation resolution
    for l in range(n_levels):                            # static unroll
        if l >= 2:
            # nearest-2x upsample of the stylemap (bf16 0/1 selection matmul)
            sm = jnp.dot(up_refs[l - 2][...], sm.astype(bf16),
                         preferred_element_type=f32)
            q *= 2

        # fused gamma/beta 1x1 style-mod conv: one matmul with N = 2*DP
        gb = jnp.dot(sm.astype(bf16), gbw_ref[l],
                     preferred_element_type=f32) + gbb_ref[l]
        gamma, beta = gb[:, :DP], gb[:, DP:]

        feat = feat_ref[0:q * q, :]                      # (q*q, DP) f32
        m = feat * (1.0 + gamma) + beta

        if l > 0:
            # nearest-2x upsample of the modulated features (identical to
            # upsample-then-modulate: modulation is per-pixel, upsample nearest)
            m = jnp.dot(up_refs[l - 1][...], m.astype(bf16),
                        preferred_element_type=f32)
            R = 2 * q
        else:
            R = q

        # stage the zero-padded conv input in bf16 VMEM
        pad_ref[1:R + 1, 1:R + 1, :] = m.reshape(R, R, DP).astype(bf16)

        # 3x3 conv as 9 tap matmuls accumulated in f32 (no im2col staging)
        y = jnp.zeros((R * R, DP), f32)
        for t in range(9):
            dh, dw = t // 3, t % 3
            patch = pad_ref[dh:dh + R, dw:dw + R, :].reshape(R * R, DP)
            y = y + jnp.dot(patch, cw_ref[l, t], preferred_element_type=f32)
        feat_ref[0:R * R, :] = _lrelu_scaled(y + cb_ref[l])

    # lane-dense 1x1 ToRGB: real RGB lives in lanes 0..2, remaining lanes zero
    o_ref[0] = jnp.dot(feat_ref[...].astype(bf16), rgbw_ref[...],
                       preferred_element_type=f32) + rgbb_ref[...]


# --------------------------------------------------------------------------
# Parameter construction (deterministic, equalized-lr init, lane-padded)
# --------------------------------------------------------------------------
def init_dp_model_params(key, cfg):
    C = cfg["latent_channel_size"]
    S = cfg["latent_spatial_size"]
    Cd = 32 * cfg["channel_multiplier"]
    size = cfg["size"]
    L = int(np.log2(size // S)) + 1
    Lm = cfg["mapping_layer_num"]
    lr_mul = cfg["lr_mul"]
    CPm = 128                    # lane-padded mapping/latent channels
    CP = _round_up(C, 128)       # lane-padded stylemap channels
    DP = _round_up(Cd, 128)      # lane-padded decoder channels

    keys = jax.random.split(key, Lm + 2 * L + 3)
    ki = iter(range(len(keys)))

    # mapping EqualLinear stack (equalized lr, bias init 0), padded to 128
    mw, mb = [], []
    for _ in range(Lm):
        raw = jax.random.normal(keys[next(ki)], (C, C), jnp.float32) / lr_mul
        w = raw.T * ((1.0 / np.sqrt(C)) * lr_mul)
        mw.append(jnp.pad(w, ((0, CPm - C), (0, CPm - C))))
        mb.append(jnp.zeros((1, CPm), jnp.float32))
    map_w = jnp.stack(mw).astype(jnp.bfloat16)           # (Lm, 128, 128)
    map_b = jnp.stack(mb)                                 # (Lm, 1, 128)

    # latent -> spatial stylemap; columns in NHWC-flat order, CP lanes / pixel
    raw = jax.random.normal(keys[next(ki)], (C * S * S, C), jnp.float32)
    w_eff = raw.T * (1.0 / np.sqrt(C))                   # (C, C*S*S)
    w4 = w_eff.reshape(C, C, S, S).transpose(0, 2, 3, 1)  # (C, S, S, C)
    w4 = jnp.pad(w4, ((0, 0), (0, 0), (0, 0), (0, CP - C)))
    sm_w = jnp.pad(w4.reshape(C, S * S * CP), ((0, CPm - C), (0, 0)))
    sm_w = sm_w.astype(jnp.bfloat16)                      # (128, S*S*CP)
    sm_b = jnp.zeros((1, S * S * CP), jnp.float32)

    const = jax.random.normal(keys[next(ki)], (S * S, Cd), jnp.float32)
    const = jnp.pad(const, ((0, 0), (0, DP - Cd)))        # (S*S, DP)

    gbw, gbb, cw, cb = [], [], [], []
    for _ in range(L):
        mwgt = jax.random.normal(keys[next(ki)], (C, 2 * Cd), jnp.float32) \
            * (1.0 / np.sqrt(C))
        w = jnp.zeros((CP, 2 * DP), jnp.float32)
        w = w.at[:C, :Cd].set(mwgt[:, :Cd])               # gamma part
        w = w.at[:C, DP:DP + Cd].set(mwgt[:, Cd:])        # beta part
        gbw.append(w)
        gbb.append(jnp.zeros((1, 2 * DP), jnp.float32))

        wc = jax.random.normal(keys[next(ki)], (3, 3, Cd, Cd), jnp.float32) \
            * (1.0 / np.sqrt(9 * Cd))
        wt = jnp.zeros((9, DP, DP), jnp.float32)
        for t in range(9):
            wt = wt.at[t, :Cd, :Cd].set(wc[t // 3, t % 3])
        cw.append(wt)
        cb.append(jnp.zeros((1, DP), jnp.float32))

    w = jax.random.normal(keys[next(ki)], (Cd, 3), jnp.float32) \
        * (1.0 / np.sqrt(Cd))
    rgb_w = jnp.zeros((DP, 128), jnp.float32).at[:Cd, :3].set(w)
    rgb_w = rgb_w.astype(jnp.bfloat16)                    # lane-dense ToRGB
    rgb_b = jnp.zeros((1, 128), jnp.float32)

    # nearest-2x 0/1 selection matrices (host-precomputed, bf16).
    # TODO(synk): O(q^4) memory; for production resolutions replace with a
    # strided-store duplication or a transposed-conv phase decomposition.
    ups = []
    for k in range(L - 1):
        q = S * (2 ** k)
        P = np.zeros((4 * q * q, q * q), np.float32)
        r = np.arange(4 * q * q)
        i2, j2 = r // (2 * q), r % (2 * q)
        P[r, (i2 // 2) * q + (j2 // 2)] = 1.0
        ups.append(jnp.asarray(P, jnp.bfloat16))

    return {
        "map_w": map_w, "map_b": map_b, "sm_w": sm_w, "sm_b": sm_b,
        "const": const,
        "gbw": jnp.stack(gbw).astype(jnp.bfloat16), "gbb": jnp.stack(gbb),
        "cw": jnp.stack(cw).astype(jnp.bfloat16), "cb": jnp.stack(cb),
        "rgb_w": rgb_w, "rgb_b": rgb_b, "ups": ups,
    }


# --------------------------------------------------------------------------
# DPModel.forward : real_img is used directly as latent z (as in fid.py)
# --------------------------------------------------------------------------
def dp_model_forward(z, params, cfg):
    B = z.shape[0]
    C = cfg["latent_channel_size"]
    S = cfg["latent_spatial_size"]
    size = cfg["size"]
    L = int(np.log2(size // S)) + 1
    Lm = cfg["mapping_layer_num"]
    Cd = 32 * cfg["channel_multiplier"]
    CPm = 128
    CP = _round_up(C, 128)
    DP = _round_up(Cd, 128)

    # Lane-pad the latent so every mapping matmul runs with K=128 (padding is
    # inert: padded weight rows/cols are zero, PixelNorm divides by real C).
    z_p = jnp.pad(z.astype(jnp.float32), ((0, 0), (0, CPm - C)))

    # fused mapping network: PixelNorm + Lm EqualLinears + to_stylemap
    sm_flat = pl.pallas_call(
        functools.partial(_mapping_kernel, n_layers=Lm, c_real=float(C)),
        out_shape=jax.ShapeDtypeStruct((B, S * S * CP), jnp.float32),
        grid=(1,),
        in_specs=[
            pl.BlockSpec((B, CPm), lambda i: (0, 0)),
            pl.BlockSpec((Lm, CPm, CPm), lambda i: (0, 0, 0)),
            pl.BlockSpec((Lm, 1, CPm), lambda i: (0, 0, 0)),
            pl.BlockSpec((CPm, S * S * CP), lambda i: (0, 0)),
            pl.BlockSpec((1, S * S * CP), lambda i: (0, 0)),
        ],
        out_specs=pl.BlockSpec((B, S * S * CP), lambda i: (0, 0)),
        compiler_params=pltpu.CompilerParams(
            dimension_semantics=("arbitrary",)),
    )(z_p, params["map_w"], params["map_b"], params["sm_w"], params["sm_b"])

    # Row-major (B, S*S*CP) -> (B, S*S, CP) is a layout no-op in XLA.
    sm3 = sm_flat.reshape(B, S * S, CP)

    ups = params["ups"]
    up_specs = [pl.BlockSpec(p.shape, lambda i: (0, 0)) for p in ups]

    # fused decoder: all levels (mod + upsample + 3x3 conv + lrelu) + ToRGB.
    # Grid over batch keeps both v7x TensorCores busy for B>=2.
    # TODO(synk): for large B fold a batch block into the matmul M dimension;
    # for production sizes stream cw[l] per level via make_async_copy instead
    # of holding the full (L, 9, DP, DP) stack resident.
    rgb = pl.pallas_call(
        functools.partial(_decoder_kernel, S=S, size=size, CP=CP, DP=DP,
                          n_levels=L),
        out_shape=jax.ShapeDtypeStruct((B, size * size, 128), jnp.float32),
        grid=(B,),
        in_specs=[
            pl.BlockSpec((1, S * S, CP), lambda i: (i, 0, 0)),
            pl.BlockSpec((S * S, DP), lambda i: (0, 0)),
            pl.BlockSpec((L, CP, 2 * DP), lambda i: (0, 0, 0)),
            pl.BlockSpec((L, 1, 2 * DP), lambda i: (0, 0, 0)),
            pl.BlockSpec((L, 9, DP, DP), lambda i: (0, 0, 0, 0)),
            pl.BlockSpec((L, 1, DP), lambda i: (0, 0, 0)),
            pl.BlockSpec((DP, 128), lambda i: (0, 0)),
            pl.BlockSpec((1, 128), lambda i: (0, 0)),
        ] + up_specs,
        out_specs=pl.BlockSpec((1, size * size, 128), lambda i: (i, 0, 0)),
        scratch_shapes=[
            pltpu.VMEM((size * size, DP), jnp.float32),         # feat carry
            pltpu.VMEM((size + 2, size + 2, DP), jnp.bfloat16),  # padded conv in
        ],
        compiler_params=pltpu.CompilerParams(
            dimension_semantics=("parallel",),
            vmem_limit_bytes=48 * 1024 * 1024),
    )(sm3, params["const"], params["gbw"], params["gbb"], params["cw"],
      params["cb"], params["rgb_w"], params["rgb_b"], *ups)

    # Lane-dense kernel output: keep the 3 real channels, go NHWC -> NCHW.
    img = rgb[..., :3].reshape(B, size, size, 3).transpose(0, 3, 1, 2)
    return img


# --------------------------------------------------------------------------
if __name__ == "__main__":
    cfg = dict(size=16, mapping_layer_num=2, latent_channel_size=32,
               latent_spatial_size=4, lr_mul=0.01, channel_multiplier=1,
               normalize_mode=None, small_generator=True)
    # TODO(synk): exact StyleMapGAN modulated-conv (weight demod, noise, ToRGB
    # skips) and the small_generator / normalize_mode variants are not in the
    # provided snippet; approximated by per-pixel affine modulation.

    key = jax.random.PRNGKey(0)
    k_param, k_z = jax.random.split(key)
    params = init_dp_model_params(k_param, cfg)

    # DPModel.forward(real_img): real_img is consumed as the latent z.
    z = jax.random.normal(k_z, (2, cfg["latent_channel_size"]), jnp.float32)

    fwd = jax.jit(lambda zz: dp_model_forward(zz, params, cfg))
    fake_img = jax.block_until_ready(fwd(z))

    assert fake_img.shape == (2, 3, cfg["size"], cfg["size"])
    assert fake_img.dtype == jnp.float32
    assert bool(jnp.all(jnp.isfinite(fake_img)))
    print("KERNEL_OK")
</pallas_src>

<mosaic_0001>
module attributes {stable_mosaic.version = 11 : i64} {
  func.func @_mapping_kernel(%arg0: i32, %arg1: memref<2x128xf32, #tpu.memory_space<vmem>>, %arg2: memref<2x128x128xbf16, #tpu.memory_space<vmem>>, %arg3: memref<2x1x128xf32, #tpu.memory_space<vmem>>, %arg4: memref<128x2048xbf16, #tpu.memory_space<vmem>>, %arg5: memref<1x2048xf32, #tpu.memory_space<vmem>>, %arg6: memref<2x2048xf32, #tpu.memory_space<vmem>>) attributes {dimension_semantics = [#tpu.dimension_semantics<arbitrary>], iteration_bounds = array<i64: 1>, scalar_prefetch = 0 : i64, scratch_operands = 0 : i64, tpu.core_type = #tpu.core_type<tc>, window_params = [{pipeline_mode = #tpu.pipeline_mode<synchronous>, transform_indices = @transform_0, window_bounds = array<i64: 2, 128>}, {pipeline_mode = #tpu.pipeline_mode<synchronous>, transform_indices = @transform_1, window_bounds = array<i64: 2, 128, 128>}, {pipeline_mode = #tpu.pipeline_mode<synchronous>, transform_indices = @transform_2, window_bounds = array<i64: 2, 1, 128>}, {pipeline_mode = #tpu.pipeline_mode<synchronous>, transform_indices = @transform_3, window_bounds = array<i64: 128, 2048>}, {pipeline_mode = #tpu.pipeline_mode<synchronous>, transform_indices = @transform_4, window_bounds = array<i64: 1, 2048>}, {pipeline_mode = #tpu.pipeline_mode<synchronous>, transform_indices = @transform_5, window_bounds = array<i64: 2, 2048>}]} {
    %c0 = arith.constant 0 : index
    %c0_0 = arith.constant 0 : index
    %0 = vector.load %arg1[%c0, %c0_0] : memref<2x128xf32, #tpu.memory_space<vmem>>, vector<2x128xf32>
    %1 = arith.mulf %0, %0 : vector<2x128xf32>
    %cst = arith.constant dense<0.000000e+00> : vector<2xf32>
    %2 = vector.multi_reduction <add>, %1, %cst [1] : vector<2x128xf32> to vector<2xf32>
    %3 = vector.shape_cast %2 : vector<2xf32> to vector<2x1xf32>
    %cst_1 = arith.constant 3.200000e+01 : f32
    %4 = vector.broadcast %cst_1 : f32 to vector<2x1xf32>
    %5 = arith.divf %3, %4 : vector<2x1xf32>
    %cst_2 = arith.constant 9.99999993E-9 : f32
    %6 = vector.broadcast %cst_2 : f32 to vector<2x1xf32>
    %7 = arith.addf %5, %6 : vector<2x1xf32>
    %8 = math.rsqrt %7 : vector<2x1xf32>
    %9 = vector.broadcast %8 : vector<2x1xf32> to vector<2x128xf32>
    %10 = arith.mulf %0, %9 : vector<2x128xf32>
    %11 = arith.truncf %10 : vector<2x128xf32> to vector<2x128xbf16>
    %c0_3 = arith.constant 0 : index
    %c0_4 = arith.constant 0 : index
    %c0_5 = arith.constant 0 : index
    %12 = vector.load %arg2[%c0_3, %c0_4, %c0_5] : memref<2x128x128xbf16, #tpu.memory_space<vmem>>, vector<1x128x128xbf16>
    %13 = vector.shape_cast %12 : vector<1x128x128xbf16> to vector<128x128xbf16>
    %cst_6 = arith.constant dense<0.000000e+00> : vector<2x128xf32>
    %14 = tpu.matmul %11, %13, %cst_6 {dimension_numbers = #tpu.dot_dimension_numbers<[1], [0], [0], [1], [0, 0, 1, 1], [], []>} : vector<2x128xbf16>, vector<128x128xbf16>, vector<2x128xf32> -> vector<2x128xf32>
    %c0_7 = arith.constant 0 : index
    %c0_8 = arith.constant 0 : index
    %c0_9 = arith.constant 0 : index
    %15 = vector.load %arg3[%c0_7, %c0_8, %c0_9] : memref<2x1x128xf32, #tpu.memory_space<vmem>>, vector<1x1x128xf32>
    %16 = vector.shape_cast %15 : vector<1x1x128xf32> to vector<1x128xf32>
    %17 = vector.broadcast %16 : vector<1x128xf32> to vector<2x128xf32>
    %18 = arith.addf %14, %17 : vector<2x128xf32>
    %cst_10 = arith.constant 0.000000e+00 : f32
    %19 = vector.broadcast %cst_10 : f32 to vector<2x128xf32>
    %20 = arith.cmpf oge, %18, %19 : vector<2x128xf32>
    %cst_11 = arith.constant 2.000000e-01 : f32
    %21 = vector.broadcast %cst_11 : f32 to vector<2x128xf32>
    %22 = arith.mulf %21, %18 : vector<2x128xf32>
    %23 = arith.select %20, %18, %22 : vector<2x128xi1>, vector<2x128xf32>
    %cst_12 = arith.constant 1.41421354 : f32
    %24 = vector.broadcast %cst_12 : f32 to vector<2x128xf32>
    %25 = arith.mulf %23, %24 : vector<2x128xf32>
    %26 = arith.truncf %25 : vector<2x128xf32> to vector<2x128xbf16>
    %c1 = arith.constant 1 : index
    %c0_13 = arith.constant 0 : index
    %c0_14 = arith.constant 0 : index
    %27 = vector.load %arg2[%c1, %c0_13, %c0_14] : memref<2x128x128xbf16, #tpu.memory_space<vmem>>, vector<1x128x128xbf16>
    %28 = vector.shape_cast %27 : vector<1x128x128xbf16> to vector<128x128xbf16>
    %cst_15 = arith.constant dense<0.000000e+00> : vector<2x128xf32>
    %29 = tpu.matmul %26, %28, %cst_15 {dimension_numbers = #tpu.dot_dimension_numbers<[1], [0], [0], [1], [0, 0, 1, 1], [], []>} : vector<2x128xbf16>, vector<128x128xbf16>, vector<2x128xf32> -> vector<2x128xf32>
    %c1_16 = arith.constant 1 : index
    %c0_17 = arith.constant 0 : index
    %c0_18 = arith.constant 0 : index
    %30 = vector.load %arg3[%c1_16, %c0_17, %c0_18] : memref<2x1x128xf32, #tpu.memory_space<vmem>>, vector<1x1x128xf32>
    %31 = vector.shape_cast %30 : vector<1x1x128xf32> to vector<1x128xf32>
    %32 = vector.broadcast %31 : vector<1x128xf32> to vector<2x128xf32>
    %33 = arith.addf %29, %32 : vector<2x128xf32>
    %cst_19 = arith.constant 0.000000e+00 : f32
    %34 = vector.broadcast %cst_19 : f32 to vector<2x128xf32>
    %35 = arith.cmpf oge, %33, %34 : vector<2x128xf32>
    %cst_20 = arith.constant 2.000000e-01 : f32
    %36 = vector.broadcast %cst_20 : f32 to vector<2x128xf32>
    %37 = arith.mulf %36, %33 : vector<2x128xf32>
    %38 = arith.select %35, %33, %37 : vector<2x128xi1>, vector<2x128xf32>
    %cst_21 = arith.constant 1.41421354 : f32
    %39 = vector.broadcast %cst_21 : f32 to vector<2x128xf32>
    %40 = arith.mulf %38, %39 : vector<2x128xf32>
    %41 = arith.truncf %40 : vector<2x128xf32> to vector<2x128xbf16>
    %c0_22 = arith.constant 0 : index
    %c0_23 = arith.constant 0 : index
    %42 = vector.load %arg4[%c0_22, %c0_23] : memref<128x2048xbf16, #tpu.memory_space<vmem>>, vector<128x2048xbf16>
    %cst_24 = arith.constant dense<0.000000e+00> : vector<2x2048xf32>
    %43 = tpu.matmul %41, %42, %cst_24 {dimension_numbers = #tpu.dot_dimension_numbers<[1], [0], [0], [1], [0, 0, 1, 1], [], []>} : vector<2x128xbf16>, vector<128x2048xbf16>, vector<2x2048xf32> -> vector<2x2048xf32>
    %c0_25 = arith.constant 0 : index
    %c0_26 = arith.constant 0 : index
    %44 = vector.load %arg5[%c0_25, %c0_26] : memref<1x2048xf32, #tpu.memory_space<vmem>>, vector<1x2048xf32>
    %45 = vector.broadcast %44 : vector<1x2048xf32> to vector<2x2048xf32>
    %46 = arith.addf %43, %45 : vector<2x2048xf32>
    %c0_27 = arith.constant 0 : index
    %c0_28 = arith.constant 0 : index
    %47 = vector.load %arg6[%c0_27, %c0_28] : memref<2x2048xf32, #tpu.memory_space<vmem>>, vector<2x2048xf32>
    tpu.vector_store %arg6[%c0_27, %c0_28], %46 {strides = array<i32>} : memref<2x2048xf32, #tpu.memory_space<vmem>>, vector<2x2048xf32>,
    return
  }
  func.func @transform_0(%arg0: i32) -> (i32, i32) {
    %c0_i32 = arith.constant 0 : i32
    %c0_i32_0 = arith.constant 0 : i32
    %c0_i32_1 = arith.constant 0 : i32
    return %c0_i32, %c0_i32_0 : i32, i32
  }
  func.func @transform_1(%arg0: i32) -> (i32, i32, i32) {
    %c0_i32 = arith.constant 0 : i32
    %c0_i32_0 = arith.constant 0 : i32
    %c0_i32_1 = arith.constant 0 : i32
    %c0_i32_2 = arith.constant 0 : i32
    return %c0_i32, %c0_i32_0, %c0_i32_1 : i32, i32, i32
  }
  func.func @transform_2(%arg0: i32) -> (i32, i32, i32) {
    %c0_i32 = arith.constant 0 : i32
    %c0_i32_0 = arith.constant 0 : i32
    %c0_i32_1 = arith.constant 0 : i32
    %c0_i32_2 = arith.constant 0 : i32
    return %c0_i32, %c0_i32_0, %c0_i32_1 : i32, i32, i32
  }
  func.func @transform_3(%arg0: i32) -> (i32, i32) {
    %c0_i32 = arith.constant 0 : i32
    %c0_i32_0 = arith.constant 0 : i32
    %c0_i32_1 = arith.constant 0 : i32
    return %c0_i32, %c0_i32_0 : i32, i32
  }
  func.func @transform_4(%arg0: i32) -> (i32, i32) {
    %c0_i32 = arith.constant 0 : i32
    %c0_i32_0 = arith.constant 0 : i32
    %c0_i32_1 = arith.constant 0 : i32
    return %c0_i32, %c0_i32_0 : i32, i32
  }
  func.func @transform_5(%arg0: i32) -> (i32, i32) {
    %c0_i32 = arith.constant 0 : i32
    %c0_i32_0 = arith.constant 0 : i32
    %c0_i32_1 = arith.constant 0 : i32
    return %c0_i32, %c0_i32_0 : i32, i32
  }
}

module attributes {stable_mosaic.version = 11 : i64} {
  func.func @_decoder_kernel(%arg0: i32, %arg1: memref<1x16x128xf32, #tpu.memory_space<vmem>>, %arg2: memref<16x128xf32, #tpu.memory_space<vmem>>, %arg3: memref<3x128x256xbf16, #tpu.memory_space<vmem>>, %arg4: memref<3x1x256xf32, #tpu.memory_space<vmem>>, %arg5: memref<3x9x128x128xbf16, #tpu.memory_space<vmem>>, %arg6: memref<3x1x128xf32, #tpu.memory_space<vmem>>, %arg7: memref<128x128xbf16, #tpu.memory_space<vmem>>, %arg8: memref<1x128xf32, #tpu.memory_space<vmem>>, %arg9: memref<64x16xbf16, #tpu.memory_space<vmem>>, %arg10: memref<256x64xbf16, #tpu.memory_space<vmem>>, %arg11: memref<1x256x128xf32, #tpu.memory_space<vmem>>, %arg12: memref<256x128xf32, #tpu.memory_space<vmem>>, %arg13: memref<18x18x128xbf16, #tpu.memory_space<vmem>>) attributes {dimension_semantics = [#tpu.dimension_semantics<parallel>], iteration_bounds = array<i64: 2>, scalar_prefetch = 0 : i64, scratch_operands = 2 : i64, tpu.core_type = #tpu.core_type<tc>, window_params = [{transform_indices = @transform_0, window_bounds = array<i64: 1, 16, 128>}, {pipeline_mode = #tpu.pipeline_mode<synchronous>, transform_indices = @transform_1, window_bounds = array<i64: 16, 128>}, {pipeline_mode = #tpu.pipeline_mode<synchronous>, transform_indices = @transform_2, window_bounds = array<i64: 3, 128, 256>}, {pipeline_mode = #tpu.pipeline_mode<synchronous>, transform_indices = @transform_3, window_bounds = array<i64: 3, 1, 256>}, {pipeline_mode = #tpu.pipeline_mode<synchronous>, transform_indices = @transform_4, window_bounds = array<i64: 3, 9, 128, 128>}, {pipeline_mode = #tpu.pipeline_mode<synchronous>, transform_indices = @transform_5, window_bounds = array<i64: 3, 1, 128>}, {pipeline_mode = #tpu.pipeline_mode<synchronous>, transform_indices = @transform_6, window_bounds = array<i64: 128, 128>}, {pipeline_mode = #tpu.pipeline_mode<synchronous>, transform_indices = @transform_7, window_bounds = array<i64: 1, 128>}, {pipeline_mode = #tpu.pipeline_mode<synchronous>, transform_indices = @transform_8, window_bounds = array<i64: 64, 16>}, {pipeline_mode = #tpu.pipeline_mode<synchronous>, transform_indices = @transform_9, window_bounds = array<i64: 256, 64>}, {transform_indices = @transform_10, window_bounds = array<i64: 1, 256, 128>}]} {
    %cst = arith.constant 0.000000e+00 : bf16
    %0 = vector.broadcast %cst : bf16 to vector<18x18x128xbf16>
    %c0 = arith.constant 0 : index
    %c0_0 = arith.constant 0 : index
    %c0_1 = arith.constant 0 : index
    %1 = vector.load %arg13[%c0, %c0_0, %c0_1] : memref<18x18x128xbf16, #tpu.memory_space<vmem>>, vector<18x18x128xbf16>
    tpu.vector_store %arg13[%c0, %c0_0, %c0_1], %0 {strides = array<i32>} : memref<18x18x128xbf16, #tpu.memory_space<vmem>>, vector<18x18x128xbf16>,
    %c0_2 = arith.constant 0 : index
    %c0_3 = arith.constant 0 : index
    %2 = vector.load %arg2[%c0_2, %c0_3] : memref<16x128xf32, #tpu.memory_space<vmem>>, vector<16x128xf32>
    %c0_4 = arith.constant 0 : index
    %c0_5 = arith.constant 0 : index
    %3 = vector.load %arg12[%c0_4, %c0_5] : memref<256x128xf32, #tpu.memory_space<vmem>>, vector<16x128xf32>
    tpu.vector_store %arg12[%c0_4, %c0_5], %2 {strides = array<i32>} : memref<256x128xf32, #tpu.memory_space<vmem>>, vector<16x128xf32>,
    %c0_6 = arith.constant 0 : index
    %c0_7 = arith.constant 0 : index
    %c0_8 = arith.constant 0 : index
    %4 = vector.load %arg1[%c0_6, %c0_7, %c0_8] : memref<1x16x128xf32, #tpu.memory_space<vmem>>, vector<1x16x128xf32>
    %5 = vector.shape_cast %4 : vector<1x16x128xf32> to vector<16x128xf32>
    %6 = arith.truncf %5 : vector<16x128xf32> to vector<16x128xbf16>
    %c0_9 = arith.constant 0 : index
    %c0_10 = arith.constant 0 : index
    %c0_11 = arith.constant 0 : index
    %7 = vector.load %arg3[%c0_9, %c0_10, %c0_11] : memref<3x128x256xbf16, #tpu.memory_space<vmem>>, vector<1x128x256xbf16>
    %8 = vector.shape_cast %7 : vector<1x128x256xbf16> to vector<128x256xbf16>
    %cst_12 = arith.constant dense<0.000000e+00> : vector<16x256xf32>
    %9 = tpu.matmul %6, %8, %cst_12 {dimension_numbers = #tpu.dot_dimension_numbers<[1], [0], [0], [1], [0, 0, 1, 1], [], []>} : vector<16x128xbf16>, vector<128x256xbf16>, vector<16x256xf32> -> vector<16x256xf32>
    %c0_13 = arith.constant 0 : index
    %c0_14 = arith.constant 0 : index
    %c0_15 = arith.constant 0 : index
    %10 = vector.load %arg4[%c0_13, %c0_14, %c0_15] : memref<3x1x256xf32, #tpu.memory_space<vmem>>, vector<1x1x256xf32>
    %11 = vector.shape_cast %10 : vector<1x1x256xf32> to vector<1x256xf32>
    %12 = vector.broadcast %11 : vector<1x256xf32> to vector<16x256xf32>
    %13 = arith.addf %9, %12 : vector<16x256xf32>
    %14 = vector.extract_strided_slice %13 {offsets = [0, 0], sizes = [16, 128], strides = [1, 1]} : vector<16x256xf32> to vector<16x128xf32>
    %15 = vector.extract_strided_slice %13 {offsets = [0, 128], sizes = [16, 128], strides = [1, 1]} : vector<16x256xf32> to vector<16x128xf32>
    %c0_16 = arith.constant 0 : index
    %c0_17 = arith.constant 0 : index
    %16 = vector.load %arg12[%c0_16, %c0_17] : memref<256x128xf32, #tpu.memory_space<vmem>>, vector<16x128xf32>
    %cst_18 = arith.constant 1.000000e+00 : f32
    %17 = vector.broadcast %cst_18 : f32 to vector<16x128xf32>
    %18 = arith.addf %17, %14 : vector<16x128xf32>
    %19 = arith.mulf %16, %18 : vector<16x128xf32>
    %20 = arith.addf %19, %15 : vector<16x128xf32>
    %21 = vector.shape_cast %20 : vector<16x128xf32> to vector<4x4x128xf32>
    %22 = arith.truncf %21 : vector<4x4x128xf32> to vector<4x4x128xbf16>
    %c1 = arith.constant 1 : index
    %c1_19 = arith.constant 1 : index
    %c0_20 = arith.constant 0 : index
    %23 = vector.load %arg13[%c1, %c1_19, %c0_20] : memref<18x18x128xbf16, #tpu.memory_space<vmem>>, vector<4x4x128xbf16>
    tpu.vector_store %arg13[%c1, %c1_19, %c0_20], %22 {strides = array<i32>} : memref<18x18x128xbf16, #tpu.memory_space<vmem>>, vector<4x4x128xbf16>,
    %cst_21 = arith.constant 0.000000e+00 : f32
    %24 = vector.broadcast %cst_21 : f32 to vector<16x128xf32>
    %c0_22 = arith.constant 0 : index
    %c0_23 = arith.constant 0 : index
    %c0_24 = arith.constant 0 : index
    %25 = vector.load %arg13[%c0_22, %c0_23, %c0_24] : memref<18x18x128xbf16, #tpu.memory_space<vmem>>, vector<4x4x128xbf16>
    %26 = vector.shape_cast %25 : vector<4x4x128xbf16> to vector<16x128xbf16>
    %c0_25 = arith.constant 0 : index
    %c0_26 = arith.constant 0 : index
    %c0_27 = arith.constant 0 : index
    %c0_28 = arith.constant 0 : index
    %27 = vector.load %arg5[%c0_25, %c0_26, %c0_27, %c0_28] : memref<3x9x128x128xbf16, #tpu.memory_space<vmem>>, vector<1x1x128x128xbf16>
    %28 = vector.shape_cast %27 : vector<1x1x128x128xbf16> to vector<128x128xbf16>
    %cst_29 = arith.constant dense<0.000000e+00> : vector<16x128xf32>
    %29 = tpu.matmul %26, %28, %cst_29 {dimension_numbers = #tpu.dot_dimension_numbers<[1], [0], [0], [1], [0, 0, 1, 1], [], []>} : vector<16x128xbf16>, vector<128x128xbf16>, vector<16x128xf32> -> vector<16x128xf32>
    %30 = arith.addf %24, %29 : vector<16x128xf32>
    %c0_30 = arith.constant 0 : index
    %c1_31 = arith.constant 1 : index
    %c0_32 = arith.constant 0 : index
    %31 = vector.load %arg13[%c0_30, %c1_31, %c0_32] : memref<18x18x128xbf16, #tpu.memory_space<vmem>>, vector<4x4x128xbf16>
    %32 = vector.shape_cast %31 : vector<4x4x128xbf16> to vector<16x128xbf16>
    %c0_33 = arith.constant 0 : index
    %c1_34 = arith.constant 1 : index
    %c0_35 = arith.constant 0 : index
    %c0_36 = arith.constant 0 : index
    %33 = vector.load %arg5[%c0_33, %c1_34, %c0_35, %c0_36] : memref<3x9x128x128xbf16, #tpu.memory_space<vmem>>, vector<1x1x128x128xbf16>
    %34 = vector.shape_cast %33 : vector<1x1x128x128xbf16> to vector<128x128xbf16>
    %cst_37 = arith.constant dense<0.000000e+00> : vector<16x128xf32>
    %35 = tpu.matmul %32, %34, %cst_37 {dimension_numbers = #tpu.dot_dimension_numbers<[1], [0], [0], [1], [0, 0, 1, 1], [], []>} : vector<16x128xbf16>, vector<128x128xbf16>, vector<16x128xf32> -> vector<16x128xf32>
    %36 = arith.addf %30, %35 : vector<16x128xf32>
    %c0_38 = arith.constant 0 : index
    %c2 = arith.constant 2 : index
    %c0_39 = arith.constant 0 : index
    %37 = vector.load %arg13[%c0_38, %c2, %c0_39] : memref<18x18x128xbf16, #tpu.memory_space<vmem>>, vector<4x4x128xbf16>
    %38 = vector.shape_cast %37 : vector<4x4x128xbf16> to vector<16x128xbf16>
    %c0_40 = arith.constant 0 : index
    %c2_41 = arith.constant 2 : index
    %c0_42 = arith.constant 0 : index
    %c0_43 = arith.constant 0 : index
    %39 = vector.load %arg5[%c0_40, %c2_41, %c0_42, %c0_43] : memref<3x9x128x128xbf16, #tpu.memory_space<vmem>>, vector<1x1x128x128xbf16>
    %40 = vector.shape_cast %39 : vector<1x1x128x128xbf16> to vector<128x128xbf16>
    %cst_44 = arith.constant dense<0.000000e+00> : vector<16x128xf32>
    %41 = tpu.matmul %38, %40, %cst_44 {dimension_numbers = #tpu.dot_dimension_numbers<[1], [0], [0], [1], [0, 0, 1, 1], [], []>} : vector<16x128xbf16>, vector<128x128xbf16>, vector<16x128xf32> -> vector<16x128xf32>
    %42 = arith.addf %36, %41 : vector<16x128xf32>
    %c1_45 = arith.constant 1 : index
    %c0_46 = arith.constant 0 : index
    %c0_47 = arith.constant 0 : index
    %43 = vector.load %arg13[%c1_45, %c0_46, %c0_47] : memref<18x18x128xbf16, #tpu.memory_space<vmem>>, vector<4x4x128xbf16>
    %44 = vector.shape_cast %43 : vector<4x4x128xbf16> to vector<16x128xbf16>
    %c0_48 = arith.constant 0 : index
    %c3 = arith.constant 3 : index
    %c0_49 = arith.constant 0 : index
    %c0_50 = arith.constant 0 : index
    %45 = vector.load %arg5[%c0_48, %c3, %c0_49, %c0_50] : memref<3x9x128x128xbf16, #tpu.memory_space<vmem>>, vector<1x1x128x128xbf16>
    %46 = vector.shape_cast %45 : vector<1x1x128x128xbf16> to vector<128x128xbf16>
    %cst_51 = arith.constant dense<0.000000e+00> : vector<16x128xf32>
    %47 = tpu.matmul %44, %46, %cst_51 {dimension_numbers = #tpu.dot_dimension_numbers<[1], [0], [0], [1], [0, 0, 1, 1], [], []>} : vector<16x128xbf16>, vector<128x128xbf16>, vector<16x128xf32> -> vector<16x128xf32>
    %48 = arith.addf %42, %47 : vector<16x128xf32>
    %c1_52 = arith.constant 1 : index
    %c1_53 = arith.constant 1 : index
    %c0_54 = arith.constant 0 : index
    %49 = vector.load %arg13[%c1_52, %c1_53, %c0_54] : memref<18x18x128xbf16, #tpu.memory_space<vmem>>, vector<4x4x128xbf16>
    %50 = vector.shape_cast %49 : vector<4x4x128xbf16> to vector<16x128xbf16>
    %c0_55 = arith.constant 0 : index
    %c4 = arith.constant 4 : index
    %c0_56 = arith.constant 0 : index
    %c0_57 = arith.constant 0 : index
    %51 = vector.load %arg5[%c0_55, %c4, %c0_56, %c0_57] : memref<3x9x128x128xbf16, #tpu.memory_space<vmem>>, vector<1x1x128x128xbf16>
    %52 = vector.shape_cast %51 : vector<1x1x128x128xbf16> to vector<128x128xbf16>
    %cst_58 = arith.constant dense<0.000000e+00> : vector<16x128xf32>
    %53 = tpu.matmul %50, %52, %cst_58 {dimension_numbers = #tpu.dot_dimension_numbers<[1], [0], [0], [1], [0, 0, 1, 1], [], []>} : vector<16x128xbf16>, vector<128x128xbf16>, vector<16x128xf32> -> vector<16x128xf32>
    %54 = arith.addf %48, %53 : vector<16x128xf32>
    %c1_59 = arith.constant 1 : index
    %c2_60 = arith.constant 2 : index
    %c0_61 = arith.constant 0 : index
    %55 = vector.load %arg13[%c1_59, %c2_60, %c0_61] : memref<18x18x128xbf16, #tpu.memory_space<vmem>>, vector<4x4x128xbf16>
    %56 = vector.shape_cast %55 : vector<4x4x128xbf16> to vector<16x128xbf16>
    %c0_62 = arith.constant 0 : index
    %c5 = arith.constant 5 : index
    %c0_63 = arith.constant 0 : index
    %c0_64 = arith.constant 0 : index
    %57 = vector.load %arg5[%c0_62, %c5, %c0_63, %c0_64] : memref<3x9x128x128xbf16, #tpu.memory_space<vmem>>, vector<1x1x128x128xbf16>
    %58 = vector.shape_cast %57 : vector<1x1x128x128xbf16> to vector<128x128xbf16>
    %cst_65 = arith.constant dense<0.000000e+00> : vector<16x128xf32>
    %59 = tpu.matmul %56, %58, %cst_65 {dimension_numbers = #tpu.dot_dimension_numbers<[1], [0], [0], [1], [0, 0, 1, 1], [], []>} : vector<16x128xbf16>, vector<128x128xbf16>, vector<16x128xf32> -> vector<16x128xf32>
    %60 = arith.addf %54, %59 : vector<16x128xf32>
    %c2_66 = arith.constant 2 : index
    %c0_67 = arith.constant 0 : index
    %c0_68 = arith.constant 0 : index
    %61 = vector.load %arg13[%c2_66, %c0_67, %c0_68] : memref<18x18x128xbf16, #tpu.memory_space<vmem>>, vector<4x4x128xbf16>
    %62 = vector.shape_cast %61 : vector<4x4x128xbf16> to vector<16x128xbf16>
    %c0_69 = arith.constant 0 : index
    %c6 = arith.constant 6 : index
    %c0_70 = arith.constant 0 : index
    %c0_71 = arith.constant 0 : index
    %63 = vector.load %arg5[%c0_69, %c6, %c0_70, %c0_71] : memref<3x9x128x128xbf16, #tpu.memory_space<vmem>>, vector<1x1x128x128xbf16>
    %64 = vector.shape_cast %63 : vector<1x1x128x128xbf16> to vector<128x128xbf16>
    %cst_72 = arith.constant dense<0.000000e+00> : vector<16x128xf32>
    %65 = tpu.matmul %62, %64, %cst_72 {dimension_numbers = #tpu.dot_dimension_numbers<[1], [0], [0], [1], [0, 0, 1, 1], [], []>} : vector<16x128xbf16>, vector<128x128xbf16>, vector<16x128xf32> -> vector<16x128xf32>
    %66 = arith.addf %60, %65 : vector<16x128xf32>
    %c2_73 = arith.constant 2 : index
    %c1_74 = arith.constant 1 : index
    %c0_75 = arith.constant 0 : index
    %67 = vector.load %arg13[%c2_73, %c1_74, %c0_75] : memref<18x18x128xbf16, #tpu.memory_space<vmem>>, vector<4x4x128xbf16>
    %68 = vector.shape_cast %67 : vector<4x4x128xbf16> to vector<16x128xbf16>
    %c0_76 = arith.constant 0 : index
    %c7 = arith.constant 7 : index
    %c0_77 = arith.constant 0 : index
    %c0_78 = arith.constant 0 : index
    %69 = vector.load %arg5[%c0_76, %c7, %c0_77, %c0_78] : memref<3x9x128x128xbf16, #tpu.memory_space<vmem>>, vector<1x1x128x128xbf16>
    %70 = vector.shape_cast %69 : vector<1x1x128x128xbf16> to vector<128x128xbf16>
    %cst_79 = arith.constant dense<0.000000e+00> : vector<16x128xf32>
    %71 = tpu.matmul %68, %70, %cst_79 {dimension_numbers = #tpu.dot_dimension_numbers<[1], [0], [0], [1], [0, 0, 1, 1], [], []>} : vector<16x128xbf16>, vector<128x128xbf16>, vector<16x128xf32> -> vector<16x128xf32>
    %72 = arith.addf %66, %71 : vector<16x128xf32>
    %c2_80 = arith.constant 2 : index
    %c2_81 = arith.constant 2 : index
    %c0_82 = arith.constant 0 : index
    %73 = vector.load %arg13[%c2_80, %c2_81, %c0_82] : memref<18x18x128xbf16, #tpu.memory_space<vmem>>, vector<4x4x128xbf16>
    %74 = vector.shape_cast %73 : vector<4x4x128xbf16> to vector<16x128xbf16>
    %c0_83 = arith.constant 0 : index
    %c8 = arith.constant 8 : index
    %c0_84 = arith.constant 0 : index
    %c0_85 = arith.constant 0 : index
    %75 = vector.load %arg5[%c0_83, %c8, %c0_84, %c0_85] : memref<3x9x128x128xbf16, #tpu.memory_space<vmem>>, vector<1x1x128x128xbf16>
    %76 = vector.shape_cast %75 : vector<1x1x128x128xbf16> to vector<128x128xbf16>
    %cst_86 = arith.constant dense<0.000000e+00> : vector<16x128xf32>
    %77 = tpu.matmul %74, %76, %cst_86 {dimension_numbers = #tpu.dot_dimension_numbers<[1], [0], [0], [1], [0, 0, 1, 1], [], []>} : vector<16x128xbf16>, vector<128x128xbf16>, vector<16x128xf32> -> vector<16x128xf32>
    %78 = arith.addf %72, %77 : vector<16x128xf32>
    %c0_87 = arith.constant 0 : index
    %c0_88 = arith.constant 0 : index
    %c0_89 = arith.constant 0 : index
    %79 = vector.load %arg6[%c0_87, %c0_88, %c0_89] : memref<3x1x128xf32, #tpu.memory_space<vmem>>, vector<1x1x128xf32>
    %80 = vector.shape_cast %79 : vector<1x1x128xf32> to vector<1x128xf32>
    %81 = vector.broadcast %80 : vector<1x128xf32> to vector<16x128xf32>
    %82 = arith.addf %78, %81 : vector<16x128xf32>
    %cst_90 = arith.constant 0.000000e+00 : f32
    %83 = vector.broadcast %cst_90 : f32 to vector<16x128xf32>
    %84 = arith.cmpf oge, %82, %83 : vector<16x128xf32>
    %cst_91 = arith.constant 2.000000e-01 : f32
    %85 = vector.broadcast %cst_91 : f32 to vector<16x128xf32>
    %86 = arith.mulf %85, %82 : vector<16x128xf32>
    %87 = arith.select %84, %82, %86 : vector<16x128xi1>, vector<16x128xf32>
    %cst_92 = arith.constant 1.41421354 : f32
    %88 = vector.broadcast %cst_92 : f32 to vector<16x128xf32>
    %89 = arith.mulf %87, %88 : vector<16x128xf32>
    %c0_93 = arith.constant 0 : index
    %c0_94 = arith.constant 0 : index
    %90 = vector.load %arg12[%c0_93, %c0_94] : memref<256x128xf32, #tpu.memory_space<vmem>>, vector<16x128xf32>
    tpu.vector_store %arg12[%c0_93, %c0_94], %89 {strides = array<i32>} : memref<256x128xf32, #tpu.memory_space<vmem>>, vector<16x128xf32>,
    %91 = arith.truncf %5 : vector<16x128xf32> to vector<16x128xbf16>
    %c1_95 = arith.constant 1 : index
    %c0_96 = arith.constant 0 : index
    %c0_97 = arith.constant 0 : index
    %92 = vector.load %arg3[%c1_95, %c0_96, %c0_97] : memref<3x128x256xbf16, #tpu.memory_space<vmem>>, vector<1x128x256xbf16>
    %93 = vector.shape_cast %92 : vector<1x128x256xbf16> to vector<128x256xbf16>
    %cst_98 = arith.constant dense<0.000000e+00> : vector<16x256xf32>
    %94 = tpu.matmul %91, %93, %cst_98 {dimension_numbers = #tpu.dot_dimension_numbers<[1], [0], [0], [1], [0, 0, 1, 1], [], []>} : vector<16x128xbf16>, vector<128x256xbf16>, vector<16x256xf32> -> vector<16x256xf32>
    %c1_99 = arith.constant 1 : index
    %c0_100 = arith.constant 0 : index
    %c0_101 = arith.constant 0 : index
    %95 = vector.load %arg4[%c1_99, %c0_100, %c0_101] : memref<3x1x256xf32, #tpu.memory_space<vmem>>, vector<1x1x256xf32>
    %96 = vector.shape_cast %95 : vector<1x1x256xf32> to vector<1x256xf32>
    %97 = vector.broadcast %96 : vector<1x256xf32> to vector<16x256xf32>
    %98 = arith.addf %94, %97 : vector<16x256xf32>
    %99 = vector.extract_strided_slice %98 {offsets = [0, 0], sizes = [16, 128], strides = [1, 1]} : vector<16x256xf32> to vector<16x128xf32>
    %100 = vector.extract_strided_slice %98 {offsets = [0, 128], sizes = [16, 128], strides = [1, 1]} : vector<16x256xf32> to vector<16x128xf32>
    %c0_102 = arith.constant 0 : index
    %c0_103 = arith.constant 0 : index
    %101 = vector.load %arg12[%c0_102, %c0_103] : memref<256x128xf32, #tpu.memory_space<vmem>>, vector<16x128xf32>
    %cst_104 = arith.constant 1.000000e+00 : f32
    %102 = vector.broadcast %cst_104 : f32 to vector<16x128xf32>
    %103 = arith.addf %102, %99 : vector<16x128xf32>
    %104 = arith.mulf %101, %103 : vector<16x128xf32>
    %105 = arith.addf %104, %100 : vector<16x128xf32>
    %c0_105 = arith.constant 0 : index
    %c0_106 = arith.constant 0 : index
    %106 = vector.load %arg9[%c0_105, %c0_106] : memref<64x16xbf16, #tpu.memory_space<vmem>>, vector<64x16xbf16>
    %107 = arith.truncf %105 : vector<16x128xf32> to vector<16x128xbf16>
    %cst_107 = arith.constant dense<0.000000e+00> : vector<64x128xf32>
    %108 = tpu.matmul %106, %107, %cst_107 {dimension_numbers = #tpu.dot_dimension_numbers<[1], [0], [0], [1], [0, 0, 1, 1], [], []>} : vector<64x16xbf16>, vector<16x128xbf16>, vector<64x128xf32> -> vector<64x128xf32>
    %109 = vector.shape_cast %108 : vector<64x128xf32> to vector<8x8x128xf32>
    %110 = arith.truncf %109 : vector<8x8x128xf32> to vector<8x8x128xbf16>
    %c1_108 = arith.constant 1 : index
    %c1_109 = arith.constant 1 : index
    %c0_110 = arith.constant 0 : index
    %111 = vector.load %arg13[%c1_108, %c1_109, %c0_110] : memref<18x18x128xbf16, #tpu.memory_space<vmem>>, vector<8x8x128xbf16>
    tpu.vector_store %arg13[%c1_108, %c1_109, %c0_110], %110 {strides = array<i32>} : memref<18x18x128xbf16, #tpu.memory_space<vmem>>, vector<8x8x128xbf16>,
    %cst_111 = arith.constant 0.000000e+00 : f32
    %112 = vector.broadcast %cst_111 : f32 to vector<64x128xf32>
    %c0_112 = arith.constant 0 : index
    %c0_113 = arith.constant 0 : index
    %c0_114 = arith.constant 0 : index
    %113 = vector.load %arg13[%c0_112, %c0_113, %c0_114] : memref<18x18x128xbf16, #tpu.memory_space<vmem>>, vector<8x8x128xbf16>
    %114 = vector.shape_cast %113 : vector<8x8x128xbf16> to vector<64x128xbf16>
    %c1_115 = arith.constant 1 : index
    %c0_116 = arith.constant 0 : index
    %c0_117 = arith.constant 0 : index
    %c0_118 = arith.constant 0 : index
    %115 = vector.load %arg5[%c1_115, %c0_116, %c0_117, %c0_118] : memref<3x9x128x128xbf16, #tpu.memory_space<vmem>>, vector<1x1x128x128xbf16>
    %116 = vector.shape_cast %115 : vector<1x1x128x128xbf16> to vector<128x128xbf16>
    %cst_119 = arith.constant dense<0.000000e+00> : vector<64x128xf32>
    %117 = tpu.matmul %114, %116, %cst_119 {dimension_numbers = #tpu.dot_dimension_numbers<[1], [0], [0], [1], [0, 0, 1, 1], [], []>} : vector<64x128xbf16>, vector<128x128xbf16>, vector<64x128xf32> -> vector<64x128xf32>
    %118 = arith.addf %112, %117 : vector<64x128xf32>
    %c0_120 = arith.constant 0 : index
    %c1_121 = arith.constant 1 : index
    %c0_122 = arith.constant 0 : index
    %119 = vector.load %arg13[%c0_120, %c1_121, %c0_122] : memref<18x18x128xbf16, #tpu.memory_space<vmem>>, vector<8x8x128xbf16>
    %120 = vector.shape_cast %119 : vector<8x8x128xbf16> to vector<64x128xbf16>
    %c1_123 = arith.constant 1 : index
    %c1_124 = arith.constant 1 : index
    %c0_125 = arith.constant 0 : index
    %c0_126 = arith.constant 0 : index
    %121 = vector.load %arg5[%c1_123, %c1_124, %c0_125, %c0_126] : memref<3x9x128x128xbf16, #tpu.memory_space<vmem>>, vector<1x1x128x128xbf16>
    %122 = vector.shape_cast %121 : vector<1x1x128x128xbf16> to vector<128x128xbf16>
    %cst_127 = arith.constant dense<0.000000e+00> : vector<64x128xf32>
    %123 = tpu.matmul %120, %122, %cst_127 {dimension_numbers = #tpu.dot_dimension_numbers<[1], [0], [0], [1], [0, 0, 1, 1], [], []>} : vector<64x128xbf16>, vector<128x128xbf16>, vector<64x128xf32> -> vector<64x128xf32>
    %124 = arith.addf %118, %123 : vector<64x128xf32>
    %c0_128 = arith.constant 0 : index
    %c2_129 = arith.constant 2 : index
    %c0_130 = arith.constant 0 : index
    %125 = vector.load %arg13[%c0_128, %c2_129, %c0_130] : memref<18x18x128xbf16, #tpu.memory_space<vmem>>, vector<8x8x128xbf16>
    %126 = vector.shape_cast %125 : vector<8x8x128xbf16> to vector<64x128xbf16>
    %c1_131 = arith.constant 1 : index
    %c2_132 = arith.constant 2 : index
    %c0_133 = arith.constant 0 : index
    %c0_134 = arith.constant 0 : index
    %127 = vector.load %arg5[%c1_131, %c2_132, %c0_133, %c0_134] : memref<3x9x128x128xbf16, #tpu.memory_space<vmem>>, vector<1x1x128x128xbf16>
    %128 = vector.shape_cast %127 : vector<1x1x128x128xbf16> to vector<128x128xbf16>
    %cst_135 = arith.constant dense<0.000000e+00> : vector<64x128xf32>
    %129 = tpu.matmul %126, %128, %cst_135 {dimension_numbers = #tpu.dot_dimension_numbers<[1], [0], [0], [1], [0, 0, 1, 1], [], []>} : vector<64x128xbf16>, vector<128x128xbf16>, vector<64x128xf32> -> vector<64x128xf32>
    %130 = arith.addf %124, %129 : vector<64x128xf32>
    %c1_136 = arith.constant 1 : index
    %c0_137 = arith.constant 0 : index
    %c0_138 = arith.constant 0 : index
    %131 = vector.load %arg13[%c1_136, %c0_137, %c0_138] : memref<18x18x128xbf16, #tpu.memory_space<vmem>>, vector<8x8x128xbf16>
    %132 = vector.shape_cast %131 : vector<8x8x128xbf16> to vector<64x128xbf16>
    %c1_139 = arith.constant 1 : index
    %c3_140 = arith.constant 3 : index
    %c0_141 = arith.constant 0 : index
    %c0_142 = arith.constant 0 : index
    %133 = vector.load %arg5[%c1_139, %c3_140, %c0_141, %c0_142] : memref<3x9x128x128xbf16, #tpu.memory_space<vmem>>, vector<1x1x128x128xbf16>
    %134 = vector.shape_cast %133 : vector<1x1x128x128xbf16> to vector<128x128xbf16>
    %cst_143 = arith.constant dense<0.000000e+00> : vector<64x128xf32>
    %135 = tpu.matmul %132, %134, %cst_143 {dimension_numbers = #tpu.dot_dimension_numbers<[1], [0], [0], [1], [0, 0, 1, 1], [], []>} : vector<64x128xbf16>, vector<128x128xbf16>, vector<64x128xf32> -> vector<64x128xf32>
    %136 = arith.addf %130, %135 : vector<64x128xf32>
    %c1_144 = arith.constant 1 : index
    %c1_145 = arith.constant 1 : index
    %c0_146 = arith.constant 0 : index
    %137 = vector.load %arg13[%c1_144, %c1_145, %c0_146] : memref<18x18x128xbf16, #tpu.memory_space<vmem>>, vector<8x8x128xbf16>
    %138 = vector.shape_cast %137 : vector<8x8x128xbf16> to vector<64x128xbf16>
    %c1_147 = arith.constant 1 : index
    %c4_148 = arith.constant 4 : index
    %c0_149 = arith.constant 0 : index
    %c0_150 = arith.constant 0 : index
    %139 = vector.load %arg5[%c1_147, %c4_148, %c0_149, %c0_150] : memref<3x9x128x128xbf16, #tpu.memory_space<vmem>>, vector<1x1x128x128xbf16>
    %140 = vector.shape_cast %139 : vector<1x1x128x128xbf16> to vector<128x128xbf16>
    %cst_151 = arith.constant dense<0.000000e+00> : vector<64x128xf32>
    %141 = tpu.matmul %138, %140, %cst_151 {dimension_numbers = #tpu.dot_dimension_numbers<[1], [0], [0], [1], [0, 0, 1, 1], [], []>} : vector<64x128xbf16>, vector<128x128xbf16>, vector<64x128xf32> -> vector<64x128xf32>
    %142 = arith.addf %136, %141 : vector<64x128xf32>
    %c1_152 = arith.constant 1 : index
    %c2_153 = arith.constant 2 : index
    %c0_154 = arith.constant 0 : index
    %143 = vector.load %arg13[%c1_152, %c2_153, %c0_154] : memref<18x18x128xbf16, #tpu.memory_space<vmem>>, vector<8x8x128xbf16>
    %144 = vector.shape_cast %143 : vector<8x8x128xbf16> to vector<64x128xbf16>
    %c1_155 = arith.constant 1 : index
    %c5_156 = arith.constant 5 : index
    %c0_157 = arith.constant 0 : index
    %c0_158 = arith.constant 0 : index
    %145 = vector.load %arg5[%c1_155, %c5_156, %c0_157, %c0_158] : memref<3x9x128x128xbf16, #tpu.memory_space<vmem>>, vector<1x1x128x128xbf16>
    %146 = vector.shape_cast %145 : vector<1x1x128x128xbf16> to vector<128x128xbf16>
    %cst_159 = arith.constant dense<0.000000e+00> : vector<64x128xf32>
    %147 = tpu.matmul %144, %146, %cst_159 {dimension_numbers = #tpu.dot_dimension_numbers<[1], [0], [0], [1], [0, 0, 1, 1], [], []>} : vector<64x128xbf16>, vector<128x128xbf16>, vector<64x128xf32> -> vector<64x128xf32>
    %148 = arith.addf %142, %147 : vector<64x128xf32>
    %c2_160 = arith.constant 2 : index
    %c0_161 = arith.constant 0 : index
    %c0_162 = arith.constant 0 : index
    %149 = vector.load %arg13[%c2_160, %c0_161, %c0_162] : memref<18x18x128xbf16, #tpu.memory_space<vmem>>, vector<8x8x128xbf16>
    %150 = vector.shape_cast %149 : vector<8x8x128xbf16> to vector<64x128xbf16>
    %c1_163 = arith.constant 1 : index
    %c6_164 = arith.constant 6 : index
    %c0_165 = arith.constant 0 : index
    %c0_166 = arith.constant 0 : index
    %151 = vector.load %arg5[%c1_163, %c6_164, %c0_165, %c0_166] : memref<3x9x128x128xbf16, #tpu.memory_space<vmem>>, vector<1x1x128x128xbf16>
    %152 = vector.shape_cast %151 : vector<1x1x128x128xbf16> to vector<128x128xbf16>
    %cst_167 = arith.constant dense<0.000000e+00> : vector<64x128xf32>
    %153 = tpu.matmul %150, %152, %cst_167 {dimension_numbers = #tpu.dot_dimension_numbers<[1], [0], [0], [1], [0, 0, 1, 1], [], []>} : vector<64x128xbf16>, vector<128x128xbf16>, vector<64x128xf32> -> vector<64x128xf32>
    %154 = arith.addf %148, %153 : vector<64x128xf32>
    %c2_168 = arith.constant 2 : index
    %c1_169 = arith.constant 1 : index
    %c0_170 = arith.constant 0 : index
    %155 = vector.load %arg13[%c2_168, %c1_169, %c0_170] : memref<18x18x128xbf16, #tpu.memory_space<vmem>>, vector<8x8x128xbf16>
    %156 = vector.shape_cast %155 : vector<8x8x128xbf16> to vector<64x128xbf16>
    %c1_171 = arith.constant 1 : index
    %c7_172 = arith.constant 7 : index
    %c0_173 = arith.constant 0 : index
    %c0_174 = arith.constant 0 : index
    %157 = vector.load %arg5[%c1_171, %c7_172, %c0_173, %c0_174] : memref<3x9x128x128xbf16, #tpu.memory_space<vmem>>, vector<1x1x128x128xbf16>
    %158 = vector.shape_cast %157 : vector<1x1x128x128xbf16> to vector<128x128xbf16>
    %cst_175 = arith.constant dense<0.000000e+00> : vector<64x128xf32>
    %159 = tpu.matmul %156, %158, %cst_175 {dimension_numbers = #tpu.dot_dimension_numbers<[1], [0], [0], [1], [0, 0, 1, 1], [], []>} : vector<64x128xbf16>, vector<128x128xbf16>, vector<64x128xf32> -> vector<64x128xf32>
    %160 = arith.addf %154, %159 : vector<64x128xf32>
    %c2_176 = arith.constant 2 : index
    %c2_177 = arith.constant 2 : index
    %c0_178 = arith.constant 0 : index
    %161 = vector.load %arg13[%c2_176, %c2_177, %c0_178] : memref<18x18x128xbf16, #tpu.memory_space<vmem>>, vector<8x8x128xbf16>
    %162 = vector.shape_cast %161 : vector<8x8x128xbf16> to vector<64x128xbf16>
    %c1_179 = arith.constant 1 : index
    %c8_180 = arith.constant 8 : index
    %c0_181 = arith.constant 0 : index
    %c0_182 = arith.constant 0 : index
    %163 = vector.load %arg5[%c1_179, %c8_180, %c0_181, %c0_182] : memref<3x9x128x128xbf16, #tpu.memory_space<vmem>>, vector<1x1x128x128xbf16>
    %164 = vector.shape_cast %163 : vector<1x1x128x128xbf16> to vector<128x128xbf16>
    %cst_183 = arith.constant dense<0.000000e+00> : vector<64x128xf32>
    %165 = tpu.matmul %162, %164, %cst_183 {dimension_numbers = #tpu.dot_dimension_numbers<[1], [0], [0], [1], [0, 0, 1, 1], [], []>} : vector<64x128xbf16>, vector<128x128xbf16>, vector<64x128xf32> -> vector<64x128xf32>
    %166 = arith.addf %160, %165 : vector<64x128xf32>
    %c1_184 = arith.constant 1 : index
    %c0_185 = arith.constant 0 : index
    %c0_186 = arith.constant 0 : index
    %167 = vector.load %arg6[%c1_184, %c0_185, %c0_186] : memref<3x1x128xf32, #tpu.memory_space<vmem>>, vector<1x1x128xf32>
    %168 = vector.shape_cast %167 : vector<1x1x128xf32> to vector<1x128xf32>
    %169 = vector.broadcast %168 : vector<1x128xf32> to vector<64x128xf32>
    %170 = arith.addf %166, %169 : vector<64x128xf32>
    %cst_187 = arith.constant 0.000000e+00 : f32
    %171 = vector.broadcast %cst_187 : f32 to vector<64x128xf32>
    %172 = arith.cmpf oge, %170, %171 : vector<64x128xf32>
    %cst_188 = arith.constant 2.000000e-01 : f32
    %173 = vector.broadcast %cst_188 : f32 to vector<64x128xf32>
    %174 = arith.mulf %173, %170 : vector<64x128xf32>
    %175 = arith.select %172, %170, %174 : vector<64x128xi1>, vector<64x128xf32>
    %cst_189 = arith.constant 1.41421354 : f32
    %176 = vector.broadcast %cst_189 : f32 to vector<64x128xf32>
    %177 = arith.mulf %175, %176 : vector<64x128xf32>
    %c0_190 = arith.constant 0 : index
    %c0_191 = arith.constant 0 : index
    %178 = vector.load %arg12[%c0_190, %c0_191] : memref<256x128xf32, #tpu.memory_space<vmem>>, vector<64x128xf32>
    tpu.vector_store %arg12[%c0_190, %c0_191], %177 {strides = array<i32>} : memref<256x128xf32, #tpu.memory_space<vmem>>, vector<64x128xf32>,
    %c0_192 = arith.constant 0 : index
    %c0_193 = arith.constant 0 : index
    %179 = vector.load %arg9[%c0_192, %c0_193] : memref<64x16xbf16, #tpu.memory_space<vmem>>, vector<64x16xbf16>
    %180 = arith.truncf %5 : vector<16x128xf32> to vector<16x128xbf16>
    %cst_194 = arith.constant dense<0.000000e+00> : vector<64x128xf32>
    %181 = tpu.matmul %179, %180, %cst_194 {dimension_numbers = #tpu.dot_dimension_numbers<[1], [0], [0], [1], [0, 0, 1, 1], [], []>} : vector<64x16xbf16>, vector<16x128xbf16>, vector<64x128xf32> -> vector<64x128xf32>
    %182 = arith.truncf %181 : vector<64x128xf32> to vector<64x128xbf16>
    %c2_195 = arith.constant 2 : index
    %c0_196 = arith.constant 0 : index
    %c0_197 = arith.constant 0 : index
    %183 = vector.load %arg3[%c2_195, %c0_196, %c0_197] : memref<3x128x256xbf16, #tpu.memory_space<vmem>>, vector<1x128x256xbf16>
    %184 = vector.shape_cast %183 : vector<1x128x256xbf16> to vector<128x256xbf16>
    %cst_198 = arith.constant dense<0.000000e+00> : vector<64x256xf32>
    %185 = tpu.matmul %182, %184, %cst_198 {dimension_numbers = #tpu.dot_dimension_numbers<[1], [0], [0], [1], [0, 0, 1, 1], [], []>} : vector<64x128xbf16>, vector<128x256xbf16>, vector<64x256xf32> -> vector<64x256xf32>
    %c2_199 = arith.constant 2 : index
    %c0_200 = arith.constant 0 : index
    %c0_201 = arith.constant 0 : index
    %186 = vector.load %arg4[%c2_199, %c0_200, %c0_201] : memref<3x1x256xf32, #tpu.memory_space<vmem>>, vector<1x1x256xf32>
    %187 = vector.shape_cast %186 : vector<1x1x256xf32> to vector<1x256xf32>
    %188 = vector.broadcast %187 : vector<1x256xf32> to vector<64x256xf32>
    %189 = arith.addf %185, %188 : vector<64x256xf32>
    %190 = vector.extract_strided_slice %189 {offsets = [0, 0], sizes = [64, 128], strides = [1, 1]} : vector<64x256xf32> to vector<64x128xf32>
    %191 = vector.extract_strided_slice %189 {offsets = [0, 128], sizes = [64, 128], strides = [1, 1]} : vector<64x256xf32> to vector<64x128xf32>
    %c0_202 = arith.constant 0 : index
    %c0_203 = arith.constant 0 : index
    %192 = vector.load %arg12[%c0_202, %c0_203] : memref<256x128xf32, #tpu.memory_space<vmem>>, vector<64x128xf32>
    %cst_204 = arith.constant 1.000000e+00 : f32
    %193 = vector.broadcast %cst_204 : f32 to vector<64x128xf32>
    %194 = arith.addf %193, %190 : vector<64x128xf32>
    %195 = arith.mulf %192, %194 : vector<64x128xf32>
    %196 = arith.addf %195, %191 : vector<64x128xf32>
    %c0_205 = arith.constant 0 : index
    %c0_206 = arith.constant 0 : index
    %197 = vector.load %arg10[%c0_205, %c0_206] : memref<256x64xbf16, #tpu.memory_space<vmem>>, vector<256x64xbf16>
    %198 = arith.truncf %196 : vector<64x128xf32> to vector<64x128xbf16>
    %cst_207 = arith.constant dense<0.000000e+00> : vector<256x128xf32>
    %199 = tpu.matmul %197, %198, %cst_207 {dimension_numbers = #tpu.dot_dimension_numbers<[1], [0], [0], [1], [0, 0, 1, 1], [], []>} : vector<256x64xbf16>, vector<64x128xbf16>, vector<256x128xf32> -> vector<256x128xf32>
    %200 = vector.shape_cast %199 : vector<256x128xf32> to vector<16x16x128xf32>
    %201 = arith.truncf %200 : vector<16x16x128xf32> to vector<16x16x128xbf16>
    %c1_208 = arith.constant 1 : index
    %c1_209 = arith.constant 1 : index
    %c0_210 = arith.constant 0 : index
    %202 = vector.load %arg13[%c1_208, %c1_209, %c0_210] : memref<18x18x128xbf16, #tpu.memory_space<vmem>>, vector<16x16x128xbf16>
    tpu.vector_store %arg13[%c1_208, %c1_209, %c0_210], %201 {strides = array<i32>} : memref<18x18x128xbf16, #tpu.memory_space<vmem>>, vector<16x16x128xbf16>,
    %cst_211 = arith.constant 0.000000e+00 : f32
    %203 = vector.broadcast %cst_211 : f32 to vector<256x128xf32>
    %c0_212 = arith.constant 0 : index
    %c0_213 = arith.constant 0 : index
    %c0_214 = arith.constant 0 : index
    %204 = vector.load %arg13[%c0_212, %c0_213, %c0_214] : memref<18x18x128xbf16, #tpu.memory_space<vmem>>, vector<16x16x128xbf16>
    %205 = vector.shape_cast %204 : vector<16x16x128xbf16> to vector<256x128xbf16>
    %c2_215 = arith.constant 2 : index
    %c0_216 = arith.constant 0 : index
    %c0_217 = arith.constant 0 : index
    %c0_218 = arith.constant 0 : index
    %206 = vector.load %arg5[%c2_215, %c0_216, %c0_217, %c0_218] : memref<3x9x128x128xbf16, #tpu.memory_space<vmem>>, vector<1x1x128x128xbf16>
    %207 = vector.shape_cast %206 : vector<1x1x128x128xbf16> to vector<128x128xbf16>
    %cst_219 = arith.constant dense<0.000000e+00> : vector<256x128xf32>
    %208 = tpu.matmul %205, %207, %cst_219 {dimension_numbers = #tpu.dot_dimension_numbers<[1], [0], [0], [1], [0, 0, 1, 1], [], []>} : vector<256x128xbf16>, vector<128x128xbf16>, vector<256x128xf32> -> vector<256x128xf32>
    %209 = arith.addf %203, %208 : vector<256x128xf32>
    %c0_220 = arith.constant 0 : index
    %c1_221 = arith.constant 1 : index
    %c0_222 = arith.constant 0 : index
    %210 = vector.load %arg13[%c0_220, %c1_221, %c0_222] : memref<18x18x128xbf16, #tpu.memory_space<vmem>>, vector<16x16x128xbf16>
    %211 = vector.shape_cast %210 : vector<16x16x128xbf16> to vector<256x128xbf16>
    %c2_223 = arith.constant 2 : index
    %c1_224 = arith.constant 1 : index
    %c0_225 = arith.constant 0 : index
    %c0_226 = arith.constant 0 : index
    %212 = vector.load %arg5[%c2_223, %c1_224, %c0_225, %c0_226] : memref<3x9x128x128xbf16, #tpu.memory_space<vmem>>, vector<1x1x128x128xbf16>
    %213 = vector.shape_cast %212 : vector<1x1x128x128xbf16> to vector<128x128xbf16>
    %cst_227 = arith.constant dense<0.000000e+00> : vector<256x128xf32>
    %214 = tpu.matmul %211, %213, %cst_227 {dimension_numbers = #tpu.dot_dimension_numbers<[1], [0], [0], [1], [0, 0, 1, 1], [], []>} : vector<256x128xbf16>, vector<128x128xbf16>, vector<256x128xf32> -> vector<256x128xf32>
    %215 = arith.addf %209, %214 : vector<256x128xf32>
    %c0_228 = arith.constant 0 : index
    %c2_229 = arith.constant 2 : index
    %c0_230 = arith.constant 0 : index
    %216 = vector.load %arg13[%c0_228, %c2_229, %c0_230] : memref<18x18x128xbf16, #tpu.memory_space<vmem>>, vector<16x16x128xbf16>
    %217 = vector.shape_cast %216 : vector<16x16x128xbf16> to vector<256x128xbf16>
    %c2_231 = arith.constant 2 : index
    %c2_232 = arith.constant 2 : index
    %c0_233 = arith.constant 0 : index
    %c0_234 = arith.constant 0 : index
    %218 = vector.load %arg5[%c2_231, %c2_232, %c0_233, %c0_234] : memref<3x9x128x128xbf16, #tpu.memory_space<vmem>>, vector<1x1x128x128xbf16>
    %219 = vector.shape_cast %218 : vector<1x1x128x128xbf16> to vector<128x128xbf16>
    %cst_235 = arith.constant dense<0.000000e+00> : vector<256x128xf32>
    %220 = tpu.matmul %217, %219, %cst_235 {dimension_numbers = #tpu.dot_dimension_numbers<[1], [0], [0], [1], [0, 0, 1, 1], [], []>} : vector<256x128xbf16>, vector<128x128xbf16>, vector<256x128xf32> -> vector<256x128xf32>
    %221 = arith.addf %215, %220 : vector<256x128xf32>
    %c1_236 = arith.constant 1 : index
    %c0_237 = arith.constant 0 : index
    %c0_238 = arith.constant 0 : index
    %222 = vector.load %arg13[%c1_236, %c0_237, %c0_238] : memref<18x18x128xbf16, #tpu.memory_space<vmem>>, vector<16x16x128xbf16>
    %223 = vector.shape_cast %222 : vector<16x16x128xbf16> to vector<256x128xbf16>
    %c2_239 = arith.constant 2 : index
    %c3_240 = arith.constant 3 : index
    %c0_241 = arith.constant 0 : index
    %c0_242 = arith.constant 0 : index
    %224 = vector.load %arg5[%c2_239, %c3_240, %c0_241, %c0_242] : memref<3x9x128x128xbf16, #tpu.memory_space<vmem>>, vector<1x1x128x128xbf16>
    %225 = vector.shape_cast %224 : vector<1x1x128x128xbf16> to vector<128x128xbf16>
    %cst_243 = arith.constant dense<0.000000e+00> : vector<256x128xf32>
    %226 = tpu.matmul %223, %225, %cst_243 {dimension_numbers = #tpu.dot_dimension_numbers<[1], [0], [0], [1], [0, 0, 1, 1], [], []>} : vector<256x128xbf16>, vector<128x128xbf16>, vector<256x128xf32> -> vector<256x128xf32>
    %227 = arith.addf %221, %226 : vector<256x128xf32>
    %c1_244 = arith.constant 1 : index
    %c1_245 = arith.constant 1 : index
    %c0_246 = arith.constant 0 : index
    %228 = vector.load %arg13[%c1_244, %c1_245, %c0_246] : memref<18x18x128xbf16, #tpu.memory_space<vmem>>, vector<16x16x128xbf16>
    %229 = vector.shape_cast %228 : vector<16x16x128xbf16> to vector<256x128xbf16>
    %c2_247 = arith.constant 2 : index
    %c4_248 = arith.constant 4 : index
    %c0_249 = arith.constant 0 : index
    %c0_250 = arith.constant 0 : index
    %230 = vector.load %arg5[%c2_247, %c4_248, %c0_249, %c0_250] : memref<3x9x128x128xbf16, #tpu.memory_space<vmem>>, vector<1x1x128x128xbf16>
    %231 = vector.shape_cast %230 : vector<1x1x128x128xbf16> to vector<128x128xbf16>
    %cst_251 = arith.constant dense<0.000000e+00> : vector<256x128xf32>
    %232 = tpu.matmul %229, %231, %cst_251 {dimension_numbers = #tpu.dot_dimension_numbers<[1], [0], [0], [1], [0, 0, 1, 1], [], []>} : vector<256x128xbf16>, vector<128x128xbf16>, vector<256x128xf32> -> vector<256x128xf32>
    %233 = arith.addf %227, %232 : vector<256x128xf32>
    %c1_252 = arith.constant 1 : index
    %c2_253 = arith.constant 2 : index
    %c0_254 = arith.constant 0 : index
    %234 = vector.load %arg13[%c1_252, %c2_253, %c0_254] : memref<18x18x128xbf16, #tpu.memory_space<vmem>>, vector<16x16x128xbf16>
    %235 = vector.shape_cast %234 : vector<16x16x128xbf16> to vector<256x128xbf16>
    %c2_255 = arith.constant 2 : index
    %c5_256 = arith.constant 5 : index
    %c0_257 = arith.constant 0 : index
    %c0_258 = arith.constant 0 : index
    %236 = vector.load %arg5[%c2_255, %c5_256, %c0_257, %c0_258] : memref<3x9x128x128xbf16, #tpu.memory_space<vmem>>, vector<1x1x128x128xbf16>
    %237 = vector.shape_cast %236 : vector<1x1x128x128xbf16> to vector<128x128xbf16>
    %cst_259 = arith.constant dense<0.000000e+00> : vector<256x128xf32>
    %238 = tpu.matmul %235, %237, %cst_259 {dimension_numbers = #tpu.dot_dimension_numbers<[1], [0], [0], [1], [0, 0, 1, 1], [], []>} : vector<256x128xbf16>, vector<128x128xbf16>, vector<256x128xf32> -> vector<256x128xf32>
    %239 = arith.addf %233, %238 : vector<256x128xf32>
    %c2_260 = arith.constant 2 : index
    %c0_261 = arith.constant 0 : index
    %c0_262 = arith.constant 0 : index
    %240 = vector.load %arg13[%c2_260, %c0_261, %c0_262] : memref<18x18x128xbf16, #tpu.memory_space<vmem>>, vector<16x16x128xbf16>
    %241 = vector.shape_cast %240 : vector<16x16x128xbf16> to vector<256x128xbf16>
    %c2_263 = arith.constant 2 : index
    %c6_264 = arith.constant 6 : index
    %c0_265 = arith.constant 0 : index
    %c0_266 = arith.constant 0 : index
    %242 = vector.load %arg5[%c2_263, %c6_264, %c0_265, %c0_266] : memref<3x9x128x128xbf16, #tpu.memory_space<vmem>>, vector<1x1x128x128xbf16>
    %243 = vector.shape_cast %242 : vector<1x1x128x128xbf16> to vector<128x128xbf16>
    %cst_267 = arith.constant dense<0.000000e+00> : vector<256x128xf32>
    %244 = tpu.matmul %241, %243, %cst_267 {dimension_numbers = #tpu.dot_dimension_numbers<[1], [0], [0], [1], [0, 0, 1, 1], [], []>} : vector<256x128xbf16>, vector<128x128xbf16>, vector<256x128xf32> -> vector<256x128xf32>
    %245 = arith.addf %239, %244 : vector<256x128xf32>
    %c2_268 = arith.constant 2 : index
    %c1_269 = arith.constant 1 : index
    %c0_270 = arith.constant 0 : index
    %246 = vector.load %arg13[%c2_268, %c1_269, %c0_270] : memref<18x18x128xbf16, #tpu.memory_space<vmem>>, vector<16x16x128xbf16>
    %247 = vector.shape_cast %246 : vector<16x16x128xbf16> to vector<256x128xbf16>
    %c2_271 = arith.constant 2 : index
    %c7_272 = arith.constant 7 : index
    %c0_273 = arith.constant 0 : index
    %c0_274 = arith.constant 0 : index
    %248 = vector.load %arg5[%c2_271, %c7_272, %c0_273, %c0_274] : memref<3x9x128x128xbf16, #tpu.memory_space<vmem>>, vector<1x1x128x128xbf16>
    %249 = vector.shape_cast %248 : vector<1x1x128x128xbf16> to vector<128x128xbf16>
    %cst_275 = arith.constant dense<0.000000e+00> : vector<256x128xf32>
    %250 = tpu.matmul %247, %249, %cst_275 {dimension_numbers = #tpu.dot_dimension_numbers<[1], [0], [0], [1], [0, 0, 1, 1], [], []>} : vector<256x128xbf16>, vector<128x128xbf16>, vector<256x128xf32> -> vector<256x128xf32>
    %251 = arith.addf %245, %250 : vector<256x128xf32>
    %c2_276 = arith.constant 2 : index
    %c2_277 = arith.constant 2 : index
    %c0_278 = arith.constant 0 : index
    %252 = vector.load %arg13[%c2_276, %c2_277, %c0_278] : memref<18x18x128xbf16, #tpu.memory_space<vmem>>, vector<16x16x128xbf16>
    %253 = vector.shape_cast %252 : vector<16x16x128xbf16> to vector<256x128xbf16>
    %c2_279 = arith.constant 2 : index
    %c8_280 = arith.constant 8 : index
    %c0_281 = arith.constant 0 : index
    %c0_282 = arith.constant 0 : index
    %254 = vector.load %arg5[%c2_279, %c8_280, %c0_281, %c0_282] : memref<3x9x128x128xbf16, #tpu.memory_space<vmem>>, vector<1x1x128x128xbf16>
    %255 = vector.shape_cast %254 : vector<1x1x128x128xbf16> to vector<128x128xbf16>
    %cst_283 = arith.constant dense<0.000000e+00> : vector<256x128xf32>
    %256 = tpu.matmul %253, %255, %cst_283 {dimension_numbers = #tpu.dot_dimension_numbers<[1], [0], [0], [1], [0, 0, 1, 1], [], []>} : vector<256x128xbf16>, vector<128x128xbf16>, vector<256x128xf32> -> vector<256x128xf32>
    %257 = arith.addf %251, %256 : vector<256x128xf32>
    %c2_284 = arith.constant 2 : index
    %c0_285 = arith.constant 0 : index
    %c0_286 = arith.constant 0 : index
    %258 = vector.load %arg6[%c2_284, %c0_285, %c0_286] : memref<3x1x128xf32, #tpu.memory_space<vmem>>, vector<1x1x128xf32>
    %259 = vector.shape_cast %258 : vector<1x1x128xf32> to vector<1x128xf32>
    %260 = vector.broadcast %259 : vector<1x128xf32> to vector<256x128xf32>
    %261 = arith.addf %257, %260 : vector<256x128xf32>
    %cst_287 = arith.constant 0.000000e+00 : f32
    %262 = vector.broadcast %cst_287 : f32 to vector<256x128xf32>
    %263 = arith.cmpf oge, %261, %262 : vector<256x128xf32>
    %cst_288 = arith.constant 2.000000e-01 : f32
    %264 = vector.broadcast %cst_288 : f32 to vector<256x128xf32>
    %265 = arith.mulf %264, %261 : vector<256x128xf32>
    %266 = arith.select %263, %261, %265 : vector<256x128xi1>, vector<256x128xf32>
    %cst_289 = arith.constant 1.41421354 : f32
    %267 = vector.broadcast %cst_289 : f32 to vector<256x128xf32>
    %268 = arith.mulf %266, %267 : vector<256x128xf32>
    %c0_290 = arith.constant 0 : index
    %c0_291 = arith.constant 0 : index
    %269 = vector.load %arg12[%c0_290, %c0_291] : memref<256x128xf32, #tpu.memory_space<vmem>>, vector<256x128xf32>
    tpu.vector_store %arg12[%c0_290, %c0_291], %268 {strides = array<i32>} : memref<256x128xf32, #tpu.memory_space<vmem>>, vector<256x128xf32>,
    %c0_292 = arith.constant 0 : index
    %c0_293 = arith.constant 0 : index
    %270 = vector.load %arg12[%c0_292, %c0_293] : memref<256x128xf32, #tpu.memory_space<vmem>>, vector<256x128xf32>
    %271 = arith.truncf %270 : vector<256x128xf32> to vector<256x128xbf16>
    %c0_294 = arith.constant 0 : index
    %c0_295 = arith.constant 0 : index
    %272 = vector.load %arg7[%c0_294, %c0_295] : memref<128x128xbf16, #tpu.memory_space<vmem>>, vector<128x128xbf16>
    %cst_296 = arith.constant dense<0.000000e+00> : vector<256x128xf32>
    %273 = tpu.matmul %271, %272, %cst_296 {dimension_numbers = #tpu.dot_dimension_numbers<[1], [0], [0], [1], [0, 0, 1, 1], [], []>} : vector<256x128xbf16>, vector<128x128xbf16>, vector<256x128xf32> -> vector<256x128xf32>
    %c0_297 = arith.constant 0 : index
    %c0_298 = arith.constant 0 : index
    %274 = vector.load %arg8[%c0_297, %c0_298] : memref<1x128xf32, #tpu.memory_space<vmem>>, vector<1x128xf32>
    %275 = vector.broadcast %274 : vector<1x128xf32> to vector<256x128xf32>
    %276 = arith.addf %273, %275 : vector<256x128xf32>
    %c0_299 = arith.constant 0 : index
    %c0_300 = arith.constant 0 : index
    %c0_301 = arith.constant 0 : index
    %277 = vector.load %arg11[%c0_299, %c0_300, %c0_301] : memref<1x256x128xf32, #tpu.memory_space<vmem>>, vector<1x256x128xf32>
    %278 = vector.shape_cast %277 : vector<1x256x128xf32> to vector<256x128xf32>
    %279 = vector.shape_cast %276 : vector<256x128xf32> to vector<1x256x128xf32>
    tpu.vector_store %arg11[%c0_299, %c0_300, %c0_301], %279 {strides = array<i32>} : memref<1x256x128xf32, #tpu.memory_space<vmem>>, vector<1x256x128xf32>,
    return
  }
  func.func @transform_0(%arg0: i32) -> (i32, i32, i32) {
    %c0_i32 = arith.constant 0 : i32
    %c0_i32_0 = arith.constant 0 : i32
    %c0_i32_1 = arith.constant 0 : i32
    return %arg0, %c0_i32, %c0_i32_0 : i32, i32, i32
  }
  func.func @transform_1(%arg0: i32) -> (i32, i32) {
    %c0_i32 = arith.constant 0 : i32
    %c0_i32_0 = arith.constant 0 : i32
    %c0_i32_1 = arith.constant 0 : i32
    return %c0_i32, %c0_i32_0 : i32, i32
  }
  func.func @transform_2(%arg0: i32) -> (i32, i32, i32) {
    %c0_i32 = arith.constant 0 : i32
    %c0_i32_0 = arith.constant 0 : i32
    %c0_i32_1 = arith.constant 0 : i32
    %c0_i32_2 = arith.constant 0 : i32
    return %c0_i32, %c0_i32_0, %c0_i32_1 : i32, i32, i32
  }
  func.func @transform_3(%arg0: i32) -> (i32, i32, i32) {
    %c0_i32 = arith.constant 0 : i32
    %c0_i32_0 = arith.constant 0 : i32
    %c0_i32_1 = arith.constant 0 : i32
    %c0_i32_2 = arith.constant 0 : i32
    return %c0_i32, %c0_i32_0, %c0_i32_1 : i32, i32, i32
  }
  func.func @transform_4(%arg0: i32) -> (i32, i32, i32, i32) {
    %c0_i32 = arith.constant 0 : i32
    %c0_i32_0 = arith.constant 0 : i32
    %c0_i32_1 = arith.constant 0 : i32
    %c0_i32_2 = arith.constant 0 : i32
    %c0_i32_3 = arith.constant 0 : i32
    return %c0_i32, %c0_i32_0, %c0_i32_1, %c0_i32_2 : i32, i32, i32, i32
  }
  func.func @transform_5(%arg0: i32) -> (i32, i32, i32) {
    %c0_i32 = arith.constant 0 : i32
    %c0_i32_0 = arith.constant 0 : i32
    %c0_i32_1 = arith.constant 0 : i32
    %c0_i32_2 = arith.constant 0 : i32
    return %c0_i32, %c0_i32_0, %c0_i32_1 : i32, i32, i32
  }
  func.func @transform_6(%arg0: i32) -> (i32, i32) {
    %c0_i32 = arith.constant 0 : i32
    %c0_i32_0 = arith.constant 0 : i32
    %c0_i32_1 = arith.constant 0 : i32
    return %c0_i32, %c0_i32_0 : i32, i32
  }
  func.func @transform_7(%arg0: i32) -> (i32, i32) {
    %c0_i32 = arith.constant 0 : i32
    %c0_i32_0 = arith.constant 0 : i32
    %c0_i32_1 = arith.constant 0 : i32
    return %c0_i32, %c0_i32_0 : i32, i32
  }
  func.func @transform_8(%arg0: i32) -> (i32, i32) {
    %c0_i32 = arith.constant 0 : i32
    %c0_i32_0 = arith.constant 0 : i32
    %c0_i32_1 = arith.constant 0 : i32
    return %c0_i32, %c0_i32_0 : i32, i32
  }
  func.func @transform_9(%arg0: i32) -> (i32, i32) {
    %c0_i32 = arith.constant 0 : i32
    %c0_i32_0 = arith.constant 0 : i32
    %c0_i32_1 = arith.constant 0 : i32
    return %c0_i32, %c0_i32_0 : i32, i32
  }
  func.func @transform_10(%arg0: i32) -> (i32, i32, i32) {
    %c0_i32 = arith.constant 0 : i32
    %c0_i32_0 = arith.constant 0 : i32
    %c0_i32_1 = arith.constant 0 : i32
    return %arg0, %c0_i32, %c0_i32_0 : i32, i32, i32
  }
}

</mosaic_0001>

<bundles_post_ra>
// kernel: _lambda_.2
= control target key start
LH: loop header
LB: loop body
LE: loop exit
PB: predicated region body
PF: predicated region fallthrough
CT: control target
= control target key end

     0   :  { %vm23_vm0 = vcmask 1041408   ;;  %v1786_v1 = vmov 0.0   ;;  %vm1787_vm1 = vmmov 0   ;;  %s2331_s0 = inlined_call_operand.vmem [shape: f32[2,128], index: 0, kind: input, shape index: {}]   ;;  %s2332_s1 = inlined_call_operand.vmem [shape: bf16[2,128,128], index: 1, kind: input, shape index: {}]   ;;  %s2333_s3 = inlined_call_operand.vmem [shape: bf16[128,2048], index: 3, kind: input, shape index: {}]   ;;  %s2334_s2 = inlined_call_operand.vmem [shape: f32[2,1,128], index: 2, kind: input, shape index: {}]   ;;  %s2335_s4 = inlined_call_operand.vmem [shape: f32[1,2048], index: 4, kind: input, shape index: {}]   ;;  %s2336_s5 = inlined_call_operand.vmem [shape: f32[2,2048], index: 5, kind: output, shape index: {}]  }
   0x1   :  { %v21_v0 = vld [vmem:[%s2331_s0] sm:$0x3]  ;;  %1724 = vmatprep.subr.bf16.mxu0 %v1786_v1  ;;  %1744 = vmatprep.subr.bf16.mxu1 %v1786_v1  ;;  %v1769_v5 = vld [vmem:[%s2332_s1 + $0x8] sm:$0xff]   ;;  %v1770_v6 = vld [vmem:[%s2332_s1 + $0x10] sm:$0xff]  }
   0x2   :  { %v22_v2 = vmul.f32 %v21_v0, %v21_v0  ;;  %v1768_v3 = vld [vmem:[%s2332_s1] sm:$0xff]   ;;  %v1771_v7 = vld [vmem:[%s2332_s1 + $0x18] sm:$0xff]   ;;  %v1773_v9 = vld [vmem:[%s2332_s1 + $0x28] sm:$0xff]   ;;  %1740 = vmatprep.mubr.msk.bf16.mxu0 %vm1787_vm1, %v1786_v1  ;;  %1760 = vmatprep.mubr.msk.bf16.mxu1 %vm1787_vm1, %v1786_v1 }
   0x3   :  { %1725 = vmatpush3.bf16.msra.mxu0 %v1768_v3  ;;  %v1772_v8 = vld [vmem:[%s2332_s1 + $0x20] sm:$0xff]   ;;  %v1774_v10 = vld [vmem:[%s2332_s1 + $0x30] sm:$0xff]   ;;  %v1775_v11 = vld [vmem:[%s2332_s1 + $0x38] sm:$0xff]  }
   0x4   :  { %v24_v4 = vsel %vm23_vm0, %v22_v2, 0.0  ;;  %1726 = vmatprep.subr.bf16.mxu0 %v1786_v1  ;;  %v1776_v12 = vld [vmem:[%s2332_s1 + $0x40] sm:$0xff]   ;;  %v1777_v13 = vld [vmem:[%s2332_s1 + $0x48] sm:$0xff]   ;;  %v1778_v14 = vld [vmem:[%s2332_s1 + $0x50] sm:$0xff]  }
   0x5   :  { %25 = vadd.xlane.f32.xlu0 %v24_v4  ;;  %1745 = vmatpush3.bf16.msra.mxu1 %v1776_v12  ;;  %v1779_v15 = vld [vmem:[%s2332_s1 + $0x58] sm:$0xff]   ;;  %v1780_v16 = vld [vmem:[%s2332_s1 + $0x60] sm:$0xff]   ;;  %v1781_v17 = vld [vmem:[%s2332_s1 + $0x68] sm:$0xff]  }
   0x6   :  { %1746 = vmatprep.subr.bf16.mxu1 %v1786_v1  ;;  %v1782_v24 = vld [vmem:[%s2332_s1 + $0x70] sm:$0xff]   ;;  %v1783_v25 = vld [vmem:[%s2332_s1 + $0x78] sm:$0xff]   ;;  %v267_v26 = vld [vmem:[%s2333_s3] sm:$0xff] }
   0x7   :  { %1727 = vmatpush3.bf16.msra.mxu0 %v1769_v5  ;;  %v275_v27 = vld [vmem:[%s2333_s3 + $0x40] sm:$0xff]  ;;  %v268_v28 = vld [vmem:[%s2333_s3 + $0x8] sm:$0xff] }
   0x8   :  { %1728 = vmatprep.subr.bf16.mxu0 %v1786_v1  ;;  %v1578_v29 = vcombine.low %v267_v26, %v275_v27  ;;  %v1579_v30 = vcombine.high %v267_v26, %v275_v27  ;;  %v276_v31 = vld [vmem:[%s2333_s3 + $0x48] sm:$0xff]  ;;  %v283_v32 = vld [vmem:[%s2333_s3 + $0x80] sm:$0xff] }
   0x9   :  { %1747 = vmatpush3.bf16.msra.mxu1 %v1777_v13  ;;  %v291_v33 = vld [vmem:[%s2333_s3 + $0xc0] sm:$0xff]  ;;  %v1580_v34 = vcombine.low %v268_v28, %v276_v31  ;;  %v1581_v35 = vcombine.high %v268_v28, %v276_v31  ;;  %v284_v62 = vld [vmem:[%s2333_s3 + $0x88] sm:$0xff] }
   0xa   :  { %1748 = vmatprep.subr.bf16.mxu1 %v1786_v1  ;;  %v1595_v36 = vcombine.high %v283_v32, %v291_v33  ;;  %v1594_v37 = vcombine.low %v283_v32, %v291_v33  ;;  %v299_v38 = vld [vmem:[%s2333_s3 + $0x100] sm:$0xff]  ;;  %v292_v63 = vld [vmem:[%s2333_s3 + $0xc8] sm:$0xff] }
   0xb   :  { %1729 = vmatpush3.bf16.msra.mxu0 %v1770_v6  ;;  %v307_v39 = vld [vmem:[%s2333_s3 + $0x140] sm:$0xff]  ;;  %v1597_v2 = vcombine.high %v284_v62, %v292_v63  ;;  %v300_v3 = vld [vmem:[%s2333_s3 + $0x108] sm:$0xff]  ;;  %v1596_v5 = vcombine.low %v284_v62, %v292_v63  ;;  %v309_v62 = vld [vmem:[%s2333_s3 + $0x150] sm:$0xff] }
   0xc   :  { %1730 = vmatprep.subr.bf16.mxu0 %v1786_v1  ;;  %v1611_v40 = vcombine.high %v299_v38, %v307_v39  ;;  %v1610_v41 = vcombine.low %v299_v38, %v307_v39  ;;  %v315_v42 = vld [vmem:[%s2333_s3 + $0x180] sm:$0xff]  ;;  %v308_v4 = vld [vmem:[%s2333_s3 + $0x148] sm:$0xff]  ;;  %v270_v38 = vld [vmem:[%s2333_s3 + $0x18] sm:$0xff] }
   0xd   :  { %1749 = vmatpush3.bf16.msra.mxu1 %v1778_v14  ;;  %v323_v43 = vld [vmem:[%s2333_s3 + $0x1c0] sm:$0xff]  ;;  %v1613_v6 = vcombine.high %v300_v3, %v308_v4  ;;  %v340_v12 = vld [vmem:[%s2333_s3 + $0x248] sm:$0xff]  ;;  %v302_v63 = vld [vmem:[%s2333_s3 + $0x118] sm:$0xff] }
   0xe   :  { %1750 = vmatprep.subr.bf16.mxu1 %v1786_v1  ;;  %v1627_v44 = vcombine.high %v315_v42, %v323_v43  ;;  %v1626_v45 = vcombine.low %v315_v42, %v323_v43  ;;  %v331_v46 = vld [vmem:[%s2333_s3 + $0x200] sm:$0xff]  ;;  %v388_v32 = vld [vmem:[%s2333_s3 + $0x3c8] sm:$0xff] }
   0xf   :  { %1731 = vmatpush3.bf16.msra.mxu0 %v1771_v7  ;;  %v339_v47 = vld [vmem:[%s2333_s3 + $0x240] sm:$0xff]  ;;  %v316_v7 = vld [vmem:[%s2333_s3 + $0x188] sm:$0xff] }
  0x10   :  { %1732 = vmatprep.subr.bf16.mxu0 %v1786_v1  ;;  %v1643_v48 = vcombine.high %v331_v46, %v339_v47  ;;  %v1642_v49 = vcombine.low %v331_v46, %v339_v47  ;;  %v347_v50 = vld [vmem:[%s2333_s3 + $0x280] sm:$0xff] }
  0x11   :  { %1751 = vmatpush3.bf16.msra.mxu1 %v1779_v15  ;;  %v355_v51 = vld [vmem:[%s2333_s3 + $0x2c0] sm:$0xff]  ;;  %v348_v15 = vld [vmem:[%s2333_s3 + $0x288] sm:$0xff] }
  0x12   :  { %1752 = vmatprep.subr.bf16.mxu1 %v1786_v1  ;;  %v1659_v52 = vcombine.high %v347_v50, %v355_v51  ;;  %v1658_v53 = vcombine.low %v347_v50, %v355_v51  ;;  %v1543_v54 = vld [vmem:[%s2334_s2] ss:$0 sm:$0xff] }
  0x13   :  { %1733 = vmatpush3.bf16.msra.mxu0 %v1772_v8  ;;  %v324_v8 = vld [vmem:[%s2333_s3 + $0x1c8] sm:$0xff]  ;;  %v379_v28 = vld [vmem:[%s2333_s3 + $0x380] sm:$0xff] }
  0x14   :  { %1734 = vmatprep.subr.bf16.mxu0 %v1786_v1  ;;  %v1628_v13 = vcombine.low %v316_v7, %v324_v8 }
  0x15   :  { %1753 = vmatpush3.bf16.msra.mxu1 %v1780_v16  ;;  %v356_v16 = vld [vmem:[%s2333_s3 + $0x2c8] sm:$0xff] }
  0x16   :  { %1754 = vmatprep.subr.bf16.mxu1 %v1786_v1 }
  0x17   :  { %1735 = vmatpush3.bf16.msra.mxu0 %v1773_v9  ;;  %v1612_v9 = vcombine.low %v300_v3, %v308_v4 }
  0x18   :  { %1736 = vmatprep.subr.bf16.mxu0 %v1786_v1 }
  0x19   :  { %1755 = vmatpush3.bf16.msra.mxu1 %v1781_v17 }
  0x1a   :  { %1756 = vmatprep.subr.bf16.mxu1 %v1786_v1 }
  0x1b   :  { %1737 = vmatpush3.bf16.msra.mxu0 %v1774_v10  ;;  %v1629_v10 = vcombine.high %v316_v7, %v324_v8  ;;  %v318_v7 = vld [vmem:[%s2333_s3 + $0x198] sm:$0xff] }
  0x1c   :  { %1738 = vmatprep.subr.bf16.mxu0 %v1786_v1  ;;  %v326_v8 = vld [vmem:[%s2333_s3 + $0x1d8] sm:$0xff] }
  0x1d   :  { %1757 = vmatpush3.bf16.msra.mxu1 %v1782_v24  ;;  %v372_v24 = vld [vmem:[%s2333_s3 + $0x348] sm:$0xff] }
  0x1e   :  { %1758 = vmatprep.subr.bf16.mxu1 %v1786_v1 }
  0x1f   :  { %1739 = vmatpush3.bf16.msra.mxu0 %v1775_v11  ;;  %v332_v11 = vld [vmem:[%s2333_s3 + $0x208] sm:$0xff] }
  0x20   :  { %1119 = vmatprep.subr.bf16.mxu0 %v1579_v30  ;;  %v1645_v14 = vcombine.high %v332_v11, %v340_v12  ;;  %v1644_v17 = vcombine.low %v332_v11, %v340_v12  ;;  %v380_v30 = vld [vmem:[%s2333_s3 + $0x388] sm:$0xff]  ;;  %v1633_v12 = vcombine.high %v318_v7, %v326_v8 }
  0x21   :  { %1759 = vmatpush3.bf16.msra.mxu1 %v1783_v25 }
  0x22   :  { %1160 = vmatprep.subr.bf16.mxu1 %v1581_v35  ;;  %v1693_v35 = vcombine.high %v380_v30, %v388_v32 }
  0x92   :  { %v26_v18 = vpop.xlane.xlu0 %25 }
  0x93   :  { %v28_v19 = vmul.f32 0.03125, %v26_v18  ;;  %v1661_v18 = vcombine.high %v348_v15, %v356_v16 }
  0x95   :  { %v29_v20 = vadd.f32 1e-08, %v28_v19  ;;  %v1660_v19 = vcombine.low %v348_v15, %v356_v16  ;;  %v334_v15 = vld [vmem:[%s2333_s3 + $0x218] sm:$0xff] }
  0x96   :  { %v342_v16 = vld [vmem:[%s2333_s3 + $0x258] sm:$0xff] }
  0x97   :  { %1784 = vrsqrt.f32 %v29_v20  ;;  %v363_v20 = vld [vmem:[%s2333_s3 + $0x300] sm:$0xff] }
  0xa1   :  { %v1785_v21 = vpop.eup %1784 }
  0xa2   :  { %v31_v22 = vmul.f32 %v1785_v21, %v21_v0  ;;  %v371_v21 = vld [vmem:[%s2333_s3 + $0x340] sm:$0xff] }
  0xa3   :  { %v1674_v25 = vcombine.low %v363_v20, %v371_v21 }
  0xa4   :  { %v32_v23 = vpack.c.bf16 %v31_v22, %v31_v22  ;;  %v364_v22 = vld [vmem:[%s2333_s3 + $0x308] sm:$0xff] }
  0xa5   :  { %v1676_v26 = vcombine.low %v364_v22, %v372_v24  ;;  %v1677_v27 = vcombine.high %v364_v22, %v372_v24  ;;  %v357_v22 = vld [vmem:[%s2333_s3 + $0x2d0] sm:$0xff]  ;;  %v358_v24 = vld [vmem:[%s2333_s3 + $0x2d8] sm:$0xff] }
  0xa6   :  { %1741 = vmatmul.mubr.bf16.vlgmr.msra.gmra.mrb[0].mxu0 %v32_v23  ;;  %v1675_v23 = vcombine.high %v363_v20, %v371_v21  ;;  %v1649_v20 = vcombine.high %v334_v15, %v342_v16  ;;  %v349_v21 = vld [vmem:[%s2333_s3 + $0x290] sm:$0xff] }
  0xa7   :  { %1120 = vmatpush1.bf16.msra.mxu0 %v1578_v29  ;;  %v387_v29 = vld [vmem:[%s2333_s3 + $0x3c0] sm:$0xff] }
  0xa8   :  { %1121 = vmatprep.subr.bf16.mxu0 %v1595_v36  ;;  %v1691_v31 = vcombine.high %v379_v28, %v387_v29  ;;  %v1690_v33 = vcombine.low %v379_v28, %v387_v29  ;;  %v269_v36 = vld [vmem:[%s2333_s3 + $0x10] sm:$0xff] }
  0xa9   :  { %v365_v29 = vld [vmem:[%s2333_s3 + $0x310] sm:$0xff] }
  0xab   :  { %1122 = vmatpush1.bf16.msra.mxu0 %v1594_v37  ;;  %v277_v37 = vld [vmem:[%s2333_s3 + $0x50] sm:$0xff] }
  0xac   :  { %1123 = vmatprep.subr.bf16.mxu0 %v1611_v40  ;;  %v1583_v39 = vcombine.high %v269_v36, %v277_v37  ;;  %v278_v40 = vld [vmem:[%s2333_s3 + $0x58] sm:$0xff] }
  0xad   :  { %v1584_v42 = vcombine.low %v270_v38, %v278_v40  ;;  %v1585_v43 = vcombine.high %v270_v38, %v278_v40  ;;  %v389_v38 = vld [vmem:[%s2333_s3 + $0x3d0] sm:$0xff]  ;;  %v390_v40 = vld [vmem:[%s2333_s3 + $0x3d8] sm:$0xff] }
  0xaf   :  { %1124 = vmatpush1.bf16.msra.mxu0 %v1610_v41  ;;  %v1582_v41 = vcombine.low %v269_v36, %v277_v37  ;;  %v381_v37 = vld [vmem:[%s2333_s3 + $0x390] sm:$0xff] }
  0xb0   :  { %1125 = vmatprep.subr.bf16.mxu0 %v1627_v44  ;;  %v1788_v44 = vmov 0  }
  0xb1   :  { %1151 = vmatprep.mubr.bf16.mxu0 %v1788_v44 }
  0xb3   :  { %1126 = vmatpush1.bf16.msra.mxu0 %v1626_v45  ;;  %v1569_v45 = vld [vmem:[%s2334_s2 + $0x1] ss:$0 sm:$0xff] }
  0xb4   :  { %1127 = vmatprep.subr.bf16.mxu0 %v1643_v48 }
  0xb7   :  { %1128 = vmatpush1.bf16.msra.mxu0 %v1642_v49 }
  0xb8   :  { %1129 = vmatprep.subr.bf16.mxu0 %v1659_v52  ;;  %v285_v52 = vld [vmem:[%s2333_s3 + $0x90] sm:$0xff] }
  0xbb   :  { %1130 = vmatpush1.bf16.msra.mxu0 %v1658_v53 }
  0xbc   :  { %1131 = vmatprep.subr.bf16.mxu0 %v1675_v23  ;;  %v350_v23 = vld [vmem:[%s2333_s3 + $0x298] sm:$0xff] }
  0xbd   :  { %v1665_v28 = vcombine.high %v350_v23, %v358_v24 }
  0xbf   :  { %1132 = vmatpush1.bf16.msra.mxu0 %v1674_v25 }
  0xc0   :  { %1133 = vmatprep.subr.bf16.mxu0 %v1691_v31  ;;  %v366_v31 = vld [vmem:[%s2333_s3 + $0x318] sm:$0xff] }
  0xc3   :  { %1134 = vmatpush1.bf16.msra.mxu0 %v1690_v33  ;;  %v1662_v33 = vcombine.low %v349_v21, %v357_v22 }
  0xc4   :  { %1201 = vmatprep.subr.bf16.mxu0 %v1583_v39  ;;  %v382_v39 = vld [vmem:[%s2333_s3 + $0x398] sm:$0xff] }
 0x179   :  { %v138_v55 = vpop.f32.mrb[0].mxu0 }
 0x17a   :  { %v139_v56 = vadd.f32 %v1543_v54, %v138_v55  ;;  %v1742_v57 = vpop.f32.mrb[1].mxu0  ;;  %v293_v54 = vld [vmem:[%s2333_s3 + $0xd0] sm:$0xff]  ;;  %v286_v55 = vld [vmem:[%s2333_s3 + $0x98] sm:$0xff] }
 0x17b   :  { %v141_v58 = vpop.f32.mrb[2].mxu0 }
 0x17c   :  { %vm144_vm2 = vcmp.ge.f32.partialorder %v139_v56, 0.0  ;;  %v145_v59 = vmul.f32 0.2, %v139_v56  ;;  %v1743_v60 = vpop.f32.mrb[3].mxu0 }
 0x17e   :  { %v146_v61 = vsel %vm144_vm2, %v139_v56, %v145_v59  ;;  %v294_v56 = vld [vmem:[%s2333_s3 + $0xd8] sm:$0xff]  ;;  %v1599_v59 = vcombine.high %v285_v52, %v293_v54 }
 0x17f   :  { %v147_v0 = vmul.f32 1.4142135, %v146_v61  ;;  %v1601_v60 = vcombine.high %v286_v55, %v294_v56  ;;  %v301_v61 = vld [vmem:[%s2333_s3 + $0x110] sm:$0xff] }
 0x180   :  { %v1615_v3 = vcombine.high %v301_v61, %v309_v62 }
 0x181   :  { %v148_v1 = vpack.c.bf16 %v147_v0, %v147_v0  ;;  %v310_v0 = vld [vmem:[%s2333_s3 + $0x158] sm:$0xff] }
 0x182   :  { %v1617_v4 = vcombine.high %v302_v63, %v310_v0 }
 0x183   :  { %1761 = vmatmul.mubr.bf16.vlgmr.msra.gmra.mrb[0].mxu1 %v148_v1  ;;  %v1598_v1 = vcombine.low %v285_v52, %v293_v54  ;;  %v287_v54 = vld [vmem:[%s2333_s3 + $0xa0] sm:$0xff] }
 0x184   :  { %1161 = vmatpush1.bf16.msra.mxu1 %v1580_v34  ;;  %v1692_v34 = vcombine.low %v380_v30, %v388_v32  ;;  %1192 = vmatprep.mubr.bf16.mxu1 %v1788_v44  ;;  %v373_v30 = vld [vmem:[%s2333_s3 + $0x350] sm:$0xff]  ;;  %v374_v32 = vld [vmem:[%s2333_s3 + $0x358] sm:$0xff] }
 0x185   :  { %1162 = vmatprep.subr.bf16.mxu1 %v1597_v2  ;;  %v1600_v2 = vcombine.low %v286_v55, %v294_v56  ;;  %v1681_v36 = vcombine.high %v366_v31, %v374_v32  ;;  %v295_v55 = vld [vmem:[%s2333_s3 + $0xe0] sm:$0xff]  ;;  %v288_v56 = vld [vmem:[%s2333_s3 + $0xa8] sm:$0xff] }
 0x188   :  { %1163 = vmatpush1.bf16.msra.mxu1 %v1596_v5  ;;  %v317_v5 = vld [vmem:[%s2333_s3 + $0x190] sm:$0xff] }
 0x189   :  { %1164 = vmatprep.subr.bf16.mxu1 %v1613_v6  ;;  %v325_v6 = vld [vmem:[%s2333_s3 + $0x1d0] sm:$0xff] }
 0x18a   :  { %v1631_v11 = vcombine.high %v317_v5, %v325_v6 }
 0x18c   :  { %1165 = vmatpush1.bf16.msra.mxu1 %v1612_v9  ;;  %v1614_v9 = vcombine.low %v301_v61, %v309_v62  ;;  %v1603_v61 = vcombine.high %v287_v54, %v295_v55 }
 0x18d   :  { %1166 = vmatprep.subr.bf16.mxu1 %v1629_v10  ;;  %v1616_v10 = vcombine.low %v302_v63, %v310_v0  ;;  %v303_v63 = vld [vmem:[%s2333_s3 + $0x120] sm:$0xff] }
 0x18e   :  { %v311_v0 = vld [vmem:[%s2333_s3 + $0x160] sm:$0xff] }
 0x190   :  { %1167 = vmatpush1.bf16.msra.mxu1 %v1628_v13  ;;  %v333_v13 = vld [vmem:[%s2333_s3 + $0x210] sm:$0xff] }
 0x191   :  { %1168 = vmatprep.subr.bf16.mxu1 %v1645_v14  ;;  %v341_v14 = vld [vmem:[%s2333_s3 + $0x250] sm:$0xff] }
 0x192   :  { %v1646_v25 = vcombine.low %v333_v13, %v341_v14 }
 0x194   :  { %1169 = vmatpush1.bf16.msra.mxu1 %v1644_v17  ;;  %v1630_v17 = vcombine.low %v317_v5, %v325_v6  ;;  %v1619_v5 = vcombine.high %v303_v63, %v311_v0 }
 0x195   :  { %1170 = vmatprep.subr.bf16.mxu1 %v1661_v18  ;;  %v1632_v18 = vcombine.low %v318_v7, %v326_v8  ;;  %v319_v7 = vld [vmem:[%s2333_s3 + $0x1a0] sm:$0xff] }
 0x196   :  { %v327_v8 = vld [vmem:[%s2333_s3 + $0x1e0] sm:$0xff] }
 0x198   :  { %1171 = vmatpush1.bf16.msra.mxu1 %v1660_v19  ;;  %v1647_v19 = vcombine.high %v333_v13, %v341_v14  ;;  %v1635_v13 = vcombine.high %v319_v7, %v327_v8 }
 0x199   :  { %1172 = vmatprep.subr.bf16.mxu1 %v1677_v27  ;;  %v1663_v27 = vcombine.high %v349_v21, %v357_v22 }
 0x19c   :  { %1173 = vmatpush1.bf16.msra.mxu1 %v1676_v26  ;;  %v1648_v26 = vcombine.low %v334_v15, %v342_v16  ;;  %v335_v15 = vld [vmem:[%s2333_s3 + $0x220] sm:$0xff] }
 0x19d   :  { %1174 = vmatprep.subr.bf16.mxu1 %v1693_v35  ;;  %v1679_v35 = vcombine.high %v365_v29, %v373_v30  ;;  %v343_v16 = vld [vmem:[%s2333_s3 + $0x260] sm:$0xff] }
 0x19e   :  { %v1651_v21 = vcombine.high %v335_v15, %v343_v16 }
 0x1a0   :  { %1175 = vmatpush1.bf16.msra.mxu1 %v1692_v34  ;;  %v1664_v34 = vcombine.low %v350_v23, %v358_v24  ;;  %v351_v23 = vld [vmem:[%s2333_s3 + $0x2a0] sm:$0xff] }
 0x1a1   :  { %1242 = vmatprep.subr.bf16.mxu1 %v1585_v43  ;;  %v1695_v43 = vcombine.high %v381_v37, %v389_v38  ;;  %v359_v24 = vld [vmem:[%s2333_s3 + $0x2e0] sm:$0xff] }
 0x256   :  { %v256_v46 = vpop.f32.mrb[0].mxu1 }
 0x257   :  { %v257_v47 = vadd.f32 %v1569_v45, %v256_v46  ;;  %v1762_v48 = vpop.f32.mrb[1].mxu1  ;;  %v1697_v45 = vcombine.high %v382_v39, %v390_v40  ;;  %v271_v46 = vld [vmem:[%s2333_s3 + $0x20] sm:$0xff] }
 0x258   :  { %v259_v49 = vpop.f32.mrb[2].mxu1  ;;  %v272_v48 = vld [vmem:[%s2333_s3 + $0x28] sm:$0xff] }
 0x259   :  { %vm262_vm3 = vcmp.ge.f32.partialorder %v257_v47, 0.0  ;;  %v263_v50 = vmul.f32 0.2, %v257_v47  ;;  %v1763_v51 = vpop.f32.mrb[3].mxu1  ;;  %v280_v49 = vld [vmem:[%s2333_s3 + $0x68] sm:$0xff] }
 0x25a   :  { %v1696_v51 = vcombine.low %v382_v39, %v390_v40  ;;  %v383_v39 = vld [vmem:[%s2333_s3 + $0x3a0] sm:$0xff] }
 0x25b   :  { %v264_v53 = vsel %vm262_vm3, %v257_v47, %v263_v50  ;;  %v279_v47 = vld [vmem:[%s2333_s3 + $0x60] sm:$0xff]  ;;  %v1694_v50 = vcombine.low %v381_v37, %v389_v38 }
 0x25c   :  { %v265_v57 = vmul.f32 1.4142135, %v264_v53  ;;  %v1587_v52 = vcombine.high %v271_v46, %v279_v47  ;;  %v1589_v53 = vcombine.high %v272_v48, %v280_v49  ;;  %v391_v40 = vld [vmem:[%s2333_s3 + $0x3e0] sm:$0xff] }
 0x25e   :  { %v1999_v58 = vpack.c.bf16 %v265_v57, %v265_v57  ;;  %v296_v57 = vld [vmem:[%s2333_s3 + $0xe8] sm:$0xff] }
 0x25f   :  { %v1605_v62 = vcombine.high %v288_v56, %v296_v57 }
 0x260   :  { %1152 = vmatmul.mubr.bf16.vlgmr.msra.gmra.mrb[4].mxu0 %v1999_v58  ;;  %1193 = vmatmul.mubr.bf16.vlgmr.msra.gmra.mrb[4].mxu1 %v1999_v58 }
 0x261   :  { %1202 = vmatpush1.bf16.msra.mxu0 %v1582_v41  ;;  %1243 = vmatpush1.bf16.msra.mxu1 %v1584_v42  ;;  %v1678_v41 = vcombine.low %v365_v29, %v373_v30  ;;  %v1680_v42 = vcombine.low %v366_v31, %v374_v32  ;;  %v1667_v29 = vcombine.high %v351_v23, %v359_v24  ;;  %v367_v31 = vld [vmem:[%s2333_s3 + $0x320] sm:$0xff] }
 0x262   :  { %1203 = vmatprep.subr.bf16.mxu0 %v1599_v59  ;;  %1244 = vmatprep.subr.bf16.mxu1 %v1601_v60  ;;  %v1586_v59 = vcombine.low %v271_v46, %v279_v47  ;;  %v1588_v60 = vcombine.low %v272_v48, %v280_v49  ;;  %v375_v32 = vld [vmem:[%s2333_s3 + $0x360] sm:$0xff]  ;;  %v1699_v46 = vcombine.high %v383_v39, %v391_v40  ;;  %v273_v48 = vld [vmem:[%s2333_s3 + $0x30] sm:$0xff] }
 0x263   :  { %1233 = vmatprep.mubr.bf16.mxu0 %v1788_v44  ;;  %1274 = vmatprep.mubr.bf16.mxu1 %v1788_v44  ;;  %v1683_v37 = vcombine.high %v367_v31, %v375_v32  ;;  %v281_v49 = vld [vmem:[%s2333_s3 + $0x70] sm:$0xff] }
 0x265   :  { %1204 = vmatpush1.bf16.msra.mxu0 %v1598_v1  ;;  %1245 = vmatpush1.bf16.msra.mxu1 %v1600_v2  ;;  %v304_v1 = vld [vmem:[%s2333_s3 + $0x128] sm:$0xff] }
 0x266   :  { %1205 = vmatprep.subr.bf16.mxu0 %v1615_v3  ;;  %1246 = vmatprep.subr.bf16.mxu1 %v1617_v4  ;;  %v312_v2 = vld [vmem:[%s2333_s3 + $0x168] sm:$0xff]  ;;  %v1602_v3 = vcombine.low %v287_v54, %v295_v55  ;;  %v1604_v4 = vcombine.low %v288_v56, %v296_v57  ;;  %v1591_v54 = vcombine.high %v273_v48, %v281_v49  ;;  %v289_v56 = vld [vmem:[%s2333_s3 + $0xb0] sm:$0xff] }
 0x267   :  { %v1621_v6 = vcombine.high %v304_v1, %v312_v2  ;;  %v297_v57 = vld [vmem:[%s2333_s3 + $0xf0] sm:$0xff] }
 0x269   :  { %1206 = vmatpush1.bf16.msra.mxu0 %v1614_v9  ;;  %1247 = vmatpush1.bf16.msra.mxu1 %v1616_v10  ;;  %v320_v9 = vld [vmem:[%s2333_s3 + $0x1a8] sm:$0xff] }
 0x26a   :  { %1207 = vmatprep.subr.bf16.mxu0 %v1631_v11  ;;  %1248 = vmatprep.subr.bf16.mxu1 %v1633_v12  ;;  %v328_v10 = vld [vmem:[%s2333_s3 + $0x1e8] sm:$0xff]  ;;  %v1618_v11 = vcombine.low %v303_v63, %v311_v0  ;;  %v1620_v12 = vcombine.low %v304_v1, %v312_v2  ;;  %v1607_v63 = vcombine.high %v289_v56, %v297_v57  ;;  %v305_v1 = vld [vmem:[%s2333_s3 + $0x130] sm:$0xff] }
 0x26b   :  { %v1637_v14 = vcombine.high %v320_v9, %v328_v10  ;;  %v313_v2 = vld [vmem:[%s2333_s3 + $0x170] sm:$0xff] }
 0x26d   :  { %1208 = vmatpush1.bf16.msra.mxu0 %v1630_v17  ;;  %1249 = vmatpush1.bf16.msra.mxu1 %v1632_v18  ;;  %v336_v17 = vld [vmem:[%s2333_s3 + $0x228] sm:$0xff] }
 0x26e   :  { %1209 = vmatprep.subr.bf16.mxu0 %v1647_v19  ;;  %1250 = vmatprep.subr.bf16.mxu1 %v1649_v20  ;;  %v344_v18 = vld [vmem:[%s2333_s3 + $0x268] sm:$0xff]  ;;  %v1634_v19 = vcombine.low %v319_v7, %v327_v8  ;;  %v1636_v20 = vcombine.low %v320_v9, %v328_v10  ;;  %v1623_v7 = vcombine.high %v305_v1, %v313_v2  ;;  %v321_v9 = vld [vmem:[%s2333_s3 + $0x1b0] sm:$0xff] }
 0x26f   :  { %v1653_v22 = vcombine.high %v336_v17, %v344_v18  ;;  %v329_v10 = vld [vmem:[%s2333_s3 + $0x1f0] sm:$0xff] }
 0x271   :  { %1210 = vmatpush1.bf16.msra.mxu0 %v1646_v25  ;;  %1251 = vmatpush1.bf16.msra.mxu1 %v1648_v26  ;;  %v352_v25 = vld [vmem:[%s2333_s3 + $0x2a8] sm:$0xff] }
 0x272   :  { %1211 = vmatprep.subr.bf16.mxu0 %v1663_v27  ;;  %1252 = vmatprep.subr.bf16.mxu1 %v1665_v28  ;;  %v360_v26 = vld [vmem:[%s2333_s3 + $0x2e8] sm:$0xff]  ;;  %v1650_v27 = vcombine.low %v335_v15, %v343_v16  ;;  %v1652_v28 = vcombine.low %v336_v17, %v344_v18  ;;  %v1639_v15 = vcombine.high %v321_v9, %v329_v10  ;;  %v337_v17 = vld [vmem:[%s2333_s3 + $0x230] sm:$0xff] }
 0x273   :  { %v1669_v30 = vcombine.high %v352_v25, %v360_v26  ;;  %v345_v18 = vld [vmem:[%s2333_s3 + $0x270] sm:$0xff] }
 0x275   :  { %1212 = vmatpush1.bf16.msra.mxu0 %v1662_v33  ;;  %1253 = vmatpush1.bf16.msra.mxu1 %v1664_v34  ;;  %v368_v33 = vld [vmem:[%s2333_s3 + $0x328] sm:$0xff] }
 0x276   :  { %1213 = vmatprep.subr.bf16.mxu0 %v1679_v35  ;;  %1254 = vmatprep.subr.bf16.mxu1 %v1681_v36  ;;  %v376_v34 = vld [vmem:[%s2333_s3 + $0x368] sm:$0xff]  ;;  %v1666_v35 = vcombine.low %v351_v23, %v359_v24  ;;  %v1668_v36 = vcombine.low %v352_v25, %v360_v26  ;;  %v353_v24 = vld [vmem:[%s2333_s3 + $0x2b0] sm:$0xff]  ;;  %v354_v26 = vld [vmem:[%s2333_s3 + $0x2b8] sm:$0xff] }
 0x277   :  { %v1685_v38 = vcombine.high %v368_v33, %v376_v34  ;;  %v361_v25 = vld [vmem:[%s2333_s3 + $0x2f0] sm:$0xff] }
 0x279   :  { %1214 = vmatpush1.bf16.msra.mxu0 %v1678_v41  ;;  %1255 = vmatpush1.bf16.msra.mxu1 %v1680_v42  ;;  %v384_v41 = vld [vmem:[%s2333_s3 + $0x3a8] sm:$0xff] }
 0x27a   :  { %1215 = vmatprep.subr.bf16.mxu0 %v1695_v43  ;;  %1256 = vmatprep.subr.bf16.mxu1 %v1697_v45  ;;  %v392_v42 = vld [vmem:[%s2333_s3 + $0x3e8] sm:$0xff]  ;;  %v1682_v43 = vcombine.low %v367_v31, %v375_v32  ;;  %v1684_v45 = vcombine.low %v368_v33, %v376_v34  ;;  %v369_v32 = vld [vmem:[%s2333_s3 + $0x330] sm:$0xff]  ;;  %v370_v34 = vld [vmem:[%s2333_s3 + $0x338] sm:$0xff] }
 0x27b   :  { %v1701_v47 = vcombine.high %v384_v41, %v392_v42  ;;  %v377_v33 = vld [vmem:[%s2333_s3 + $0x370] sm:$0xff] }
 0x27d   :  { %1216 = vmatpush1.bf16.msra.mxu0 %v1694_v50  ;;  %1257 = vmatpush1.bf16.msra.mxu1 %v1696_v51  ;;  %v274_v50 = vld [vmem:[%s2333_s3 + $0x38] sm:$0xff] }
 0x27e   :  { %1283 = vmatprep.subr.bf16.mxu0 %v1587_v52  ;;  %1324 = vmatprep.subr.bf16.mxu1 %v1589_v53  ;;  %v282_v51 = vld [vmem:[%s2333_s3 + $0x78] sm:$0xff]  ;;  %v1698_v52 = vcombine.low %v383_v39, %v391_v40  ;;  %v1700_v53 = vcombine.low %v384_v41, %v392_v42  ;;  %v385_v40 = vld [vmem:[%s2333_s3 + $0x3b0] sm:$0xff] }
 0x27f   :  { %v1593_v55 = vcombine.high %v274_v50, %v282_v51  ;;  %v393_v41 = vld [vmem:[%s2333_s3 + $0x3f0] sm:$0xff]  ;;  %v386_v42 = vld [vmem:[%s2333_s3 + $0x3b8] sm:$0xff] }
 0x280   :  { %1234 = vmatmul.mubr.bf16.vlgmr.msra.gmra.mrb[8].mxu0 %v1999_v58  ;;  %1275 = vmatmul.mubr.bf16.vlgmr.msra.gmra.mrb[8].mxu1 %v1999_v58 }
 0x281   :  { %1284 = vmatpush1.bf16.msra.mxu0 %v1586_v59  ;;  %1325 = vmatpush1.bf16.msra.mxu1 %v1588_v60  ;;  %v290_v59 = vld [vmem:[%s2333_s3 + $0xb8] sm:$0xff] }
 0x282   :  { %1285 = vmatprep.subr.bf16.mxu0 %v1603_v61  ;;  %1326 = vmatprep.subr.bf16.mxu1 %v1605_v62  ;;  %v298_v60 = vld [vmem:[%s2333_s3 + $0xf8] sm:$0xff]  ;;  %v1590_v61 = vcombine.low %v273_v48, %v281_v49  ;;  %v1592_v62 = vcombine.low %v274_v50, %v282_v51  ;;  %v1702_v49 = vcombine.low %v385_v40, %v393_v41  ;;  %v399_v51 = vlaneseq }
 0x283   :  { %1315 = vmatprep.mubr.bf16.mxu0 %v1788_v44  ;;  %1356 = vmatprep.mubr.bf16.mxu1 %v1788_v44  ;;  %v1609_v0 = vcombine.high %v290_v59, %v298_v60 }
 0x285   :  { %1286 = vmatpush1.bf16.msra.mxu0 %v1602_v3  ;;  %1327 = vmatpush1.bf16.msra.mxu1 %v1604_v4  ;;  %v306_v3 = vld [vmem:[%s2333_s3 + $0x138] sm:$0xff] }
 0x286   :  { %1287 = vmatprep.subr.bf16.mxu0 %v1619_v5  ;;  %1328 = vmatprep.subr.bf16.mxu1 %v1621_v6  ;;  %v314_v4 = vld [vmem:[%s2333_s3 + $0x178] sm:$0xff]  ;;  %v1606_v5 = vcombine.low %v289_v56, %v297_v57  ;;  %v1608_v6 = vcombine.low %v290_v59, %v298_v60 }
 0x287   :  { %v1625_v8 = vcombine.high %v306_v3, %v314_v4 }
 0x289   :  { %1288 = vmatpush1.bf16.msra.mxu0 %v1618_v11  ;;  %1329 = vmatpush1.bf16.msra.mxu1 %v1620_v12  ;;  %v322_v11 = vld [vmem:[%s2333_s3 + $0x1b8] sm:$0xff] }
 0x28a   :  { %1289 = vmatprep.subr.bf16.mxu0 %v1635_v13  ;;  %1330 = vmatprep.subr.bf16.mxu1 %v1637_v14  ;;  %v330_v12 = vld [vmem:[%s2333_s3 + $0x1f8] sm:$0xff]  ;;  %v1622_v13 = vcombine.low %v305_v1, %v313_v2  ;;  %v1624_v14 = vcombine.low %v306_v3, %v314_v4 }
 0x28b   :  { %v1641_v16 = vcombine.high %v322_v11, %v330_v12 }
 0x28d   :  { %1290 = vmatpush1.bf16.msra.mxu0 %v1634_v19  ;;  %1331 = vmatpush1.bf16.msra.mxu1 %v1636_v20  ;;  %v346_v19 = vld [vmem:[%s2333_s3 + $0x278] sm:$0xff]  ;;  %v1638_v20 = vcombine.low %v321_v9, %v329_v10 }
 0x28e   :  { %1291 = vmatprep.subr.bf16.mxu0 %v1651_v21  ;;  %1332 = vmatprep.subr.bf16.mxu1 %v1653_v22  ;;  %v1640_v21 = vcombine.low %v322_v11, %v330_v12  ;;  %v1655_v22 = vcombine.high %v337_v17, %v345_v18 }
 0x291   :  { %1292 = vmatpush1.bf16.msra.mxu0 %v1650_v27  ;;  %1333 = vmatpush1.bf16.msra.mxu1 %v1652_v28  ;;  %v362_v27 = vld [vmem:[%s2333_s3 + $0x2f8] sm:$0xff]  ;;  %v1654_v28 = vcombine.low %v337_v17, %v345_v18 }
 0x292   :  { %1293 = vmatprep.subr.bf16.mxu0 %v1667_v29  ;;  %1334 = vmatprep.subr.bf16.mxu1 %v1669_v30  ;;  %v1671_v30 = vcombine.high %v353_v24, %v361_v25  ;;  %v1673_v31 = vcombine.high %v354_v26, %v362_v27 }
 0x295   :  { %1294 = vmatpush1.bf16.msra.mxu0 %v1666_v35  ;;  %1335 = vmatpush1.bf16.msra.mxu1 %v1668_v36  ;;  %v378_v35 = vld [vmem:[%s2333_s3 + $0x378] sm:$0xff]  ;;  %v1670_v36 = vcombine.low %v353_v24, %v361_v25 }
 0x296   :  { %1295 = vmatprep.subr.bf16.mxu0 %v1683_v37  ;;  %1336 = vmatprep.subr.bf16.mxu1 %v1685_v38  ;;  %v1672_v37 = vcombine.low %v354_v26, %v362_v27  ;;  %v1687_v38 = vcombine.high %v369_v32, %v377_v33  ;;  %v1689_v39 = vcombine.high %v370_v34, %v378_v35 }
 0x299   :  { %1296 = vmatpush1.bf16.msra.mxu0 %v1682_v43  ;;  %1337 = vmatpush1.bf16.msra.mxu1 %v1684_v45  ;;  %v394_v43 = vld [vmem:[%s2333_s3 + $0x3f8] sm:$0xff]  ;;  %v1686_v45 = vcombine.low %v369_v32, %v377_v33 }
 0x29a   :  { %1297 = vmatprep.subr.bf16.mxu0 %v1699_v46  ;;  %1338 = vmatprep.subr.bf16.mxu1 %v1701_v47  ;;  %v1688_v46 = vcombine.low %v370_v34, %v378_v35  ;;  %v1703_v47 = vcombine.high %v385_v40, %v393_v41  ;;  %v1705_v48 = vcombine.high %v386_v42, %v394_v43 }
 0x29b   :  { %v1704_v50 = vcombine.low %v386_v42, %v394_v43 }
 0x29d   :  { %1298 = vmatpush1.bf16.msra.mxu0 %v1698_v52  ;;  %1339 = vmatpush1.bf16.msra.mxu1 %v1700_v53  ;;  %v400_v52 = vshrl.u32 %v399_v51, 7 }
 0x29e   :  { %1365 = vmatprep.subr.bf16.mxu0 %v1591_v54  ;;  %1406 = vmatprep.subr.bf16.mxu1 %v1593_v55  ;;  %v396_v54 = vld [vmem:[%s2335_s4 + $0x8] sm:$0xff] }
 0x29f   :  { %v401_v53 = vsub.s32 0, %v400_v52  ;;  %v409_v56 = vsub.s32 2, %v400_v52  ;;  %v405_v57 = vsub.s32 1, %v400_v52  ;;  %v413_v59 = vsub.s32 3, %v400_v52 }
 0x2a0   :  { %1316 = vmatmul.mubr.bf16.vlgmr.msra.gmra.mrb[12].mxu0 %v1999_v58  ;;  %1357 = vmatmul.mubr.bf16.vlgmr.msra.gmra.mrb[12].mxu1 %v1999_v58  ;;  %v421_v1 = vsub.s32 5, %v400_v52  ;;  %v429_v2 = vsub.s32 7, %v400_v52 }
 0x2a1   :  { %1366 = vmatpush1.bf16.msra.mxu0 %v1590_v61  ;;  %1407 = vmatpush1.bf16.msra.mxu1 %v1592_v62  ;;  %v2282_v55 = vrot.slane %v396_v54, %v401_v53  ;;  %v2284_v60 = vrot.slane %v396_v54, %v409_v56  ;;  %v2286_v61 = vrot.slane %v396_v54, %v405_v57 }
 0x2a2   :  { %1367 = vmatprep.subr.bf16.mxu0 %v1607_v63  ;;  %1408 = vmatprep.subr.bf16.mxu1 %v1609_v0  ;;  %v2288_v62 = vrot.slane %v396_v54, %v413_v59  ;;  %v417_v63 = vsub.s32 4, %v400_v52  ;;  %v425_v0 = vsub.s32 6, %v400_v52  ;;  %v2294_v4 = vrot.slane %v396_v54, %v421_v1 }
 0x2a3   :  { %1397 = vmatprep.mubr.bf16.mxu0 %v1788_v44  ;;  %1438 = vmatprep.mubr.bf16.mxu1 %v1788_v44  ;;  %v338_v44 = vld [vmem:[%s2333_s3 + $0x238] sm:$0xff] }
 0x2a4   :  { %v1657_v23 = vcombine.high %v338_v44, %v346_v19  ;;  %v1656_v29 = vcombine.low %v338_v44, %v346_v19  ;;  %v2292_v3 = vrot.slane %v396_v54, %v425_v0 }
 0x2a5   :  { %1368 = vmatpush1.bf16.msra.mxu0 %v1606_v5  ;;  %1409 = vmatpush1.bf16.msra.mxu1 %v1608_v6  ;;  %v2296_v5 = vrot.slane %v396_v54, %v429_v2  ;;  %v395_v6 = vld [vmem:[%s2335_s4] sm:$0xff] }
 0x2a6   :  { %1369 = vmatprep.subr.bf16.mxu0 %v1623_v7  ;;  %1410 = vmatprep.subr.bf16.mxu1 %v1625_v8  ;;  %v1789_v7 = vmov 1983009808   ;;  %v402_v9 = vrot.slane %v395_v6, %v401_v53  ;;  %v410_v10 = vrot.slane %v395_v6, %v409_v56  ;;  %v406_v11 = vrot.slane %v395_v6, %v405_v57 }
 0x2a7   :  { %v1466_v8 = vunpack.c.l.s4 %v1789_v7  ;;  %v426_v32 = vrot.slane %v395_v6, %v425_v0  ;;  %v422_v33 = vrot.slane %v395_v6, %v421_v1  ;;  %v430_v34 = vrot.slane %v395_v6, %v429_v2 }
 0x2a9   :  { %1370 = vmatpush1.bf16.msra.mxu0 %v1622_v13  ;;  %1411 = vmatpush1.bf16.msra.mxu1 %v1624_v14  ;;  %v1467_v12 = vunpack.c.0.s8 %v1466_v8  ;;  %v414_v13 = vrot.slane %v395_v6, %v413_v59 }
 0x2aa   :  { %1371 = vmatprep.subr.bf16.mxu0 %v1639_v15  ;;  %1412 = vmatprep.subr.bf16.mxu1 %v1641_v16 }
 0x2ad   :  { %1372 = vmatpush1.bf16.msra.mxu0 %v1638_v20  ;;  %1413 = vmatpush1.bf16.msra.mxu1 %v1640_v21  ;;  %v2301_v20 = vsub.s32 %v1467_v12, %v400_v52 }
 0x2ae   :  { %1373 = vmatprep.subr.bf16.mxu0 %v1655_v22  ;;  %1414 = vmatprep.subr.bf16.mxu1 %v1657_v23 }
 0x2b1   :  { %1374 = vmatpush1.bf16.msra.mxu0 %v1654_v28  ;;  %1415 = vmatpush1.bf16.msra.mxu1 %v1656_v29 }
 0x2b2   :  { %1375 = vmatprep.subr.bf16.mxu0 %v1671_v30  ;;  %1416 = vmatprep.subr.bf16.mxu1 %v1673_v31  ;;  %v418_v31 = vrot.slane %v395_v6, %v417_v63 }
 0x2b5   :  { %1376 = vmatpush1.bf16.msra.mxu0 %v1670_v36  ;;  %1417 = vmatpush1.bf16.msra.mxu1 %v1672_v37 }
 0x2b6   :  { %1377 = vmatprep.subr.bf16.mxu0 %v1687_v38  ;;  %1418 = vmatprep.subr.bf16.mxu1 %v1689_v39 }
 0x2b9   :  { %1378 = vmatpush1.bf16.msra.mxu0 %v1686_v45  ;;  %1419 = vmatpush1.bf16.msra.mxu1 %v1688_v46 }
 0x2ba   :  { %1379 = vmatprep.subr.bf16.mxu0 %v1703_v47  ;;  %1420 = vmatprep.subr.bf16.mxu1 %v1705_v48 }
 0x2bd   :  { %1380 = vmatpush1.bf16.msra.mxu0 %v1702_v49  ;;  %1421 = vmatpush1.bf16.msra.mxu1 %v1704_v50 }
 0x2c0   :  { %1398 = vmatmul.mubr.bf16.vlgmr.msra.gmra.mrb[16].mxu0 %v1999_v58  ;;  %1439 = vmatmul.mubr.bf16.vlgmr.msra.gmra.mrb[16].mxu1 %v1999_v58  ;;  %v2290_v58 = vrot.slane %v396_v54, %v417_v63 }
 0x333   :  { %v1153_v14 = vpop.f32.mrb[4].mxu0  ;;  %v1194_v15 = vpop.f32.mrb[4].mxu1 }
 0x334   :  { %v1154_v16 = vadd.f32 %v1153_v14, %v402_v9  ;;  %v1195_v17 = vadd.f32 %v1194_v15, %v410_v10  ;;  %v1155_v18 = vpop.f32.mrb[5].mxu0  ;;  %v1196_v44 = vpop.f32.mrb[5].mxu1 }
 0x335   :  { %v1156_v19 = vadd.f32 %v1155_v18, %v406_v11  ;;  %v1197_v21 = vadd.f32 %v1196_v44, %v414_v13  ;;  %v1157_v22 = vpop.f32.mrb[6].mxu0  ;;  %v1198_v23 = vpop.f32.mrb[6].mxu1 }
 0x336   :  { %v1158_v24 = vpop.f32.mrb[7].mxu0  ;;  %v1199_v25 = vpop.f32.mrb[7].mxu1 }
 0x337   :  { %v1463_v26 = vcombine.low %v1154_v16, %v1156_v19  ;;  %v1464_v27 = vcombine.low %v1195_v17, %v1197_v21 }
 0x339   :  { %v1471_v28 = vrot.slane %v1463_v26, %v2301_v20  ;;  %v1478_v29 = vrot.slane %v1464_v27, %v2301_v20 }
 0x33b   :  { %v1479_v30 = vcombine.low %v1471_v28, %v1478_v29 }
 0x33d   :  { %1535 = vst [vmem:[%s2336_s5] sm:$0xff] %v1479_v30 }
 0x353   :  { %v1235_v35 = vpop.f32.mrb[8].mxu0  ;;  %v1276_v36 = vpop.f32.mrb[8].mxu1 }
 0x354   :  { %v1236_v37 = vadd.f32 %v1235_v35, %v418_v31  ;;  %v1277_v38 = vadd.f32 %v1276_v36, %v426_v32  ;;  %v1237_v39 = vpop.f32.mrb[9].mxu0  ;;  %v1278_v40 = vpop.f32.mrb[9].mxu1 }
 0x355   :  { %v1238_v41 = vadd.f32 %v1237_v39, %v422_v33  ;;  %v1279_v42 = vadd.f32 %v1278_v40, %v430_v34  ;;  %v1239_v43 = vpop.f32.mrb[10].mxu0  ;;  %v1280_v45 = vpop.f32.mrb[10].mxu1 }
 0x356   :  { %v1240_v46 = vpop.f32.mrb[11].mxu0  ;;  %v1281_v47 = vpop.f32.mrb[11].mxu1 }
 0x357   :  { %v1480_v48 = vcombine.low %v1236_v37, %v1238_v41  ;;  %v1481_v49 = vcombine.low %v1277_v38, %v1279_v42 }
 0x359   :  { %v1488_v50 = vrot.slane %v1480_v48, %v2301_v20  ;;  %v1495_v51 = vrot.slane %v1481_v49, %v2301_v20 }
 0x35b   :  { %v1496_v52 = vcombine.low %v1488_v50, %v1495_v51 }
 0x35d   :  { %1536 = vst [vmem:[%s2336_s5 + $0x8] sm:$0xff] %v1496_v52 }
 0x373   :  { %v1317_v53 = vpop.f32.mrb[12].mxu0  ;;  %v1358_v54 = vpop.f32.mrb[12].mxu1 }
 0x374   :  { %v1318_v56 = vadd.f32 %v1317_v53, %v2282_v55  ;;  %v1359_v57 = vadd.f32 %v1358_v54, %v2284_v60  ;;  %v1319_v59 = vpop.f32.mrb[13].mxu0  ;;  %v1360_v63 = vpop.f32.mrb[13].mxu1 }
 0x375   :  { %v1320_v0 = vadd.f32 %v1319_v59, %v2286_v61  ;;  %v1361_v1 = vadd.f32 %v1360_v63, %v2288_v62  ;;  %v1321_v2 = vpop.f32.mrb[14].mxu0  ;;  %v1362_v6 = vpop.f32.mrb[14].mxu1 }
 0x376   :  { %v1322_v7 = vpop.f32.mrb[15].mxu0  ;;  %v1363_v8 = vpop.f32.mrb[15].mxu1 }
 0x377   :  { %v1497_v9 = vcombine.low %v1318_v56, %v1320_v0  ;;  %v1498_v10 = vcombine.low %v1359_v57, %v1361_v1 }
 0x379   :  { %v1505_v11 = vrot.slane %v1497_v9, %v2301_v20  ;;  %v1512_v12 = vrot.slane %v1498_v10, %v2301_v20 }
 0x37b   :  { %v1513_v13 = vcombine.low %v1505_v11, %v1512_v12 }
 0x37d   :  { %1537 = vst [vmem:[%s2336_s5 + $0x10] sm:$0xff] %v1513_v13 }
 0x393   :  { %v1399_v55 = vpop.f32.mrb[16].mxu0  ;;  %v1440_v60 = vpop.f32.mrb[16].mxu1 }
 0x394   :  { %v1400_v61 = vadd.f32 %v1399_v55, %v2290_v58  ;;  %v1441_v62 = vadd.f32 %v1440_v60, %v2292_v3  ;;  %v1401_v14 = vpop.f32.mrb[17].mxu0  ;;  %v1442_v15 = vpop.f32.mrb[17].mxu1 }
 0x395   :  { %v1402_v16 = vadd.f32 %v1401_v14, %v2294_v4  ;;  %v1443_v17 = vadd.f32 %v1442_v15, %v2296_v5  ;;  %v1403_v18 = vpop.f32.mrb[18].mxu0  ;;  %v1444_v44 = vpop.f32.mrb[18].mxu1 }
 0x396   :  { %v1404_v19 = vpop.f32.mrb[19].mxu0  ;;  %v1445_v21 = vpop.f32.mrb[19].mxu1 }
 0x397   :  { %v1514_v22 = vcombine.low %v1400_v61, %v1402_v16  ;;  %v1515_v23 = vcombine.low %v1441_v62, %v1443_v17 }
 0x399   :  { %v1522_v24 = vrot.slane %v1514_v22, %v2301_v20  ;;  %v1529_v25 = vrot.slane %v1515_v23, %v2301_v20 }
 0x39b   :  { %v1530_v26 = vcombine.low %v1522_v24, %v1529_v25 }
 0x39d   :  { %1538 = vst [vmem:[%s2336_s5 + $0x18] sm:$0xff] %v1530_v26 }

// kernel: _lambda_.3
= control target key start
LH: loop header
LB: loop body
LE: loop exit
PB: predicated region body
PF: predicated region fallthrough
CT: control target
= control target key end

     0   :  { %s14704_s13 = smov 0   ;;  %s18067_s0 = inlined_call_operand.vmem [shape: f32[2,16,128], index: 0, kind: input, shape index: {}]   ;;  %s18068_s1 = inlined_call_operand.vmem [shape: f32[16,128], index: 1, kind: input, shape index: {}]   ;;  %s18069_s2 = inlined_call_operand.vmem [shape: bf16[3,128,256], index: 2, kind: input, shape index: {}]   ;;  %s18070_s3 = inlined_call_operand.vmem [shape: f32[3,1,256], index: 3, kind: input, shape index: {}]   ;;  %s18071_s4 = inlined_call_operand.vmem [shape: bf16[3,9,128,128], index: 4, kind: input, shape index: {}]   ;;  %s18072_s5 = inlined_call_operand.vmem [shape: f32[3,1,128], index: 5, kind: input, shape index: {}]   ;;  %s18073_s6 = inlined_call_operand.vmem [shape: bf16[128,128], index: 6, kind: input, shape index: {}]   ;;  %s18074_s7 = inlined_call_operand.vmem [shape: f32[1,128], index: 7, kind: input, shape index: {}]   ;;  %s18075_s8 = inlined_call_operand.vmem [shape: bf16[64,16], index: 8, kind: input, shape index: {}]   ;;  %s18076_s9 = inlined_call_operand.vmem [shape: bf16[256,64], index: 9, kind: input, shape index: {}]   ;;  %s18077_s10 = inlined_call_operand.vmem [shape: f32[2,256,128], index: 10, kind: output, shape index: {}]  }
   0x1 LB: > { %s11299_s14 = sadd.s32 4294967295, %s14643_s13   ;;  %p11303_p0 = scmp.ge.s32.totalorder %s14643_s13, 1  ;;  %s14643_s13 = sphi %s14704_s13, %s20_s13  }
   0x2   : > { %p312_p1 = scmp.lt.s32.totalorder %s14643_s13, 3 }
   0x4   : > { %p313_p2 = pnand %p11303_p0, %p312_p1 }
   0x6   : > { %316 = sbr.rel (%p313_p2) target bundleno = 2642 (0xa52), region = 60 }
   0xd   : > { %v14207_v0 = vld [vmem:[%s18069_s2 + $0x4] ss:$8 sps:$4 sm:$0xff]   ;;  %v14209_v1 = vld [vmem:[%s18069_s2] ss:$8 sps:$4 sm:$0xff]   ;;  %v14645_v2 = vmov 0   ;;  %p350_p3 = scmp.lt.s32.totalorder %s11299_s14, 1  ;;  %v440_v37 = vlaneseq }
   0xe   : > { %562 = vmatprep.mubr.bf16.mxu0 %v14645_v2  ;;  %361 = vst [vmem:[#allocation3] sm:$0xf] %v14645_v2  ;;  %362 = vst [vmem:[#allocation3 + $0x4] sm:$0xf] %v14645_v2  ;;  %530 = vmatprep.subr.bf16.mxu0 %v14207_v0  ;;  %v14210_v3 = vld [vmem:[%s18069_s2 + $0x14] ss:$8 sps:$4 sm:$0xff]  }
   0xf   : > { %363 = vst [vmem:[#allocation3 + $0x8] sm:$0x1] %v14645_v2  ;;  %364 = vst [vmem:[#allocation3 + $0xc] sm:$0xf] %v14645_v2  ;;  %531 = vmatpush1.bf16.msra.mxu0 %v14209_v1  ;;  %v14212_v4 = vld [vmem:[%s18069_s2 + $0x10] ss:$8 sps:$4 sm:$0xff]  }
  0x10   : > { %365 = vst [vmem:[#allocation3 + $0x10] sm:$0xf] %v14645_v2  ;;  %366 = vst [vmem:[#allocation3 + $0x14] sm:$0x1] %v14645_v2  ;;  %532 = vmatprep.subr.bf16.mxu0 %v14210_v3  ;;  %v14213_v5 = vld [vmem:[%s18069_s2 + $0x24] ss:$8 sps:$4 sm:$0xff]  }
  0x11   : > { %367 = vst [vmem:[#allocation3 + $0x18] sm:$0xf] %v14645_v2  ;;  %368 = vst [vmem:[#allocation3 + $0x1c] sm:$0xf] %v14645_v2  ;;  %v14215_v6 = vld [vmem:[%s18069_s2 + $0x20] ss:$8 sps:$4 sm:$0xff]  }
  0x12   : > { %369 = vst [vmem:[#allocation3 + $0x20] sm:$0x1] %v14645_v2  ;;  %370 = vst [vmem:[#allocation3 + $0x24] sm:$0xf] %v14645_v2  ;;  %s18233_s14 = smov (!%p350_p3, %s11299_s14), 1  ;;  %v14231_v20 = vld [vmem:[%s18071_s4] sm:$0xff]  }
  0x13   : > { %371 = vst [vmem:[#allocation3 + $0x28] sm:$0xf] %v14645_v2  ;;  %372 = vst [vmem:[#allocation3 + $0x2c] sm:$0x1] %v14645_v2  ;;  %533 = vmatpush1.bf16.msra.mxu0 %v14212_v4  ;;  %v14216_v7 = vld [vmem:[%s18069_s2 + $0x34] ss:$8 sps:$4 sm:$0xff]  }
  0x14   : > { %373 = vst [vmem:[#allocation3 + $0x30] sm:$0xf] %v14645_v2  ;;  %374 = vst [vmem:[#allocation3 + $0x34] sm:$0xf] %v14645_v2  ;;  %534 = vmatprep.subr.bf16.mxu0 %v14213_v5  ;;  %v14218_v8 = vld [vmem:[%s18069_s2 + $0x30] ss:$8 sps:$4 sm:$0xff]  }
  0x15   : > { %375 = vst [vmem:[#allocation3 + $0x38] sm:$0x1] %v14645_v2  ;;  %376 = vst [vmem:[#allocation3 + $0x3c] sm:$0xf] %v14645_v2  ;;  %v14219_v9 = vld [vmem:[%s18069_s2 + $0x44] ss:$8 sps:$4 sm:$0xff]  }
  0x16   : > { %377 = vst [vmem:[#allocation3 + $0x40] sm:$0xf] %v14645_v2  ;;  %378 = vst [vmem:[#allocation3 + $0x44] sm:$0x1] %v14645_v2  ;;  %s12418_s15 = sshll.u32 %s18233_s14, 4  ;;  %v14646_v21 = vmov 0.0  }
  0x17   : > { %379 = vst [vmem:[#allocation3 + $0x48] sm:$0xf] %v14645_v2  ;;  %380 = vst [vmem:[#allocation3 + $0x4c] sm:$0xf] %v14645_v2  ;;  %535 = vmatpush1.bf16.msra.mxu0 %v14215_v6  ;;  %v14221_v10 = vld [vmem:[%s18069_s2 + $0x40] ss:$8 sps:$4 sm:$0xff]   ;;  %s354_s30 = scalar_lea.vmem %s18067_s0, %s12418_s15  ;;  %12923 = vmatprep.subr.bf16.mxu1 %v14646_v21 }
  0x18   : > { %381 = vst [vmem:[#allocation3 + $0x50] sm:$0x1] %v14645_v2  ;;  %382 = vst [vmem:[#allocation3 + $0x54] sm:$0xf] %v14645_v2  ;;  %536 = vmatprep.subr.bf16.mxu0 %v14216_v7  ;;  %v14222_v11 = vld [vmem:[%s18069_s2 + $0x54] ss:$8 sps:$4 sm:$0xff]  }
  0x19   : > { %383 = vst [vmem:[#allocation3 + $0x58] sm:$0xf] %v14645_v2  ;;  %384 = vst [vmem:[#allocation3 + $0x5c] sm:$0x1] %v14645_v2  ;;  %v14224_v12 = vld [vmem:[%s18069_s2 + $0x50] ss:$8 sps:$4 sm:$0xff]  }
  0x1a   : > { %385 = vst [vmem:[#allocation3 + $0x60] sm:$0xf] %v14645_v2  ;;  %386 = vst [vmem:[#allocation3 + $0x64] sm:$0xf] %v14645_v2  ;;  %v14225_v13 = vld [vmem:[%s18069_s2 + $0x64] ss:$8 sps:$4 sm:$0xff]  }
  0x1b   : > { %387 = vst [vmem:[#allocation3 + $0x68] sm:$0x1] %v14645_v2  ;;  %388 = vst [vmem:[#allocation3 + $0x6c] sm:$0xf] %v14645_v2  ;;  %537 = vmatpush1.bf16.msra.mxu0 %v14218_v8  ;;  %v14227_v14 = vld [vmem:[%s18069_s2 + $0x60] ss:$8 sps:$4 sm:$0xff]  }
  0x1c   : > { %389 = vst [vmem:[#allocation3 + $0x70] sm:$0xf] %v14645_v2  ;;  %390 = vst [vmem:[#allocation3 + $0x74] sm:$0x1] %v14645_v2  ;;  %538 = vmatprep.subr.bf16.mxu0 %v14219_v9  ;;  %v14228_v15 = vld [vmem:[%s18069_s2 + $0x74] ss:$8 sps:$4 sm:$0xff]  }
  0x1d   : > { %391 = vst [vmem:[#allocation3 + $0x78] sm:$0xf] %v14645_v2  ;;  %392 = vst [vmem:[#allocation3 + $0x7c] sm:$0xf] %v14645_v2  ;;  %v14230_v16 = vld [vmem:[%s18069_s2 + $0x70] ss:$8 sps:$4 sm:$0xff]  }
  0x1e   : > { %393 = vst [vmem:[#allocation3 + $0x80] sm:$0x1] %v14645_v2  ;;  %394 = vst [vmem:[#allocation3 + $0x84] sm:$0xf] %v14645_v2  ;;  %v419_v17 = vld [vmem:[%s354_s30] sm:$0xff]  ;;  %v420_v18 = vld [vmem:[%s354_s30 + $0x8] sm:$0xff] }
  0x1f   : > { %395 = vst [vmem:[#allocation3 + $0x88] sm:$0xf] %v14645_v2  ;;  %396 = vst [vmem:[#allocation3 + $0x8c] sm:$0x1] %v14645_v2  ;;  %539 = vmatpush1.bf16.msra.mxu0 %v14221_v10  ;;  %v14825_v19 = vpack.c.bf16 %v420_v18, %v419_v17  ;;  %v14232_v22 = vld [vmem:[%s18071_s4 + $0x8] sm:$0xff]   ;;  %v14233_v23 = vld [vmem:[%s18071_s4 + $0x10] sm:$0xff]  }
  0x20   : > { %397 = vst [vmem:[#allocation3 + $0x90] sm:$0xf] %v14645_v2  ;;  %398 = vst [vmem:[#allocation3 + $0x94] sm:$0xf] %v14645_v2  ;;  %540 = vmatprep.subr.bf16.mxu0 %v14222_v11  ;;  %v14234_v24 = vld [vmem:[%s18071_s4 + $0x40] sm:$0xff]   ;;  %v14235_v25 = vld [vmem:[%s18071_s4 + $0x18] sm:$0xff]  }
  0x21   : > { %399 = vst [vmem:[#allocation3 + $0x98] sm:$0x1] %v14645_v2  ;;  %400 = vst [vmem:[#allocation3 + $0x9c] sm:$0xf] %v14645_v2  ;;  %12924 = vmatpush3.bf16.msra.mxu1 %v14234_v24  ;;  %v14236_v26 = vld [vmem:[%s18071_s4 + $0x48] sm:$0xff]   ;;  %v14237_v27 = vld [vmem:[%s18071_s4 + $0x20] sm:$0xff]  }
  0x22   : > { %401 = vst [vmem:[#allocation3 + $0xa0] sm:$0xf] %v14645_v2  ;;  %402 = vst [vmem:[#allocation3 + $0xa4] sm:$0x1] %v14645_v2  ;;  %12925 = vmatprep.subr.bf16.mxu1 %v14646_v21  ;;  %v14238_v28 = vld [vmem:[%s18071_s4 + $0x50] sm:$0xff]   ;;  %v14239_v29 = vld [vmem:[%s18071_s4 + $0x28] sm:$0xff]  }
  0x23   : > { %403 = vst [vmem:[#allocation3 + $0xa8] sm:$0xf] %v14645_v2  ;;  %404 = vst [vmem:[#allocation3 + $0xac] sm:$0xf] %v14645_v2  ;;  %541 = vmatpush1.bf16.msra.mxu0 %v14224_v12  ;;  %v14240_v30 = vld [vmem:[%s18071_s4 + $0x58] sm:$0xff]   ;;  %v14241_v31 = vld [vmem:[%s18071_s4 + $0x30] sm:$0xff]  }
  0x24   : > { %405 = vst [vmem:[#allocation3 + $0xb0] sm:$0x1] %v14645_v2  ;;  %406 = vst [vmem:[#allocation3 + $0xb4] sm:$0xf] %v14645_v2  ;;  %542 = vmatprep.subr.bf16.mxu0 %v14225_v13  ;;  %v14242_v32 = vld [vmem:[%s18071_s4 + $0x60] sm:$0xff]   ;;  %vm14647_vm0 = vmmov 0  }
  0x25   : > { %407 = vst [vmem:[#allocation3 + $0xb8] sm:$0xf] %v14645_v2  ;;  %408 = vst [vmem:[#allocation3 + $0xbc] sm:$0x1] %v14645_v2  ;;  %12926 = vmatpush3.bf16.msra.mxu1 %v14236_v26  ;;  %v14243_v33 = vld [vmem:[%s18071_s4 + $0x38] sm:$0xff]   ;;  %12939 = vmatprep.mubr.msk.bf16.mxu1 %vm14647_vm0, %v14646_v21  ;;  %v14244_v34 = vld [vmem:[%s18071_s4 + $0x68] sm:$0xff]  }
  0x26   : > { %409 = vst [vmem:[#allocation3 + $0xc0] sm:$0xf] %v14645_v2  ;;  %410 = vst [vmem:[#allocation3 + $0xc4] sm:$0xf] %v14645_v2  ;;  %12927 = vmatprep.subr.bf16.mxu1 %v14646_v21  ;;  %v14248_v35 = vld [vmem:[%s18071_s4 + $0x70] sm:$0xff]   ;;  %v14250_v36 = vld [vmem:[%s18071_s4 + $0x78] sm:$0xff]  }
  0x27   : > { %411 = vst [vmem:[#allocation3 + $0xc8] sm:$0x1] %v14645_v2  ;;  %412 = vst [vmem:[#allocation3 + $0xcc] sm:$0xf] %v14645_v2  ;;  %543 = vmatpush1.bf16.msra.mxu0 %v14227_v14  ;;  %v14898_v38 = vshrl.u32 %v440_v37, 7  ;;  %v415_v47 = vld [vmem:[%s18068_s1] sm:$0xff] }
  0x28   : > { %413 = vst [vmem:[#allocation3 + $0xd0] sm:$0xf] %v14645_v2  ;;  %414 = vst [vmem:[#allocation3 + $0xd4] sm:$0x1] %v14645_v2  ;;  %544 = vmatprep.subr.bf16.mxu0 %v14228_v15  ;;  %v438_v40 = vld [vmem:[%s18070_s3] sm:$0x3] }
  0x29   : > { %12928 = vmatpush3.bf16.msra.mxu1 %v14238_v28  ;;  %v14901_v39 = vsub.s32 0, %v14898_v38  ;;  %v14908_v42 = vsub.s32 1, %v14898_v38  ;;  %v416_v52 = vld [vmem:[%s18068_s1 + $0x8] sm:$0xff]  ;;  %vm636_vm1 = vcmask 1042432   ;;  %vm637_vm2 = vsmask.f32 2306 }
  0x2a   : > { %12929 = vmatprep.subr.bf16.mxu1 %v14646_v21  ;;  %v11328_v59 = vld.sshfl [vmem:[#allocation3] sm:$0x13 pattern:$0x76325410]  ;;  %v14648_v5 = vmov 1983009808   ;;  %vm14918_vm3 = vmand %vm636_vm1, %vm637_vm2 }
  0x2b   : > { %545 = vmatpush1.bf16.msra.mxu0 %v14230_v16  ;;  %v443_v41 = vrot.slane %v438_v40, %v14901_v39  ;;  %v447_v45 = vrot.slane %v438_v40, %v14908_v42  ;;  %v719_v63 = vshrl.u32 %v11328_v59, 16  ;;  %v722_v0 = vshll.u32 %v11328_v59, 16  ;;  %v639_v13 = vld [vmem:[#allocation3 + $0xc] sm:$0x7]  ;;  %s12419_s11 = sshll.u32 %s18233_s14, 8 }
  0x2c   : > { %12943 = vmatprep.subr.bf16.mxu0 %v14646_v21  ;;  %v794_v6 = vunpack.c.l.s4 %v14648_v5  ;;  %v686_v15 = vcombine.high %v11328_v59, %v11328_v59  ;;  %vm711_vm4 = vsmask.f32 1280  ;;  %vm712_vm5 = vsmask.f32 3336  ;;  %s17998_s18 = scalar_lea.vmem %s18077_s10, %s12419_s11 }
  0x2d   : > { %12930 = vmatpush3.bf16.msra.mxu1 %v14240_v30  ;;  %v721_v16 = vrot.slane %v719_v63, 6  ;;  %v724_v17 = vrot.slane %v722_v0, 7  ;;  %vm713_vm6 = vmor %vm711_vm4, %vm712_vm5  ;;  %vm714_vm7 = vsmask.f32 5392  ;;  %vm716_vm9 = vsmask.f32 7448 }
  0x2e   : > { %563 = vmatmul.mubr.bf16.vlgmr.msra.gmra.mrb[0].mxu0 %v14825_v19  ;;  %12931 = vmatprep.subr.bf16.mxu1 %v14646_v21  ;;  %v728_v40 = vshll.u32 %v686_v15, 16  ;;  %vm715_vm8 = vmor %vm713_vm6, %vm714_vm7  ;;  %vm1049_vm10 = vcmask 1040384   ;;  %vm1050_vm11 = vcmask 1042434   ;;  %vm1052_vm13 = vcmask 1044484  }
  0x2f   : > { %12944 = vmatpush3.bf16.msra.mxu0 %v14231_v20  ;;  %12959 = vmatprep.mubr.msk.bf16.mxu0 %vm14647_vm0, %v14646_v21  ;;  %v725_v37 = vor.u32 %v724_v17, %v721_v16  ;;  %vm14935_vm12 = vmor %vm715_vm8, %vm716_vm9  ;;  %vm1054_vm14 = vcmask 1046534   ;;  %v14249_v16 = vld [vmem:[%s18071_s4 + $0xc8] sm:$0xff]   ;;  %vm2680_vm6 = vsmask.f32 256  ;;  %vm2674_vm7 = vcmask 1043456  }
  0x30   : > { %12945 = vmatprep.subr.bf16.mxu0 %v14646_v21  ;;  %vm14963_vm15 = vmor %vm1049_vm10, %vm1050_vm11  ;;  %vm2675_vm8 = vsmask.f32 7938 }
  0x31   : > { %12932 = vmatpush3.bf16.msra.mxu1 %v14242_v32  ;;  %vm1053_vm2 = vmor %vm14963_vm15, %vm1052_vm13 }
  0x32   : > { %12933 = vmatprep.subr.bf16.mxu1 %v14646_v21  ;;  %vm15417_vm9 = vmand %vm1049_vm10, %vm2680_vm6  ;;  %vm2760_vm10 = vsmask.f32 3328 }
  0x33   : > { %12946 = vmatpush3.bf16.msra.mxu0 %v14232_v22  ;;  %vm15424_vm11 = vmand %vm2674_vm7, %vm2675_vm8 }
  0x34   : > { %12947 = vmatprep.subr.bf16.mxu0 %v14646_v21 }
  0x35   : > { %12934 = vmatpush3.bf16.msra.mxu1 %v14244_v34 }
  0x36   : > { %12935 = vmatprep.subr.bf16.mxu1 %v14646_v21 }
  0x37   : > { %12948 = vmatpush3.bf16.msra.mxu0 %v14233_v23  ;;  %v642_v23 = vld [vmem:[#allocation3 + $0x18] sm:$0x7] }
  0x38   : > { %12949 = vmatprep.subr.bf16.mxu0 %v14646_v21 }
  0x39   : > { %12936 = vmatpush3.bf16.msra.mxu1 %v14248_v35 }
  0x3a   : > { %12937 = vmatprep.subr.bf16.mxu1 %v14646_v21 }
  0x3b   : > { %12950 = vmatpush3.bf16.msra.mxu0 %v14235_v25 }
  0x3c   : > { %12951 = vmatprep.subr.bf16.mxu0 %v14646_v21 }
  0x3d   : > { %12938 = vmatpush3.bf16.msra.mxu1 %v14250_v36 }
  0x3e   : > { %12963 = vmatprep.subr.bf16.mxu1 %v14646_v21 }
  0x3f   : > { %12952 = vmatpush3.bf16.msra.mxu0 %v14237_v27 }
  0x40   : > { %12953 = vmatprep.subr.bf16.mxu0 %v14646_v21 }
  0x43   : > { %12954 = vmatpush3.bf16.msra.mxu0 %v14239_v29 }
  0x44   : > { %12955 = vmatprep.subr.bf16.mxu0 %v14646_v21 }
  0x47   : > { %12956 = vmatpush3.bf16.msra.mxu0 %v14241_v31  ;;  %v645_v31 = vld [vmem:[#allocation3 + $0x24] sm:$0x7] }
  0x48   : > { %12957 = vmatprep.subr.bf16.mxu0 %v14646_v21 }
  0x4b   : > { %12958 = vmatpush3.bf16.msra.mxu0 %v14243_v33  ;;  %v648_v33 = vld [vmem:[#allocation3 + $0x30] sm:$0x7] }
  0x4c   : > { %12983 = vmatprep.subr.bf16.mxu0 %v14646_v21 }
 0x101   : > { %v564_v43 = vpop.f32.mrb[0].mxu0 }
 0x102   : > { %v565_v44 = vadd.f32 %v564_v43, %v443_v41  ;;  %v566_v46 = vpop.f32.mrb[1].mxu0 }
 0x103   : > { %v568_v48 = vpop.f32.mrb[2].mxu0  ;;  %v567_v54 = vadd.f32 %v566_v46, %v447_v45  ;;  %v730_v46 = vrot.slane %v728_v40, 7 }
 0x104   : > { %v575_v49 = vadd.f32 1.0, %v565_v44  ;;  %v569_v50 = vadd.f32 %v568_v48, %v443_v41  ;;  %v570_v51 = vpop.f32.mrb[3].mxu0  ;;  %v795_v41 = vunpack.c.0.s8 %v794_v6  ;;  %v14930_v44 = vld.sshfl [vmem:[#allocation3 + $0x3c] sm:$0x13 pattern:$0x76325410] }
 0x105   : > { %v571_v58 = vadd.f32 %v570_v51, %v447_v45  ;;  %v726_v45 = vrot.slane %v725_v37, 2 }
 0x106   : > { %v577_v53 = vmul.f32 %v575_v49, %v415_v47  ;;  %v576_v55 = vadd.f32 1.0, %v569_v50  ;;  %v14933_v47 = vsub.s32 %v795_v41, %v14898_v38  ;;  %v1954_v50 = vshrl.u32 %v14930_v44, 16  ;;  %v14258_v49 = vld [vmem:[%s18071_s4 + $0x98] sm:$0xff]  }
 0x108   : > { %v579_v56 = vadd.f32 %v577_v53, %v567_v54  ;;  %v578_v57 = vmul.f32 %v576_v55, %v416_v52  ;;  %v14940_v52 = vld.sshfl [vmem:[#allocation3 + $0x3c] sm:$0x12 pattern:$0x76325410]  ;;  %v14954_v15 = vrot.slane %v1954_v50, 6 }
 0x10a   : > { %v583_v60 = vcombine.high %v579_v56, %v579_v56  ;;  %v12420_v61 = vpack.c.bf16 %v579_v56, %v579_v56  ;;  %v580_v62 = vadd.f32 %v578_v57, %v571_v58  ;;  %v14944_v56 = vsel %vm14935_vm12, %v726_v45, %v730_v46  ;;  %v14251_v46 = vld [vmem:[%s18071_s4 + $0xd0] sm:$0xff]  }
 0x10c   : > { %v12421_v1 = vpack.c.bf16 %v583_v60, %v583_v60  ;;  %v604_v3 = vshrl.u32 %v12420_v61, 16  ;;  %v584_v4 = vcombine.high %v580_v62, %v580_v62  ;;  %v12422_v7 = vpack.c.bf16 %v580_v62, %v580_v62 }
 0x10d   : > { %v607_v9 = vshll.u32 %v12420_v61, 16  ;;  %v1957_v61 = vshll.u32 %v14930_v44, 16 }
 0x10e   : > { %v606_v8 = vrot.slane %v604_v3, 7  ;;  %v611_v10 = vshrl.u32 %v12421_v1, 16  ;;  %v12423_v11 = vpack.c.bf16 %v584_v4, %v584_v4  ;;  %v618_v14 = vshrl.u32 %v12422_v7, 16  ;;  %v14247_v3 = vld [vmem:[%s18071_s4 + $0xc0] sm:$0xff]  }
 0x10f   : > { %v614_v22 = vshll.u32 %v12421_v1, 16  ;;  %v621_v26 = vshll.u32 %v12422_v7, 16  ;;  %v2132_v7 = vcombine.high %v14940_v52, %v14940_v52 }
 0x110   : > { %v609_v18 = vor.u32 %v607_v9, %v606_v8  ;;  %v613_v20 = vrot.slane %v611_v10, 7  ;;  %v625_v24 = vshrl.u32 %v12423_v11, 16  ;;  %v620_v25 = vrot.slane %v618_v14, 7 }
 0x111   : > { %v628_v30 = vshll.u32 %v12423_v11, 16 }
 0x112   : > { %v616_v27 = vor.u32 %v614_v22, %v613_v20  ;;  %v640_v28 = vsel %vm14918_vm3, %v609_v18, %v639_v13  ;;  %v627_v29 = vrot.slane %v625_v24, 7  ;;  %v623_v32 = vor.u32 %v621_v26, %v620_v25 }
 0x113   : > { %641 = vst [vmem:[#allocation3 + $0xc] sm:$0x7] %v640_v28  ;;  %v1959_v22 = vrot.slane %v1957_v61, 7  ;;  %v1910_v28 = vcombine.high %v14930_v44, %v14930_v44 }
 0x114   : > { %v643_v34 = vsel %vm14918_vm3, %v616_v27, %v642_v23  ;;  %v630_v35 = vor.u32 %v628_v30, %v627_v29  ;;  %v646_v36 = vsel %vm14918_vm3, %v623_v32, %v645_v31  ;;  %v11539_v32 = vrot.slane %v14940_v52, 9 }
 0x115   : > { %644 = vst [vmem:[#allocation3 + $0x18] sm:$0x7] %v643_v34  ;;  %647 = vst [vmem:[#allocation3 + $0x24] sm:$0x7] %v646_v36 }
 0x116   : > { %v649_v43 = vsel %vm14918_vm3, %v630_v35, %v648_v33  ;;  %v2147_v33 = vrot.slane %v2132_v7, 7  ;;  %vm14986_vm3 = vmor %vm1053_vm2, %vm1054_vm14  ;;  %vm3182_vm14 = vcmask 1046532  }
 0x117   : > { %650 = vst [vmem:[#allocation3 + $0x30] sm:$0x7] %v649_v43  ;;  %vm15577_vm15 = vmor %vm636_vm1, %vm3182_vm14  ;;  %vm5190_vm1 = vcmask 523264  }
 0x11a   : > { %v14245_v48 = vld [vmem:[#allocation3] ss:$12 sps:$4 sm:$0x33]  }
 0x11b   : > { %v11329_v51 = vld.sshfl [vmem:[#allocation3 + $0xc] sm:$0x13 pattern:$0x76325410]  ;;  %v910_v57 = vrot.slane %v14245_v48, %v14933_v47 }
 0x11c   : > { %v11330_v53 = vld.sshfl [vmem:[#allocation3 + $0x18] sm:$0x13 pattern:$0x76325410]  ;;  %v694_v54 = vcombine.high %v11329_v51, %v11329_v51  ;;  %v733_v38 = vshrl.u32 %v11329_v51, 16  ;;  %v736_v60 = vshll.u32 %v11329_v51, 16 }
 0x11d   : > { %v14246_v55 = vld [vmem:[#allocation3 + $0x18] ss:$12 sps:$4 sm:$0x33]   ;;  %v702_v59 = vcombine.high %v11330_v53, %v11330_v53  ;;  %v747_v1 = vshrl.u32 %v11330_v53, 16  ;;  %v750_v6 = vshll.u32 %v11330_v53, 16 }
 0x11e   : > { %v11331_v58 = vld.sshfl [vmem:[#allocation3 + $0x24] sm:$0x13 pattern:$0x76325410]  ;;  %v917_v62 = vrot.slane %v14246_v55, %v14933_v47  ;;  %v735_v0 = vrot.slane %v733_v38, 6  ;;  %v738_v4 = vrot.slane %v736_v60, 7 }
 0x11f   : > { %v710_v63 = vcombine.high %v11331_v58, %v11331_v58  ;;  %v742_v5 = vshll.u32 %v694_v54, 16  ;;  %v749_v9 = vrot.slane %v747_v1, 6  ;;  %v761_v10 = vshrl.u32 %v11331_v58, 16  ;;  %v14253_v1 = vld [vmem:[%s18071_s4 + $0xd8] sm:$0xff]  }
 0x120   : > { %v918_v8 = vcombine.low %v910_v57, %v917_v62  ;;  %v764_v11 = vshll.u32 %v11331_v58, 16  ;;  %v739_v12 = vor.u32 %v738_v4, %v735_v0  ;;  %v752_v13 = vrot.slane %v750_v6, 7  ;;  %v11366_v26 = vld.sshfl [vmem:[#allocation3 + $0x18] sm:$0x12 pattern:$0x76325410] }
 0x121   : > { %v756_v14 = vshll.u32 %v702_v59, 16  ;;  %v763_v17 = vrot.slane %v761_v10, 6  ;;  %v770_v20 = vshll.u32 %v710_v63, 16  ;;  %v744_v24 = vrot.slane %v742_v5, 7  ;;  %v14252_v5 = vld [vmem:[%s18071_s4 + $0x80] sm:$0xff]  }
 0x122   : > { %12960 = vmatmul.mubr.bf16.vlgmr.msra.gmra.mrb[4].mxu0 %v918_v8  ;;  %v766_v18 = vrot.slane %v764_v11, 7  ;;  %v740_v23 = vrot.slane %v739_v12, 2  ;;  %v753_v25 = vor.u32 %v752_v13, %v749_v9  ;;  %v11367_v30 = vld.sshfl [vmem:[#allocation3 + $0x24] sm:$0x12 pattern:$0x76325410]  ;;  %v1040_v31 = vcombine.high %v11366_v26, %v11366_v26 }
 0x123   : > { %12984 = vmatpush3.bf16.msra.mxu0 %v14247_v3  ;;  %12999 = vmatprep.mubr.msk.bf16.mxu0 %vm14647_vm0, %v14646_v21  ;;  %v758_v36 = vrot.slane %v756_v14, 7  ;;  %v1048_v37 = vcombine.high %v11367_v30, %v11367_v30  ;;  %v11451_v40 = vld.sshfl [vmem:[#allocation3 + $0x30] sm:$0x12 pattern:$0x76325410]  ;;  %v772_v43 = vrot.slane %v770_v20, 7  ;;  %v1960_v57 = vor.u32 %v1959_v22, %v14954_v15 }
 0x124   : > { %12985 = vmatprep.subr.bf16.mxu0 %v14646_v21  ;;  %v767_v29 = vor.u32 %v766_v18, %v763_v17  ;;  %v745_v34 = vsel %vm14935_vm12, %v740_v23, %v744_v24  ;;  %v754_v35 = vrot.slane %v753_v25, 2  ;;  %v11370_v44 = vrot.slane %v11366_v26, 9  ;;  %v11423_v55 = vld.sshfl [vmem:[#allocation3 + $0x30] sm:$0x13 pattern:$0x76325410] }
 0x125   : > { %v791_v45 = vcombine.low %v14944_v56, %v745_v34  ;;  %v1066_v50 = vrot.slane %v1040_v31, 7  ;;  %v11371_v51 = vrot.slane %v11367_v30, 9  ;;  %v1070_v52 = vrot.slane %v1048_v37, 7  ;;  %v14255_v17 = vld [vmem:[%s18071_s4 + $0xe0] sm:$0xff]   ;;  %v14254_v20 = vld [vmem:[%s18071_s4 + $0x88] sm:$0xff]   ;;  %v14256_v31 = vld [vmem:[%s18071_s4 + $0x90] sm:$0xff]  }
 0x126   : > { %v768_v41 = vrot.slane %v767_v29, 2  ;;  %v759_v48 = vsel %vm14935_vm12, %v754_v35, %v758_v36  ;;  %v1593_v54 = vcombine.high %v11451_v40, %v11451_v40  ;;  %v1963_v58 = vshll.u32 %v1910_v28, 16  ;;  %v14257_v29 = vld [vmem:[%s18071_s4 + $0xe8] sm:$0xff]   ;;  %v14259_v35 = vld [vmem:[%s18071_s4 + $0xf0] sm:$0xff]  }
 0x127   : > { %12986 = vmatpush3.bf16.msra.mxu0 %v14249_v16  ;;  %v14993_v59 = vsel %vm14986_vm3, %v11370_v44, %v1066_v50  ;;  %v14997_v60 = vsel %vm14986_vm3, %v11371_v51, %v1070_v52  ;;  %v11455_v61 = vrot.slane %v11451_v40, 9  ;;  %v799_v63 = vrot.slane %v791_v45, %v14933_v47  ;;  %v11364_v36 = vld.sshfl [vmem:[#allocation3] sm:$0x12 pattern:$0x76325410] }
 0x128   : > { %12987 = vmatprep.subr.bf16.mxu0 %v14646_v21  ;;  %v773_v53 = vsel %vm14935_vm12, %v768_v41, %v772_v43  ;;  %v1608_v62 = vrot.slane %v1593_v54, 7  ;;  %v1371_v3 = vcombine.high %v11423_v55, %v11423_v55  ;;  %v1415_v4 = vshrl.u32 %v11423_v55, 16  ;;  %v14264_v41 = vld [vmem:[#allocation3 + $0x24] ss:$12 sps:$4 sm:$0x33]  }
 0x129   : > { %v792_v56 = vcombine.low %v759_v48, %v773_v53  ;;  %v1418_v7 = vshll.u32 %v11423_v55, 16  ;;  %v2148_v8 = vsel %vm14986_vm3, %v11539_v32, %v2147_v33  ;;  %v1090_v10 = vcombine.low %v14993_v59, %v14997_v60  ;;  %v11365_v43 = vld.sshfl [vmem:[#allocation3 + $0xc] sm:$0x12 pattern:$0x76325410]  ;;  %v14260_v50 = vld [vmem:[%s18071_s4 + $0xa0] sm:$0xff]  }
 0x12a   : > { %v15012_v6 = vsel %vm14986_vm3, %v11455_v61, %v1608_v62  ;;  %v1417_v11 = vrot.slane %v1415_v4, 6  ;;  %v1961_v12 = vrot.slane %v1960_v57, 2  ;;  %v1424_v14 = vshll.u32 %v1371_v3, 16  ;;  %v14265_v55 = vld [vmem:[%s18071_s4 + $0x140] sm:$0xff]   ;;  %v14266_v3 = vld [vmem:[%s18071_s4 + $0xb0] sm:$0xff]  }
 0x12b   : > { %12988 = vmatpush3.bf16.msra.mxu0 %v14251_v46  ;;  %v15001_v0 = vrot.slane %v792_v56, %v14933_v47  ;;  %v1420_v13 = vrot.slane %v1418_v7, 7  ;;  %v1445_v15 = vcombine.low %v745_v34, %v759_v48  ;;  %v1965_v16 = vrot.slane %v1963_v58, 7  ;;  %v14263_v46 = vld [vmem:[#allocation3 + $0xc] ss:$12 sps:$4 sm:$0x33]  }
 0x12c   : > { %12989 = vmatprep.subr.bf16.mxu0 %v14646_v21  ;;  %v2167_v18 = vcombine.low %v15012_v6, %v2148_v8  ;;  %v15034_v24 = vrot.slane %v1090_v10, %v14933_v47  ;;  %v1426_v27 = vrot.slane %v1424_v14, 7  ;;  %v14261_v48 = vld [vmem:[%s18071_s4 + $0xf8] sm:$0xff]   ;;  %v1238_v51 = vrot.slane %v14264_v41, %v14933_v47  ;;  %v14262_v56 = vld [vmem:[%s18071_s4 + $0xa8] sm:$0xff]   ;;  %v14269_v8 = vld [vmem:[%s18071_s4 + $0x150] sm:$0xff]  }
 0x12d   : > { %v807_v9 = vcombine.low %v799_v63, %v15001_v0  ;;  %v1421_v22 = vor.u32 %v1420_v13, %v1417_v11  ;;  %v15028_v23 = vrot.slane %v1445_v15, %v14933_v47  ;;  %v1966_v28 = vsel %vm14935_vm12, %v1961_v12, %v1965_v16  ;;  %v14271_v10 = vld [vmem:[%s18071_s4 + $0x158] sm:$0xff]   ;;  %v14270_v11 = vld [vmem:[%s18071_s4 + $0x100] sm:$0xff]   ;;  %v14272_v14 = vld [vmem:[%s18071_s4 + $0x108] sm:$0xff]  }
 0x12e   : > { %v15037_v25 = vrot.slane %v2167_v18, %v14933_v47  ;;  %v1024_v52 = vcombine.high %v11364_v36, %v11364_v36  ;;  %v1231_v54 = vrot.slane %v14263_v46, %v14933_v47  ;;  %v11368_v58 = vrot.slane %v11364_v36, 9  ;;  %v14273_v13 = vld [vmem:[%s18071_s4 + $0x160] sm:$0xff]   ;;  %v14275_v15 = vld [vmem:[%s18071_s4 + $0x168] sm:$0xff]   ;;  %v14274_v16 = vld [vmem:[%s18071_s4 + $0x110] sm:$0xff]  }
 0x12f   : > { %12940 = vmatmul.mubr.bf16.vlgmr.msra.gmra.mrb[0].mxu1 %v807_v9  ;;  %12990 = vmatpush3.bf16.msra.mxu0 %v14253_v1  ;;  %v1422_v26 = vrot.slane %v1421_v22, 2  ;;  %v11369_v63 = vrot.slane %v11365_v43, 9  ;;  %v14267_v1 = vld [vmem:[%s18071_s4 + $0x148] sm:$0xff]   ;;  %v14268_v9 = vld [vmem:[%s18071_s4 + $0xb8] sm:$0xff]   ;;  %v14286_v36 = vld [vmem:[%s18071_s4 + $0x180] sm:$0xff]  }
 0x130   : > { %12964 = vmatpush3.bf16.msra.mxu1 %v14252_v5  ;;  %12991 = vmatprep.subr.bf16.mxu0 %v14646_v21  ;;  %v2182_v30 = vcombine.low %v15034_v24, %v15037_v25  ;;  %v1239_v57 = vcombine.low %v1231_v54, %v1238_v51  ;;  %v1058_v61 = vrot.slane %v1024_v52, 7  ;;  %v14276_v18 = vld [vmem:[%s18071_s4 + $0x118] sm:$0xff]   ;;  %v14288_v41 = vld [vmem:[%s18071_s4 + $0x188] sm:$0xff]  }
 0x131   : > { %12965 = vmatprep.subr.bf16.mxu1 %v14646_v21  ;;  %12979 = vmatprep.mubr.msk.bf16.mxu1 %vm14647_vm0, %v14646_v21  ;;  %v1427_v32 = vsel %vm14935_vm12, %v1422_v26, %v1426_v27  ;;  %v14279_v26 = vld [vmem:[%s18071_s4 + $0x178] sm:$0xff]   ;;  %v14278_v27 = vld [vmem:[%s18071_s4 + $0x120] sm:$0xff]   ;;  %v14296_v52 = vld [vmem:[%s18071_s4 + $0x1a8] sm:$0xff]   ;;  %vm2761_vm12 = vsmask.f32 7440 }
 0x132   : > { %v1446_v33 = vcombine.low %v773_v53, %v1427_v32  ;;  %v1985_v34 = vcombine.low %v1427_v32, %v1966_v28  ;;  %v1032_v53 = vcombine.high %v11365_v43, %v11365_v43  ;;  %v1059_v4 = vsel %vm14986_vm3, %v11368_v58, %v1058_v61  ;;  %v14282_v32 = vld [vmem:[%s18071_s4 + $0x130] sm:$0xff]   ;;  %v14295_v46 = vld [vmem:[%s18071_s4 + $0x1f8] sm:$0xff]   ;;  %v14302_v51 = vld [vmem:[%s18069_s2 + $0x80] ss:$8 sps:$4 sm:$0xff]  }
 0x133   : > { %12992 = vmatpush3.bf16.msra.mxu0 %v14255_v17  ;;  %v14277_v17 = vld [vmem:[%s18071_s4 + $0x170] sm:$0xff]   ;;  %vm15491_vm13 = vmor %vm2760_vm10, %vm2761_vm12  ;;  %vm5496_vm12 = vsmask.f32 4368 }
 0x134   : > { %12966 = vmatpush3.bf16.msra.mxu1 %v14254_v20  ;;  %12993 = vmatprep.subr.bf16.mxu0 %v14646_v21  ;;  %v15057_v37 = vrot.slane %v1446_v33, %v14933_v47  ;;  %v15060_v40 = vrot.slane %v1985_v34, %v14933_v47  ;;  %v1062_v62 = vrot.slane %v1032_v53, 7  ;;  %v1628_v20 = vcombine.low %v14997_v60, %v15012_v6  ;;  %v14280_v6 = vld [vmem:[%s18071_s4 + $0x128] sm:$0xff]   ;;  %v14285_v33 = vld [vmem:[%s18071_s4 + $0x1d0] sm:$0xff]   ;;  %v14284_v34 = vld [vmem:[%s18071_s4 + $0x138] sm:$0xff]  }
 0x135   : > { %12967 = vmatprep.subr.bf16.mxu1 %v14646_v21  ;;  %v14293_v43 = vld [vmem:[%s18071_s4 + $0x1f0] sm:$0xff]   ;;  %vm16113_vm14 = vmor %vm2680_vm6, %vm5496_vm12 }
 0x136   : > { %v1461_v45 = vcombine.low %v15028_v23, %v15057_v37  ;;  %v2000_v44 = vcombine.low %v15001_v0, %v15060_v40  ;;  %v1063_v5 = vsel %vm14986_vm3, %v11369_v63, %v1062_v62  ;;  %v1642_v28 = vrot.slane %v1628_v20, %v14933_v47  ;;  %v14291_v23 = vld [vmem:[%s18071_s4 + $0x1e8] sm:$0xff]   ;;  %v14290_v37 = vld [vmem:[%s18071_s4 + $0x190] sm:$0xff]   ;;  %v14299_v40 = vld [vmem:[#allocation3 + $0x18] ss:$12 sps:$4 sm:$0x33]  }
 0x137   : > { %12994 = vmatpush3.bf16.msra.mxu0 %v14257_v29  ;;  %v1089_v7 = vcombine.low %v1059_v4, %v1063_v5  ;;  %v1627_v22 = vcombine.low %v1063_v5, %v14993_v59  ;;  %v14281_v59 = vld [vmem:[%s18071_s4 + $0x1c0] sm:$0xff]   ;;  %v14308_v53 = vld [vmem:[%s18069_s2 + $0x94] ss:$8 sps:$4 sm:$0xff]   ;;  %v14306_v54 = vld [vmem:[%s18069_s2 + $0x90] ss:$8 sps:$4 sm:$0xff]   ;;  %v1770_v62 = vrot.slane %v14299_v40, %v14933_v47 }
 0x138   : > { %12968 = vmatpush3.bf16.msra.mxu1 %v14256_v31  ;;  %12995 = vmatprep.subr.bf16.mxu0 %v14646_v21  ;;  %v14283_v31 = vld [vmem:[%s18071_s4 + $0x1c8] sm:$0xff]   ;;  %v14300_v0 = vld [vmem:[#allocation3 + $0x30] ss:$12 sps:$4 sm:$0x33]  }
 0x139   : > { %12969 = vmatprep.subr.bf16.mxu1 %v14646_v21  ;;  %v1097_v38 = vrot.slane %v1089_v7, %v14933_v47  ;;  %v1635_v60 = vrot.slane %v1627_v22, %v14933_v47  ;;  %v14316_v58 = vld [vmem:[%s18069_s2 + $0xb4] ss:$8 sps:$4 sm:$0xff]   ;;  %v1777_v61 = vrot.slane %v14300_v0, %v14933_v47  ;;  %v14314_v63 = vld [vmem:[%s18069_s2 + $0xb0] ss:$8 sps:$4 sm:$0xff]   ;;  %v14318_v47 = vld [vmem:[%s18069_s2 + $0xc0] ss:$8 sps:$4 sm:$0xff]  }
 0x13a   : > { %v14305_v5 = vld [vmem:[%s18071_s4 + $0x208] sm:$0xff]   ;;  %v14324_v7 = vld [vmem:[%s18069_s2 + $0xd4] ss:$8 sps:$4 sm:$0xff]  }
 0x13b   : > { %12996 = vmatpush3.bf16.msra.mxu0 %v14259_v35  ;;  %v1105_v12 = vcombine.low %v1097_v38, %v15034_v24  ;;  %v1643_v29 = vcombine.low %v1635_v60, %v1642_v28  ;;  %v14287_v35 = vld [vmem:[%s18071_s4 + $0x1d8] sm:$0xff]   ;;  %v1778_v4 = vcombine.low %v1770_v62, %v1777_v61  ;;  %v14328_v38 = vld [vmem:[%s18069_s2 + $0xe4] ss:$8 sps:$4 sm:$0xff]  }
 0x13c   : > { %12970 = vmatpush3.bf16.msra.mxu1 %v14258_v49  ;;  %12997 = vmatprep.subr.bf16.mxu0 %v14646_v21  ;;  %v14289_v49 = vld [vmem:[%s18071_s4 + $0x1e0] sm:$0xff]  }
 0x13d   : > { %12971 = vmatprep.subr.bf16.mxu1 %v14646_v21 }
 0x13f   : > { %12998 = vmatpush3.bf16.msra.mxu0 %v14261_v48  ;;  %v14294_v48 = vld [vmem:[%s18071_s4 + $0x1a0] sm:$0xff]  }
 0x140   : > { %12972 = vmatpush3.bf16.msra.mxu1 %v14260_v50  ;;  %13023 = vmatprep.subr.bf16.mxu0 %v14646_v21  ;;  %v14304_v50 = vld [vmem:[%s18069_s2 + $0x84] ss:$8 sps:$4 sm:$0xff]  }
 0x141   : > { %12973 = vmatprep.subr.bf16.mxu1 %v14646_v21 }
 0x142   : > { %13000 = vmatmul.mubr.bf16.vlgmr.msra.gmra.mrb[8].mxu0 %v1239_v57  ;;  %v14298_v57 = vld [vmem:[%s18071_s4 + $0x1b8] sm:$0xff]  }
 0x143   : > { %13024 = vmatpush3.bf16.msra.mxu0 %v14265_v55  ;;  %13039 = vmatprep.mubr.msk.bf16.mxu0 %vm14647_vm0, %v14646_v21  ;;  %v14297_v55 = vld [vmem:[%s18071_s4 + $0x1b0] sm:$0xff]  }
 0x144   : > { %12974 = vmatpush3.bf16.msra.mxu1 %v14262_v56  ;;  %13025 = vmatprep.subr.bf16.mxu0 %v14646_v21  ;;  %v14312_v56 = vld [vmem:[%s18069_s2 + $0xa4] ss:$8 sps:$4 sm:$0xff]  }
 0x145   : > { %12975 = vmatprep.subr.bf16.mxu1 %v14646_v21 }
 0x147   : > { %13026 = vmatpush3.bf16.msra.mxu0 %v14267_v1  ;;  %v14301_v1 = vld [vmem:[%s18071_s4 + $0x200] sm:$0xff]  }
 0x148   : > { %12976 = vmatpush3.bf16.msra.mxu1 %v14266_v3  ;;  %13027 = vmatprep.subr.bf16.mxu0 %v14646_v21  ;;  %v14320_v3 = vld [vmem:[%s18069_s2 + $0xc4] ss:$8 sps:$4 sm:$0xff]  }
 0x149   : > { %12977 = vmatprep.subr.bf16.mxu1 %v14646_v21 }
 0x14b   : > { %13028 = vmatpush3.bf16.msra.mxu0 %v14269_v8  ;;  %v14322_v8 = vld [vmem:[%s18069_s2 + $0xd0] ss:$8 sps:$4 sm:$0xff]  }
 0x14c   : > { %12978 = vmatpush3.bf16.msra.mxu1 %v14268_v9  ;;  %13029 = vmatprep.subr.bf16.mxu0 %v14646_v21  ;;  %v14309_v9 = vld [vmem:[%s18071_s4 + $0x210] sm:$0xff]  }
 0x14d   : > { %13003 = vmatprep.subr.bf16.mxu1 %v14646_v21 }
 0x14f   : > { %12980 = vmatmul.mubr.bf16.vlgmr.msra.gmra.mrb[4].mxu1 %v1105_v12  ;;  %13030 = vmatpush3.bf16.msra.mxu0 %v14271_v10  ;;  %v14326_v10 = vld [vmem:[%s18069_s2 + $0xe0] ss:$8 sps:$4 sm:$0xff]   ;;  %v14332_v12 = vld [vmem:[%s18069_s2 + $0xf4] ss:$8 sps:$4 sm:$0xff]  }
 0x150   : > { %13004 = vmatpush3.bf16.msra.mxu1 %v14270_v11  ;;  %13031 = vmatprep.subr.bf16.mxu0 %v14646_v21  ;;  %v14313_v11 = vld [vmem:[%s18071_s4 + $0x218] sm:$0xff]  }
 0x151   : > { %13005 = vmatprep.subr.bf16.mxu1 %v14646_v21  ;;  %13019 = vmatprep.mubr.msk.bf16.mxu1 %vm14647_vm0, %v14646_v21 }
 0x153   : > { %13032 = vmatpush3.bf16.msra.mxu0 %v14273_v13  ;;  %v14330_v13 = vld [vmem:[%s18069_s2 + $0xf0] ss:$8 sps:$4 sm:$0xff]  }
 0x154   : > { %13006 = vmatpush3.bf16.msra.mxu1 %v14272_v14  ;;  %13033 = vmatprep.subr.bf16.mxu0 %v14646_v21  ;;  %v14317_v14 = vld [vmem:[%s18071_s4 + $0x220] sm:$0xff]  }
 0x155   : > { %13007 = vmatprep.subr.bf16.mxu1 %v14646_v21 }
 0x157   : > { %13034 = vmatpush3.bf16.msra.mxu0 %v14275_v15  ;;  %v14321_v15 = vld [vmem:[%s18071_s4 + $0x228] sm:$0xff]  }
 0x158   : > { %13008 = vmatpush3.bf16.msra.mxu1 %v14274_v16  ;;  %13035 = vmatprep.subr.bf16.mxu0 %v14646_v21  ;;  %v14325_v16 = vld [vmem:[%s18071_s4 + $0x230] sm:$0xff]  }
 0x159   : > { %13009 = vmatprep.subr.bf16.mxu1 %v14646_v21 }
 0x15b   : > { %13036 = vmatpush3.bf16.msra.mxu0 %v14277_v17  ;;  %v14329_v17 = vld [vmem:[%s18071_s4 + $0x238] sm:$0xff]  }
 0x15c   : > { %13010 = vmatpush3.bf16.msra.mxu1 %v14276_v18  ;;  %13037 = vmatprep.subr.bf16.mxu0 %v14646_v21 }
 0x15d   : > { %13011 = vmatprep.subr.bf16.mxu1 %v14646_v21 }
 0x15f   : > { %13038 = vmatpush3.bf16.msra.mxu0 %v14279_v26 }
 0x160   : > { %13012 = vmatpush3.bf16.msra.mxu1 %v14278_v27  ;;  %13063 = vmatprep.subr.bf16.mxu0 %v14646_v21 }
 0x161   : > { %13013 = vmatprep.subr.bf16.mxu1 %v14646_v21 }
 0x162   : > { %13040 = vmatmul.mubr.bf16.vlgmr.msra.gmra.mrb[12].mxu0 %v1643_v29 }
 0x163   : > { %13064 = vmatpush3.bf16.msra.mxu0 %v14281_v59  ;;  %13079 = vmatprep.mubr.msk.bf16.mxu0 %vm14647_vm0, %v14646_v21 }
 0x164   : > { %13014 = vmatpush3.bf16.msra.mxu1 %v14280_v6  ;;  %13065 = vmatprep.subr.bf16.mxu0 %v14646_v21 }
 0x165   : > { %13015 = vmatprep.subr.bf16.mxu1 %v14646_v21 }
 0x167   : > { %13066 = vmatpush3.bf16.msra.mxu0 %v14283_v31 }
 0x168   : > { %13016 = vmatpush3.bf16.msra.mxu1 %v14282_v32  ;;  %13067 = vmatprep.subr.bf16.mxu0 %v14646_v21 }
 0x169   : > { %13017 = vmatprep.subr.bf16.mxu1 %v14646_v21 }
 0x16b   : > { %13068 = vmatpush3.bf16.msra.mxu0 %v14285_v33 }
 0x16c   : > { %13018 = vmatpush3.bf16.msra.mxu1 %v14284_v34  ;;  %13069 = vmatprep.subr.bf16.mxu0 %v14646_v21 }
 0x16d   : > { %13043 = vmatprep.subr.bf16.mxu1 %v14646_v21 }
 0x16f   : > { %13020 = vmatmul.mubr.bf16.vlgmr.msra.gmra.mrb[8].mxu1 %v1461_v45  ;;  %13070 = vmatpush3.bf16.msra.mxu0 %v14287_v35  ;;  %v14292_v45 = vld [vmem:[%s18071_s4 + $0x198] sm:$0xff]  }
 0x170   : > { %13044 = vmatpush3.bf16.msra.mxu1 %v14286_v36  ;;  %13071 = vmatprep.subr.bf16.mxu0 %v14646_v21 }
 0x171   : > { %13045 = vmatprep.subr.bf16.mxu1 %v14646_v21  ;;  %13059 = vmatprep.mubr.msk.bf16.mxu1 %vm14647_vm0, %v14646_v21 }
 0x173   : > { %13072 = vmatpush3.bf16.msra.mxu0 %v14289_v49 }
 0x174   : > { %13046 = vmatpush3.bf16.msra.mxu1 %v14288_v41  ;;  %13073 = vmatprep.subr.bf16.mxu0 %v14646_v21 }
 0x175   : > { %13047 = vmatprep.subr.bf16.mxu1 %v14646_v21 }
 0x177   : > { %13074 = vmatpush3.bf16.msra.mxu0 %v14291_v23 }
 0x178   : > { %13048 = vmatpush3.bf16.msra.mxu1 %v14290_v37  ;;  %13075 = vmatprep.subr.bf16.mxu0 %v14646_v21 }
 0x179   : > { %13049 = vmatprep.subr.bf16.mxu1 %v14646_v21 }
 0x17b   : > { %13076 = vmatpush3.bf16.msra.mxu0 %v14293_v43 }
 0x17c   : > { %13050 = vmatpush3.bf16.msra.mxu1 %v14292_v45  ;;  %13077 = vmatprep.subr.bf16.mxu0 %v14646_v21 }
 0x17d   : > { %13051 = vmatprep.subr.bf16.mxu1 %v14646_v21 }
 0x17f   : > { %13078 = vmatpush3.bf16.msra.mxu0 %v14295_v46 }
 0x180   : > { %13052 = vmatpush3.bf16.msra.mxu1 %v14294_v48  ;;  %2404 = vmatprep.subr.bf16.mxu0 %v14304_v50 }
 0x181   : > { %13053 = vmatprep.subr.bf16.mxu1 %v14646_v21 }
 0x182   : > { %13080 = vmatmul.mubr.bf16.vlgmr.msra.gmra.mrb[16].mxu0 %v2000_v44  ;;  %v14310_v44 = vld [vmem:[%s18069_s2 + $0xa0] ss:$8 sps:$4 sm:$0xff]  }
 0x183   : > { %2405 = vmatpush1.bf16.msra.mxu0 %v14302_v51  ;;  %2436 = vmatprep.mubr.bf16.mxu0 %v14645_v2 }
 0x184   : > { %13054 = vmatpush3.bf16.msra.mxu1 %v14296_v52  ;;  %2406 = vmatprep.subr.bf16.mxu0 %v14308_v53 }
 0x185   : > { %13055 = vmatprep.subr.bf16.mxu1 %v14646_v21 }
 0x187   : > { %2407 = vmatpush1.bf16.msra.mxu0 %v14306_v54 }
 0x188   : > { %13056 = vmatpush3.bf16.msra.mxu1 %v14297_v55  ;;  %2408 = vmatprep.subr.bf16.mxu0 %v14312_v56 }
 0x189   : > { %13057 = vmatprep.subr.bf16.mxu1 %v14646_v21 }
 0x18b   : > { %2409 = vmatpush1.bf16.msra.mxu0 %v14310_v44 }
 0x18c   : > { %13058 = vmatpush3.bf16.msra.mxu1 %v14298_v57  ;;  %2410 = vmatprep.subr.bf16.mxu0 %v14316_v58 }
 0x18d   : > { %13083 = vmatprep.subr.bf16.mxu1 %v14646_v21 }
 0x18f   : > { %13060 = vmatmul.mubr.bf16.vlgmr.msra.gmra.mrb[12].mxu1 %v1778_v4  ;;  %2411 = vmatpush1.bf16.msra.mxu0 %v14314_v63 }
 0x190   : > { %13084 = vmatpush3.bf16.msra.mxu1 %v14301_v1  ;;  %2412 = vmatprep.subr.bf16.mxu0 %v14320_v3 }
 0x191   : > { %13085 = vmatprep.subr.bf16.mxu1 %v14646_v21  ;;  %13099 = vmatprep.mubr.msk.bf16.mxu1 %vm14647_vm0, %v14646_v21  ;;  %vm2484_vm0 = vcmask 130048  }
 0x193   : > { %2413 = vmatpush1.bf16.msra.mxu0 %v14318_v47 }
 0x194   : > { %13086 = vmatpush3.bf16.msra.mxu1 %v14305_v5  ;;  %2414 = vmatprep.subr.bf16.mxu0 %v14324_v7 }
 0x195   : > { %13087 = vmatprep.subr.bf16.mxu1 %v14646_v21 }
 0x197   : > { %2415 = vmatpush1.bf16.msra.mxu0 %v14322_v8 }
 0x198   : > { %13088 = vmatpush3.bf16.msra.mxu1 %v14309_v9  ;;  %2416 = vmatprep.subr.bf16.mxu0 %v14328_v38  ;;  %v11581_v9 = vld [vmem:[%s18070_s3 + $0x2] sm:$0x3] }
 0x199   : > { %13089 = vmatprep.subr.bf16.mxu1 %v14646_v21  ;;  %v2317_v38 = vrot.slane %v11581_v9, %v14901_v39 }
 0x19b   : > { %2417 = vmatpush1.bf16.msra.mxu0 %v14326_v10 }
 0x19c   : > { %13090 = vmatpush3.bf16.msra.mxu1 %v14313_v11  ;;  %2418 = vmatprep.subr.bf16.mxu0 %v14332_v12  ;;  %v11564_v11 = vld [vmem:[%s18072_s5] ss:$0 sm:$0xff] }
 0x19d   : > { %13091 = vmatprep.subr.bf16.mxu1 %v14646_v21 }
 0x19f   : > { %2419 = vmatpush1.bf16.msra.mxu0 %v14330_v13 }
 0x1a0   : > { %13092 = vmatpush3.bf16.msra.mxu1 %v14317_v14  ;;  %13329 = vmatprep.subr.bf16.mxu0 %v14825_v19 }
 0x1a1   : > { %13093 = vmatprep.subr.bf16.mxu1 %v14646_v21 }
 0x1a2   : > { %2437 = vmatmul.mubr.bf16.vlgmr.msra.gmra.mrb[20].mxu0 %v14825_v19 }
 0x1a3   : > { %13330 = vmatpush3.bf16.msra.mxu0 %v14825_v19 }
 0x1a4   : > { %13094 = vmatpush3.bf16.msra.mxu1 %v14321_v15 }
 0x1a5   : > { %13095 = vmatprep.subr.bf16.mxu1 %v14646_v21 }
 0x1a8   : > { %13096 = vmatpush3.bf16.msra.mxu1 %v14325_v16 }
 0x1a9   : > { %13097 = vmatprep.subr.bf16.mxu1 %v14646_v21  ;;  %v14333_v21 = vld [vmem:[%s18075_s8] sm:$0xff]  }
 0x1ac   : > { %13098 = vmatpush3.bf16.msra.mxu1 %v14329_v17 }
 0x1af   : > { %13100 = vmatmul.mubr.bf16.vlgmr.msra.gmra.mrb[16].mxu1 %v2182_v30 }
 0x1b0   : > { %13105 = vmatprep.mubr.msk.bf16.mxu1 %vm2484_vm0, %v14333_v21 }
 0x1f5   : > { %v1002_v19 = vpop.f32.mrb[4].mxu0 }
 0x1f6   : > { %v12961_v18 = vpop.f32.mrb[5].mxu0 }
 0x1f7   : > { %v1005_v20 = vpop.f32.mrb[6].mxu0 }
 0x1f8   : > { %v12962_v22 = vpop.f32.mrb[7].mxu0 }
 0x202   : > { %v891_v26 = vpop.f32.mrb[0].mxu1 }
 0x203   : > { %v1003_v27 = vadd.f32 %v1002_v19, %v891_v26  ;;  %v12941_v28 = vpop.f32.mrb[1].mxu1  ;;  %v2321_v26 = vrot.slane %v11581_v9, %v14908_v42 }
 0x204   : > { %v894_v60 = vpop.f32.mrb[2].mxu1 }
 0x205   : > { %v1006_v59 = vadd.f32 %v1005_v20, %v894_v60  ;;  %v12942_v6 = vpop.f32.mrb[3].mxu1 }
 0x215   : > { %v1323_v29 = vpop.f32.mrb[8].mxu0 }
 0x216   : > { %v13001_v31 = vpop.f32.mrb[9].mxu0 }
 0x217   : > { %v1326_v32 = vpop.f32.mrb[10].mxu0 }
 0x218   : > { %v13002_v24 = vpop.f32.mrb[11].mxu0 }
 0x222   : > { %v1189_v25 = vpop.f32.mrb[4].mxu1 }
 0x223   : > { %v1196_v30 = vadd.f32 %v1189_v25, %v1003_v27  ;;  %v12981_v33 = vpop.f32.mrb[5].mxu1 }
 0x224   : > { %v1192_v34 = vpop.f32.mrb[6].mxu1 }
 0x225   : > { %v1197_v35 = vadd.f32 %v1192_v34, %v1006_v59  ;;  %v12982_v36 = vpop.f32.mrb[7].mxu1  ;;  %v1330_v49 = vadd.f32 %v1323_v29, %v1196_v30 }
 0x226   : > { %v14334_v36 = vld [vmem:[%s18075_s8 + $0x8] sm:$0xff]  }
 0x227   : > { %v1331_v41 = vadd.f32 %v1326_v32, %v1197_v35  ;;  %v14337_v35 = vld [vmem:[%s18071_s4 + $0x280] sm:$0xff]  }
 0x235   : > { %v1727_v23 = vpop.f32.mrb[12].mxu0 }
 0x236   : > { %v13041_v37 = vpop.f32.mrb[13].mxu0 }
 0x237   : > { %v1730_v43 = vpop.f32.mrb[14].mxu0  ;;  %v14339_v37 = vld [vmem:[%s18071_s4 + $0x290] sm:$0xff]  }
 0x238   : > { %v13042_v45 = vpop.f32.mrb[15].mxu0 }
 0x239   : > { %v14341_v45 = vld [vmem:[%s18071_s4 + $0x2a0] sm:$0xff]  }
 0x242   : > { %v1545_v46 = vpop.f32.mrb[8].mxu1 }
 0x243   : > { %v1552_v48 = vadd.f32 %v1545_v46, %v1330_v49  ;;  %v13021_v50 = vpop.f32.mrb[9].mxu1  ;;  %v14335_v49 = vld [vmem:[%s18075_s8 + $0x10] sm:$0xff]   ;;  %v14342_v46 = vld [vmem:[%s18071_s4 + $0x2a8] sm:$0xff]  }
 0x244   : > { %v1548_v51 = vpop.f32.mrb[10].mxu1  ;;  %v14344_v50 = vld [vmem:[%s18071_s4 + $0x2b8] sm:$0xff]  }
 0x245   : > { %v1553_v52 = vadd.f32 %v1548_v51, %v1331_v41  ;;  %v13022_v53 = vpop.f32.mrb[11].mxu1  ;;  %v1734_v54 = vadd.f32 %v1727_v23, %v1552_v48  ;;  %v14336_v41 = vld [vmem:[%s18075_s8 + $0x18] sm:$0xff]   ;;  %v14338_v23 = vld [vmem:[%s18071_s4 + $0x288] sm:$0xff]   ;;  %v14343_v48 = vld [vmem:[%s18071_s4 + $0x2b0] sm:$0xff]  }
 0x246   : > { %v15388_v51 = vld [vmem:[%s18071_s4 + $0x240] sm:$0xff]   ;;  %v14353_v53 = vld [vmem:[%s18075_s8 + $0x8] sm:$0xff]  }
 0x247   : > { %v1735_v55 = vadd.f32 %v1730_v43, %v1553_v52  ;;  %v14340_v43 = vld [vmem:[%s18071_s4 + $0x298] sm:$0xff]   ;;  %v14352_v52 = vld [vmem:[%s18075_s8] sm:$0xff]  }
 0x248   : > { %13331 = vmatprep.mubr.msk.bf16.mxu0 %vm2484_vm0, %v14352_v52 }
 0x249   : > { %13332 = vmatmul.mubr.msk.bf16.vlgmr.msra.gmra.mrb[24].mxu0 %vm2484_vm0, %v14353_v53 }
 0x255   : > { %v2084_v56 = vpop.f32.mrb[16].mxu0 }
 0x256   : > { %v13081_v0 = vpop.f32.mrb[17].mxu0 }
 0x257   : > { %v2087_v40 = vpop.f32.mrb[18].mxu0 }
 0x258   : > { %v13082_v44 = vpop.f32.mrb[19].mxu0 }
 0x262   : > { %v1862_v57 = vpop.f32.mrb[12].mxu1 }
 0x263   : > { %v1869_v58 = vadd.f32 %v1862_v57, %v1734_v54  ;;  %v13061_v61 = vpop.f32.mrb[13].mxu1  ;;  %v14360_v54 = vld [vmem:[%s18075_s8 + $0x10] sm:$0xff]  }
 0x264   : > { %v1865_v62 = vpop.f32.mrb[14].mxu1  ;;  %13335 = vmatprep.mubr.msk.bf16.mxu0 %vm2484_vm0, %v14360_v54 }
 0x265   : > { %v1870_v63 = vadd.f32 %v1865_v62, %v1735_v55  ;;  %v13062_v1 = vpop.f32.mrb[15].mxu1  ;;  %v2091_v3 = vadd.f32 %v2084_v56, %v1869_v58  ;;  %v14361_v55 = vld [vmem:[%s18075_s8 + $0x18] sm:$0xff]   ;;  %v15408_v56 = vld [vmem:[#allocation3] sm:$0xf] }
 0x266   : > { %13336 = vmatmul.mubr.msk.bf16.gmra.mrb[28].mxu0 %vm2484_vm0, %v14361_v55  ;;  %v2764_v57 = vshrl.u32 %v15408_v56, 16  ;;  %v2767_v62 = vshll.u32 %v15408_v56, 16 }
 0x267   : > { %v2092_v4 = vadd.f32 %v2087_v40, %v1870_v63  ;;  %5001 = vmatprep.mubr.bf16.mxu0 %v14645_v2 }
 0x275   : > { %v2438_v47 = vpop.f32.mrb[20].mxu0 }
 0x276   : > { %v2440_v5 = vpop.f32.mrb[21].mxu0  ;;  %v2439_v15 = vadd.f32 %v2438_v47, %v2317_v38 }
 0x277   : > { %v2442_v7 = vpop.f32.mrb[22].mxu0  ;;  %v2441_v21 = vadd.f32 %v2440_v5, %v2321_v26 }
 0x278   : > { %v2444_v8 = vpop.f32.mrb[23].mxu0  ;;  %v2449_v22 = vadd.f32 1.0, %v2439_v15  ;;  %v2443_v27 = vadd.f32 %v2442_v7, %v2317_v38 }
 0x279   : > { %v2445_v30 = vadd.f32 %v2444_v8, %v2321_v26 }
 0x27a   : > { %v2450_v32 = vadd.f32 1.0, %v2443_v27 }
 0x282   : > { %v2266_v10 = vpop.f32.mrb[16].mxu1 }
 0x283   : > { %v2273_v12 = vadd.f32 %v2266_v10, %v2091_v3  ;;  %v13101_v13 = vpop.f32.mrb[17].mxu1 }
 0x284   : > { %v2269_v14 = vpop.f32.mrb[18].mxu1  ;;  %v2691_v13 = vld [vmem:[#allocation3 + $0x24] sm:$0xf] }
 0x285   : > { %v2282_v16 = vadd.f32 %v11564_v11, %v2273_v12  ;;  %v2274_v17 = vadd.f32 %v2269_v14, %v2092_v4  ;;  %v13102_v19 = vpop.f32.mrb[19].mxu1  ;;  %v15412_v4 = vld [vmem:[#allocation3 + $0x4] sm:$0x1]  ;;  %v2694_v14 = vld [vmem:[#allocation3 + $0x28] sm:$0x1] }
 0x286   : > { %v2773_v7 = vshll.u32 %v15412_v4, 16  ;;  %v15428_v19 = vrot.slane %v2767_v62, 5  ;;  %v2718_v62 = vld [vmem:[#allocation3 + $0x58] sm:$0x1] }
 0x287   : > { %vm2284_vm4 = vcmp.ge.f32.partialorder %v2282_v16, 0.0  ;;  %v2286_v18 = vmul.f32 0.2, %v2282_v16  ;;  %v2283_v20 = vadd.f32 %v11564_v11, %v2274_v17  ;;  %v15421_v11 = vrot.slane %v2764_v57, 4 }
 0x289   : > { %vm2285_vm5 = vcmp.ge.f32.partialorder %v2283_v20, 0.0  ;;  %v2287_v28 = vmul.f32 0.2, %v2283_v20  ;;  %v2288_v60 = vsel %vm2284_vm4, %v2282_v16, %v2286_v18 }
 0x28a   : > { %v2290_v59 = vmul.f32 1.4142135, %v2288_v60 }
 0x28b   : > { %v2289_v6 = vsel %vm2285_vm5, %v2283_v20, %v2287_v28 }
 0x28c   : > { %v2451_v29 = vmul.f32 %v2449_v22, %v2290_v59  ;;  %v2291_v31 = vmul.f32 1.4142135, %v2289_v6  ;;  %v2682_v22 = vld [vmem:[#allocation3 + $0x10] sm:$0x1]  ;;  %v2700_v59 = vld [vmem:[#allocation3 + $0x34] sm:$0x1] }
 0x28e   : > { %v2453_v24 = vadd.f32 %v2451_v29, %v2441_v21  ;;  %v2452_v25 = vmul.f32 %v2450_v32, %v2291_v31 }
 0x290   : > { %v2454_v33 = vadd.f32 %v2452_v25, %v2445_v30 }
 0x292   : > { %v2463_v34 = vpack.c.bf16 %v2454_v33, %v2453_v24  ;;  %v2677_v24 = vld [vmem:[#allocation3 + $0xc] sm:$0xf]  ;;  %v2688_v33 = vld [vmem:[#allocation3 + $0x1c] sm:$0x1] }
 0x294   : > { %13103 = vmatprep.subr.bf16.mxu1 %v2463_v34 }
 0x295   : > { %13104 = vmatpush3.bf16.msra.mxu1 %v2463_v34 }
 0x296   : > { %13113 = vmatprep.subr.bf16.mxu1 %v14337_v35 }
 0x298   : > { %13106 = vmatmul.mubr.msk.bf16.vlgmr.msra.gmra.mrb[20].mxu1 %vm2484_vm0, %v14334_v36 }
 0x299   : > { %13109 = vmatprep.mubr.msk.bf16.mxu1 %vm2484_vm0, %v14335_v49  ;;  %13114 = vmatpush3.bf16.msra.mxu1 %v14337_v35  ;;  %v2697_v49 = vld [vmem:[#allocation3 + $0x30] sm:$0xf] }
 0x29a   : > { %13115 = vmatprep.subr.bf16.mxu1 %v14338_v23 }
 0x29d   : > { %13116 = vmatpush3.bf16.msra.mxu1 %v14338_v23 }
 0x29e   : > { %13117 = vmatprep.subr.bf16.mxu1 %v14339_v37 }
 0x2a0   : > { %13110 = vmatmul.mubr.msk.bf16.gmra.mrb[24].mxu1 %vm2484_vm0, %v14336_v41 }
 0x2a1   : > { %13118 = vmatpush3.bf16.msra.mxu1 %v14339_v37 }
 0x2a2   : > { %13119 = vmatprep.subr.bf16.mxu1 %v14340_v43 }
 0x2a5   : > { %13120 = vmatpush3.bf16.msra.mxu1 %v14340_v43 }
 0x2a6   : > { %13121 = vmatprep.subr.bf16.mxu1 %v14341_v45 }
 0x2a9   : > { %13122 = vmatpush3.bf16.msra.mxu1 %v14341_v45 }
 0x2aa   : > { %13123 = vmatprep.subr.bf16.mxu1 %v14342_v46 }
 0x2ad   : > { %13124 = vmatpush3.bf16.msra.mxu1 %v14342_v46  ;;  %v2685_v46 = vld [vmem:[#allocation3 + $0x18] sm:$0xf] }
 0x2ae   : > { %13125 = vmatprep.subr.bf16.mxu1 %v14343_v48 }
 0x2b1   : > { %13126 = vmatpush3.bf16.msra.mxu1 %v14343_v48 }
 0x2b2   : > { %13127 = vmatprep.subr.bf16.mxu1 %v14344_v50 }
 0x2b5   : > { %13128 = vmatpush3.bf16.msra.mxu1 %v14344_v50 }
 0x2b6   : > { %13137 = vmatprep.subr.bf16.mxu1 %v15388_v51 }
 0x36b   : > { %v13107_v0 = vpop.f32.mrb[20].mxu1 }
 0x36c   : > { %v12426_v40 = vpack.c.bf16 %v13107_v0, %v13107_v0  ;;  %v2531_v44 = vpop.f32.mrb[21].mxu1 }
 0x36d   : > { %v12424_v58 = vpack.c.bf16 %v2531_v44, %v2531_v44  ;;  %v13108_v61 = vpop.f32.mrb[22].mxu1 }
 0x36e   : > { %v2611_v63 = vshrl.u32 %v12426_v40, 16  ;;  %v12427_v1 = vpack.c.bf16 %v13108_v61, %v13108_v61  ;;  %v2534_v3 = vpop.f32.mrb[23].mxu1  ;;  %v2614_v38 = vshll.u32 %v12426_v40, 16  ;;  %v2715_v61 = vld [vmem:[#allocation3 + $0x54] sm:$0xf] }
 0x36f   : > { %v2595_v47 = vshrl.u32 %v12424_v58, 16  ;;  %v12425_v5 = vpack.c.bf16 %v2534_v3, %v2534_v3  ;;  %v2598_v16 = vshll.u32 %v12424_v58, 16 }
 0x370   : > { %v2613_v9 = vrot.slane %v2611_v63, 7  ;;  %v2619_v10 = vshrl.u32 %v12427_v1, 16  ;;  %v2622_v27 = vshll.u32 %v12427_v1, 16  ;;  %v2703_v63 = vld [vmem:[#allocation3 + $0x3c] sm:$0xf] }
 0x371   : > { %v2597_v15 = vrot.slane %v2595_v47, 7  ;;  %v2603_v17 = vshrl.u32 %v12425_v5, 16  ;;  %v2606_v29 = vshll.u32 %v12425_v5, 16  ;;  %v2706_v1 = vld [vmem:[#allocation3 + $0x40] sm:$0x1] }
 0x372   : > { %v2616_v18 = vor.u32 %v2614_v38, %v2613_v9  ;;  %v2617_v20 = vrot.slane %v2613_v9, 4  ;;  %v2621_v26 = vrot.slane %v2619_v10, 7 }
 0x373   : > { %v2600_v28 = vor.u32 %v2598_v16, %v2597_v15  ;;  %v2601_v60 = vrot.slane %v2597_v15, 4  ;;  %v2605_v6 = vrot.slane %v2603_v17, 7  ;;  %v13111_v21 = vpop.f32.mrb[24].mxu1  ;;  %v2724_v15 = vld [vmem:[#allocation3 + $0x64] sm:$0x1]  ;;  %v2770_v17 = vor.u32 %v15428_v19, %v15421_v11 }
 0x374   : > { %v2692_v31 = vsel %vm15424_vm11, %v2616_v18, %v2691_v13  ;;  %v2695_v32 = vsel %vm15417_vm9, %v2617_v20, %v2694_v14  ;;  %v2624_v25 = vor.u32 %v2622_v27, %v2621_v26  ;;  %v2625_v30 = vrot.slane %v2621_v26, 4  ;;  %v2547_v34 = vpop.f32.mrb[25].mxu1  ;;  %v2721_v13 = vld [vmem:[#allocation3 + $0x60] sm:$0xf] }
 0x375   : > { %2696 = vst [vmem:[#allocation3 + $0x28] sm:$0x1] %v2695_v32  ;;  %2693 = vst [vmem:[#allocation3 + $0x24] sm:$0xf] %v2692_v31  ;;  %v2678_v35 = vsel %vm15424_vm11, %v2600_v28, %v2677_v24  ;;  %v2683_v36 = vsel %vm15417_vm9, %v2601_v60, %v2682_v22  ;;  %v2608_v41 = vor.u32 %v2606_v29, %v2605_v6  ;;  %v2609_v23 = vrot.slane %v2605_v6, 4  ;;  %v13112_v37 = vpop.f32.mrb[26].mxu1 }
 0x376   : > { %2679 = vst [vmem:[#allocation3 + $0xc] sm:$0xf] %v2678_v35  ;;  %2684 = vst [vmem:[#allocation3 + $0x10] sm:$0x1] %v2683_v36  ;;  %v2698_v43 = vsel %vm15424_vm11, %v2624_v25, %v2697_v49  ;;  %v2701_v45 = vsel %vm15417_vm9, %v2625_v30, %v2700_v59  ;;  %v12430_v48 = vpack.c.bf16 %v13111_v21, %v13111_v21  ;;  %v2550_v52 = vpop.f32.mrb[27].mxu1  ;;  %v15450_v18 = vrot.slane %v2773_v7, 5 }
 0x377   : > { %v12428_v50 = vpack.c.bf16 %v2547_v34, %v2547_v34  ;;  %2699 = vst [vmem:[#allocation3 + $0x30] sm:$0xf] %v2698_v43  ;;  %2702 = vst [vmem:[#allocation3 + $0x34] sm:$0x1] %v2701_v45  ;;  %v2686_v53 = vsel %vm15424_vm11, %v2608_v41, %v2685_v46  ;;  %v2689_v54 = vsel %vm15417_vm9, %v2609_v23, %v2688_v33  ;;  %v2709_v28 = vld [vmem:[#allocation3 + $0x48] sm:$0xf] }
 0x378   : > { %v12431_v55 = vpack.c.bf16 %v13112_v37, %v13112_v37  ;;  %v12429_v0 = vpack.c.bf16 %v2550_v52, %v2550_v52  ;;  %2690 = vst [vmem:[#allocation3 + $0x1c] sm:$0x1] %v2689_v54  ;;  %2687 = vst [vmem:[#allocation3 + $0x18] sm:$0xf] %v2686_v53  ;;  %v2643_v40 = vshrl.u32 %v12430_v48, 16  ;;  %v2646_v44 = vshll.u32 %v12430_v48, 16 }
 0x379   : > { %v2627_v57 = vshrl.u32 %v12428_v50, 16  ;;  %v2630_v58 = vshll.u32 %v12428_v50, 16  ;;  %v2712_v60 = vld [vmem:[#allocation3 + $0x4c] sm:$0x1]  ;;  %v2771_v41 = vrot.slane %v2770_v17, 4 }
 0x37a   : > { %v2651_v3 = vshrl.u32 %v12431_v55, 16  ;;  %v2654_v47 = vshll.u32 %v12431_v55, 16  ;;  %v2635_v5 = vshrl.u32 %v12429_v0, 16  ;;  %v2638_v9 = vshll.u32 %v12429_v0, 16  ;;  %v14586_v54 = vld [vmem:[%s18073_s6 + $0x8] sm:$0xff]  }
 0x37b   : > { %v2645_v38 = vrot.slane %v2643_v40, 7  ;;  %v2629_v10 = vrot.slane %v2627_v57, 7 }
 0x37c   : > { %v2653_v14 = vrot.slane %v2651_v3, 7  ;;  %v2637_v16 = vrot.slane %v2635_v5, 7  ;;  %v15464_v25 = vld [vmem:[#allocation3 + $0x24] sm:$0xf]  ;;  %v15480_v43 = vld [vmem:[#allocation3 + $0x28] sm:$0x1] }
 0x37d   : > { %v2648_v20 = vor.u32 %v2646_v44, %v2645_v38  ;;  %v2649_v22 = vrot.slane %v2645_v38, 4  ;;  %v2632_v26 = vor.u32 %v2630_v58, %v2629_v10  ;;  %v2633_v27 = vrot.slane %v2629_v10, 4  ;;  %v15452_v31 = vld [vmem:[#allocation3 + $0xc] sm:$0xf]  ;;  %v15462_v24 = vld [vmem:[#allocation3 + $0x10] sm:$0x1] }
 0x37e   : > { %v2656_v59 = vor.u32 %v2654_v47, %v2653_v14  ;;  %v2657_v6 = vrot.slane %v2653_v14, 4  ;;  %v2640_v29 = vor.u32 %v2638_v9, %v2637_v16  ;;  %v2641_v21 = vrot.slane %v2637_v16, 4  ;;  %v15487_v53 = vld [vmem:[#allocation3 + $0x30] sm:$0xf]  ;;  %v15502_v38 = vld [vmem:[#allocation3 + $0x34] sm:$0x1] }
 0x37f   : > { %v2716_v32 = vsel %vm15424_vm11, %v2648_v20, %v2715_v61  ;;  %v2719_v11 = vsel %vm15417_vm9, %v2649_v22, %v2718_v62  ;;  %v2704_v7 = vsel %vm15424_vm11, %v2632_v26, %v2703_v63  ;;  %v2707_v19 = vsel %vm15417_vm9, %v2633_v27, %v2706_v1  ;;  %v15474_v36 = vld [vmem:[#allocation3 + $0x18] sm:$0xf]  ;;  %v15476_v49 = vld [vmem:[#allocation3 + $0x1c] sm:$0x1] }
 0x380   : > { %2717 = vst [vmem:[#allocation3 + $0x54] sm:$0xf] %v2716_v32  ;;  %2720 = vst [vmem:[#allocation3 + $0x58] sm:$0x1] %v2719_v11  ;;  %v2722_v30 = vsel %vm15424_vm11, %v2656_v59, %v2721_v13  ;;  %v2725_v33 = vsel %vm15417_vm9, %v2657_v6, %v2724_v15  ;;  %v2710_v34 = vsel %vm15424_vm11, %v2640_v29, %v2709_v28  ;;  %v2778_v23 = vshrl.u32 %v15452_v31, 16 }
 0x381   : > { %2705 = vst [vmem:[#allocation3 + $0x3c] sm:$0xf] %v2704_v7  ;;  %2708 = vst [vmem:[#allocation3 + $0x40] sm:$0x1] %v2707_v19  ;;  %v2713_v35 = vsel %vm15417_vm9, %v2641_v21, %v2712_v60  ;;  %v2781_v37 = vshll.u32 %v15452_v31, 16  ;;  %v2792_v45 = vshrl.u32 %v15474_v36, 16  ;;  %v2776_v47 = vsel %vm15491_vm13, %v2771_v41, %v15450_v18 }
 0x382   : > { %2723 = vst [vmem:[#allocation3 + $0x60] sm:$0xf] %v2722_v30  ;;  %2726 = vst [vmem:[#allocation3 + $0x64] sm:$0x1] %v2725_v33  ;;  %v2787_v46 = vshll.u32 %v15462_v24, 16  ;;  %v2795_v48 = vshll.u32 %v15474_v36, 16 }
 0x383   : > { %2711 = vst [vmem:[#allocation3 + $0x48] sm:$0xf] %v2710_v34  ;;  %2714 = vst [vmem:[#allocation3 + $0x4c] sm:$0x1] %v2713_v35  ;;  %v2806_v50 = vshrl.u32 %v15464_v25, 16  ;;  %v2809_v52 = vshll.u32 %v15464_v25, 16 }
 0x384   : > { %v2780_v55 = vrot.slane %v2778_v23, 4  ;;  %v2783_v0 = vrot.slane %v2781_v37, 5  ;;  %v2794_v40 = vrot.slane %v2792_v45, 4  ;;  %v2801_v44 = vshll.u32 %v15476_v49, 16  ;;  %v14346_v33 = vld [vmem:[%s18071_s4 + $0x248] sm:$0xff]  }
 0x385   : > { %v2797_v57 = vrot.slane %v2795_v48, 5  ;;  %v2808_v58 = vrot.slane %v2806_v50, 4  ;;  %v2811_v61 = vrot.slane %v2809_v52, 5  ;;  %v2815_v63 = vshll.u32 %v15480_v43, 16 }
 0x386   : > { %v2784_v62 = vor.u32 %v2783_v0, %v2780_v55  ;;  %v2820_v1 = vshrl.u32 %v15487_v53, 16  ;;  %v2823_v3 = vshll.u32 %v15487_v53, 16  ;;  %v2789_v13 = vrot.slane %v2787_v46, 5 }
 0x387   : > { %v2798_v5 = vor.u32 %v2797_v57, %v2794_v40  ;;  %v2812_v9 = vor.u32 %v2811_v61, %v2808_v58  ;;  %v2803_v14 = vrot.slane %v2801_v44, 5  ;;  %v2817_v15 = vrot.slane %v2815_v63, 5  ;;  %v15519_v7 = vld [vmem:[#allocation3 + $0x54] sm:$0xf]  ;;  %v15527_v37 = vld [vmem:[#allocation3 + $0x58] sm:$0x1] }
 0x388   : > { %v2785_v10 = vrot.slane %v2784_v62, 4  ;;  %v15504_v16 = vld [vmem:[#allocation3 + $0x3c] sm:$0xf]  ;;  %v2822_v22 = vrot.slane %v2820_v1, 4  ;;  %v2825_v26 = vrot.slane %v2823_v3, 5  ;;  %v2829_v28 = vshll.u32 %v15502_v38, 16 }
 0x389   : > { %v2799_v17 = vrot.slane %v2798_v5, 4  ;;  %v2813_v20 = vrot.slane %v2812_v9, 4  ;;  %v2834_v18 = vshrl.u32 %v15504_v16, 16  ;;  %v2837_v60 = vshll.u32 %v15504_v16, 16  ;;  %v15517_v32 = vld [vmem:[#allocation3 + $0x40] sm:$0x1] }
 0x38a   : > { %v2790_v27 = vsel %vm15491_vm13, %v2785_v10, %v2789_v13  ;;  %v15511_v59 = vld [vmem:[#allocation3 + $0x48] sm:$0xf]  ;;  %v2826_v11 = vor.u32 %v2825_v26, %v2822_v22  ;;  %v15521_v19 = vld [vmem:[#allocation3 + $0x4c] sm:$0x1]  ;;  %v2843_v41 = vshll.u32 %v15517_v32, 16  ;;  %v2862_v55 = vshrl.u32 %v15519_v7, 16 }
 0x38b   : > { %v11646_v6 = vcombine.low %v2776_v47, %v2790_v27  ;;  %v2804_v29 = vsel %vm15491_vm13, %v2799_v17, %v2803_v14  ;;  %v2818_v21 = vsel %vm15491_vm13, %v2813_v20, %v2817_v15  ;;  %v2836_v34 = vrot.slane %v2834_v18, 4  ;;  %v14347_v44 = vld [vmem:[%s18071_s4 + $0x250] sm:$0xff]   ;;  %v14349_v17 = vld [vmem:[%s18071_s4 + $0x258] sm:$0xff]   ;;  %v14351_v18 = vld [vmem:[%s18071_s4 + $0x268] sm:$0xff]  }
 0x38c   : > { %v11647_v30 = vcombine.low %v2804_v29, %v2818_v21  ;;  %v2839_v35 = vrot.slane %v2837_v60, 5  ;;  %v2827_v23 = vrot.slane %v2826_v11, 4  ;;  %v2848_v45 = vshrl.u32 %v15511_v59, 16  ;;  %v14354_v60 = vld [vmem:[%s18071_s4 + $0x270] sm:$0xff]   ;;  %v3159_v29 = vld [vmem:[#allocation3 + $0xc] sm:$0xe] }
 0x38d   : > { %13129 = vmatprep.mubr.bf16.mxu1 %v11646_v6  ;;  %v2851_v46 = vshll.u32 %v15511_v59, 16  ;;  %v2857_v48 = vshll.u32 %v15521_v19, 16  ;;  %v2845_v52 = vrot.slane %v2843_v41, 5  ;;  %v2865_v0 = vshll.u32 %v15519_v7, 16  ;;  %v3158_v6 = vld [vmem:[#allocation3] sm:$0xe] }
 0x38e   : > { %13130 = vmatmul.mubr.bf16.vlgmr.msra.gmra.mrb[28].mxu1 %v11647_v30  ;;  %v2840_v50 = vor.u32 %v2839_v35, %v2836_v34  ;;  %v2831_v40 = vrot.slane %v2829_v28, 5  ;;  %v2850_v57 = vrot.slane %v2848_v45, 4  ;;  %v2864_v62 = vrot.slane %v2862_v55, 4  ;;  %v14350_v28 = vld [vmem:[%s18071_s4 + $0x260] sm:$0xff]   ;;  %v14359_v11 = vld [vmem:[%s18071_s4 + $0x2c8] sm:$0xff]  }
 0x38f   : > { %13138 = vmatpush3.bf16.msra.mxu1 %v15388_v51  ;;  %v2853_v58 = vrot.slane %v2851_v46, 5  ;;  %v2867_v63 = vrot.slane %v2865_v0, 5  ;;  %v2871_v1 = vshll.u32 %v15527_v37, 16  ;;  %v2859_v47 = vrot.slane %v2857_v48, 5  ;;  %v14365_v45 = vld [vmem:[%s18071_s4 + $0x2e0] sm:$0xff]  }
 0x390   : > { %13139 = vmatprep.subr.bf16.mxu1 %v14346_v33  ;;  %v2841_v61 = vrot.slane %v2840_v50, 4  ;;  %v2832_v5 = vsel %vm15491_vm13, %v2827_v23, %v2831_v40  ;;  %v11658_v27 = vcombine.low %v15408_v56, %v15452_v31  ;;  %v14355_v56 = vld [vmem:[%s18071_s4 + $0x278] sm:$0xff]   ;;  %v14357_v31 = vld [vmem:[%s18071_s4 + $0x2c0] sm:$0xff]   ;;  %v11659_v21 = vcombine.low %v15474_v36, %v15464_v25  ;;  %v14363_v25 = vld [vmem:[%s18071_s4 + $0x2d0] sm:$0xff]  }
 0x391   : > { %v2854_v3 = vor.u32 %v2853_v58, %v2850_v57  ;;  %v2868_v9 = vor.u32 %v2867_v63, %v2864_v62  ;;  %v2873_v10 = vrot.slane %v2871_v1, 5  ;;  %v11660_v30 = vcombine.low %v15487_v53, %v15504_v16  ;;  %v14364_v53 = vld [vmem:[%s18071_s4 + $0x2d8] sm:$0xff]   ;;  %v3162_v40 = vld [vmem:[#allocation3 + $0x30] sm:$0xe]  ;;  %v14369_v62 = vld [vmem:[%s18071_s4 + $0x300] sm:$0xff]  }
 0x392   : > { %v2846_v51 = vsel %vm15491_vm13, %v2841_v61, %v2845_v52  ;;  %v3186_v34 = vrot.slane %v15412_v4, 5  ;;  %v11671_v35 = vrot.slane %v3159_v29, 9  ;;  %v3190_v41 = vrot.slane %v15462_v24, 5  ;;  %v3160_v46 = vld [vmem:[#allocation3 + $0x18] sm:$0xe]  ;;  %v14376_v29 = vld [vmem:[%s18071_s4 + $0x330] sm:$0xff]  }
 0x393   : > { %13140 = vmatpush3.bf16.msra.mxu1 %v14346_v33  ;;  %v11648_v13 = vcombine.low %v2832_v5, %v2846_v51  ;;  %v2855_v14 = vrot.slane %v2854_v3, 4  ;;  %v2869_v15 = vrot.slane %v2868_v9, 4  ;;  %v11670_v33 = vrot.slane %v3158_v6, 9  ;;  %v3163_v48 = vld [vmem:[#allocation3 + $0x3c] sm:$0xe]  ;;  %v14570_v23 = vld [vmem:[%s18071_s4 + $0x650] sm:$0xff]  }
 0x394   : > { %13141 = vmatprep.subr.bf16.mxu1 %v14347_v44  ;;  %v3191_v4 = vsel %vm15577_vm15, %v11671_v35, %v3190_v41  ;;  %v11661_v24 = vcombine.low %v15511_v59, %v15519_v7  ;;  %v14366_v59 = vld [vmem:[%s18071_s4 + $0x2e8] sm:$0xff]   ;;  %v14367_v7 = vld [vmem:[%s18071_s4 + $0x2f0] sm:$0xff]   ;;  %v14368_v50 = vld [vmem:[%s18071_s4 + $0x2f8] sm:$0xff]   ;;  %v11672_v55 = vrot.slane %v3160_v46, 9  ;;  %v3194_v0 = vrot.slane %v15476_v49, 5 }
 0x395   : > { %13133 = vmatprep.mubr.bf16.mxu1 %v11648_v13  ;;  %v2860_v20 = vsel %vm15491_vm13, %v2855_v14, %v2859_v47  ;;  %v2874_v22 = vsel %vm15491_vm13, %v2869_v15, %v2873_v10  ;;  %v3187_v36 = vsel %vm15577_vm15, %v11670_v33, %v3186_v34  ;;  %v3161_v52 = vld [vmem:[#allocation3 + $0x24] sm:$0xe]  ;;  %v3206_v57 = vrot.slane %v15517_v32, 5  ;;  %v3164_v49 = vld [vmem:[#allocation3 + $0x48] sm:$0xe]  ;;  %v14377_v35 = vld [vmem:[%s18071_s4 + $0x338] sm:$0xff]  }
 0x396   : > { %v11649_v26 = vcombine.low %v2860_v20, %v2874_v22  ;;  %v11694_v16 = vcombine.low %v3187_v36, %v3191_v4  ;;  %v11673_v58 = vrot.slane %v3161_v52, 9  ;;  %v3198_v61 = vrot.slane %v15480_v43, 5  ;;  %v3165_v32 = vld [vmem:[#allocation3 + $0x54] sm:$0xe]  ;;  %v14421_v33 = vld [vmem:[%s18069_s2 + $0x120] ss:$8 sps:$4 sm:$0xff]  }
 0x397   : > { %13142 = vmatpush3.bf16.msra.mxu1 %v14347_v44  ;;  %v11675_v44 = vrot.slane %v3163_v48, 9  ;;  %v11674_v63 = vrot.slane %v3162_v40, 9  ;;  %v3202_v1 = vrot.slane %v15502_v38, 5  ;;  %v3195_v3 = vsel %vm15577_vm15, %v11672_v55, %v3194_v0  ;;  %v14370_v38 = vld [vmem:[%s18071_s4 + $0x308] sm:$0xff]   ;;  %v14419_v6 = vld [vmem:[%s18069_s2 + $0x114] ss:$8 sps:$4 sm:$0xff]  }
 0x398   : > { %13143 = vmatprep.subr.bf16.mxu1 %v14349_v17  ;;  %13134 = vmatmul.mubr.bf16.gmra.mrb[32].mxu1 %v11649_v26  ;;  %v3199_v43 = vsel %vm15577_vm15, %v11673_v58, %v3198_v61  ;;  %v11676_v9 = vrot.slane %v3164_v49, 9  ;;  %v3210_v13 = vrot.slane %v15521_v19, 5  ;;  %v11677_v14 = vrot.slane %v3165_v32, 9  ;;  %v14373_v19 = vld [vmem:[%s18071_s4 + $0x318] sm:$0xff]   ;;  %v14423_v34 = vld [vmem:[%s18069_s2 + $0x124] ss:$8 sps:$4 sm:$0xff]  }
 0x399   : > { %13153 = vmatprep.mubr.bf16.mxu1 %v11658_v27  ;;  %v3207_v47 = vsel %vm15577_vm15, %v11675_v44, %v3206_v57  ;;  %v11695_v5 = vcombine.low %v3195_v3, %v3199_v43  ;;  %v3203_v51 = vsel %vm15577_vm15, %v11674_v63, %v3202_v1  ;;  %v3214_v15 = vrot.slane %v15527_v37, 5  ;;  %v14372_v37 = vld [vmem:[#allocation3 + $0xc] ss:$12 sps:$4 sm:$0xff]   ;;  %v14374_v27 = vld [vmem:[%s18071_s4 + $0x320] sm:$0xff]   ;;  %v15676_v48 = vld [vmem:[#allocation3 + $0x10] sm:$0x1] }
 0x39a   : > { %v11696_v10 = vcombine.low %v3203_v51, %v3207_v47  ;;  %v3211_v20 = vsel %vm15577_vm15, %v11676_v9, %v3210_v13  ;;  %v14431_v52 = vld [vmem:[%s18069_s2 + $0x144] ss:$8 sps:$4 sm:$0xff]   ;;  %v14380_v57 = vld [vmem:[#allocation3 + $0x3c] ss:$12 sps:$4 sm:$0xff]   ;;  %v3566_v58 = vshll.u32 %v15676_v48, 16  ;;  %v14383_v1 = vld [vmem:[%s18071_s4 + $0x350] sm:$0xff]  }
 0x39b   : > { %13144 = vmatpush3.bf16.msra.mxu1 %v14349_v17  ;;  %v14371_v17 = vld [vmem:[%s18071_s4 + $0x310] sm:$0xff]   ;;  %v3215_v22 = vsel %vm15577_vm15, %v11677_v14, %v3214_v15  ;;  %v14381_v0 = vld [vmem:[%s18071_s4 + $0x348] sm:$0xff]   ;;  %v14384_v9 = vld [vmem:[%s18071_s4 + $0x358] sm:$0xff]  }
 0x39c   : > { %13145 = vmatprep.subr.bf16.mxu1 %v14350_v28  ;;  %v11697_v26 = vcombine.low %v3211_v20, %v3215_v22  ;;  %v14378_v55 = vld [vmem:[#allocation3 + $0x24] ss:$12 sps:$4 sm:$0xff]   ;;  %v14435_v63 = vld [vmem:[%s18069_s2 + $0x154] ss:$8 sps:$4 sm:$0xff]   ;;  %v3568_v47 = vrot.slane %v3566_v58, 5 }
 0x39d   : > { %v14437_v43 = vld [vmem:[%s18069_s2 + $0x160] ss:$8 sps:$4 sm:$0xff]   ;;  %v3546_v13 = vld [vmem:[#allocation3 + $0x30] sm:$0xf]  ;;  %v3548_v14 = vld [vmem:[#allocation3 + $0x3c] sm:$0xf] }
 0x39e   : > { %v14382_v51 = vld [vmem:[#allocation3 + $0x54] ss:$12 sps:$4 sm:$0xff]   ;;  %v3550_v15 = vld [vmem:[#allocation3 + $0x48] sm:$0xf] }
 0x39f   : > { %13146 = vmatpush3.bf16.msra.mxu1 %v14350_v28  ;;  %v14413_v28 = vld [vmem:[%s18069_s2 + $0x100] ss:$8 sps:$4 sm:$0xff]   ;;  %v14443_v20 = vld [vmem:[%s18069_s2 + $0x174] ss:$8 sps:$4 sm:$0xff]  }
 0x3a0   : > { %13147 = vmatprep.subr.bf16.mxu1 %v14351_v18  ;;  %v14385_v22 = vld [vmem:[%s18071_s4 + $0x360] sm:$0xff]  }
 0x3a3   : > { %13148 = vmatpush3.bf16.msra.mxu1 %v14351_v18  ;;  %v14415_v18 = vld [vmem:[%s18069_s2 + $0x104] ss:$8 sps:$4 sm:$0xff]  }
 0x3a4   : > { %13149 = vmatprep.subr.bf16.mxu1 %v14354_v60  ;;  %4969 = vmatprep.subr.bf16.mxu0 %v14415_v18  ;;  %v3613_v18 = vshrl.u32 %v3548_v14, 16 }
 0x3a5   : > { %4970 = vmatpush1.bf16.msra.mxu0 %v14413_v28 }
 0x3a6   : > { %4971 = vmatprep.subr.bf16.mxu0 %v14419_v6 }
 0x3a7   : > { %13150 = vmatpush3.bf16.msra.mxu1 %v14354_v60  ;;  %v14375_v60 = vld [vmem:[%s18071_s4 + $0x328] sm:$0xff]  }
 0x3a8   : > { %13151 = vmatprep.subr.bf16.mxu1 %v14355_v56 }
 0x3ab   : > { %13152 = vmatpush3.bf16.msra.mxu1 %v14355_v56  ;;  %v3542_v56 = vld [vmem:[#allocation3 + $0x18] sm:$0xf] }
 0x3ac   : > { %13161 = vmatprep.subr.bf16.mxu1 %v14357_v31 }
 0x3ae   : > { %13154 = vmatmul.mubr.bf16.vlgmr.msra.gmra.mrb[28].mxu1 %v11659_v21  ;;  %v3540_v21 = vld [vmem:[#allocation3 + $0xc] sm:$0xf] }
 0x3af   : > { %13157 = vmatprep.mubr.bf16.mxu1 %v11660_v30  ;;  %13162 = vmatpush3.bf16.msra.mxu1 %v14357_v31  ;;  %v14417_v31 = vld [vmem:[%s18069_s2 + $0x110] ss:$8 sps:$4 sm:$0xff]   ;;  %v3574_v30 = vshll.u32 %v3542_v56, 16  ;;  %v3557_v41 = vshrl.u32 %v3540_v21, 16 }
 0x3b0   : > { %13163 = vmatprep.subr.bf16.mxu1 %v14359_v11  ;;  %4972 = vmatpush1.bf16.msra.mxu0 %v14417_v31  ;;  %v3630_v31 = vshll.u32 %v3550_v15, 16 }
 0x3b1   : > { %4973 = vmatprep.subr.bf16.mxu0 %v14423_v34  ;;  %v3576_v4 = vrot.slane %v3574_v30, 5 }
 0x3b3   : > { %13164 = vmatpush3.bf16.msra.mxu1 %v14359_v11  ;;  %v3571_v11 = vshrl.u32 %v3542_v56, 16  ;;  %v3627_v56 = vshrl.u32 %v3550_v15, 16 }
 0x3b4   : > { %13165 = vmatprep.subr.bf16.mxu1 %v14363_v25  ;;  %4974 = vmatpush1.bf16.msra.mxu0 %v14421_v33  ;;  %v14386_v33 = vld [vmem:[%s18071_s4 + $0x368] sm:$0xff]  }
 0x3b5   : > { %v3573_v36 = vrot.slane %v3571_v11, 4 }
 0x3b6   : > { %13158 = vmatmul.mubr.bf16.gmra.mrb[32].mxu1 %v11661_v24  ;;  %v14425_v24 = vld [vmem:[%s18069_s2 + $0x130] ss:$8 sps:$4 sm:$0xff]  }
 0x3b7   : > { %13166 = vmatpush3.bf16.msra.mxu1 %v14363_v25  ;;  %13177 = vmatprep.mubr.bf16.mxu1 %v11694_v16  ;;  %v3560_v25 = vshll.u32 %v3540_v21, 16  ;;  %v14379_v16 = vld [vmem:[%s18071_s4 + $0x340] sm:$0xff]   ;;  %v3577_v46 = vor.u32 %v3576_v4, %v3573_v36  ;;  %v3615_v36 = vrot.slane %v3613_v18, 4 }
 0x3b8   : > { %13167 = vmatprep.subr.bf16.mxu1 %v14364_v53 }
 0x3b9   : > { %v3578_v61 = vrot.slane %v3577_v46, 4 }
 0x3bb   : > { %13168 = vmatpush3.bf16.msra.mxu1 %v14364_v53  ;;  %v14427_v53 = vld [vmem:[%s18069_s2 + $0x134] ss:$8 sps:$4 sm:$0xff]  }
 0x3bc   : > { %13169 = vmatprep.subr.bf16.mxu1 %v14365_v45  ;;  %4975 = vmatprep.subr.bf16.mxu0 %v14427_v53  ;;  %v3632_v53 = vrot.slane %v3630_v31, 5 }
 0x3bd   : > { %4976 = vmatpush1.bf16.msra.mxu0 %v14425_v24  ;;  %v3629_v24 = vrot.slane %v3627_v56, 4 }
 0x3be   : > { %4977 = vmatprep.subr.bf16.mxu0 %v14431_v52  ;;  %v15729_v52 = vld [vmem:[#allocation3 + $0x34] sm:$0x1] }
 0x3bf   : > { %13170 = vmatpush3.bf16.msra.mxu1 %v14365_v45  ;;  %v3559_v45 = vrot.slane %v3557_v41, 4 }
 0x3c0   : > { %13171 = vmatprep.subr.bf16.mxu1 %v14366_v59 }
 0x3c3   : > { %13172 = vmatpush3.bf16.msra.mxu1 %v14366_v59  ;;  %v3562_v59 = vrot.slane %v3560_v25, 5  ;;  %v3552_v25 = vld [vmem:[#allocation3 + $0x54] sm:$0xf] }
 0x3c4   : > { %13173 = vmatprep.subr.bf16.mxu1 %v14367_v7 }
 0x3c5   : > { %v3563_v40 = vor.u32 %v3562_v59, %v3559_v45  ;;  %v14387_v45 = vld [vmem:[%s18071_s4 + $0x370] sm:$0xff]  }
 0x3c7   : > { %13174 = vmatpush3.bf16.msra.mxu1 %v14367_v7  ;;  %v15674_v7 = vld [vmem:[#allocation3 + $0x1c] sm:$0x1]  ;;  %v3564_v3 = vrot.slane %v3563_v40, 4  ;;  %v15733_v40 = vld [vmem:[#allocation3 + $0x4c] sm:$0x1] }
 0x3c8   : > { %13175 = vmatprep.subr.bf16.mxu1 %v14368_v50  ;;  %v3580_v44 = vshll.u32 %v15674_v7, 16 }
 0x3ca   : > { %v3582_v49 = vrot.slane %v3580_v44, 5  ;;  %v3641_v44 = vshrl.u32 %v3552_v25, 16 }
 0x3cb   : > { %13176 = vmatpush3.bf16.msra.mxu1 %v14368_v50  ;;  %v14429_v50 = vld [vmem:[%s18069_s2 + $0x140] ss:$8 sps:$4 sm:$0xff]  }
 0x3cc   : > { %13185 = vmatprep.subr.bf16.mxu1 %v14369_v62  ;;  %4978 = vmatpush1.bf16.msra.mxu0 %v14429_v50  ;;  %v3583_v32 = vsel %vm15491_vm13, %v3578_v61, %v3582_v49  ;;  %v15727_v50 = vld [vmem:[#allocation3 + $0x28] sm:$0x1] }
 0x3cd   : > { %4979 = vmatprep.subr.bf16.mxu0 %v14435_v63 }
 0x3ce   : > { %13178 = vmatmul.mubr.bf16.vlgmr.msra.gmra.mrb[28].mxu1 %v11695_v5  ;;  %v14439_v5 = vld [vmem:[%s18069_s2 + $0x164] ss:$8 sps:$4 sm:$0xff]  }
 0x3cf   : > { %13181 = vmatprep.mubr.bf16.mxu1 %v11696_v10  ;;  %13186 = vmatpush3.bf16.msra.mxu1 %v14369_v62  ;;  %v14433_v62 = vld [vmem:[%s18069_s2 + $0x150] ss:$8 sps:$4 sm:$0xff]  }
 0x3d0   : > { %13187 = vmatprep.subr.bf16.mxu1 %v14370_v38  ;;  %4980 = vmatpush1.bf16.msra.mxu0 %v14433_v62 }
 0x3d1   : > { %4981 = vmatprep.subr.bf16.mxu0 %v14439_v5 }
 0x3d3   : > { %13188 = vmatpush3.bf16.msra.mxu1 %v14370_v38  ;;  %v3569_v38 = vsel %vm15491_vm13, %v3564_v3, %v3568_v47  ;;  %v3636_v3 = vshll.u32 %v15733_v40, 16  ;;  %v3608_v47 = vshll.u32 %v15729_v52, 16 }
 0x3d4   : > { %13189 = vmatprep.subr.bf16.mxu1 %v14371_v17  ;;  %v11750_v10 = vcombine.low %v3569_v38, %v3583_v32  ;;  %4982 = vmatpush1.bf16.msra.mxu0 %v14437_v43  ;;  %v14388_v32 = vld [vmem:[%s18071_s4 + $0x378] sm:$0xff]   ;;  %v3594_v43 = vshll.u32 %v15727_v50, 16 }
 0x3d5   : > { %4983 = vmatprep.subr.bf16.mxu0 %v14443_v20 }
 0x3d6   : > { %13182 = vmatmul.mubr.bf16.gmra.mrb[32].mxu1 %v11697_v26  ;;  %v3544_v26 = vld [vmem:[#allocation3 + $0x24] sm:$0xf] }
 0x3d7   : > { %13190 = vmatpush3.bf16.msra.mxu1 %v14371_v17  ;;  %13201 = vmatprep.mubr.bf16.mxu1 %v14372_v37  ;;  %v14441_v17 = vld [vmem:[%s18069_s2 + $0x170] ss:$8 sps:$4 sm:$0xff]   ;;  %v3602_v37 = vshll.u32 %v3546_v13, 16  ;;  %v3588_v21 = vshll.u32 %v3544_v26, 16 }
 0x3d8   : > { %13191 = vmatprep.subr.bf16.mxu1 %v14373_v19  ;;  %4984 = vmatpush1.bf16.msra.mxu0 %v14441_v17  ;;  %v3638_v17 = vrot.slane %v3636_v3, 5 }
 0x3d9   : > { %v3590_v46 = vrot.slane %v3588_v21, 5 }
 0x3db   : > { %13192 = vmatpush3.bf16.msra.mxu1 %v14373_v19  ;;  %v3599_v19 = vshrl.u32 %v3546_v13, 16 }
 0x3dc   : > { %13193 = vmatprep.subr.bf16.mxu1 %v14374_v27 }
 0x3dd   : > { %v3601_v34 = vrot.slane %v3599_v19, 4  ;;  %v3596_v19 = vrot.slane %v3594_v43, 5  ;;  %v3825_v43 = vld [vmem:[#allocation3 + $0x30] sm:$0xe] }
 0x3df   : > { %13194 = vmatpush3.bf16.msra.mxu1 %v14374_v27  ;;  %v13333_v27 = vpop.f32.mrb[24].mxu0 }
 0x3e0   : > { %13195 = vmatprep.subr.bf16.mxu1 %v14375_v60  ;;  %v4824_v28 = vpop.f32.mrb[25].mxu0 }
 0x3e1   : > { %v13334_v6 = vpop.f32.mrb[26].mxu0 }
 0x3e2   : > { %v4856_v11 = vpack.c.bf16 %v13334_v6, %v13333_v27  ;;  %v4827_v30 = vpop.f32.mrb[27].mxu0  ;;  %v15748_v27 = vld [vmem:[#allocation3 + $0x64] sm:$0x1] }
 0x3e3   : > { %13196 = vmatpush3.bf16.msra.mxu1 %v14375_v60  ;;  %v3616_v60 = vshll.u32 %v3548_v14, 16  ;;  %v4855_v41 = vpack.c.bf16 %v4827_v30, %v4824_v28  ;;  %v13337_v18 = vpop.f32.mrb[28].mxu0  ;;  %v3664_v6 = vshll.u32 %v15748_v27, 16 }
 0x3e4   : > { %13197 = vmatprep.subr.bf16.mxu1 %v14376_v29 }
 0x3e5   : > { %v3618_v4 = vrot.slane %v3616_v60, 5  ;;  %5002 = vmatmul.mubr.bf16.vlgmr.msra.gmra.mrb[32].mxu0 %v4855_v41 }
 0x3e6   : > { %5011 = vmatprep.mubr.bf16.mxu0 %v14645_v2 }
 0x3e7   : > { %13198 = vmatpush3.bf16.msra.mxu1 %v14376_v29  ;;  %v3585_v29 = vshrl.u32 %v3544_v26, 16  ;;  %v3619_v62 = vor.u32 %v3618_v4, %v3615_v36  ;;  %v15742_v26 = vld [vmem:[#allocation3 + $0x58] sm:$0x1]  ;;  %v14390_v36 = vld [vmem:[%s18071_s4 + $0x388] sm:$0xff]  }
 0x3e8   : > { %13199 = vmatprep.subr.bf16.mxu1 %v14377_v35  ;;  %v3650_v28 = vshll.u32 %v15742_v26, 16 }
 0x3e9   : > { %v3587_v59 = vrot.slane %v3585_v29, 4  ;;  %v3620_v13 = vrot.slane %v3619_v62, 4  ;;  %v4840_v29 = vpop.f32.mrb[29].mxu0 }
 0x3ea   : > { %v13338_v30 = vpop.f32.mrb[30].mxu0  ;;  %v3652_v4 = vrot.slane %v3650_v28, 5 }
 0x3eb   : > { %13200 = vmatpush3.bf16.msra.mxu1 %v14377_v35  ;;  %v3604_v35 = vrot.slane %v3602_v37, 5  ;;  %v3591_v49 = vor.u32 %v3590_v46, %v3587_v59  ;;  %v14389_v37 = vld [vmem:[%s18071_s4 + $0x380] sm:$0xff]   ;;  %v4843_v41 = vpop.f32.mrb[31].mxu0  ;;  %v3666_v59 = vrot.slane %v3664_v6, 5  ;;  %v3822_v46 = vld [vmem:[#allocation3 + $0xc] sm:$0xe] }
 0x3ec   : > { %13209 = vmatprep.subr.bf16.mxu1 %v14379_v16 }
 0x3ed   : > { %5012 = vmatmul.mubr.bf16.gmra.mrb[36].mxu0 %v4856_v11  ;;  %v3592_v20 = vrot.slane %v3591_v49, 4  ;;  %v14393_v49 = vld [vmem:[%s18071_s4 + $0x3a0] sm:$0xff]  }
 0x3ee   : > { %13202 = vmatmul.mubr.bf16.vlgmr.msra.gmra.mrb[28].mxu1 %v14378_v55  ;;  %v3605_v55 = vor.u32 %v3604_v35, %v3601_v34  ;;  %5021 = vmatprep.mubr.bf16.mxu0 %v14645_v2  ;;  %v3823_v34 = vld [vmem:[#allocation3 + $0x18] sm:$0xe]  ;;  %v4858_v35 = vpack.c.bf16 %v13338_v30, %v13337_v18  ;;  %v3828_v18 = vld [vmem:[#allocation3 + $0x54] sm:$0xe] }
 0x3ef   : > { %13205 = vmatprep.mubr.bf16.mxu1 %v14380_v57  ;;  %13210 = vmatpush3.bf16.msra.mxu1 %v14379_v16  ;;  %v3554_v16 = vld [vmem:[#allocation3 + $0x60] sm:$0xf]  ;;  %v3644_v57 = vshll.u32 %v3552_v25, 16  ;;  %v14399_v30 = vld [vmem:[%s18071_s4 + $0x3d0] sm:$0xff]  }
 0x3f0   : > { %13211 = vmatprep.subr.bf16.mxu1 %v14381_v0  ;;  %v3655_v58 = vshrl.u32 %v3554_v16, 16  ;;  %v3658_v61 = vshll.u32 %v3554_v16, 16  ;;  %v3606_v5 = vrot.slane %v3605_v55, 4  ;;  %v11763_v55 = vrot.slane %v3823_v34, 9 }
 0x3f1   : > { %v3646_v38 = vrot.slane %v3644_v57, 5  ;;  %v14391_v57 = vld [vmem:[%s18071_s4 + $0x390] sm:$0xff]  }
 0x3f3   : > { %13212 = vmatpush3.bf16.msra.mxu1 %v14381_v0  ;;  %v15731_v0 = vld [vmem:[#allocation3 + $0x40] sm:$0x1] }
 0x3f4   : > { %13213 = vmatprep.subr.bf16.mxu1 %v14383_v1  ;;  %v3622_v63 = vshll.u32 %v15731_v0, 16 }
 0x3f6   : > { %13206 = vmatmul.mubr.bf16.gmra.mrb[32].mxu1 %v14382_v51  ;;  %v3643_v51 = vrot.slane %v3641_v44, 4  ;;  %v3624_v14 = vrot.slane %v3622_v63, 5  ;;  %v3852_v44 = vrot.slane %v15674_v7, 5 }
 0x3f7   : > { %13214 = vmatpush3.bf16.msra.mxu1 %v14383_v1  ;;  %13225 = vmatprep.mubr.bf16.mxu1 %v11750_v10  ;;  %v3633_v1 = vor.u32 %v3632_v53, %v3629_v24  ;;  %v3660_v10 = vrot.slane %v3658_v61, 5  ;;  %v4857_v24 = vpack.c.bf16 %v4843_v41, %v4840_v29  ;;  %v3848_v61 = vrot.slane %v15676_v48, 5  ;;  %v14392_v48 = vld [vmem:[%s18071_s4 + $0x398] sm:$0xff]   ;;  %v14402_v41 = vld [vmem:[%s18071_s4 + $0x3e0] sm:$0xff]  }
 0x3f8   : > { %13215 = vmatprep.subr.bf16.mxu1 %v14384_v9  ;;  %v3647_v56 = vor.u32 %v3646_v38, %v3643_v51  ;;  %v3625_v21 = vsel %vm15491_vm13, %v3620_v13, %v3624_v14  ;;  %v3853_v7 = vsel %vm15577_vm15, %v11763_v55, %v3852_v44  ;;  %v3827_v51 = vld [vmem:[#allocation3 + $0x48] sm:$0xe]  ;;  %v14396_v38 = vld [vmem:[%s18071_s4 + $0x3b8] sm:$0xff]   ;;  %v3860_v13 = vrot.slane %v15729_v52, 5 }
 0x3f9   : > { %v3634_v15 = vrot.slane %v3633_v1, 4  ;;  %5022 = vmatmul.mubr.bf16.gmra.mrb[40].mxu0 %v4857_v24  ;;  %v3872_v29 = vrot.slane %v15742_v26, 5  ;;  %v14401_v26 = vld [vmem:[%s18071_s4 + $0x3d8] sm:$0xff]   ;;  %v4204_v24 = vld [vmem:[#allocation3 + $0x24] sm:$0xf] }
 0x3fa   : > { %v3648_v16 = vrot.slane %v3647_v56, 4  ;;  %5031 = vmatprep.mubr.bf16.mxu0 %v14645_v2  ;;  %v14398_v56 = vld [vmem:[%s18071_s4 + $0x3c8] sm:$0xff]  }
 0x3fb   : > { %13216 = vmatpush3.bf16.msra.mxu1 %v14384_v9  ;;  %v3657_v9 = vrot.slane %v3655_v58, 4  ;;  %v3639_v11 = vsel %vm15491_vm13, %v3634_v15, %v3638_v17  ;;  %v11762_v58 = vrot.slane %v3822_v46, 9  ;;  %v3864_v15 = vrot.slane %v15731_v0, 5 }
 0x3fc   : > { %13217 = vmatprep.subr.bf16.mxu1 %v14385_v22  ;;  %v11752_v53 = vcombine.low %v3625_v21, %v3639_v11  ;;  %v3653_v62 = vsel %vm15491_vm13, %v3648_v16, %v3652_v4  ;;  %v11767_v17 = vrot.slane %v3827_v51, 9  ;;  %v3876_v11 = vrot.slane %v15748_v27, 5  ;;  %v14400_v27 = vld [vmem:[#allocation3 + $0x18] ss:$12 sps:$4 sm:$0xff]   ;;  %v14404_v4 = vld [vmem:[%s18071_s4 + $0x3f0] sm:$0xff]  }
 0x3fd   : > { %v3661_v31 = vor.u32 %v3660_v10, %v3657_v9  ;;  %v3849_v3 = vsel %vm15577_vm15, %v11762_v58, %v3848_v61  ;;  %v3824_v9 = vld [vmem:[#allocation3 + $0x24] sm:$0xe]  ;;  %v11765_v10 = vrot.slane %v3825_v43, 9  ;;  %v4236_v46 = vshll.u32 %v4204_v24, 16  ;;  %v14411_v43 = vld [vmem:[%s18071_s4 + $0x410] sm:$0xff]  }
 0x3fe   : > { %v11786_v2 = vcombine.low %v3849_v3, %v3853_v7  ;;  %v15839_v7 = vld [vmem:[#allocation3 + $0x28] sm:$0x1] }
 0x3ff   : > { %13218 = vmatpush3.bf16.msra.mxu1 %v14385_v22  ;;  %v3610_v22 = vrot.slane %v3608_v47, 5  ;;  %v14394_v47 = vld [vmem:[%s18071_s4 + $0x3a8] sm:$0xff]   ;;  %v3861_v28 = vsel %vm15577_vm15, %v11765_v10, %v3860_v13  ;;  %v4238_v61 = vrot.slane %v4236_v46, 5 }
 0x400   : > { %13219 = vmatprep.subr.bf16.mxu1 %v14386_v33  ;;  %v14409_v3 = vld [vmem:[%s18071_s4 + $0x408] sm:$0xff]  }
 0x401   : > { %v3611_v60 = vsel %vm15491_vm13, %v3606_v5, %v3610_v22  ;;  %5032 = vmatmul.mubr.bf16.gmra.mrb[44].mxu0 %v4858_v35  ;;  %v3826_v5 = vld [vmem:[#allocation3 + $0x3c] sm:$0xe]  ;;  %v11764_v22 = vrot.slane %v3824_v9, 9  ;;  %v14410_v10 = vld [vmem:[#allocation3 + $0x60] ss:$12 sps:$4 sm:$0xff]  }
 0x402   : > { %v11766_v14 = vrot.slane %v3826_v5, 9 }
 0x403   : > { %13220 = vmatpush3.bf16.msra.mxu1 %v14386_v33  ;;  %v3597_v33 = vsel %vm15491_vm13, %v3592_v20, %v3596_v19  ;;  %v3868_v20 = vrot.slane %v15733_v40, 5  ;;  %v3856_v19 = vrot.slane %v15727_v50, 5  ;;  %v3829_v40 = vld [vmem:[#allocation3 + $0x60] sm:$0xe] }
 0x404   : > { %13221 = vmatprep.subr.bf16.mxu1 %v14387_v45  ;;  %v11751_v25 = vcombine.low %v3597_v33, %v3611_v60  ;;  %v3865_v52 = vsel %vm15577_vm15, %v11766_v14, %v3864_v15  ;;  %v11769_v21 = vrot.slane %v3829_v40, 9  ;;  %v14412_v14 = vld [vmem:[%s18071_s4 + $0x418] sm:$0xff]  }
 0x405   : > { %v3869_v0 = vsel %vm15577_vm15, %v11767_v17, %v3868_v20  ;;  %v3857_v50 = vsel %vm15577_vm15, %v11764_v22, %v3856_v19  ;;  %v4208_v17 = vld [vmem:[#allocation3 + $0x3c] sm:$0xf]  ;;  %v4210_v20 = vld [vmem:[#allocation3 + $0x48] sm:$0xf]  ;;  %v4212_v22 = vld [vmem:[#allocation3 + $0x54] sm:$0xf] }
 0x406   : > { %v11787_v60 = vcombine.low %v3857_v50, %v3861_v28  ;;  %v11788_v6 = vcombine.low %v3865_v52, %v3869_v0  ;;  %v3877_v34 = vsel %vm15577_vm15, %v11769_v21, %v3876_v11  ;;  %v14416_v19 = vld [vmem:[%s18071_s4 + $0x420] sm:$0xff]   ;;  %v4261_v28 = vshrl.u32 %v4208_v17, 16 }
 0x407   : > { %13222 = vmatpush3.bf16.msra.mxu1 %v14387_v45  ;;  %v3662_v45 = vrot.slane %v3661_v31, 4  ;;  %v11768_v31 = vrot.slane %v3828_v18, 9  ;;  %v4264_v18 = vshll.u32 %v4208_v17, 16  ;;  %v4275_v52 = vshrl.u32 %v4210_v20, 16 }
 0x408   : > { %13223 = vmatprep.subr.bf16.mxu1 %v14388_v32  ;;  %v4278_v0 = vshll.u32 %v4210_v20, 16  ;;  %v4289_v40 = vshrl.u32 %v4212_v22, 16  ;;  %v4292_v50 = vshll.u32 %v4212_v22, 16 }
 0x409   : > { %v3667_v63 = vsel %vm15491_vm13, %v3662_v45, %v3666_v59  ;;  %v3873_v33 = vsel %vm15577_vm15, %v11768_v31, %v3872_v29  ;;  %v14405_v45 = vld [vmem:[%s18071_s4 + $0x3f8] sm:$0xff]   ;;  %v4233_v59 = vshrl.u32 %v4204_v24, 16  ;;  %v14420_v31 = vld [vmem:[%s18071_s4 + $0x428] sm:$0xff]   ;;  %v4263_v29 = vrot.slane %v4261_v28, 4 }
 0x40a   : > { %v11753_v1 = vcombine.low %v3653_v62, %v3667_v63  ;;  %v11789_v35 = vcombine.low %v3873_v33, %v3877_v34  ;;  %v15837_v62 = vld [vmem:[#allocation3 + $0x1c] sm:$0x1]  ;;  %v4266_v21 = vrot.slane %v4264_v18, 5  ;;  %v4277_v11 = vrot.slane %v4275_v52, 4  ;;  %v15869_v24 = vld [vmem:[#allocation3 + $0x4c] sm:$0x1] }
 0x40b   : > { %13224 = vmatpush3.bf16.msra.mxu1 %v14388_v32  ;;  %v14395_v32 = vld [vmem:[%s18071_s4 + $0x3b0] sm:$0xff]   ;;  %v4235_v58 = vrot.slane %v4233_v59, 4  ;;  %v4291_v33 = vrot.slane %v4289_v40, 4  ;;  %v4294_v34 = vrot.slane %v4292_v50, 5  ;;  %v15872_v59 = vld [vmem:[#allocation3 + $0x58] sm:$0x1] }
 0x40c   : > { %13233 = vmatprep.subr.bf16.mxu1 %v14389_v37  ;;  %v4484_v40 = vld [vmem:[#allocation3 + $0x18] sm:$0xe] }
 0x40e   : > { %13226 = vmatmul.mubr.bf16.vlgmr.msra.gmra.mrb[28].mxu1 %v11751_v25  ;;  %v14403_v25 = vld [vmem:[%s18071_s4 + $0x3e8] sm:$0xff]  }
 0x40f   : > { %13229 = vmatprep.mubr.bf16.mxu1 %v11752_v53  ;;  %13234 = vmatpush3.bf16.msra.mxu1 %v14389_v37  ;;  %v14397_v37 = vld [vmem:[%s18071_s4 + $0x3c0] sm:$0xff]  }
 0x410   : > { %13235 = vmatprep.subr.bf16.mxu1 %v14390_v36 }
 0x413   : > { %13236 = vmatpush3.bf16.msra.mxu1 %v14390_v36  ;;  %v4202_v36 = vld [vmem:[#allocation3 + $0x18] sm:$0xf] }
 0x414   : > { %13237 = vmatprep.subr.bf16.mxu1 %v14391_v57  ;;  %v4219_v53 = vshrl.u32 %v4202_v36, 16  ;;  %v4222_v16 = vshll.u32 %v4202_v36, 16  ;;  %v14424_v36 = vld [vmem:[%s18071_s4 + $0x430] sm:$0xff]  }
 0x416   : > { %13230 = vmatmul.mubr.bf16.gmra.mrb[32].mxu1 %v11753_v1  ;;  %v4221_v55 = vrot.slane %v4219_v53, 4  ;;  %v4224_v44 = vrot.slane %v4222_v16, 5  ;;  %v14406_v1 = vld [vmem:[#allocation3 + $0x30] ss:$12 sps:$4 sm:$0xff]   ;;  %v4267_v16 = vor.u32 %v4266_v21, %v4263_v29 }
 0x417   : > { %13238 = vmatpush3.bf16.msra.mxu1 %v14391_v57  ;;  %13249 = vmatprep.mubr.bf16.mxu1 %v11786_v2  ;;  %v14407_v57 = vld [vmem:[%s18071_s4 + $0x400] sm:$0xff]   ;;  %v4239_v2 = vor.u32 %v4238_v61, %v4235_v58  ;;  %v4295_v58 = vor.u32 %v4294_v34, %v4291_v33  ;;  %v4298_v61 = vshll.u32 %v15872_v59, 16  ;;  %v4510_v33 = vrot.slane %v15837_v62, 5  ;;  %v14440_v34 = vld [vmem:[%s18071_s4 + $0x450] sm:$0xff]  }
 0x418   : > { %13239 = vmatprep.subr.bf16.mxu1 %v14392_v48  ;;  %v4225_v63 = vor.u32 %v4224_v44, %v4221_v55 }
 0x419   : > { %v4240_v51 = vrot.slane %v4239_v2, 4 }
 0x41b   : > { %13240 = vmatpush3.bf16.msra.mxu1 %v14392_v48  ;;  %v4228_v48 = vshll.u32 %v15837_v62, 16 }
 0x41c   : > { %13241 = vmatprep.subr.bf16.mxu1 %v14393_v49 }
 0x41d   : > { %v4230_v5 = vrot.slane %v4228_v48, 5 }
 0x41f   : > { %13242 = vmatpush3.bf16.msra.mxu1 %v14393_v49  ;;  %v14408_v49 = vld [vmem:[#allocation3 + $0x48] ss:$12 sps:$4 sm:$0xff]  }
 0x420   : > { %13243 = vmatprep.subr.bf16.mxu1 %v14394_v47 }
 0x423   : > { %13244 = vmatpush3.bf16.msra.mxu1 %v14394_v47  ;;  %v4226_v47 = vrot.slane %v4225_v63, 4 }
 0x424   : > { %13245 = vmatprep.subr.bf16.mxu1 %v14395_v32 }
 0x427   : > { %13246 = vmatpush3.bf16.msra.mxu1 %v14395_v32  ;;  %v4242_v32 = vshll.u32 %v15839_v7, 16 }
 0x428   : > { %13247 = vmatprep.subr.bf16.mxu1 %v14396_v38 }
 0x429   : > { %v4244_v9 = vrot.slane %v4242_v32, 5 }
 0x42b   : > { %13248 = vmatpush3.bf16.msra.mxu1 %v14396_v38  ;;  %v4231_v38 = vsel %vm15491_vm13, %v4226_v47, %v4230_v5  ;;  %v4245_v13 = vsel %vm15491_vm13, %v4240_v51, %v4244_v9  ;;  %v4300_v9 = vrot.slane %v4298_v61, 5  ;;  %v14448_v61 = vld [vmem:[%s18071_s4 + $0x478] sm:$0xff]  }
 0x42c   : > { %13257 = vmatprep.subr.bf16.mxu1 %v14397_v37  ;;  %v11842_v15 = vcombine.low %v4231_v38, %v4245_v13  ;;  %v4296_v38 = vrot.slane %v4295_v58, 4  ;;  %v15880_v13 = vld [vmem:[#allocation3 + $0x70] sm:$0x1]  ;;  %v4489_v58 = vld [vmem:[#allocation3 + $0x54] sm:$0xe] }
 0x42d   : > { %v4326_v20 = vshll.u32 %v15880_v13, 16 }
 0x42e   : > { %13250 = vmatmul.mubr.bf16.vlgmr.msra.gmra.mrb[28].mxu1 %v11787_v60  ;;  %v4301_v52 = vsel %vm15491_vm13, %v4296_v38, %v4300_v9  ;;  %v4490_v9 = vld [vmem:[#allocation3 + $0x60] sm:$0xe] }
 0x42f   : > { %13253 = vmatprep.mubr.bf16.mxu1 %v11788_v6  ;;  %13258 = vmatpush3.bf16.msra.mxu1 %v14397_v37  ;;  %v4206_v37 = vld [vmem:[#allocation3 + $0x30] sm:$0xf]  ;;  %v4216_v6 = vld [vmem:[#allocation3 + $0x6c] sm:$0xf]  ;;  %v4328_v21 = vrot.slane %v4326_v20, 5  ;;  %v4538_v20 = vrot.slane %v15880_v13, 5 }
 0x430   : > { %13259 = vmatprep.subr.bf16.mxu1 %v14398_v56  ;;  %v4247_v60 = vshrl.u32 %v4206_v37, 16  ;;  %v4320_v53 = vshll.u32 %v4216_v6, 16 }
 0x432   : > { %v4322_v2 = vrot.slane %v4320_v53, 5 }
 0x433   : > { %13260 = vmatpush3.bf16.msra.mxu1 %v14398_v56  ;;  %v4250_v56 = vshll.u32 %v4206_v37, 16 }
 0x434   : > { %13261 = vmatprep.subr.bf16.mxu1 %v14399_v30 }
 0x436   : > { %13254 = vmatmul.mubr.bf16.gmra.mrb[32].mxu1 %v11789_v35  ;;  %v4214_v35 = vld [vmem:[#allocation3 + $0x60] sm:$0xf] }
 0x437   : > { %13262 = vmatpush3.bf16.msra.mxu1 %v14399_v30  ;;  %13273 = vmatprep.mubr.bf16.mxu1 %v14400_v27  ;;  %v4280_v30 = vrot.slane %v4278_v0, 5  ;;  %v4249_v27 = vrot.slane %v4247_v60, 4  ;;  %v4303_v46 = vshrl.u32 %v4214_v35, 16  ;;  %v4306_v55 = vshll.u32 %v4214_v35, 16  ;;  %v14436_v60 = vld [vmem:[%s18071_s4 + $0x448] sm:$0xff]  }
 0x438   : > { %13263 = vmatprep.subr.bf16.mxu1 %v14401_v26 }
 0x439   : > { %v4281_v44 = vor.u32 %v4280_v30, %v4277_v11  ;;  %v4305_v32 = vrot.slane %v4303_v46, 4  ;;  %v4485_v11 = vld [vmem:[#allocation3 + $0x24] sm:$0xe]  ;;  %v11854_v30 = vrot.slane %v4484_v40, 9  ;;  %v14446_v46 = vld [vmem:[%s18071_s4 + $0x468] sm:$0xff]  }
 0x43a   : > { %v11855_v35 = vrot.slane %v4485_v11, 9 }
 0x43b   : > { %13264 = vmatpush3.bf16.msra.mxu1 %v14401_v26  ;;  %v15862_v26 = vld [vmem:[#allocation3 + $0x34] sm:$0x1]  ;;  %v4282_v5 = vrot.slane %v4281_v44, 4  ;;  %v4487_v44 = vld [vmem:[#allocation3 + $0x3c] sm:$0xe] }
 0x43c   : > { %13265 = vmatprep.subr.bf16.mxu1 %v14402_v41 }
 0x43f   : > { %13266 = vmatpush3.bf16.msra.mxu1 %v14402_v41  ;;  %v4252_v41 = vrot.slane %v4250_v56, 5 }
 0x440   : > { %13267 = vmatprep.subr.bf16.mxu1 %v14403_v25 }
 0x441   : > { %v4253_v63 = vor.u32 %v4252_v41, %v4249_v27  ;;  %v4514_v27 = vrot.slane %v15839_v7, 5 }
 0x443   : > { %13268 = vmatpush3.bf16.msra.mxu1 %v14403_v25  ;;  %v4317_v25 = vshrl.u32 %v4216_v6, 16  ;;  %v4515_v53 = vsel %vm15577_vm15, %v11855_v35, %v4514_v27  ;;  %v14466_v35 = vld [vmem:[%s18071_s4 + $0x488] sm:$0xff]   ;;  %v14467_v27 = vld [vmem:[%s18071_s4 + $0x490] sm:$0xff]  }
 0x444   : > { %13269 = vmatprep.subr.bf16.mxu1 %v14404_v4 }
 0x445   : > { %v4319_v48 = vrot.slane %v4317_v25, 4 }
 0x447   : > { %13270 = vmatpush3.bf16.msra.mxu1 %v14404_v4  ;;  %v15867_v4 = vld [vmem:[#allocation3 + $0x40] sm:$0x1]  ;;  %v4323_v17 = vor.u32 %v4322_v2, %v4319_v48  ;;  %v4526_v2 = vrot.slane %v15869_v24, 5 }
 0x448   : > { %13271 = vmatprep.subr.bf16.mxu1 %v14405_v45 }
 0x449   : > { %v4324_v56 = vrot.slane %v4323_v17, 4 }
 0x44b   : > { %13272 = vmatpush3.bf16.msra.mxu1 %v14405_v45  ;;  %v4270_v45 = vshll.u32 %v15867_v4, 16  ;;  %v4329_v25 = vsel %vm15491_vm13, %v4324_v56, %v4328_v21 }
 0x44c   : > { %13281 = vmatprep.subr.bf16.mxu1 %v14407_v57 }
 0x44d   : > { %v4272_v47 = vrot.slane %v4270_v45, 5  ;;  %v14445_v45 = vld [vmem:[%s18071_s4 + $0x460] sm:$0xff]  }
 0x44e   : > { %13274 = vmatmul.mubr.bf16.vlgmr.msra.gmra.mrb[28].mxu1 %v14406_v1  ;;  %v14428_v1 = vld [vmem:[%s18071_s4 + $0x438] sm:$0xff]  }
 0x44f   : > { %13277 = vmatprep.mubr.bf16.mxu1 %v14408_v49  ;;  %13282 = vmatpush3.bf16.msra.mxu1 %v14407_v57  ;;  %v4284_v57 = vshll.u32 %v15869_v24, 16  ;;  %v4268_v49 = vrot.slane %v4267_v16, 4  ;;  %v14444_v16 = vld [vmem:[%s18071_s4 + $0x458] sm:$0xff]  }
 0x450   : > { %13283 = vmatprep.subr.bf16.mxu1 %v14409_v3 }
 0x451   : > { %v4286_v51 = vrot.slane %v4284_v57, 5  ;;  %v4488_v57 = vld [vmem:[#allocation3 + $0x48] sm:$0xe] }
 0x452   : > { %v11858_v48 = vrot.slane %v4488_v57, 9 }
 0x453   : > { %13284 = vmatpush3.bf16.msra.mxu1 %v14409_v3  ;;  %v4256_v3 = vshll.u32 %v15862_v26, 16  ;;  %v4287_v18 = vsel %vm15491_vm13, %v4282_v5, %v4286_v51  ;;  %v4491_v51 = vld [vmem:[#allocation3 + $0x6c] sm:$0xe] }
 0x454   : > { %13285 = vmatprep.subr.bf16.mxu1 %v14411_v43  ;;  %v4527_v38 = vsel %vm15577_vm15, %v11858_v48, %v4526_v2 }
 0x455   : > { %v4258_v22 = vrot.slane %v4256_v3, 5  ;;  %v4522_v3 = vrot.slane %v15867_v4, 5 }
 0x456   : > { %13278 = vmatmul.mubr.bf16.gmra.mrb[32].mxu1 %v14410_v10  ;;  %v4254_v10 = vrot.slane %v4253_v63, 4  ;;  %v4486_v63 = vld [vmem:[#allocation3 + $0x30] sm:$0xe] }
 0x457   : > { %13286 = vmatpush3.bf16.msra.mxu1 %v14411_v43  ;;  %13297 = vmatprep.mubr.bf16.mxu1 %v11842_v15  ;;  %v4308_v43 = vrot.slane %v4306_v55, 5  ;;  %v15885_v15 = vld [vmem:[#allocation3 + $0x64] sm:$0x1]  ;;  %v14447_v55 = vld [vmem:[%s18071_s4 + $0x470] sm:$0xff]  }
 0x458   : > { %13287 = vmatprep.subr.bf16.mxu1 %v14412_v14  ;;  %v4312_v28 = vshll.u32 %v15885_v15, 16  ;;  %v4259_v0 = vsel %vm15491_vm13, %v4254_v10, %v4258_v22  ;;  %v11861_v10 = vrot.slane %v4491_v51, 9  ;;  %v4534_v17 = vrot.slane %v15885_v15, 5 }
 0x459   : > { %v4309_v37 = vor.u32 %v4308_v43, %v4305_v32  ;;  %v11856_v32 = vrot.slane %v4486_v63, 9  ;;  %v4518_v43 = vrot.slane %v15862_v26, 5  ;;  %v11860_v26 = vrot.slane %v4490_v9, 9 }
 0x45a   : > { %v4314_v29 = vrot.slane %v4312_v28, 5 }
 0x45b   : > { %13288 = vmatpush3.bf16.msra.mxu1 %v14412_v14  ;;  %v14432_v14 = vld [vmem:[%s18071_s4 + $0x440] sm:$0xff]   ;;  %v4310_v6 = vrot.slane %v4309_v37, 4  ;;  %v4519_v24 = vsel %vm15577_vm15, %v11856_v32, %v4518_v43  ;;  %v4535_v22 = vsel %vm15577_vm15, %v11860_v26, %v4534_v17 }
 0x45c   : > { %13289 = vmatprep.subr.bf16.mxu1 %v14416_v19 }
 0x45d   : > { %v4315_v41 = vsel %vm15491_vm13, %v4310_v6, %v4314_v29 }
 0x45e   : > { %v11845_v62 = vcombine.low %v4315_v41, %v4329_v25  ;;  %v11916_v41 = vld [vmem:[%s18070_s3 + $0x4] sm:$0x3] }
 0x45f   : > { %13290 = vmatpush3.bf16.msra.mxu1 %v14416_v19  ;;  %v4273_v19 = vsel %vm15491_vm13, %v4268_v49, %v4272_v47  ;;  %v11859_v49 = vrot.slane %v4489_v58, 9  ;;  %v4530_v47 = vrot.slane %v15872_v59, 5  ;;  %v4882_v25 = vrot.slane %v11916_v41, %v14901_v39 }
 0x460   : > { %13291 = vmatprep.subr.bf16.mxu1 %v14420_v31  ;;  %v11843_v50 = vcombine.low %v4259_v0, %v4273_v19  ;;  %v4539_v19 = vsel %vm15577_vm15, %v11861_v10, %v4538_v20 }
 0x461   : > { %v4531_v4 = vsel %vm15577_vm15, %v11859_v49, %v4530_v47  ;;  %v11881_v37 = vcombine.low %v4535_v22, %v4539_v19 }
 0x463   : > { %13292 = vmatpush3.bf16.msra.mxu1 %v14420_v31  ;;  %v11844_v31 = vcombine.low %v4287_v18, %v4301_v52 }
 0x464   : > { %13293 = vmatprep.subr.bf16.mxu1 %v14424_v36 }
 0x467   : > { %13294 = vmatpush3.bf16.msra.mxu1 %v14424_v36  ;;  %v4511_v36 = vsel %vm15577_vm15, %v11854_v30, %v4510_v33  ;;  %v14449_v33 = vld [vmem:[%s18076_s9] sm:$0xff]  }
 0x468   : > { %13295 = vmatprep.subr.bf16.mxu1 %v14428_v1  ;;  %v11878_v7 = vcombine.low %v4511_v36, %v4515_v53  ;;  %v15970_v36 = vrot.slane %v11916_v41, %v14908_v42 }
 0x46b   : > { %13296 = vmatpush3.bf16.msra.mxu1 %v14428_v1  ;;  %v11857_v1 = vrot.slane %v4487_v44, 9 }
 0x46c   : > { %13305 = vmatprep.subr.bf16.mxu1 %v14432_v14 }
 0x46d   : > { %v4523_v5 = vsel %vm15577_vm15, %v11857_v1, %v4522_v3 }
 0x46e   : > { %13298 = vmatmul.mubr.bf16.vlgmr.msra.gmra.mrb[28].mxu1 %v11843_v50  ;;  %v11879_v59 = vcombine.low %v4519_v24, %v4523_v5 }
 0x46f   : > { %13301 = vmatprep.mubr.bf16.mxu1 %v11844_v31  ;;  %13306 = vmatpush3.bf16.msra.mxu1 %v14432_v14  ;;  %v11880_v14 = vcombine.low %v4527_v38, %v4531_v4 }
 0x470   : > { %13307 = vmatprep.subr.bf16.mxu1 %v14436_v60 }
 0x473   : > { %13308 = vmatpush3.bf16.msra.mxu1 %v14436_v60 }
 0x474   : > { %13309 = vmatprep.subr.bf16.mxu1 %v14440_v34 }
 0x476   : > { %13302 = vmatmul.mubr.bf16.gmra.mrb[32].mxu1 %v11845_v62 }
 0x477   : > { %13310 = vmatpush3.bf16.msra.mxu1 %v14440_v34  ;;  %13321 = vmatprep.mubr.bf16.mxu1 %v11878_v7  ;;  %v14465_v34 = vld [vmem:[%s18071_s4 + $0x480] sm:$0xff]  }
 0x478   : > { %13311 = vmatprep.subr.bf16.mxu1 %v14444_v16  ;;  %13427 = vmatprep.subr.bf16.mxu0 %v14465_v34 }
 0x479   : > { %13428 = vmatpush3.bf16.msra.mxu0 %v14465_v34 }
 0x47a   : > { %13429 = vmatprep.subr.bf16.mxu0 %v14466_v35 }
 0x47b   : > { %13312 = vmatpush3.bf16.msra.mxu1 %v14444_v16 }
 0x47c   : > { %13313 = vmatprep.subr.bf16.mxu1 %v14445_v45 }
 0x47d   : > { %13430 = vmatpush3.bf16.msra.mxu0 %v14466_v35 }
 0x47e   : > { %13431 = vmatprep.subr.bf16.mxu0 %v14467_v27 }
 0x47f   : > { %13314 = vmatpush3.bf16.msra.mxu1 %v14445_v45  ;;  %v11891_v45 = vld [vmem:[%s18072_s5 + $0x1] ss:$0 sm:$0xff] }
 0x480   : > { %13315 = vmatprep.subr.bf16.mxu1 %v14446_v46 }
 0x481   : > { %13432 = vmatpush3.bf16.msra.mxu0 %v14467_v27 }
 0x483   : > { %13316 = vmatpush3.bf16.msra.mxu1 %v14446_v46 }
 0x484   : > { %13317 = vmatprep.subr.bf16.mxu1 %v14447_v55 }
 0x487   : > { %13318 = vmatpush3.bf16.msra.mxu1 %v14447_v55 }
 0x488   : > { %13319 = vmatprep.subr.bf16.mxu1 %v14448_v61 }
 0x48b   : > { %13320 = vmatpush3.bf16.msra.mxu1 %v14448_v61 }
 0x48e   : > { %13322 = vmatmul.mubr.bf16.vlgmr.msra.gmra.mrb[28].mxu1 %v11879_v59 }
 0x48f   : > { %13325 = vmatprep.mubr.bf16.mxu1 %v11880_v14 }
 0x496   : > { %13326 = vmatmul.mubr.bf16.gmra.mrb[32].mxu1 %v11881_v37 }
 0x497   : > { %13347 = vmatprep.mubr.msk.bf16.mxu1 %vm5190_vm1, %v14449_v33 }
 0x4b8   : > { %v5003_v28 = vpop.f32.mrb[32].mxu0 }
 0x4b9   : > { %v5005_v18 = vpop.f32.mrb[33].mxu0  ;;  %v5004_v62 = vadd.f32 %v5003_v28, %v4882_v25 }
 0x4ba   : > { %v5007_v52 = vpop.f32.mrb[34].mxu0  ;;  %v5006_v55 = vadd.f32 %v5005_v18, %v15970_v36 }
 0x4bb   : > { %v5009_v0 = vpop.f32.mrb[35].mxu0  ;;  %v5008_v53 = vadd.f32 %v5007_v52, %v4882_v25  ;;  %v5050_v46 = vadd.f32 1.0, %v5004_v62 }
 0x4bc   : > { %v5010_v58 = vadd.f32 %v5009_v0, %v15970_v36 }
 0x4bd   : > { %v5051_v57 = vadd.f32 1.0, %v5008_v53 }
 0x4c0   : > { %v5013_v40 = vpop.f32.mrb[36].mxu0 }
 0x4c1   : > { %v5015_v50 = vpop.f32.mrb[37].mxu0  ;;  %v5014_v16 = vadd.f32 %v5013_v40, %v4882_v25 }
 0x4c2   : > { %v5017_v60 = vpop.f32.mrb[38].mxu0  ;;  %v5016_v39 = vadd.f32 %v5015_v50, %v15970_v36 }
 0x4c3   : > { %v5019_v15 = vpop.f32.mrb[39].mxu0  ;;  %v5018_v7 = vadd.f32 %v5017_v60, %v4882_v25  ;;  %v5052_v63 = vadd.f32 1.0, %v5014_v16 }
 0x4c4   : > { %v5020_v3 = vadd.f32 %v5019_v15, %v15970_v36 }
 0x4c5   : > { %v5053_v1 = vadd.f32 1.0, %v5018_v7 }
 0x4cc   : > { %v5023_v56 = vpop.f32.mrb[40].mxu0 }
 0x4cd   : > { %v5025_v13 = vpop.f32.mrb[41].mxu0  ;;  %v5024_v32 = vadd.f32 %v5023_v56, %v4882_v25 }
 0x4ce   : > { %v5027_v31 = vpop.f32.mrb[42].mxu0  ;;  %v15980_v38 = vadd.f32 %v5025_v13, %v15970_v36 }
 0x4cf   : > { %v15946_v6 = vpop.f32.mrb[43].mxu0  ;;  %v5054_v20 = vadd.f32 1.0, %v5024_v32  ;;  %v5028_v22 = vadd.f32 %v5027_v31, %v4882_v25 }
 0x4d4   : > { %v5033_v29 = vpop.f32.mrb[44].mxu0 }
 0x4d5   : > { %v5035_v21 = vpop.f32.mrb[45].mxu0  ;;  %v5034_v24 = vadd.f32 %v5033_v29, %v4882_v25 }
 0x4d6   : > { %v15948_v11 = vpop.f32.mrb[46].mxu0  ;;  %v5036_v18 = vadd.f32 %v5035_v21, %v15970_v36 }
 0x4d7   : > { %v15950_v30 = vpop.f32.mrb[47].mxu0  ;;  %v5056_v50 = vadd.f32 1.0, %v5034_v24  ;;  %v5038_v13 = vadd.f32 %v15948_v11, %v4882_v25 }
 0x561   : > { %v13323_v44 = vpop.f32.mrb[28].mxu1 }
 0x562   : > { %v4704_v61 = vadd.f32 %v13323_v44, %v11891_v45  ;;  %v4655_v42 = vpop.f32.mrb[29].mxu1 }
 0x563   : > { %v4702_v48 = vadd.f32 %v11891_v45, %v4655_v42  ;;  %v13324_v2 = vpop.f32.mrb[30].mxu1 }
 0x564   : > { %vm4712_vm2 = vcmp.ge.f32.partialorder %v4704_v61, 0.0  ;;  %v4720_v49 = vmul.f32 0.2, %v4704_v61  ;;  %v4705_v47 = vadd.f32 %v13324_v2, %v11891_v45  ;;  %v4658_v43 = vpop.f32.mrb[31].mxu1 }
 0x565   : > { %vm4710_vm3 = vcmp.ge.f32.partialorder %v4702_v48, 0.0  ;;  %v4718_v5 = vmul.f32 0.2, %v4702_v48  ;;  %v4703_v51 = vadd.f32 %v11891_v45, %v4658_v43 }
 0x566   : > { %v4728_v4 = vsel %vm4712_vm2, %v4704_v61, %v4720_v49  ;;  %vm4713_vm0 = vcmp.ge.f32.partialorder %v4705_v47, 0.0  ;;  %v4721_v9 = vmul.f32 0.2, %v4705_v47  ;;  %v5055_v49 = vadd.f32 1.0, %v5028_v22  ;;  %v14459_v22 = vld [vmem:[%s18076_s9 + $0x50] sm:$0xff]  }
 0x567   : > { %v4736_v59 = vmul.f32 1.4142135, %v4728_v4  ;;  %v4726_v10 = vsel %vm4710_vm3, %v4702_v48, %v4718_v5  ;;  %vm4711_vm4 = vcmp.ge.f32.partialorder %v4703_v51, 0.0  ;;  %v4719_v14 = vmul.f32 0.2, %v4703_v51 }
 0x568   : > { %v4734_v26 = vmul.f32 1.4142135, %v4726_v10  ;;  %v4729_v17 = vsel %vm4713_vm0, %v4705_v47, %v4721_v9  ;;  %v5030_v5 = vadd.f32 %v15946_v6, %v15970_v36  ;;  %v14451_v6 = vld [vmem:[%s18076_s9 + $0x10] sm:$0xff]   ;;  %v14454_v10 = vld [vmem:[%s18076_s9 + $0x28] sm:$0xff]  }
 0x569   : > { %v5060_v19 = vmul.f32 %v5052_v63, %v4736_v59  ;;  %v4737_v37 = vmul.f32 1.4142135, %v4729_v17  ;;  %v4727_v28 = vsel %vm4711_vm4, %v4703_v51, %v4719_v14  ;;  %v13327_v52 = vpop.f32.mrb[32].mxu1  ;;  %v14455_v14 = vld [vmem:[%s18076_s9 + $0x30] sm:$0xff]   ;;  %v14457_v17 = vld [vmem:[%s18076_s9 + $0x40] sm:$0xff]  }
 0x56a   : > { %v5058_v0 = vmul.f32 %v5050_v46, %v4734_v26  ;;  %v4735_v40 = vmul.f32 1.4142135, %v4727_v28  ;;  %v4708_v60 = vadd.f32 %v13327_v52, %v11891_v45  ;;  %v4671_v15 = vpop.f32.mrb[33].mxu1  ;;  %v14456_v26 = vld [vmem:[%s18076_s9 + $0x38] sm:$0xff]   ;;  %v14462_v28 = vld [vmem:[%s18076_s9 + $0x68] sm:$0xff]  }
 0x56b   : > { %v5061_v56 = vmul.f32 %v5053_v1, %v4737_v37  ;;  %v4706_v29 = vadd.f32 %v11891_v45, %v4671_v15  ;;  %v13328_v33 = vpop.f32.mrb[34].mxu1  ;;  %v5068_v34 = vadd.f32 %v5060_v19, %v5016_v39  ;;  %v5057_v1 = vadd.f32 1.0, %v5038_v13  ;;  %v14460_v19 = vld [vmem:[%s18076_s9 + $0x58] sm:$0xff]   ;;  %v14461_v37 = vld [vmem:[%s18076_s9 + $0x60] sm:$0xff]   ;;  %v14472_v15 = vld [vmem:[%s18071_s4 + $0x4d0] sm:$0xff]  }
 0x56c   : > { %v5059_v35 = vmul.f32 %v5051_v57, %v4735_v40  ;;  %vm4716_vm5 = vcmp.ge.f32.partialorder %v4708_v60, 0.0  ;;  %v4724_v31 = vmul.f32 0.2, %v4708_v60  ;;  %v4709_v27 = vadd.f32 %v13328_v33, %v11891_v45  ;;  %v4674_v41 = vpop.f32.mrb[35].mxu1  ;;  %v14464_v52 = vld [vmem:[%s18076_s9 + $0x78] sm:$0xff]   ;;  %v14476_v33 = vld [vmem:[%s18071_s4 + $0x4e0] sm:$0xff]  }
 0x56d   : > { %vm4714_vm7 = vcmp.ge.f32.partialorder %v4706_v29, 0.0  ;;  %v4722_v62 = vmul.f32 0.2, %v4706_v29  ;;  %v4707_v21 = vadd.f32 %v11891_v45, %v4674_v41  ;;  %v5066_v53 = vadd.f32 %v5058_v0, %v5006_v55  ;;  %v14468_v0 = vld [vmem:[%s18071_s4 + $0x4c0] sm:$0xff]   ;;  %v14469_v40 = vld [vmem:[%s18071_s4 + $0x498] sm:$0xff]  }
 0x56e   : > { %v4732_v16 = vsel %vm4716_vm5, %v4708_v60, %v4724_v31  ;;  %vm4717_vm8 = vcmp.ge.f32.partialorder %v4709_v27, 0.0  ;;  %v4725_v7 = vmul.f32 0.2, %v4709_v27  ;;  %v5067_v46 = vadd.f32 %v5059_v35, %v5010_v58  ;;  %v14471_v60 = vld [vmem:[%s18071_s4 + $0x4a0] sm:$0xff]   ;;  %13433 = vmatprep.subr.bf16.mxu0 %v14469_v40  ;;  %v14474_v13 = vld [vmem:[%s18071_s4 + $0x4d8] sm:$0xff]   ;;  %v14478_v35 = vld [vmem:[%s18071_s4 + $0x4e8] sm:$0xff]  }
 0x56f   : > { %v4740_v44 = vmul.f32 1.4142135, %v4732_v16  ;;  %v4730_v61 = vsel %vm4714_vm7, %v4706_v29, %v4722_v62  ;;  %vm4715_vm10 = vcmp.ge.f32.partialorder %v4707_v21, 0.0  ;;  %v4723_v11 = vmul.f32 0.2, %v4707_v21  ;;  %13434 = vmatpush3.bf16.msra.mxu0 %v14469_v40  ;;  %v14475_v29 = vld [vmem:[%s18071_s4 + $0x4b0] sm:$0xff]  }
 0x570   : > { %v4738_v25 = vmul.f32 1.4142135, %v4730_v61  ;;  %v4733_v42 = vsel %vm4717_vm8, %v4709_v27, %v4725_v7  ;;  %v5106_v39 = vpack.c.bf16 %v5067_v46, %v5066_v53  ;;  %v5069_v57 = vadd.f32 %v5061_v56, %v5020_v3  ;;  %13435 = vmatprep.subr.bf16.mxu0 %v14471_v60  ;;  %v14473_v56 = vld [vmem:[%s18071_s4 + $0x4a8] sm:$0xff]   ;;  %v5930_v31 = vld [vmem:[#allocation3] sm:$0xf]  ;;  %v14481_v46 = vld [vmem:[%s18071_s4 + $0x4f0] sm:$0xff]  }
 0x571   : > { %v5064_v63 = vmul.f32 %v5056_v50, %v4740_v44  ;;  %v4741_v48 = vmul.f32 1.4142135, %v4733_v42  ;;  %v4731_v2 = vsel %vm4715_vm10, %v4707_v21, %v4723_v11  ;;  %v5040_v58 = vadd.f32 %v15950_v30, %v15970_v36  ;;  %v14450_v30 = vld [vmem:[%s18076_s9 + $0x8] sm:$0xff]   ;;  %v14452_v36 = vld [vmem:[%s18076_s9 + $0x18] sm:$0xff]   ;;  %v16082_v27 = vld [vmem:[#allocation3 + $0x4] sm:$0xf] }
 0x572   : > { %v5062_v47 = vmul.f32 %v5054_v20, %v4738_v25  ;;  %v4739_v45 = vmul.f32 1.4142135, %v4731_v2  ;;  %13339 = vmatprep.subr.bf16.mxu1 %v5106_v39  ;;  %v5107_v55 = vpack.c.bf16 %v5069_v57, %v5068_v34  ;;  %v14458_v20 = vld [vmem:[%s18076_s9 + $0x48] sm:$0xff]   ;;  %v14477_v34 = vld [vmem:[%s18071_s4 + $0x4b8] sm:$0xff]   ;;  %v5996_v41 = vshrl.u32 %v5930_v31, 16  ;;  %v16092_v44 = vld [vmem:[%s18071_s4 + $0x500] sm:$0xff]  }
 0x573   : > { %v5065_v32 = vmul.f32 %v5057_v1, %v4741_v48  ;;  %13340 = vmatpush3.bf16.msra.mxu1 %v5106_v39  ;;  %v5072_v43 = vadd.f32 %v5064_v63, %v5036_v18  ;;  %v14463_v18 = vld [vmem:[%s18076_s9 + $0x70] sm:$0xff]   ;;  %v14470_v50 = vld [vmem:[%s18071_s4 + $0x4c8] sm:$0xff]   ;;  %13436 = vmatpush3.bf16.msra.mxu0 %v14471_v60  ;;  %v5999_v62 = vshll.u32 %v5930_v31, 16  ;;  %v12053_v21 = vcombine.low %v5930_v31, %v16082_v27  ;;  %v14484_v61 = vld [vmem:[%s18071_s4 + $0x4f8] sm:$0xff]  }
 0x574   : > { %v5063_v51 = vmul.f32 %v5055_v49, %v4739_v45  ;;  %13341 = vmatprep.subr.bf16.mxu1 %v5107_v55  ;;  %v5070_v3 = vadd.f32 %v5062_v47, %v15980_v38  ;;  %v14453_v38 = vld [vmem:[%s18076_s9 + $0x20] sm:$0xff]   ;;  %13437 = vmatprep.subr.bf16.mxu0 %v14473_v56  ;;  %v5998_v53 = vrot.slane %v5996_v41, 4  ;;  %v6009_v7 = vshrl.u32 %v16082_v27, 16  ;;  %v16098_v39 = vld [vmem:[#allocation3 + $0x8] sm:$0x1] }
 0x575   : > { %v5073_v4 = vadd.f32 %v5065_v32, %v5040_v58  ;;  %13443 = vmatprep.mubr.bf16.mxu0 %v12053_v21  ;;  %v6001_v16 = vrot.slane %v5999_v62, 5  ;;  %v6005_v25 = vshll.u32 %v16082_v27, 16  ;;  %v6015_v1 = vshll.u32 %v16098_v39, 16  ;;  %v16109_v58 = vld [vmem:[%s18071_s4 + $0x680] sm:$0xff]  }
 0x576   : > { %v5071_v9 = vadd.f32 %v5063_v51, %v5030_v5  ;;  %v6011_v42 = vrot.slane %v6009_v7, 4  ;;  %v5829_v40 = vld [vmem:[#allocation3 + $0x20] sm:$0x1] }
 0x577   : > { %13342 = vmatpush3.bf16.msra.mxu1 %v5107_v55  ;;  %v5109_v24 = vpack.c.bf16 %v5073_v4, %v5072_v43  ;;  %13438 = vmatpush3.bf16.msra.mxu0 %v14473_v56  ;;  %v6002_v11 = vor.u32 %v6001_v16, %v5998_v53  ;;  %v6007_v63 = vrot.slane %v6005_v25, 5  ;;  %v6017_v2 = vrot.slane %v6015_v1, 5  ;;  %v5818_v56 = vld [vmem:[#allocation3 + $0xc] sm:$0xf] }
 0x578   : > { %v5108_v59 = vpack.c.bf16 %v5071_v9, %v5070_v3  ;;  %13439 = vmatprep.subr.bf16.mxu0 %v14475_v29 }
 0x579   : > { %v6003_v57 = vrot.slane %v6002_v11, 4  ;;  %v6012_v48 = vor.u32 %v6011_v42, %v6007_v63  ;;  %v16125_v11 = vld [vmem:[#allocation3] sm:$0xe] }
 0x57a   : > { %13343 = vmatprep.subr.bf16.mxu1 %v5108_v59 }
 0x57b   : > { %13344 = vmatpush3.bf16.msra.mxu1 %v5108_v59  ;;  %13440 = vmatpush3.bf16.msra.mxu0 %v14475_v29  ;;  %v6008_v49 = vsel %vm15491_vm13, %v6003_v57, %v6007_v63  ;;  %v6013_v47 = vrot.slane %v6012_v48, 4 }
 0x57c   : > { %13345 = vmatprep.subr.bf16.mxu1 %v5109_v24  ;;  %13441 = vmatprep.subr.bf16.mxu0 %v14477_v34 }
 0x57d   : > { %v6018_v45 = vsel %vm15491_vm13, %v6013_v47, %v6017_v2 }
 0x57e   : > { %v12029_v55 = vcombine.low %v6008_v49, %v6018_v45  ;;  %v12077_v45 = vrot.slane %v16125_v11, 9 }
 0x57f   : > { %13346 = vmatpush3.bf16.msra.mxu1 %v5109_v24  ;;  %13442 = vmatpush3.bf16.msra.mxu0 %v14477_v34 }
 0x580   : > { %13379 = vmatprep.subr.bf16.mxu1 %v14468_v0  ;;  %13475 = vmatprep.subr.bf16.mxu0 %v16092_v44 }
 0x582   : > { %13348 = vmatmul.mubr.msk.bf16.vlgmr.msra.gmra.mrb[36].mxu1 %vm5190_vm1, %v14450_v30 }
 0x583   : > { %13351 = vmatprep.mubr.msk.bf16.mxu1 %vm5190_vm1, %v14451_v6  ;;  %13380 = vmatpush3.bf16.msra.mxu1 %v14468_v0 }
 0x584   : > { %13381 = vmatprep.subr.bf16.mxu1 %v14470_v50 }
 0x587   : > { %13382 = vmatpush3.bf16.msra.mxu1 %v14470_v50 }
 0x588   : > { %13383 = vmatprep.subr.bf16.mxu1 %v14472_v15 }
 0x58a   : > { %13352 = vmatmul.mubr.msk.bf16.gmra.mrb[40].mxu1 %vm5190_vm1, %v14452_v36 }
 0x58b   : > { %13355 = vmatprep.mubr.msk.bf16.mxu1 %vm5190_vm1, %v14453_v38  ;;  %13384 = vmatpush3.bf16.msra.mxu1 %v14472_v15 }
 0x58c   : > { %13385 = vmatprep.subr.bf16.mxu1 %v14474_v13 }
 0x58f   : > { %13386 = vmatpush3.bf16.msra.mxu1 %v14474_v13 }
 0x590   : > { %13387 = vmatprep.subr.bf16.mxu1 %v14476_v33 }
 0x592   : > { %13356 = vmatmul.mubr.msk.bf16.gmra.mrb[44].mxu1 %vm5190_vm1, %v14454_v10 }
 0x593   : > { %13359 = vmatprep.mubr.msk.bf16.mxu1 %vm5190_vm1, %v14455_v14  ;;  %13388 = vmatpush3.bf16.msra.mxu1 %v14476_v33  ;;  %v5822_v33 = vld [vmem:[#allocation3 + $0x14] sm:$0x1] }
 0x594   : > { %13389 = vmatprep.subr.bf16.mxu1 %v14478_v35 }
 0x597   : > { %13390 = vmatpush3.bf16.msra.mxu1 %v14478_v35 }
 0x598   : > { %13391 = vmatprep.subr.bf16.mxu1 %v14481_v46 }
 0x59a   : > { %13360 = vmatmul.mubr.msk.bf16.gmra.mrb[48].mxu1 %vm5190_vm1, %v14456_v26 }
 0x59b   : > { %13363 = vmatprep.mubr.msk.bf16.mxu1 %vm5190_vm1, %v14457_v17  ;;  %13392 = vmatpush3.bf16.msra.mxu1 %v14481_v46 }
 0x59c   : > { %13393 = vmatprep.subr.bf16.mxu1 %v14484_v61 }
 0x59f   : > { %13394 = vmatpush3.bf16.msra.mxu1 %v14484_v61 }
 0x5a0   : > { %13859 = vmatprep.subr.bf16.mxu1 %v16109_v58 }
 0x5a2   : > { %13364 = vmatmul.mubr.msk.bf16.gmra.mrb[52].mxu1 %vm5190_vm1, %v14458_v20  ;;  %v5825_v20 = vld [vmem:[#allocation3 + $0x18] sm:$0xf] }
 0x5a3   : > { %13367 = vmatprep.mubr.msk.bf16.mxu1 %vm5190_vm1, %v14459_v22 }
 0x5aa   : > { %13368 = vmatmul.mubr.msk.bf16.gmra.mrb[56].mxu1 %vm5190_vm1, %v14460_v19 }
 0x5ab   : > { %13371 = vmatprep.mubr.msk.bf16.mxu1 %vm5190_vm1, %v14461_v37 }
 0x5b2   : > { %13372 = vmatmul.mubr.msk.bf16.gmra.mrb[60].mxu1 %vm5190_vm1, %v14462_v28 }
 0x5b3   : > { %13375 = vmatprep.mubr.msk.bf16.mxu1 %vm5190_vm1, %v14463_v18 }
 0x5ba   : > { %13376 = vmatmul.mubr.msk.bf16.gmra.mrb[64].mxu1 %vm5190_vm1, %v14464_v52 }
 0x5bb   : > { %13395 = vmatprep.mubr.bf16.mxu1 %v12029_v55  ;;  %v7024_v55 = vrot.slane %v16082_v27, 5 }
 0x655   : > { %v13349_v32 = vpop.f32.mrb[36].mxu1 }
 0x656   : > { %v12434_v43 = vpack.c.bf16 %v13349_v32, %v13349_v32  ;;  %v5273_v5 = vpop.f32.mrb[37].mxu1 }
 0x657   : > { %v12432_v51 = vpack.c.bf16 %v5273_v5, %v5273_v5  ;;  %v13350_v3 = vpop.f32.mrb[38].mxu1  ;;  %v5839_v5 = vld [vmem:[#allocation3 + $0x30] sm:$0xf] }
 0x658   : > { %v5516_v4 = vshrl.u32 %v12434_v43, 16  ;;  %v12435_v9 = vpack.c.bf16 %v13350_v3, %v13350_v3  ;;  %v5276_v24 = vpop.f32.mrb[39].mxu1  ;;  %v5519_v36 = vshll.u32 %v12434_v43, 16  ;;  %v7027_v3 = vrot.slane %v16098_v39, 5 }
 0x659   : > { %v5499_v59 = vshrl.u32 %v12432_v51, 16  ;;  %v12433_v30 = vpack.c.bf16 %v5276_v24, %v5276_v24  ;;  %v5502_v14 = vshll.u32 %v12432_v51, 16  ;;  %v5832_v24 = vld [vmem:[#allocation3 + $0x24] sm:$0xf] }
 0x65a   : > { %v5518_v6 = vrot.slane %v5516_v4, 7  ;;  %v5524_v38 = vshrl.u32 %v12435_v9, 16  ;;  %v5527_v19 = vshll.u32 %v12435_v9, 16 }
 0x65b   : > { %v5501_v10 = vrot.slane %v5499_v59, 7  ;;  %v5507_v26 = vshrl.u32 %v12433_v30, 16  ;;  %v5510_v37 = vshll.u32 %v12433_v30, 16 }
 0x65c   : > { %v5521_v17 = vor.u32 %v5519_v36, %v5518_v6  ;;  %v5526_v22 = vrot.slane %v5524_v38, 7  ;;  %v5522_v28 = vrot.slane %v5518_v6, 4 }
 0x65d   : > { %v5504_v18 = vor.u32 %v5502_v14, %v5501_v10  ;;  %v5505_v52 = vrot.slane %v5501_v10, 4  ;;  %v5509_v50 = vrot.slane %v5507_v26, 7  ;;  %v13353_v60 = vpop.f32.mrb[40].mxu1 }
 0x65e   : > { %v5826_v15 = vsel %vm15424_vm11, %v5521_v17, %v5825_v20  ;;  %v5529_v13 = vor.u32 %v5527_v19, %v5526_v22  ;;  %v5531_v29 = vrot.slane %v5526_v22, 4  ;;  %v12438_v34 = vpack.c.bf16 %v13353_v60, %v13353_v60  ;;  %v5289_v35 = vpop.f32.mrb[41].mxu1  ;;  %v5843_v22 = vld [vmem:[#allocation3 + $0x38] sm:$0x1] }
 0x65f   : > { %5827 = vst [vmem:[#allocation3 + $0x18] sm:$0xf] %v5826_v15  ;;  %v5819_v31 = vsel %vm15424_vm11, %v5504_v18, %v5818_v56  ;;  %v5512_v41 = vor.u32 %v5510_v37, %v5509_v50  ;;  %v5514_v62 = vrot.slane %v5509_v50, 4  ;;  %v12436_v21 = vpack.c.bf16 %v5289_v35, %v5289_v35  ;;  %v13354_v53 = vpop.f32.mrb[42].mxu1  ;;  %v5836_v50 = vld [vmem:[#allocation3 + $0x2c] sm:$0x1] }
 0x660   : > { %5820 = vst [vmem:[#allocation3 + $0xc] sm:$0xf] %v5819_v31  ;;  %v5530_v16 = vsel %vm16113_vm14, %v5522_v28, %v5529_v13  ;;  %v5830_v7 = vsel %vm15417_vm9, %v5531_v29, %v5829_v40  ;;  %v5550_v46 = vshrl.u32 %v12438_v34, 16  ;;  %v5292_v61 = vpop.f32.mrb[43].mxu1  ;;  %v5553_v1 = vshll.u32 %v12438_v34, 16 }
 0x661   : > { %5828 = vst [vmem:[#allocation3 + $0x1c] sm:$0xf] %v5530_v16  ;;  %5831 = vst [vmem:[#allocation3 + $0x20] sm:$0x1] %v5830_v7  ;;  %v5513_v25 = vsel %vm16113_vm14, %v5505_v52, %v5512_v41  ;;  %v5823_v42 = vsel %vm15417_vm9, %v5514_v62, %v5822_v33  ;;  %v5533_v57 = vshrl.u32 %v12436_v21, 16  ;;  %v12439_v48 = vpack.c.bf16 %v13354_v53, %v13354_v53 }
 0x662   : > { %5821 = vst [vmem:[#allocation3 + $0x10] sm:$0xf] %v5513_v25  ;;  %5824 = vst [vmem:[#allocation3 + $0x14] sm:$0x1] %v5823_v42  ;;  %v5552_v63 = vrot.slane %v5550_v46, 7  ;;  %v12437_v2 = vpack.c.bf16 %v5292_v61, %v5292_v61  ;;  %v5536_v47 = vshll.u32 %v12436_v21, 16 }
 0x663   : > { %v5535_v49 = vrot.slane %v5533_v57, 7  ;;  %v5558_v51 = vshrl.u32 %v12439_v48, 16  ;;  %v5561_v59 = vshll.u32 %v12439_v48, 16  ;;  %v5853_v16 = vld [vmem:[#allocation3 + $0x48] sm:$0xf] }
 0x664   : > { %v5555_v32 = vor.u32 %v5553_v1, %v5552_v63  ;;  %v5556_v43 = vrot.slane %v5552_v63, 4  ;;  %v5541_v30 = vshrl.u32 %v12437_v2, 16  ;;  %v5544_v10 = vshll.u32 %v12437_v2, 16  ;;  %v5846_v42 = vld [vmem:[#allocation3 + $0x3c] sm:$0xf] }
 0x665   : > { %v5538_v4 = vor.u32 %v5536_v47, %v5535_v49  ;;  %v5539_v9 = vrot.slane %v5535_v49, 4  ;;  %v13357_v6 = vpop.f32.mrb[44].mxu1  ;;  %v5560_v38 = vrot.slane %v5558_v51, 7  ;;  %v16155_v1 = vsel %vm15577_vm15, %v12077_v45, %v7024_v55  ;;  %v5857_v51 = vld [vmem:[#allocation3 + $0x50] sm:$0x1] }
 0x666   : > { %v5840_v36 = vsel %vm15424_vm11, %v5555_v32, %v5839_v5  ;;  %v12442_v14 = vpack.c.bf16 %v13357_v6, %v13357_v6  ;;  %v5305_v26 = vpop.f32.mrb[45].mxu1  ;;  %v16136_v17 = vld [vmem:[#allocation3 + $0x18] sm:$0xf]  ;;  %v5543_v19 = vrot.slane %v5541_v30, 7  ;;  %v5850_v6 = vld [vmem:[#allocation3 + $0x44] sm:$0x1] }
 0x667   : > { %5841 = vst [vmem:[#allocation3 + $0x30] sm:$0xf] %v5840_v36  ;;  %v5833_v20 = vsel %vm15424_vm11, %v5538_v4, %v5832_v24  ;;  %v12440_v37 = vpack.c.bf16 %v5305_v26, %v5305_v26  ;;  %v13358_v28 = vpop.f32.mrb[46].mxu1  ;;  %v6044_v18 = vshrl.u32 %v16136_v17, 16  ;;  %v5563_v52 = vor.u32 %v5561_v59, %v5560_v38  ;;  %v5932_v61 = vld [vmem:[#allocation3 + $0xc] sm:$0xf] }
 0x668   : > { %5834 = vst [vmem:[#allocation3 + $0x24] sm:$0xf] %v5833_v20  ;;  %v5565_v40 = vrot.slane %v5560_v38, 4  ;;  %v5584_v60 = vshrl.u32 %v12442_v14, 16  ;;  %v5587_v15 = vshll.u32 %v12442_v14, 16  ;;  %v5308_v56 = vpop.f32.mrb[47].mxu1  ;;  %v5546_v13 = vor.u32 %v5544_v10, %v5543_v19 }
 0x669   : > { %v5548_v29 = vrot.slane %v5543_v19, 4  ;;  %v5567_v33 = vshrl.u32 %v12440_v37, 16  ;;  %v5570_v34 = vshll.u32 %v12440_v37, 16  ;;  %v5564_v35 = vsel %vm16113_vm14, %v5556_v43, %v5563_v52  ;;  %v16149_v63 = vld [vmem:[#allocation3 + $0x10] sm:$0xf]  ;;  %v14487_v10 = vld [vmem:[%s18071_s4 + $0x508] sm:$0xff]  }
 0x66a   : > { %v5844_v31 = vsel %vm15417_vm9, %v5565_v40, %v5843_v22  ;;  %v5586_v41 = vrot.slane %v5584_v60, 7  ;;  %v12443_v62 = vpack.c.bf16 %v13358_v28, %v13358_v28  ;;  %5842 = vst [vmem:[#allocation3 + $0x34] sm:$0xf] %v5564_v35  ;;  %v5547_v21 = vsel %vm16113_vm14, %v5539_v9, %v5546_v13  ;;  %v16168_v19 = vld [vmem:[#allocation3 + $0x1c] sm:$0xf] }
 0x66b   : > { %5845 = vst [vmem:[#allocation3 + $0x38] sm:$0x1] %v5844_v31  ;;  %v5837_v53 = vsel %vm15417_vm9, %v5548_v29, %v5836_v50  ;;  %v5569_v7 = vrot.slane %v5567_v33, 7  ;;  %v12441_v46 = vpack.c.bf16 %v5308_v56, %v5308_v56  ;;  %5835 = vst [vmem:[#allocation3 + $0x28] sm:$0xf] %v5547_v21  ;;  %v6020_v4 = vshrl.u32 %v5932_v61, 16 }
 0x66c   : > { %5838 = vst [vmem:[#allocation3 + $0x2c] sm:$0x1] %v5837_v53  ;;  %v5589_v11 = vor.u32 %v5587_v15, %v5586_v41  ;;  %v5590_v25 = vrot.slane %v5586_v41, 4  ;;  %v5592_v57 = vshrl.u32 %v12443_v62, 16  ;;  %v5595_v49 = vshll.u32 %v12443_v62, 16 }
 0x66d   : > { %v5572_v48 = vor.u32 %v5570_v34, %v5569_v7  ;;  %v5573_v2 = vrot.slane %v5569_v7, 4  ;;  %v5575_v47 = vshrl.u32 %v12441_v46, 16  ;;  %v13361_v32 = vpop.f32.mrb[48].mxu1  ;;  %v6023_v9 = vshll.u32 %v5932_v61, 16 }
 0x66e   : > { %v5854_v43 = vsel %vm15424_vm11, %v5589_v11, %v5853_v16  ;;  %v5594_v5 = vrot.slane %v5592_v57, 7  ;;  %v5321_v24 = vpop.f32.mrb[49].mxu1  ;;  %v5578_v45 = vshll.u32 %v12441_v46, 16  ;;  %v12054_v36 = vcombine.low %v5932_v61, %v16149_v63 }
 0x66f   : > { %5855 = vst [vmem:[#allocation3 + $0x48] sm:$0xf] %v5854_v43  ;;  %v5847_v59 = vsel %vm15424_vm11, %v5572_v48, %v5846_v42  ;;  %v5577_v30 = vrot.slane %v5575_v47, 7  ;;  %v13362_v38 = vpop.f32.mrb[50].mxu1  ;;  %v16165_v20 = vrot.slane %v6020_v4, 4  ;;  %v6033_v22 = vshrl.u32 %v16149_v63, 16 }
 0x670   : > { %5848 = vst [vmem:[#allocation3 + $0x3c] sm:$0xf] %v5847_v59  ;;  %v5597_v14 = vor.u32 %v5595_v49, %v5594_v5  ;;  %v5599_v26 = vrot.slane %v5594_v5, 4  ;;  %v5324_v37 = vpop.f32.mrb[51].mxu1  ;;  %v16170_v40 = vrot.slane %v6023_v9, 5  ;;  %13444 = vmatmul.mubr.bf16.vlgmr.msra.gmra.mrb[48].mxu0 %v12054_v36  ;;  %v12446_v50 = vpack.c.bf16 %v13361_v32, %v13361_v32 }
 0x671   : > { %v5580_v28 = vor.u32 %v5578_v45, %v5577_v30  ;;  %v5582_v52 = vrot.slane %v5577_v30, 4  ;;  %v16178_v56 = vrot.slane %v6044_v18, 4  ;;  %v6047_v13 = vshll.u32 %v16136_v17, 16  ;;  %13476 = vmatpush3.bf16.msra.mxu0 %v16092_v44  ;;  %v5936_v29 = vld [vmem:[#allocation3 + $0x24] sm:$0xf]  ;;  %v14490_v18 = vld [vmem:[%s18071_s4 + $0x510] sm:$0xff]  }
 0x672   : > { %v5598_v60 = vsel %vm16113_vm14, %v5590_v25, %v5597_v14  ;;  %v5858_v15 = vsel %vm15417_vm9, %v5599_v26, %v5857_v51  ;;  %v5618_v35 = vshrl.u32 %v12446_v50, 16  ;;  %v6057_v31 = vshrl.u32 %v16168_v19, 16  ;;  %13477 = vmatprep.subr.bf16.mxu0 %v14487_v10  ;;  %v16192_v53 = vld [vmem:[#allocation3 + $0x28] sm:$0xf]  ;;  %v5867_v25 = vld [vmem:[#allocation3 + $0x60] sm:$0xf] }
 0x673   : > { %5856 = vst [vmem:[#allocation3 + $0x4c] sm:$0xf] %v5598_v60  ;;  %5859 = vst [vmem:[#allocation3 + $0x50] sm:$0x1] %v5858_v15  ;;  %v5581_v33 = vsel %vm16113_vm14, %v5573_v2, %v5580_v28  ;;  %v5851_v34 = vsel %vm15417_vm9, %v5582_v52, %v5850_v6  ;;  %v5621_v44 = vshll.u32 %v12446_v50, 16  ;;  %v12055_v41 = vcombine.low %v16136_v17, %v16168_v19  ;;  %v14493_v51 = vld [vmem:[%s18071_s4 + $0x518] sm:$0xff]  }
 0x674   : > { %5849 = vst [vmem:[#allocation3 + $0x40] sm:$0xf] %v5581_v33  ;;  %5852 = vst [vmem:[#allocation3 + $0x44] sm:$0x1] %v5851_v34  ;;  %v12444_v62 = vpack.c.bf16 %v5321_v24, %v5321_v24  ;;  %v12447_v21 = vpack.c.bf16 %v13362_v38, %v13362_v38  ;;  %v5620_v16 = vrot.slane %v5618_v35, 7  ;;  %v12445_v7 = vpack.c.bf16 %v5324_v37, %v5324_v37 }
 0x675   : > { %v6068_v46 = vshrl.u32 %v5936_v29, 16  ;;  %v6071_v61 = vshll.u32 %v5936_v29, 16  ;;  %v13365_v11 = vpop.f32.mrb[52].mxu1  ;;  %v16194_v42 = vrot.slane %v6047_v13, 5  ;;  %13447 = vmatprep.mubr.bf16.mxu0 %v12055_v41  ;;  %13478 = vmatpush3.bf16.msra.mxu0 %v14487_v10  ;;  %v5871_v6 = vld [vmem:[#allocation3 + $0x68] sm:$0x1]  ;;  %v12056_v10 = vcombine.low %v5936_v29, %v16192_v53 }
 0x676   : > { %v5601_v57 = vshrl.u32 %v12444_v62, 16  ;;  %v5604_v48 = vshll.u32 %v12444_v62, 16  ;;  %v5626_v2 = vshrl.u32 %v12447_v21, 16  ;;  %v16196_v49 = vpop.f32.mrb[53].mxu1  ;;  %v5623_v17 = vor.u32 %v5621_v44, %v5620_v16  ;;  %13479 = vmatprep.subr.bf16.mxu0 %v14490_v18  ;;  %v5864_v52 = vld [vmem:[#allocation3 + $0x5c] sm:$0x1] }
 0x677   : > { %v5624_v47 = vrot.slane %v5620_v16, 4  ;;  %v5629_v32 = vshll.u32 %v12447_v21, 16  ;;  %v5609_v43 = vshrl.u32 %v12445_v7, 16  ;;  %v16198_v5 = vpop.f32.mrb[54].mxu1  ;;  %v5612_v24 = vshll.u32 %v12445_v7, 16  ;;  %v14496_v29 = vld [vmem:[%s18071_s4 + $0x520] sm:$0xff]  }
 0x678   : > { %v5603_v4 = vrot.slane %v5601_v57, 7  ;;  %v5628_v9 = vrot.slane %v5626_v2, 7  ;;  %v16203_v59 = vrot.slane %v6068_v46, 4  ;;  %v16205_v30 = vpop.f32.mrb[55].mxu1  ;;  %v5868_v45 = vsel %vm15424_vm11, %v5623_v17, %v5867_v25  ;;  %v5860_v50 = vld [vmem:[#allocation3 + $0x54] sm:$0xf]  ;;  %13448 = vmatmul.mubr.bf16.gmra.mrb[52].mxu0 %v12056_v10 }
 0x679   : > { %v5611_v36 = vrot.slane %v5609_v43, 7  ;;  %v16209_v38 = vrot.slane %v6071_v61, 5  ;;  %5869 = vst [vmem:[#allocation3 + $0x60] sm:$0xf] %v5868_v45  ;;  %13480 = vmatpush3.bf16.msra.mxu0 %v14490_v18  ;;  %v12450_v13 = vpack.c.bf16 %v13365_v11, %v13365_v11  ;;  %v5980_v33 = vld [vmem:[#allocation3 + $0x14] sm:$0x1]  ;;  %v6026_v34 = vor.u32 %v16170_v40, %v16165_v20 }
 0x67a   : > { %v5606_v14 = vor.u32 %v5604_v48, %v5603_v4  ;;  %v5607_v26 = vrot.slane %v5603_v4, 4  ;;  %v5631_v37 = vor.u32 %v5629_v32, %v5628_v9  ;;  %v5633_v28 = vrot.slane %v5628_v9, 4  ;;  %13481 = vmatprep.subr.bf16.mxu0 %v14493_v51  ;;  %v5938_v62 = vld [vmem:[#allocation3 + $0x30] sm:$0xf]  ;;  %v16229_v7 = vld [vmem:[#allocation3 + $0x34] sm:$0xf] }
 0x67b   : > { %v5614_v60 = vor.u32 %v5612_v24, %v5611_v36  ;;  %v5616_v15 = vrot.slane %v5611_v36, 4  ;;  %v6029_v41 = vshll.u32 %v16149_v63, 16  ;;  %v6081_v21 = vshrl.u32 %v16192_v53, 16  ;;  %v14500_v4 = vld [vmem:[%s18071_s4 + $0x528] sm:$0xff]   ;;  %v5881_v9 = vld [vmem:[#allocation3 + $0x78] sm:$0xf] }
 0x67c   : > { %v5861_v35 = vsel %vm15424_vm11, %v5606_v14, %v5860_v50  ;;  %v5632_v18 = vsel %vm16113_vm14, %v5624_v47, %v5631_v37  ;;  %v5872_v44 = vsel %vm15417_vm9, %v5633_v28, %v5871_v6  ;;  %v5652_v16 = vshrl.u32 %v12450_v13, 16  ;;  %v5981_v45 = vld [vmem:[#allocation3 + $0x20] sm:$0x1] }
 0x67d   : > { %5862 = vst [vmem:[#allocation3 + $0x54] sm:$0xf] %v5861_v35  ;;  %5870 = vst [vmem:[#allocation3 + $0x64] sm:$0xf] %v5632_v18  ;;  %v5615_v20 = vsel %vm16113_vm14, %v5607_v26, %v5614_v60  ;;  %v5865_v40 = vsel %vm15417_vm9, %v5616_v15, %v5864_v52  ;;  %v16231_v46 = vpop.f32.mrb[56].mxu1  ;;  %v6027_v61 = vrot.slane %v6026_v34, 4  ;;  %13482 = vmatpush3.bf16.msra.mxu0 %v14493_v51 }
 0x67e   : > { %5873 = vst [vmem:[#allocation3 + $0x68] sm:$0x1] %v5872_v44  ;;  %5863 = vst [vmem:[#allocation3 + $0x58] sm:$0xf] %v5615_v20  ;;  %v6031_v11 = vrot.slane %v6029_v41, 5  ;;  %v6035_v25 = vrot.slane %v6033_v22, 4  ;;  %13483 = vmatprep.subr.bf16.mxu0 %v14496_v29  ;;  %v12057_v51 = vcombine.low %v5938_v62, %v16229_v7  ;;  %v12448_v28 = vpack.c.bf16 %v16196_v49, %v16196_v49 }
 0x67f   : > { %5866 = vst [vmem:[#allocation3 + $0x5c] sm:$0x1] %v5865_v40  ;;  %v6039_v57 = vshll.u32 %v5980_v33, 16  ;;  %v16235_v48 = vpop.f32.mrb[57].mxu1  ;;  %v16237_v2 = vrot.slane %v5652_v16, 7  ;;  %v5655_v17 = vshll.u32 %v12450_v13, 16  ;;  %v6050_v52 = vor.u32 %v16194_v42, %v16178_v56 }
 0x680   : > { %v6092_v47 = vshrl.u32 %v5938_v62, 16  ;;  %v6095_v32 = vshll.u32 %v5938_v62, 16  ;;  %v16239_v43 = vpop.f32.mrb[58].mxu1  ;;  %v6032_v63 = vsel %vm15491_vm13, %v6027_v61, %v6031_v11  ;;  %v6036_v22 = vor.u32 %v6035_v25, %v6031_v11  ;;  %13451 = vmatprep.mubr.bf16.mxu0 %v12057_v51  ;;  %v16265_v34 = vld [vmem:[#allocation3 + $0x3c] sm:$0xf]  ;;  %v14505_v56 = vld [vmem:[%s18071_s4 + $0x530] sm:$0xff]  }
 0x681   : > { %v6105_v24 = vshrl.u32 %v16229_v7, 16  ;;  %v16248_v6 = vpop.f32.mrb[59].mxu1  ;;  %v5657_v36 = vor.u32 %v5655_v17, %v16237_v2  ;;  %v5658_v10 = vrot.slane %v16237_v2, 4  ;;  %v6041_v14 = vrot.slane %v6039_v57, 5  ;;  %13484 = vmatpush3.bf16.msra.mxu0 %v14496_v29  ;;  %v5874_v18 = vld [vmem:[#allocation3 + $0x6c] sm:$0xf] }
 0x682   : > { %v16252_v26 = vrot.slane %v6092_v47, 4  ;;  %v6037_v37 = vrot.slane %v6036_v22, 4  ;;  %v6053_v50 = vshll.u32 %v16168_v19, 16  ;;  %v6059_v15 = vrot.slane %v6057_v31, 4  ;;  %13485 = vmatprep.subr.bf16.mxu0 %v14500_v4  ;;  %v14501_v62 = vld [vmem:[%s18071_s4 + $0x688] sm:$0xff]  }
 0x683   : > { %v5882_v60 = vsel %vm15424_vm11, %v5657_v36, %v5881_v9  ;;  %v6063_v13 = vshll.u32 %v5981_v45, 16  ;;  %v12451_v33 = vpack.c.bf16 %v16198_v5, %v16198_v5  ;;  %v16272_v49 = vrot.slane %v6095_v32, 5  ;;  %v5885_v16 = vld [vmem:[#allocation3 + $0x80] sm:$0x1] }
 0x684   : > { %5883 = vst [vmem:[#allocation3 + $0x78] sm:$0xf] %v5882_v60  ;;  %v6042_v42 = vsel %vm15491_vm13, %v6037_v37, %v6041_v14  ;;  %v5635_v29 = vshrl.u32 %v12448_v28, 16  ;;  %v6051_v19 = vrot.slane %v6050_v52, 4  ;;  %v5638_v35 = vshll.u32 %v12448_v28, 16 }
 0x685   : > { %v12030_v31 = vcombine.low %v6032_v63, %v6042_v42  ;;  %v6055_v44 = vrot.slane %v6053_v50, 5  ;;  %v5660_v5 = vshrl.u32 %v12451_v33, 16  ;;  %v16274_v41 = vpop.f32.mrb[60].mxu1  ;;  %v6065_v40 = vrot.slane %v6063_v13, 5  ;;  %13486 = vmatpush3.bf16.msra.mxu0 %v14500_v4  ;;  %v14509_v63 = vld [vmem:[%s18071_s4 + $0x538] sm:$0xff]   ;;  %v14504_v50 = vld [vmem:[%s18071_s4 + $0x690] sm:$0xff]  }
 0x686   : > { %v5637_v20 = vrot.slane %v5635_v29, 7  ;;  %v12449_v61 = vpack.c.bf16 %v16205_v30, %v16205_v30  ;;  %v6116_v11 = vshrl.u32 %v16265_v34, 16  ;;  %v16282_v25 = vpop.f32.mrb[61].mxu1  ;;  %v5663_v47 = vshll.u32 %v12451_v33, 16  ;;  %13487 = vmatprep.subr.bf16.mxu0 %v14505_v56  ;;  %v16292_v4 = vld [vmem:[#allocation3 + $0x40] sm:$0xf] }
 0x687   : > { %13396 = vmatmul.mubr.bf16.vlgmr.msra.gmra.mrb[68].mxu1 %v12030_v31  ;;  %v6060_v57 = vor.u32 %v6059_v15, %v6055_v44  ;;  %v5662_v17 = vrot.slane %v5660_v5, 7  ;;  %v6119_v32 = vshll.u32 %v16265_v34, 16  ;;  %v16285_v9 = vpop.f32.mrb[62].mxu1  ;;  %v6056_v51 = vsel %vm15491_vm13, %v6051_v19, %v6055_v44  ;;  %v16306_v42 = vld [vmem:[#allocation3 + $0x2c] sm:$0x1] }
 0x688   : > { %v5640_v22 = vor.u32 %v5638_v35, %v5637_v20  ;;  %v5641_v30 = vrot.slane %v5637_v20, 4  ;;  %v5643_v45 = vshrl.u32 %v12449_v61, 16  ;;  %v16294_v36 = vpop.f32.mrb[63].mxu1  ;;  %13867 = vmatpush3.bf16.msra.mxu1 %v16109_v58  ;;  %v5646_v52 = vshll.u32 %v12449_v61, 16  ;;  %v5878_v31 = vld [vmem:[#allocation3 + $0x74] sm:$0x1] }
 0x689   : > { %v6061_v14 = vrot.slane %v6060_v57, 4  ;;  %v5665_v37 = vor.u32 %v5663_v47, %v5662_v17  ;;  %v5667_v28 = vrot.slane %v5662_v17, 4  ;;  %13860 = vmatprep.subr.bf16.mxu1 %v14501_v62  ;;  %v16302_v13 = vrot.slane %v6116_v11, 4  ;;  %13488 = vmatpush3.bf16.msra.mxu0 %v14505_v56  ;;  %v16321_v56 = vld [vmem:[%s18071_s4 + $0x540] sm:$0xff]   ;;  %v5942_v5 = vld [vmem:[#allocation3 + $0x48] sm:$0xf] }
 0x68a   : > { %v5875_v60 = vsel %vm15424_vm11, %v5640_v22, %v5874_v18  ;;  %v5645_v15 = vrot.slane %v5643_v45, 7  ;;  %v16304_v33 = vrot.slane %v6119_v32, 5  ;;  %v12058_v35 = vcombine.low %v16265_v34, %v16292_v4  ;;  %13489 = vmatprep.subr.bf16.mxu0 %v14509_v63  ;;  %v14506_v34 = vld [vmem:[%s18071_s4 + $0x698] sm:$0xff]   ;;  %v16334_v11 = vld [vmem:[#allocation3 + $0x4c] sm:$0xf] }
 0x68b   : > { %5876 = vst [vmem:[#allocation3 + $0x6c] sm:$0xf] %v5875_v60  ;;  %v6066_v58 = vsel %vm15491_vm13, %v6061_v14, %v6065_v40  ;;  %v5666_v29 = vsel %vm16113_vm14, %v5658_v10, %v5665_v37  ;;  %v5886_v19 = vsel %vm15417_vm9, %v5667_v28, %v5885_v16  ;;  %v12454_v10 = vpack.c.bf16 %v16231_v46, %v16231_v46 }
 0x68c   : > { %v12031_v18 = vcombine.low %v6056_v51, %v6066_v58  ;;  %5884 = vst [vmem:[#allocation3 + $0x7c] sm:$0xf] %v5666_v29  ;;  %5887 = vst [vmem:[#allocation3 + $0x80] sm:$0x1] %v5886_v19  ;;  %v5648_v2 = vor.u32 %v5646_v52, %v5645_v15  ;;  %v5650_v44 = vrot.slane %v5645_v15, 4  ;;  %13868 = vmatpush3.bf16.msra.mxu1 %v14501_v62  ;;  %13452 = vmatmul.mubr.bf16.gmra.mrb[56].mxu0 %v12058_v35  ;;  %v14508_v29 = vld [vmem:[%s18071_s4 + $0x6a0] sm:$0xff]  }
 0x68d   : > { %v6074_v20 = vor.u32 %v16209_v38, %v16203_v59  ;;  %v6077_v40 = vshll.u32 %v16192_v53, 16  ;;  %v6083_v16 = vrot.slane %v6081_v21, 4  ;;  %v6087_v61 = vshll.u32 %v16306_v42, 16  ;;  %v16336_v46 = vpop.f32.mrb[64].mxu1  ;;  %13861 = vmatprep.subr.bf16.mxu1 %v14504_v50  ;;  %13490 = vmatpush3.bf16.msra.mxu0 %v14509_v63  ;;  %v5895_v21 = vld [vmem:[#allocation3 + $0x90] sm:$0xf] }
 0x68e   : > { %13399 = vmatprep.mubr.bf16.mxu1 %v12031_v18  ;;  %v5649_v62 = vsel %vm16113_vm14, %v5641_v30, %v5648_v2  ;;  %v5879_v57 = vsel %vm15417_vm9, %v5650_v44, %v5878_v31  ;;  %v6129_v59 = vshrl.u32 %v16292_v4, 16  ;;  %v5686_v38 = vshrl.u32 %v12454_v10, 16  ;;  %v16343_v17 = vpop.f32.mrb[65].mxu1  ;;  %v16345_v51 = vld [vmem:[#allocation3 + $0x38] sm:$0x1]  ;;  %13523 = vmatprep.subr.bf16.mxu0 %v16321_v56 }
 0x68f   : > { %5877 = vst [vmem:[#allocation3 + $0x70] sm:$0xf] %v5649_v62  ;;  %5880 = vst [vmem:[#allocation3 + $0x74] sm:$0x1] %v5879_v57  ;;  %v5689_v53 = vshll.u32 %v12454_v10, 16  ;;  %v6075_v47 = vrot.slane %v6074_v20, 4  ;;  %v12059_v28 = vcombine.low %v5942_v5, %v16334_v11  ;;  %v12452_v58 = vpack.c.bf16 %v16235_v48, %v16235_v48 }
 0x690   : > { %v6079_v32 = vrot.slane %v6077_v40, 5  ;;  %v6140_v22 = vshrl.u32 %v5942_v5, 16  ;;  %v16347_v45 = vpop.f32.mrb[66].mxu1  ;;  %v16350_v30 = vrot.slane %v5686_v38, 7  ;;  %v6089_v14 = vrot.slane %v6087_v61, 5  ;;  %13869 = vmatpush3.bf16.msra.mxu1 %v14504_v50 }
 0x691   : > { %v6143_v37 = vshll.u32 %v5942_v5, 16  ;;  %v16353_v63 = vpop.f32.mrb[67].mxu1  ;;  %v6153_v15 = vshrl.u32 %v16334_v11, 16  ;;  %13862 = vmatprep.subr.bf16.mxu1 %v14506_v34  ;;  %13455 = vmatprep.mubr.bf16.mxu0 %v12059_v28  ;;  %v6098_v50 = vor.u32 %v16272_v49, %v16252_v26  ;;  %v5669_v2 = vshrl.u32 %v12452_v58, 16  ;;  %v16370_v10 = vld [vmem:[#allocation3 + $0x54] sm:$0xf] }
 0x692   : > { %v6080_v52 = vsel %vm15491_vm13, %v6075_v47, %v6079_v32  ;;  %v6084_v60 = vor.u32 %v6083_v16, %v6079_v32  ;;  %v5691_v19 = vor.u32 %v5689_v53, %v16350_v30  ;;  %v5692_v31 = vrot.slane %v16350_v30, 4  ;;  %v5888_v53 = vld [vmem:[#allocation3 + $0x84] sm:$0xf] }
 0x693   : > { %v16365_v35 = vrot.slane %v6140_v22, 4  ;;  %v5672_v44 = vshll.u32 %v12452_v58, 16  ;;  %v6101_v48 = vshll.u32 %v16229_v7, 16  ;;  %v6099_v20 = vrot.slane %v6098_v50, 4  ;;  %v5899_v58 = vld [vmem:[#allocation3 + $0x98] sm:$0x1] }
 0x694   : > { %v6085_v18 = vrot.slane %v6084_v60, 4  ;;  %v5896_v5 = vsel %vm15424_vm11, %v5691_v19, %v5895_v21  ;;  %v6107_v40 = vrot.slane %v6105_v24, 4  ;;  %v6111_v16 = vshll.u32 %v16345_v51, 16  ;;  %13870 = vmatpush3.bf16.msra.mxu1 %v14506_v34  ;;  %v14510_v34 = vld [vmem:[%s18071_s4 + $0x6a8] sm:$0xff]  }
 0x695   : > { %5897 = vst [vmem:[#allocation3 + $0x90] sm:$0xf] %v5896_v5  ;;  %v5671_v49 = vrot.slane %v5669_v2, 7  ;;  %v6103_v61 = vrot.slane %v6101_v48, 5  ;;  %v12455_v62 = vpack.c.bf16 %v16239_v43, %v16239_v43  ;;  %13863 = vmatprep.subr.bf16.mxu1 %v14508_v29  ;;  %v16381_v38 = vrot.slane %v6143_v37, 5 }
 0x696   : > { %v6090_v26 = vsel %vm15491_vm13, %v6085_v18, %v6089_v14  ;;  %v12453_v7 = vpack.c.bf16 %v16248_v6, %v16248_v6  ;;  %v6164_v24 = vshrl.u32 %v16370_v10, 16  ;;  %v6113_v22 = vrot.slane %v6111_v16, 5  ;;  %v16389_v14 = vld [vmem:[#allocation3 + $0x58] sm:$0xf] }
 0x697   : > { %v12032_v57 = vcombine.low %v6080_v52, %v6090_v26  ;;  %v5674_v21 = vor.u32 %v5672_v44, %v5671_v49  ;;  %v5675_v47 = vrot.slane %v5671_v49, 4  ;;  %v6108_v32 = vor.u32 %v6107_v40, %v6103_v61  ;;  %v5892_v44 = vld [vmem:[#allocation3 + $0x8c] sm:$0x1] }
 0x698   : > { %v6104_v43 = vsel %vm15491_vm13, %v6099_v20, %v6103_v61  ;;  %v5694_v37 = vshrl.u32 %v12455_v62, 16  ;;  %v5697_v28 = vshll.u32 %v12455_v62, 16  ;;  %v5677_v52 = vshrl.u32 %v12453_v7, 16  ;;  %13871 = vmatpush3.bf16.msra.mxu1 %v14508_v29  ;;  %v14511_v20 = vld [vmem:[%s18071_s4 + $0x6b0] sm:$0xff]  }
 0x699   : > { %13400 = vmatmul.mubr.bf16.gmra.mrb[72].mxu1 %v12032_v57  ;;  %v5889_v6 = vsel %vm15424_vm11, %v5674_v21, %v5888_v53  ;;  %v6109_v60 = vrot.slane %v6108_v32, 4  ;;  %v5680_v19 = vshll.u32 %v12453_v7, 16  ;;  %v16395_v50 = vrot.slane %v6164_v24, 4  ;;  %13864 = vmatprep.subr.bf16.mxu1 %v14510_v34  ;;  %v16410_v57 = vld [vmem:[#allocation3 + $0x44] sm:$0x1] }
 0x69a   : > { %5890 = vst [vmem:[#allocation3 + $0x84] sm:$0xf] %v5889_v6  ;;  %v5696_v18 = vrot.slane %v5694_v37, 7  ;;  %v5679_v2 = vrot.slane %v5677_v52, 7  ;;  %v6167_v48 = vshll.u32 %v16370_v10, 16  ;;  %v12060_v5 = vcombine.low %v16370_v10, %v16389_v14 }
 0x69b   : > { %v6114_v40 = vsel %vm15491_vm13, %v6109_v60, %v6113_v22  ;;  %v6177_v16 = vshrl.u32 %v16389_v14, 16  ;;  %v12458_v29 = vpack.c.bf16 %v16274_v41, %v16274_v41  ;;  %v6122_v26 = vor.u32 %v16304_v33, %v16302_v13  ;;  %v5946_v53 = vld [vmem:[#allocation3 + $0x60] sm:$0xf]  ;;  %v16412_v22 = vld [vmem:[#allocation3 + $0x64] sm:$0xf] }
 0x69c   : > { %v12033_v49 = vcombine.low %v6104_v43, %v6114_v40  ;;  %v5699_v61 = vor.u32 %v5697_v28, %v5696_v18  ;;  %v5701_v62 = vrot.slane %v5696_v18, 4  ;;  %v5682_v10 = vor.u32 %v5680_v19, %v5679_v2  ;;  %13456 = vmatmul.mubr.bf16.gmra.mrb[60].mxu0 %v12060_v5  ;;  %13872 = vmatpush3.bf16.msra.mxu1 %v14510_v34  ;;  %v5909_v43 = vld [vmem:[#allocation3 + $0xa8] sm:$0xf]  ;;  %v14513_v34 = vld [vmem:[%s18071_s4 + $0x6b8] sm:$0xff]   ;;  %v16439_v5 = vld [vmem:[#allocation3 + $0x50] sm:$0x1] }
 0x69d   : > { %v5684_v7 = vrot.slane %v5679_v2, 4  ;;  %v5720_v24 = vshrl.u32 %v12458_v29, 16  ;;  %v5723_v21 = vshll.u32 %v12458_v29, 16  ;;  %v6123_v32 = vrot.slane %v6122_v26, 4  ;;  %13865 = vmatprep.subr.bf16.mxu1 %v14511_v20 }
 0x69e   : > { %13403 = vmatprep.mubr.bf16.mxu1 %v12033_v49  ;;  %v5700_v41 = vsel %vm16113_vm14, %v5692_v31, %v5699_v61  ;;  %v5900_v13 = vsel %vm15417_vm9, %v5701_v62, %v5899_v58  ;;  %v5683_v33 = vsel %vm16113_vm14, %v5675_v47, %v5682_v10  ;;  %v6125_v37 = vshll.u32 %v16292_v4, 16  ;;  %v5948_v61 = vld [vmem:[#allocation3 + $0x6c] sm:$0xf] }
 0x69f   : > { %5898 = vst [vmem:[#allocation3 + $0x94] sm:$0xf] %v5700_v41  ;;  %5901 = vst [vmem:[#allocation3 + $0x98] sm:$0x1] %v5900_v13  ;;  %v5893_v30 = vsel %vm15417_vm9, %v5684_v7, %v5892_v44  ;;  %v16428_v31 = vrot.slane %v5720_v24, 7  ;;  %v6131_v28 = vrot.slane %v6129_v59, 4  ;;  %v12061_v44 = vcombine.low %v5946_v53, %v16412_v22 }
 0x6a0   : > { %5891 = vst [vmem:[#allocation3 + $0x88] sm:$0xf] %v5683_v33  ;;  %v6135_v47 = vshll.u32 %v16410_v57, 16  ;;  %5894 = vst [vmem:[#allocation3 + $0x8c] sm:$0x1] %v5893_v30  ;;  %v16433_v52 = vrot.slane %v6167_v48, 5  ;;  %13873 = vmatpush3.bf16.msra.mxu1 %v14511_v20  ;;  %v12456_v26 = vpack.c.bf16 %v16282_v25, %v16282_v25  ;;  %v6146_v49 = vor.u32 %v16381_v38, %v16365_v35 }
 0x6a1   : > { %v6127_v6 = vrot.slane %v6125_v37, 5  ;;  %v6188_v60 = vshrl.u32 %v5946_v53, 16  ;;  %v6191_v58 = vshll.u32 %v5946_v53, 16  ;;  %v5725_v19 = vor.u32 %v5723_v21, %v16428_v31  ;;  %13866 = vmatprep.subr.bf16.mxu1 %v14513_v34  ;;  %13459 = vmatprep.mubr.bf16.mxu0 %v12061_v44  ;;  %v16461_v37 = vld [vmem:[#allocation3 + $0x70] sm:$0xf] }
 0x6a2   : > { %v5726_v18 = vrot.slane %v16428_v31, 4  ;;  %v6201_v2 = vshrl.u32 %v16412_v22, 16  ;;  %v6137_v48 = vrot.slane %v6135_v47, 5  ;;  %v6149_v20 = vshll.u32 %v16334_v11, 16  ;;  %v5902_v30 = vld [vmem:[#allocation3 + $0x9c] sm:$0xf] }
 0x6a3   : > { %v6128_v4 = vsel %vm15491_vm13, %v6123_v32, %v6127_v6  ;;  %v6132_v59 = vor.u32 %v6131_v28, %v6127_v6  ;;  %v16443_v40 = vrot.slane %v6188_v60, 4  ;;  %v5910_v29 = vsel %vm15424_vm11, %v5725_v19, %v5909_v43 }
 0x6a4   : > { %5911 = vst [vmem:[#allocation3 + $0xa8] sm:$0xf] %v5910_v29  ;;  %v6155_v10 = vrot.slane %v6153_v15, 4  ;;  %v6159_v53 = vshll.u32 %v16439_v5, 16  ;;  %v12459_v7 = vpack.c.bf16 %v16285_v9, %v16285_v9  ;;  %v16457_v24 = vrot.slane %v6191_v58, 5  ;;  %13874 = vmatpush3.bf16.msra.mxu1 %v14513_v34 }
 0x6a5   : > { %v6133_v62 = vrot.slane %v6132_v59, 4  ;;  %v5703_v21 = vshrl.u32 %v12456_v26, 16  ;;  %v6147_v25 = vrot.slane %v6146_v49, 4  ;;  %v6151_v32 = vrot.slane %v6149_v20, 5  ;;  %v5913_v58 = vld [vmem:[#allocation3 + $0xb0] sm:$0x1] }
 0x6a6   : > { %v5706_v38 = vshll.u32 %v12456_v26, 16  ;;  %v6161_v41 = vrot.slane %v6159_v53, 5  ;;  %v5728_v13 = vshrl.u32 %v12459_v7, 16  ;;  %v5731_v43 = vshll.u32 %v12459_v7, 16  ;;  %v16474_v20 = vld [vmem:[#allocation3 + $0x5c] sm:$0x1] }
 0x6a7   : > { %v6138_v35 = vsel %vm15491_vm13, %v6133_v62, %v6137_v48  ;;  %v5705_v11 = vrot.slane %v5703_v21, 7  ;;  %v6156_v15 = vor.u32 %v6155_v10, %v6151_v32  ;;  %v6152_v9 = vsel %vm15491_vm13, %v6147_v25, %v6151_v32  ;;  %v5906_v21 = vld [vmem:[#allocation3 + $0xa4] sm:$0x1] }
 0x6a8   : > { %v12034_v33 = vcombine.low %v6128_v4, %v6138_v35  ;;  %v5730_v31 = vrot.slane %v5728_v13, 7  ;;  %v12457_v34 = vpack.c.bf16 %v16294_v36, %v16294_v36  ;;  %v6212_v28 = vshrl.u32 %v5948_v61, 16 }
 0x6a9   : > { %v5708_v47 = vor.u32 %v5706_v38, %v5705_v11  ;;  %v5709_v6 = vrot.slane %v5705_v11, 4  ;;  %v6157_v60 = vrot.slane %v6156_v15, 4  ;;  %v6215_v19 = vshll.u32 %v5948_v61, 16 }
 0x6aa   : > { %13404 = vmatmul.mubr.bf16.gmra.mrb[76].mxu1 %v12034_v33  ;;  %v5733_v44 = vor.u32 %v5731_v43, %v5730_v31  ;;  %v5735_v4 = vrot.slane %v5730_v31, 4  ;;  %v5711_v59 = vshrl.u32 %v12457_v34, 16  ;;  %v6225_v48 = vshrl.u32 %v16461_v37, 16 }
 0x6ab   : > { %v5903_v29 = vsel %vm15424_vm11, %v5708_v47, %v5902_v30  ;;  %v6162_v26 = vsel %vm15491_vm13, %v6157_v60, %v6161_v41  ;;  %v5714_v49 = vshll.u32 %v12457_v34, 16  ;;  %v16472_v36 = vrot.slane %v6212_v28, 4  ;;  %v5950_v41 = vld [vmem:[#allocation3 + $0x78] sm:$0xf]  ;;  %v16491_v30 = vld [vmem:[#allocation3 + $0x7c] sm:$0xf] }
 0x6ac   : > { %5904 = vst [vmem:[#allocation3 + $0x9c] sm:$0xf] %v5903_v29  ;;  %v12035_v62 = vcombine.low %v6152_v9, %v6162_v26  ;;  %v5734_v10 = vsel %vm16113_vm14, %v5726_v18, %v5733_v44  ;;  %v5914_v53 = vsel %vm15417_vm9, %v5735_v4, %v5913_v58  ;;  %v5713_v7 = vrot.slane %v5711_v59, 7  ;;  %v5923_v60 = vld [vmem:[#allocation3 + $0xc0] sm:$0xf] }
 0x6ad   : > { %5912 = vst [vmem:[#allocation3 + $0xac] sm:$0xf] %v5734_v10  ;;  %5915 = vst [vmem:[#allocation3 + $0xb0] sm:$0x1] %v5914_v53  ;;  %v12062_v25 = vcombine.low %v5948_v61, %v16461_v37  ;;  %v12462_v32 = vpack.c.bf16 %v16336_v46, %v16336_v46  ;;  %v6170_v35 = vor.u32 %v16433_v52, %v16395_v50  ;;  %v6173_v38 = vshll.u32 %v16389_v14, 16 }
 0x6ae   : > { %13407 = vmatprep.mubr.bf16.mxu1 %v12035_v62  ;;  %v5716_v18 = vor.u32 %v5714_v49, %v5713_v7  ;;  %v5718_v13 = vrot.slane %v5713_v7, 4  ;;  %v6179_v33 = vrot.slane %v6177_v16, 4  ;;  %v6183_v11 = vshll.u32 %v16474_v20, 16  ;;  %v16506_v4 = vld [vmem:[#allocation3 + $0x68] sm:$0x1] }
 0x6af   : > { %v16489_v15 = vrot.slane %v6215_v19, 5  ;;  %13460 = vmatmul.mubr.bf16.gmra.mrb[64].mxu0 %v12062_v25  ;;  %v5754_v61 = vshrl.u32 %v12462_v32, 16  ;;  %v6171_v43 = vrot.slane %v6170_v35, 4  ;;  %v6175_v46 = vrot.slane %v6173_v38, 5 }
 0x6b0   : > { %v5717_v50 = vsel %vm16113_vm14, %v5709_v6, %v5716_v18  ;;  %v5907_v52 = vsel %vm15417_vm9, %v5718_v13, %v5906_v21  ;;  %v5757_v9 = vshll.u32 %v12462_v32, 16  ;;  %v6236_v31 = vshrl.u32 %v5950_v41, 16  ;;  %v5952_v21 = vld [vmem:[#allocation3 + $0x84] sm:$0xf] }
 0x6b1   : > { %5905 = vst [vmem:[#allocation3 + $0xa0] sm:$0xf] %v5717_v50  ;;  %5908 = vst [vmem:[#allocation3 + $0xa4] sm:$0x1] %v5907_v52  ;;  %v16497_v16 = vrot.slane %v5754_v61, 7  ;;  %v6176_v34 = vsel %vm15491_vm13, %v6171_v43, %v6175_v46  ;;  %v6180_v28 = vor.u32 %v6179_v33, %v6175_v46  ;;  %v6185_v47 = vrot.slane %v6183_v11, 5 }
 0x6b2   : > { %v16501_v58 = vrot.slane %v6236_v31, 4  ;;  %v6239_v19 = vshll.u32 %v5950_v41, 16  ;;  %v12063_v6 = vcombine.low %v5950_v41, %v16491_v30  ;;  %v12460_v44 = vpack.c.bf16 %v16343_v17, %v16343_v17  ;;  %v16527_v52 = vld [vmem:[#allocation3 + $0x88] sm:$0xf] }
 0x6b3   : > { %v5759_v59 = vor.u32 %v5757_v9, %v16497_v16  ;;  %v5760_v29 = vrot.slane %v16497_v16, 4  ;;  %v6181_v26 = vrot.slane %v6180_v28, 4  ;;  %v6249_v49 = vshrl.u32 %v16491_v30, 16 }
 0x6b4   : > { %13463 = vmatprep.mubr.bf16.mxu0 %v12063_v6  ;;  %v5737_v62 = vshrl.u32 %v12460_v44, 16  ;;  %v5740_v10 = vshll.u32 %v12460_v44, 16  ;;  %v6194_v53 = vor.u32 %v16457_v24, %v16443_v40  ;;  %v6197_v7 = vshll.u32 %v16412_v22, 16  ;;  %v5916_v24 = vld [vmem:[#allocation3 + $0xb4] sm:$0xf] }
 0x6b5   : > { %v5924_v17 = vsel %vm15424_vm11, %v5759_v59, %v5923_v60  ;;  %v6186_v25 = vsel %vm15491_vm13, %v6181_v26, %v6185_v47  ;;  %v6203_v32 = vrot.slane %v6201_v2, 4  ;;  %v6207_v35 = vshll.u32 %v16506_v4, 16  ;;  %v5927_v47 = vld [vmem:[#allocation3 + $0xc8] sm:$0x1]  ;;  %v5920_v59 = vld [vmem:[#allocation3 + $0xbc] sm:$0x1] }
 0x6b6   : > { %5925 = vst [vmem:[#allocation3 + $0xc0] sm:$0xf] %v5924_v17  ;;  %v12036_v38 = vcombine.low %v6176_v34, %v6186_v25  ;;  %v5739_v41 = vrot.slane %v5737_v62, 7  ;;  %v6195_v18 = vrot.slane %v6194_v53, 4  ;;  %v6199_v13 = vrot.slane %v6197_v7, 5 }
 0x6b7   : > { %v16521_v40 = vrot.slane %v6239_v19, 5  ;;  %v12463_v33 = vpack.c.bf16 %v16347_v45, %v16347_v45  ;;  %v12461_v11 = vpack.c.bf16 %v16353_v63, %v16353_v63  ;;  %v6260_v61 = vshrl.u32 %v5952_v21, 16  ;;  %v16535_v19 = vld [vmem:[#allocation3 + $0x74] sm:$0x1] }
 0x6b8   : > { %13408 = vmatmul.mubr.bf16.gmra.mrb[80].mxu1 %v12036_v38  ;;  %v5742_v43 = vor.u32 %v5740_v10, %v5739_v41  ;;  %v5743_v2 = vrot.slane %v5739_v41, 4  ;;  %v6204_v46 = vor.u32 %v6203_v32, %v6199_v13  ;;  %v6209_v50 = vrot.slane %v6207_v35, 5  ;;  %v5954_v38 = vld [vmem:[#allocation3 + $0x90] sm:$0xf] }
 0x6b9   : > { %v6200_v9 = vsel %vm15491_vm13, %v6195_v18, %v6199_v13  ;;  %v5762_v31 = vshrl.u32 %v12463_v33, 16  ;;  %v5765_v16 = vshll.u32 %v12463_v33, 16  ;;  %v5745_v34 = vshrl.u32 %v12461_v11, 16 }
 0x6ba   : > { %v5917_v45 = vsel %vm15424_vm11, %v5742_v43, %v5916_v24  ;;  %v6205_v28 = vrot.slane %v6204_v46, 4  ;;  %v5748_v63 = vshll.u32 %v12461_v11, 16  ;;  %v16533_v60 = vrot.slane %v6260_v61, 4  ;;  %v16546_v24 = vld [vmem:[#allocation3 + $0x94] sm:$0xf] }
 0x6bb   : > { %5918 = vst [vmem:[#allocation3 + $0xb4] sm:$0xf] %v5917_v45  ;;  %v5764_v6 = vrot.slane %v5762_v31, 7  ;;  %v5747_v44 = vrot.slane %v5745_v34, 7  ;;  %v6263_v26 = vshll.u32 %v5952_v21, 16  ;;  %v12064_v62 = vcombine.low %v5952_v21, %v16527_v52 }
 0x6bc   : > { %v6210_v10 = vsel %vm15491_vm13, %v6205_v28, %v6209_v50  ;;  %v6273_v12 = vshrl.u32 %v16527_v52, 16  ;;  %v6218_v53 = vor.u32 %v16489_v15, %v16472_v36  ;;  %v6221_v7 = vshll.u32 %v16461_v37, 16  ;;  %v16557_v50 = vld [vmem:[#allocation3 + $0x80] sm:$0x1]  ;;  %v16566_v28 = vld [vmem:[#allocation3 + $0x8c] sm:$0x1] }
 0x6bd   : > { %v12037_v17 = vcombine.low %v6200_v9, %v6210_v10  ;;  %v5767_v25 = vor.u32 %v5765_v16, %v5764_v6  ;;  %v5769_v32 = vrot.slane %v5764_v6, 4  ;;  %v5750_v35 = vor.u32 %v5748_v63, %v5747_v44  ;;  %13464 = vmatmul.mubr.bf16.gmra.mrb[68].mxu0 %v12064_v62 }
 0x6be   : > { %v5752_v41 = vrot.slane %v5747_v44, 4  ;;  %v6219_v18 = vrot.slane %v6218_v53, 4  ;;  %v6223_v13 = vrot.slane %v6221_v7, 5  ;;  %v6227_v21 = vrot.slane %v6225_v48, 4  ;;  %v16571_v44 = vld [vmem:[#allocation3 + $0xa0] sm:$0xf] }
 0x6bf   : > { %13411 = vmatprep.mubr.bf16.mxu1 %v12037_v17  ;;  %v5768_v36 = vsel %vm16113_vm14, %v5760_v29, %v5767_v25  ;;  %v5928_v15 = vsel %vm15417_vm9, %v5769_v32, %v5927_v47  ;;  %v5751_v33 = vsel %vm16113_vm14, %v5743_v2, %v5750_v35  ;;  %v6231_v11 = vshll.u32 %v16535_v19, 16  ;;  %v5956_v29 = vld [vmem:[#allocation3 + $0x9c] sm:$0xf] }
 0x6c0   : > { %5926 = vst [vmem:[#allocation3 + $0xc4] sm:$0xf] %v5768_v36  ;;  %5929 = vst [vmem:[#allocation3 + $0xc8] sm:$0x1] %v5928_v15  ;;  %v5921_v48 = vsel %vm15417_vm9, %v5752_v41, %v5920_v59  ;;  %v6265_v61 = vrot.slane %v6263_v26, 5  ;;  %v6228_v43 = vor.u32 %v6227_v21, %v6223_v13  ;;  %v6284_v46 = vshrl.u32 %v5954_v38, 16 }
 0x6c1   : > { %5919 = vst [vmem:[#allocation3 + $0xb8] sm:$0xf] %v5751_v33  ;;  %5922 = vst [vmem:[#allocation3 + $0xbc] sm:$0x1] %v5921_v48  ;;  %v6224_v9 = vsel %vm15491_vm13, %v6219_v18, %v6223_v13  ;;  %v6233_v0 = vrot.slane %v6231_v11, 5  ;;  %v6287_v2 = vshll.u32 %v5954_v38, 16  ;;  %v12065_v31 = vcombine.low %v5954_v38, %v16546_v24 }
 0x6c2   : > { %v6229_v16 = vrot.slane %v6228_v43, 4  ;;  %v6297_v34 = vshrl.u32 %v16546_v24, 16  ;;  %v6242_v8 = vor.u32 %v16521_v40, %v16501_v58  ;;  %v6245_v45 = vshll.u32 %v16491_v30, 16  ;;  %v5958_v40 = vld [vmem:[#allocation3 + $0xa8] sm:$0xf] }
 0x6c3   : > { %v6286_v47 = vrot.slane %v6284_v46, 4  ;;  %13467 = vmatprep.mubr.bf16.mxu0 %v12065_v31  ;;  %v6251_v63 = vrot.slane %v6249_v49, 4  ;;  %v6255_v6 = vshll.u32 %v16557_v50, 16  ;;  %v6308_v59 = vshrl.u32 %v5956_v29, 16  ;;  %v16579_v41 = vld [vmem:[#allocation3 + $0xac] sm:$0xf] }
 0x6c4   : > { %v6234_v26 = vsel %vm15491_vm13, %v6229_v16, %v6233_v0  ;;  %v6243_v62 = vrot.slane %v6242_v8, 4  ;;  %v6247_v10 = vrot.slane %v6245_v45, 5  ;;  %v6311_v58 = vshll.u32 %v5956_v29, 16  ;;  %v16584_v43 = vld [vmem:[#allocation3 + $0x98] sm:$0x1] }
 0x6c5   : > { %v12038_v53 = vcombine.low %v6224_v9, %v6234_v26  ;;  %v6289_v7 = vrot.slane %v6287_v2, 5  ;;  %v6257_v17 = vrot.slane %v6255_v6, 5  ;;  %v6310_v25 = vrot.slane %v6308_v59, 4  ;;  %v5960_v2 = vld [vmem:[#allocation3 + $0xb4] sm:$0xf] }
 0x6c6   : > { %v6248_v32 = vsel %vm15491_vm13, %v6243_v62, %v6247_v10  ;;  %v6252_v49 = vor.u32 %v6251_v63, %v6247_v10  ;;  %v6321_v35 = vshrl.u32 %v16571_v44, 16  ;;  %v12066_v38 = vcombine.low %v5956_v29, %v16571_v44 }
 0x6c7   : > { %13412 = vmatmul.mubr.bf16.gmra.mrb[84].mxu1 %v12038_v53  ;;  %v6266_v18 = vor.u32 %v6265_v61, %v16533_v60  ;;  %v6269_v13 = vshll.u32 %v16527_v52, 16  ;;  %v6275_v21 = vrot.slane %v6273_v12, 4  ;;  %v6279_v36 = vshll.u32 %v16566_v28, 16 }
 0x6c8   : > { %v6253_v15 = vrot.slane %v6252_v49, 4  ;;  %v6313_v33 = vrot.slane %v6311_v58, 5  ;;  %13468 = vmatmul.mubr.bf16.gmra.mrb[72].mxu0 %v12066_v38  ;;  %v6332_v11 = vshrl.u32 %v5958_v40, 16  ;;  %v6335_v48 = vshll.u32 %v5958_v40, 16  ;;  %v16591_v6 = vld [vmem:[#allocation3 + $0xb8] sm:$0xf] }
 0x6c9   : > { %v6267_v46 = vrot.slane %v6266_v18, 4  ;;  %v6271_v9 = vrot.slane %v6269_v13, 5  ;;  %v6345_v29 = vshrl.u32 %v16579_v41, 16  ;;  %v12067_v0 = vcombine.low %v5958_v40, %v16579_v41  ;;  %v16598_v49 = vld [vmem:[#allocation3 + $0xa4] sm:$0x1] }
 0x6ca   : > { %v6258_v60 = vsel %vm15491_vm13, %v6253_v15, %v6257_v17  ;;  %v6281_v12 = vrot.slane %v6279_v36, 5  ;;  %v6334_v61 = vrot.slane %v6332_v11, 4  ;;  %v6290_v31 = vor.u32 %v6289_v7, %v6286_v47  ;;  %v16604_v36 = vld [vmem:[#allocation3 + $0xb0] sm:$0x1] }
 0x6cb   : > { %v12039_v16 = vcombine.low %v6248_v32, %v6258_v60  ;;  %v6276_v8 = vor.u32 %v6275_v21, %v6271_v9  ;;  %v6337_v45 = vrot.slane %v6335_v48, 5  ;;  %13471 = vmatprep.mubr.bf16.mxu0 %v12067_v0  ;;  %v6293_v63 = vshll.u32 %v16546_v24, 16 }
 0x6cc   : > { %v6291_v59 = vrot.slane %v6290_v31, 4  ;;  %v6299_v26 = vrot.slane %v6297_v34, 4  ;;  %v6303_v62 = vshll.u32 %v16584_v43, 16  ;;  %v6356_v10 = vshrl.u32 %v5960_v2, 16 }
 0x6cd   : > { %13415 = vmatprep.mubr.bf16.mxu1 %v12039_v16  ;;  %v6272_v58 = vsel %vm15491_vm13, %v6267_v46, %v6271_v9  ;;  %v6277_v40 = vrot.slane %v6276_v8, 4  ;;  %v6295_v53 = vrot.slane %v6293_v63, 5  ;;  %v6359_v47 = vshll.u32 %v5960_v2, 16 }
 0x6ce   : > { %v6305_v7 = vrot.slane %v6303_v62, 5  ;;  %v6369_v17 = vshrl.u32 %v16591_v6, 16  ;;  %v12068_v32 = vcombine.low %v5960_v2, %v16591_v6  ;;  %v6314_v38 = vor.u32 %v6313_v33, %v6310_v25 }
 0x6cf   : > { %v6282_v34 = vsel %vm15491_vm13, %v6277_v40, %v6281_v12  ;;  %v6296_v18 = vsel %vm15491_vm13, %v6291_v59, %v6295_v53  ;;  %v6300_v13 = vor.u32 %v6299_v26, %v6295_v53  ;;  %v6358_v21 = vrot.slane %v6356_v10, 4  ;;  %v6975_v59 = vld [vmem:[#allocation3 + $0xc] sm:$0xe] }
 0x6d0   : > { %v12040_v15 = vcombine.low %v6272_v58, %v6282_v34  ;;  %13472 = vmatmul.mubr.bf16.gmra.mrb[76].mxu0 %v12068_v32  ;;  %v6315_v11 = vrot.slane %v6314_v38, 4  ;;  %v6317_v48 = vshll.u32 %v16571_v44, 16  ;;  %v6323_v46 = vrot.slane %v6321_v35, 4 }
 0x6d1   : > { %v6301_v9 = vrot.slane %v6300_v13, 4  ;;  %v6327_v0 = vshll.u32 %v16598_v49, 16  ;;  %v6338_v25 = vor.u32 %v6337_v45, %v6334_v61  ;;  %v6341_v33 = vshll.u32 %v16579_v41, 16 }
 0x6d2   : > { %13416 = vmatmul.mubr.bf16.gmra.mrb[88].mxu1 %v12040_v15  ;;  %v6319_v2 = vrot.slane %v6317_v48, 5  ;;  %v6347_v60 = vrot.slane %v6345_v29, 4  ;;  %v6351_v12 = vshll.u32 %v16604_v36, 16  ;;  %v7026_v31 = vrot.slane %v7024_v55, 4  ;;  %v16622_v55 = vld [vmem:[#allocation3 + $0xbc] sm:$0x1] }
 0x6d3   : > { %v6306_v16 = vsel %vm15491_vm13, %v6301_v9, %v6305_v7  ;;  %v6361_v8 = vrot.slane %v6359_v47, 5  ;;  %v6339_v63 = vrot.slane %v6338_v25, 4  ;;  %v6343_v35 = vrot.slane %v6341_v33, 5  ;;  %v14593_v7 = vld [vmem:[#allocation3 + $0x10] sm:$0xf] }
 0x6d4   : > { %v12041_v26 = vcombine.low %v6296_v18, %v6306_v16  ;;  %v6320_v61 = vsel %vm15491_vm13, %v6315_v11, %v6319_v2  ;;  %v6324_v45 = vor.u32 %v6323_v46, %v6319_v2  ;;  %v6329_v62 = vrot.slane %v6327_v0, 5  ;;  %v6976_v25 = vld [vmem:[#allocation3 + $0x18] sm:$0xe]  ;;  %v14595_v16 = vld [vmem:[#allocation3 + $0x1c] sm:$0xf] }
 0x6d5   : > { %v6344_v29 = vsel %vm15491_vm13, %v6339_v63, %v6343_v35  ;;  %v6348_v10 = vor.u32 %v6347_v60, %v6343_v35  ;;  %v6353_v58 = vrot.slane %v6351_v12, 5  ;;  %v7028_v27 = vsel %vm15577_vm15, %v7026_v31, %v7027_v3  ;;  %v14594_v3 = vld [vmem:[#allocation3 + $0x14] sm:$0x1]  ;;  %v10236_v60 = vld [vmem:[#allocation3 + $0x30] sm:$0xe]  ;;  %v14514_v35 = vld [vmem:[%s18071_s4 + $0x548] sm:$0xff]  }
 0x6d6   : > { %13419 = vmatprep.mubr.bf16.mxu1 %v12041_v26  ;;  %v6325_v40 = vrot.slane %v6324_v45, 4  ;;  %v12109_v53 = vcombine.low %v16155_v1, %v7028_v27  ;;  %v12078_v47 = vrot.slane %v6975_v59, 9  ;;  %v7031_v32 = vrot.slane %v14593_v7, 5  ;;  %v9488_v63 = vld [vmem:[#allocation3 + $0x38] sm:$0x1] }
 0x6d7   : > { %v6349_v38 = vrot.slane %v6348_v10, 4  ;;  %v6362_v34 = vor.u32 %v6361_v8, %v6358_v21  ;;  %v6365_v18 = vshll.u32 %v16591_v6, 16  ;;  %v6371_v13 = vrot.slane %v6369_v17, 4  ;;  %v9487_v21 = vld [vmem:[#allocation3 + $0x34] sm:$0xf] }
 0x6d8   : > { %v6330_v39 = vsel %vm15491_vm13, %v6325_v40, %v6329_v62  ;;  %13491 = vmatprep.mubr.bf16.mxu0 %v12109_v53  ;;  %v7033_v15 = vrot.slane %v7031_v32, 4  ;;  %v7034_v11 = vrot.slane %v14594_v3, 5  ;;  %v6375_v48 = vshll.u32 %v16622_v55, 16  ;;  %v6977_v62 = vld [vmem:[#allocation3 + $0x24] sm:$0xe] }
 0x6d9   : > { %v12042_v46 = vcombine.low %v6320_v61, %v6330_v39  ;;  %v6354_v1 = vsel %vm15491_vm13, %v6349_v38, %v6353_v58  ;;  %v6363_v9 = vrot.slane %v6362_v34, 4  ;;  %v6367_v0 = vrot.slane %v6365_v18, 5  ;;  %v14596_v58 = vld [vmem:[#allocation3 + $0x20] sm:$0x1]  ;;  %v6978_v34 = vld [vmem:[#allocation3 + $0x30] sm:$0xe] }
 0x6da   : > { %v12043_v33 = vcombine.low %v6344_v29, %v6354_v1  ;;  %v7032_v17 = vsel %vm15577_vm15, %v12078_v47, %v7031_v32  ;;  %v7035_v2 = vsel %vm15577_vm15, %v7033_v15, %v7034_v11  ;;  %v7038_v8 = vrot.slane %v14595_v16, 5  ;;  %v14597_v32 = vld [vmem:[#allocation3 + $0x28] sm:$0xf]  ;;  %v14598_v15 = vld [vmem:[#allocation3 + $0x34] sm:$0xf] }
 0x6db   : > { %13420 = vmatmul.mubr.bf16.gmra.mrb[92].mxu1 %v12042_v46  ;;  %v12110_v12 = vcombine.low %v7032_v17, %v7035_v2  ;;  %v6372_v31 = vor.u32 %v6371_v13, %v6367_v0  ;;  %v6368_v59 = vsel %vm15491_vm13, %v6363_v9, %v6367_v0  ;;  %v6377_v26 = vrot.slane %v6375_v48, 5  ;;  %v9490_v11 = vld [vmem:[#allocation3 + $0x40] sm:$0xf]  ;;  %v14515_v48 = vld [vmem:[%s18071_s4 + $0x550] sm:$0xff]   ;;  %v9493_v0 = vld [vmem:[#allocation3 + $0x4c] sm:$0xf] }
 0x6dc   : > { %13423 = vmatprep.mubr.bf16.mxu1 %v12043_v33  ;;  %v12079_v61 = vrot.slane %v6976_v25, 9  ;;  %v10314_v45 = vrot.slane %v9487_v21, 5  ;;  %v7040_v10 = vrot.slane %v7038_v8, 4  ;;  %v7041_v27 = vrot.slane %v14596_v58, 5  ;;  %v9491_v2 = vld [vmem:[#allocation3 + $0x44] sm:$0x1] }
 0x6dd   : > { %13492 = vmatmul.mubr.bf16.vlgmr.msra.gmra.mrb[48].mxu0 %v12110_v12  ;;  %v6373_v29 = vrot.slane %v6372_v31, 4  ;;  %v12351_v40 = vrot.slane %v10236_v60, 9  ;;  %v10317_v7 = vrot.slane %v9488_v63, 5  ;;  %v7045_v38 = vrot.slane %v14597_v32, 5  ;;  %v10237_v31 = vld [vmem:[#allocation3 + $0x3c] sm:$0xe] }
 0x6de   : > { %v7039_v53 = vsel %vm15577_vm15, %v12079_v61, %v7038_v8  ;;  %v10316_v47 = vrot.slane %v10314_v45, 4  ;;  %13524 = vmatpush3.bf16.msra.mxu0 %v16321_v56  ;;  %v7042_v13 = vsel %vm15577_vm15, %v7040_v10, %v7041_v27  ;;  %v12080_v39 = vrot.slane %v6977_v62, 9  ;;  %v9494_v8 = vld [vmem:[#allocation3 + $0x50] sm:$0x1]  ;;  %v14599_v32 = vld [vmem:[#allocation3 + $0x40] sm:$0xf] }
 0x6df   : > { %v6378_v18 = vsel %vm15491_vm13, %v6373_v29, %v6377_v26  ;;  %v7052_v3 = vrot.slane %v14598_v15, 5  ;;  %13525 = vmatprep.subr.bf16.mxu0 %v14514_v35  ;;  %v12111_v56 = vcombine.low %v7039_v53, %v7042_v13  ;;  %v10315_v1 = vsel %vm15577_vm15, %v12351_v40, %v10314_v45  ;;  %v10238_v26 = vld [vmem:[#allocation3 + $0x48] sm:$0xe]  ;;  %v14516_v29 = vld [vmem:[%s18071_s4 + $0x558] sm:$0xff]   ;;  %v14600_v15 = vld [vmem:[#allocation3 + $0x4c] sm:$0xf] }
 0x6e0   : > { %v12044_v46 = vcombine.low %v6368_v59, %v6378_v18  ;;  %v10318_v9 = vsel %vm15577_vm15, %v10316_v47, %v10317_v7  ;;  %v7047_v25 = vrot.slane %v7045_v38, 4  ;;  %v7048_v21 = vrot.slane %v16306_v42, 5  ;;  %v6979_v53 = vld [vmem:[#allocation3 + $0x3c] sm:$0xe] }
 0x6e1   : > { %v12081_v33 = vrot.slane %v6978_v34, 9  ;;  %v7054_v17 = vrot.slane %v7052_v3, 4  ;;  %13495 = vmatprep.mubr.bf16.mxu0 %v12111_v56  ;;  %v12383_v60 = vcombine.low %v10315_v1, %v10318_v9  ;;  %v7055_v12 = vrot.slane %v16345_v51, 5  ;;  %v9496_v34 = vld [vmem:[#allocation3 + $0x58] sm:$0xf] }
 0x6e2   : > { %v10321_v16 = vrot.slane %v9490_v11, 5  ;;  %13526 = vmatpush3.bf16.msra.mxu0 %v14514_v35  ;;  %v7046_v63 = vsel %vm15577_vm15, %v12080_v39, %v7045_v38  ;;  %v7049_v59 = vsel %vm15577_vm15, %v7047_v25, %v7048_v21  ;;  %v10328_v61 = vrot.slane %v9493_v0, 5  ;;  %v6980_v39 = vld [vmem:[#allocation3 + $0x48] sm:$0xe]  ;;  %v9499_v11 = vld [vmem:[#allocation3 + $0x64] sm:$0xf] }
 0x6e3   : > { %13424 = vmatmul.mubr.bf16.gmra.mrb[96].mxu1 %v12044_v46  ;;  %v7053_v42 = vsel %vm15577_vm15, %v12081_v33, %v7052_v3  ;;  %13527 = vmatprep.subr.bf16.mxu0 %v14515_v48  ;;  %v12112_v45 = vcombine.low %v7046_v63, %v7049_v59  ;;  %v7056_v51 = vsel %vm15577_vm15, %v7054_v17, %v7055_v12  ;;  %v10324_v35 = vrot.slane %v9491_v2, 5  ;;  %v14517_v0 = vld [vmem:[%s18071_s4 + $0x560] sm:$0xff]   ;;  %v9497_v17 = vld [vmem:[#allocation3 + $0x5c] sm:$0x1] }
 0x6e4   : > { %13783 = vmatprep.mubr.bf16.mxu1 %v12383_v60  ;;  %v10323_v62 = vrot.slane %v10321_v16, 4  ;;  %v12113_v10 = vcombine.low %v7053_v42, %v7056_v51  ;;  %v12352_v58 = vrot.slane %v10237_v31, 9  ;;  %v10330_v27 = vrot.slane %v10328_v61, 4  ;;  %v10240_v60 = vld [vmem:[#allocation3 + $0x60] sm:$0xe] }
 0x6e5   : > { %v10331_v40 = vrot.slane %v9494_v8, 5  ;;  %13496 = vmatmul.mubr.bf16.gmra.mrb[52].mxu0 %v12112_v45  ;;  %v12353_v7 = vrot.slane %v10238_v26, 9  ;;  %v7059_v38 = vrot.slane %v14599_v32, 5  ;;  %v7066_v3 = vrot.slane %v14600_v15, 5  ;;  %v9500_v8 = vld [vmem:[#allocation3 + $0x68] sm:$0x1] }
 0x6e6   : > { %v10325_v47 = vsel %vm15577_vm15, %v10323_v62, %v10324_v35  ;;  %13499 = vmatprep.mubr.bf16.mxu0 %v12113_v10  ;;  %v10322_v18 = vsel %vm15577_vm15, %v12352_v58, %v10321_v16  ;;  %13528 = vmatpush3.bf16.msra.mxu0 %v14515_v48  ;;  %v12082_v56 = vrot.slane %v6979_v53, 9  ;;  %v7062_v9 = vrot.slane %v16410_v57, 5  ;;  %v10239_v16 = vld [vmem:[#allocation3 + $0x54] sm:$0xe]  ;;  %v14518_v26 = vld [vmem:[%s18071_s4 + $0x568] sm:$0xff]  }
 0x6e7   : > { %v10332_v13 = vsel %vm15577_vm15, %v10330_v27, %v10331_v40  ;;  %v10329_v46 = vsel %vm15577_vm15, %v12353_v7, %v10328_v61  ;;  %v7061_v1 = vrot.slane %v7059_v38, 4  ;;  %13529 = vmatprep.subr.bf16.mxu0 %v14516_v29  ;;  %v12384_v25 = vcombine.low %v10322_v18, %v10325_v47  ;;  %v6981_v35 = vld [vmem:[#allocation3 + $0x54] sm:$0xe]  ;;  %v16697_v7 = vld [vmem:[#allocation3 + $0x7c] sm:$0xf] }
 0x6e8   : > { %v7068_v21 = vrot.slane %v7066_v3, 4  ;;  %v7069_v33 = vrot.slane %v16439_v5, 5  ;;  %v10335_v2 = vrot.slane %v9496_v34, 5  ;;  %v12385_v48 = vcombine.low %v10329_v46, %v10332_v13  ;;  %v16686_v5 = vld [vmem:[#allocation3 + $0x70] sm:$0xf] }
 0x6e9   : > { %v7063_v12 = vsel %vm15577_vm15, %v7061_v1, %v7062_v9  ;;  %v12083_v31 = vrot.slane %v6980_v39, 9  ;;  %v10342_v57 = vrot.slane %v9499_v11, 5  ;;  %v7060_v63 = vsel %vm15577_vm15, %v12082_v56, %v7059_v38  ;;  %v14519_v11 = vld [vmem:[%s18071_s4 + $0x570] sm:$0xff]   ;;  %v10241_v9 = vld [vmem:[#allocation3 + $0x6c] sm:$0xe] }
 0x6ea   : > { %v7070_v59 = vsel %vm15577_vm15, %v7068_v21, %v7069_v33  ;;  %v10337_v42 = vrot.slane %v10335_v2, 4  ;;  %13530 = vmatpush3.bf16.msra.mxu0 %v14516_v29  ;;  %v12114_v61 = vcombine.low %v7060_v63, %v7063_v12  ;;  %v10338_v51 = vrot.slane %v9497_v17, 5  ;;  %v9503_v1 = vld [vmem:[#allocation3 + $0x74] sm:$0x1]  ;;  %v14521_v12 = vld [vmem:[%s18071_s4 + $0x578] sm:$0xff]  }
 0x6eb   : > { %13784 = vmatmul.mubr.bf16.vlgmr.msra.gmra.mrb[100].mxu1 %v12384_v25  ;;  %v7067_v45 = vsel %vm15577_vm15, %v12083_v31, %v7066_v3  ;;  %v10344_v62 = vrot.slane %v10342_v57, 4  ;;  %13531 = vmatprep.subr.bf16.mxu0 %v14517_v0  ;;  %v12354_v58 = vrot.slane %v10239_v16, 9  ;;  %v10345_v27 = vrot.slane %v9500_v8, 5  ;;  %v9506_v3 = vld [vmem:[#allocation3 + $0x80] sm:$0x1] }
 0x6ec   : > { %13787 = vmatprep.mubr.bf16.mxu1 %v12385_v48  ;;  %v12115_v10 = vcombine.low %v7067_v45, %v7070_v59  ;;  %v7073_v40 = vrot.slane %v16389_v14, 5  ;;  %v10339_v29 = vsel %vm15577_vm15, %v10337_v42, %v10338_v51  ;;  %v12355_v53 = vrot.slane %v10240_v60, 9  ;;  %v6982_v14 = vld [vmem:[#allocation3 + $0x60] sm:$0xe]  ;;  %v16726_v59 = vld [vmem:[#allocation3 + $0x94] sm:$0xf] }
 0x6ed   : > { %13500 = vmatmul.mubr.bf16.gmra.mrb[56].mxu0 %v12114_v61  ;;  %v7080_v47 = vrot.slane %v16412_v22, 5  ;;  %v10336_v32 = vsel %vm15577_vm15, %v12354_v58, %v10335_v2  ;;  %v10346_v38 = vsel %vm15577_vm15, %v10344_v62, %v10345_v27  ;;  %v7076_v18 = vrot.slane %v16474_v20, 5  ;;  %v16716_v2 = vld [vmem:[#allocation3 + $0x88] sm:$0xf]  ;;  %v6984_v61 = vld [vmem:[#allocation3 + $0x78] sm:$0xe] }
 0x6ee   : > { %13503 = vmatprep.mubr.bf16.mxu0 %v12115_v10  ;;  %v7075_v34 = vrot.slane %v7073_v40, 4  ;;  %13532 = vmatpush3.bf16.msra.mxu0 %v14517_v0  ;;  %v10343_v13 = vsel %vm15577_vm15, %v12355_v53, %v10342_v57  ;;  %v7083_v22 = vrot.slane %v16506_v4, 5  ;;  %v10349_v15 = vrot.slane %v16686_v5, 5  ;;  %v10242_v0 = vld [vmem:[#allocation3 + $0x78] sm:$0xe] }
 0x6ef   : > { %v7082_v39 = vrot.slane %v7080_v47, 4  ;;  %13533 = vmatprep.subr.bf16.mxu0 %v14518_v26  ;;  %v12386_v46 = vcombine.low %v10336_v32, %v10339_v29  ;;  %v12084_v56 = vrot.slane %v6981_v35, 9  ;;  %v10356_v25 = vrot.slane %v16697_v7, 5  ;;  %v6983_v57 = vld [vmem:[#allocation3 + $0x6c] sm:$0xe] }
 0x6f0   : > { %v7077_v20 = vsel %vm15577_vm15, %v7075_v34, %v7076_v18  ;;  %v12387_v21 = vcombine.low %v10343_v13, %v10346_v38  ;;  %v12085_v4 = vrot.slane %v6982_v14, 9  ;;  %v10351_v17 = vrot.slane %v10349_v15, 4  ;;  %v10243_v10 = vld [vmem:[#allocation3 + $0x84] sm:$0xe]  ;;  %v9512_v7 = vld [vmem:[#allocation3 + $0x98] sm:$0x1] }
 0x6f1   : > { %v7084_v33 = vsel %vm15577_vm15, %v7082_v39, %v7083_v22  ;;  %v7074_v60 = vsel %vm15577_vm15, %v12084_v56, %v7073_v40  ;;  %v10358_v48 = vrot.slane %v10356_v25, 4  ;;  %v10352_v8 = vrot.slane %v9503_v1, 5  ;;  %v9509_v40 = vld [vmem:[#allocation3 + $0x8c] sm:$0x1]  ;;  %v10244_v14 = vld [vmem:[#allocation3 + $0x90] sm:$0xe] }
 0x6f2   : > { %13534 = vmatpush3.bf16.msra.mxu0 %v14518_v26  ;;  %v12116_v31 = vcombine.low %v7074_v60, %v7077_v20  ;;  %v7081_v16 = vsel %vm15577_vm15, %v12085_v4, %v7080_v47  ;;  %v7087_v63 = vrot.slane %v16461_v37, 5  ;;  %v10359_v5 = vrot.slane %v9506_v3, 5  ;;  %v16748_v13 = vld [vmem:[#allocation3 + $0xa0] sm:$0xf]  ;;  %v16752_v3 = vld [vmem:[#allocation3 + $0xac] sm:$0xf] }
 0x6f3   : > { %13788 = vmatmul.mubr.bf16.gmra.mrb[104].mxu1 %v12386_v46  ;;  %13535 = vmatprep.subr.bf16.mxu0 %v14519_v11  ;;  %v12117_v42 = vcombine.low %v7081_v16, %v7084_v33  ;;  %v7094_v26 = vrot.slane %v16491_v30, 5  ;;  %v12356_v45 = vrot.slane %v10241_v9, 9  ;;  %v10353_v51 = vsel %vm15577_vm15, %v10351_v17, %v10352_v8  ;;  %v16738_v30 = vld [vmem:[%s18071_s4 + $0x580] sm:$0xff]  }
 0x6f4   : > { %13791 = vmatprep.mubr.bf16.mxu1 %v12387_v21  ;;  %v12357_v62 = vrot.slane %v10242_v0, 9  ;;  %v7089_v35 = vrot.slane %v7087_v63, 4  ;;  %v10360_v37 = vsel %vm15577_vm15, %v10358_v48, %v10359_v5  ;;  %v7090_v58 = vrot.slane %v16535_v19, 5  ;;  %v6985_v60 = vld [vmem:[#allocation3 + $0x84] sm:$0xe] }
 0x6f5   : > { %13504 = vmatmul.mubr.bf16.gmra.mrb[60].mxu0 %v12116_v31  ;;  %v7096_v27 = vrot.slane %v7094_v26, 4  ;;  %v10363_v29 = vrot.slane %v16716_v2, 5  ;;  %v10350_v53 = vsel %vm15577_vm15, %v12356_v45, %v10349_v15  ;;  %v7097_v47 = vrot.slane %v16557_v50, 5  ;;  %v9515_v45 = vld [vmem:[#allocation3 + $0xa4] sm:$0x1] }
 0x6f6   : > { %13507 = vmatprep.mubr.bf16.mxu0 %v12117_v42  ;;  %13536 = vmatpush3.bf16.msra.mxu0 %v14519_v11  ;;  %v10370_v32 = vrot.slane %v16726_v59, 5  ;;  %v12388_v19 = vcombine.low %v10350_v53, %v10353_v51  ;;  %v10357_v38 = vsel %vm15577_vm15, %v12357_v62, %v10356_v25  ;;  %v12086_v34 = vrot.slane %v6983_v57, 9  ;;  %v6986_v25 = vld [vmem:[#allocation3 + $0x90] sm:$0xe]  ;;  %v10245_v59 = vld [vmem:[#allocation3 + $0x9c] sm:$0xe] }
 0x6f7   : > { %13537 = vmatprep.subr.bf16.mxu0 %v14521_v12  ;;  %v7091_v18 = vsel %vm15577_vm15, %v7089_v35, %v7090_v58  ;;  %v12389_v39 = vcombine.low %v10357_v38, %v10360_v37  ;;  %v12087_v22 = vrot.slane %v6984_v61, 9  ;;  %v7098_v50 = vsel %vm15577_vm15, %v7096_v27, %v7097_v47  ;;  %v10246_v51 = vld [vmem:[#allocation3 + $0xa8] sm:$0xe] }
 0x6f8   : > { %v10365_v15 = vrot.slane %v10363_v29, 4  ;;  %v7088_v11 = vsel %vm15577_vm15, %v12086_v34, %v7087_v63  ;;  %v12358_v46 = vrot.slane %v10243_v10, 9  ;;  %v10372_v56 = vrot.slane %v10370_v32, 4  ;;  %v9518_v10 = vld [vmem:[#allocation3 + $0xb0] sm:$0x1] }
 0x6f9   : > { %v7101_v20 = vrot.slane %v16527_v52, 5  ;;  %v12118_v1 = vcombine.low %v7088_v11, %v7091_v18  ;;  %v7095_v9 = vsel %vm15577_vm15, %v12087_v22, %v7094_v26  ;;  %v10366_v0 = vrot.slane %v9509_v40, 5  ;;  %v9520_v40 = vld [vmem:[#allocation3 + $0xb8] sm:$0xf] }
 0x6fa   : > { %13538 = vmatpush3.bf16.msra.mxu0 %v14521_v12  ;;  %v7108_v21 = vrot.slane %v16546_v24, 5  ;;  %v12119_v4 = vcombine.low %v7095_v9, %v7098_v50  ;;  %v10373_v33 = vrot.slane %v9512_v7, 5  ;;  %v12359_v52 = vrot.slane %v10244_v14, 9  ;;  %v9523_v7 = vld [vmem:[#allocation3 + $0xc4] sm:$0xf] }
 0x6fb   : > { %13792 = vmatmul.mubr.bf16.gmra.mrb[108].mxu1 %v12388_v19  ;;  %13571 = vmatprep.subr.bf16.mxu0 %v16738_v30  ;;  %v7103_v17 = vrot.slane %v7101_v20, 4  ;;  %v10367_v2 = vsel %vm15577_vm15, %v10365_v15, %v10366_v0  ;;  %v10377_v12 = vrot.slane %v16748_v13, 5  ;;  %v7104_v24 = vrot.slane %v16566_v28, 5  ;;  %v6987_v14 = vld [vmem:[#allocation3 + $0x9c] sm:$0xe] }
 0x6fc   : > { %13795 = vmatprep.mubr.bf16.mxu1 %v12389_v39  ;;  %v7110_v48 = vrot.slane %v7108_v21, 4  ;;  %v10374_v31 = vsel %vm15577_vm15, %v10372_v56, %v10373_v33  ;;  %v10384_v16 = vrot.slane %v16752_v3, 5  ;;  %v10364_v8 = vsel %vm15577_vm15, %v12358_v46, %v10363_v29  ;;  %v6988_v50 = vld [vmem:[#allocation3 + $0xa8] sm:$0xe]  ;;  %v9521_v9 = vld [vmem:[#allocation3 + $0xbc] sm:$0x1] }
 0x6fd   : > { %13508 = vmatmul.mubr.bf16.gmra.mrb[64].mxu0 %v12118_v1  ;;  %v10371_v57 = vsel %vm15577_vm15, %v12359_v52, %v10370_v32  ;;  %v7111_v63 = vrot.slane %v16584_v43, 5  ;;  %v12390_v42 = vcombine.low %v10364_v8, %v10367_v2  ;;  %v12088_v5 = vrot.slane %v6985_v60, 9  ;;  %v9524_v33 = vld [vmem:[#allocation3 + $0xc8] sm:$0x1] }
 0x6fe   : > { %13511 = vmatprep.mubr.bf16.mxu0 %v12119_v4  ;;  %v7105_v61 = vsel %vm15577_vm15, %v7103_v17, %v7104_v24  ;;  %v12089_v26 = vrot.slane %v6986_v25, 9  ;;  %v12391_v28 = vcombine.low %v10371_v57, %v10374_v31  ;;  %v10379_v35 = vrot.slane %v10377_v12, 4  ;;  %v6989_v57 = vld [vmem:[#allocation3 + $0xb4] sm:$0xe] }
 0x6ff   : > { %v7112_v62 = vsel %vm15577_vm15, %v7110_v48, %v7111_v63  ;;  %v7115_v37 = vrot.slane %v16571_v44, 5  ;;  %v7102_v43 = vsel %vm15577_vm15, %v12088_v5, %v7101_v20  ;;  %v10386_v58 = vrot.slane %v10384_v16, 4 }
 0x700   : > { %v7122_v27 = vrot.slane %v16579_v41, 5  ;;  %v12120_v29 = vcombine.low %v7102_v43, %v7105_v61  ;;  %v7109_v53 = vsel %vm15577_vm15, %v12089_v26, %v7108_v21  ;;  %v10380_v47 = vrot.slane %v9515_v45, 5  ;;  %v14523_v43 = vld [vmem:[#allocation3 + $0x24] sm:$0xff]  }
 0x701   : > { %v12121_v32 = vcombine.low %v7109_v53, %v7112_v62  ;;  %v12360_v19 = vrot.slane %v10245_v59, 9  ;;  %v10387_v38 = vrot.slane %v9518_v10, 5  ;;  %v7117_v34 = vrot.slane %v7115_v37, 4  ;;  %v14520_v10 = vld [vmem:[#allocation3 + $0xc] sm:$0xff]   ;;  %v14533_v53 = vld [vmem:[%s18071_s4 + $0x598] sm:$0xff]  }
 0x702   : > { %v10381_v44 = vsel %vm15577_vm15, %v10379_v35, %v10380_v47  ;;  %v12361_v18 = vrot.slane %v10246_v51, 9  ;;  %v7124_v13 = vrot.slane %v7122_v27, 4  ;;  %v10391_v41 = vrot.slane %v9520_v40, 5  ;;  %v7843_v40 = vld [vmem:[#allocation3 + $0x10] sm:$0xf] }
 0x703   : > { %13796 = vmatmul.mubr.bf16.gmra.mrb[112].mxu1 %v12390_v42  ;;  %v10388_v39 = vsel %vm15577_vm15, %v10386_v58, %v10387_v38  ;;  %v7118_v22 = vrot.slane %v16598_v49, 5  ;;  %v10398_v15 = vrot.slane %v9523_v7, 5  ;;  %v10378_v3 = vsel %vm15577_vm15, %v12360_v19, %v10377_v12  ;;  %v14530_v58 = vld [vmem:[%s18071_s4 + $0x590] sm:$0xff]   ;;  %v7845_v47 = vld [vmem:[#allocation3 + $0x18] sm:$0xf]  ;;  %v14526_v7 = vld [vmem:[#allocation3 + $0x3c] sm:$0xff]  }
 0x704   : > { %13799 = vmatprep.mubr.bf16.mxu1 %v12391_v28  ;;  %v10385_v11 = vsel %vm15577_vm15, %v12361_v18, %v10384_v16  ;;  %v7125_v46 = vrot.slane %v16604_v36, 5  ;;  %v12392_v56 = vcombine.low %v10378_v3, %v10381_v44  ;;  %v12090_v20 = vrot.slane %v6987_v14, 9  ;;  %v10247_v36 = vld [vmem:[#allocation3 + $0xb4] sm:$0xe]  ;;  %v14536_v14 = vld [vmem:[%s18071_s4 + $0x5a0] sm:$0xff]  }
 0x705   : > { %13512 = vmatmul.mubr.bf16.gmra.mrb[68].mxu0 %v12120_v29  ;;  %v7119_v1 = vsel %vm15577_vm15, %v7117_v34, %v7118_v22  ;;  %v7129_v0 = vrot.slane %v16591_v6, 5  ;;  %v12393_v25 = vcombine.low %v10385_v11, %v10388_v39  ;;  %v12091_v49 = vrot.slane %v6988_v50, 9  ;;  %v10248_v6 = vld [vmem:[#allocation3 + $0xc0] sm:$0xe]  ;;  %v14525_v29 = vld [vmem:[#allocation3 + $0x30] sm:$0xff]  }
 0x706   : > { %13515 = vmatprep.mubr.bf16.mxu0 %v12121_v32  ;;  %v7126_v21 = vsel %vm15577_vm15, %v7124_v13, %v7125_v46  ;;  %v10393_v4 = vrot.slane %v10391_v41, 4  ;;  %v7116_v17 = vsel %vm15577_vm15, %v12090_v20, %v7115_v37  ;;  %v10400_v2 = vrot.slane %v10398_v15, 4  ;;  %v14527_v37 = vld [vmem:[%s18071_s4 + $0x588] sm:$0xff]   ;;  %v7846_v34 = vld [vmem:[#allocation3 + $0x1c] sm:$0xf]  ;;  %v14529_v20 = vld [vmem:[#allocation3 + $0x54] sm:$0xff]  }
 0x707   : > { %v12122_v52 = vcombine.low %v7116_v17, %v7119_v1  ;;  %v7123_v60 = vsel %vm15577_vm15, %v12091_v49, %v7122_v27  ;;  %v10394_v48 = vrot.slane %v9521_v9, 5  ;;  %v10401_v31 = vrot.slane %v9524_v33, 5  ;;  %v7842_v27 = vld [vmem:[#allocation3 + $0xc] sm:$0xf]  ;;  %v7848_v1 = vld [vmem:[#allocation3 + $0x24] sm:$0xf] }
 0x708   : > { %v12123_v12 = vcombine.low %v7123_v60, %v7126_v21  ;;  %v7131_v24 = vrot.slane %v7129_v0, 4  ;;  %v12362_v16 = vrot.slane %v10247_v36, 9  ;;  %v12363_v63 = vrot.slane %v10248_v6, 9  ;;  %v14528_v46 = vld [vmem:[#allocation3 + $0x48] sm:$0xff]   ;;  %v16833_v9 = vld [vmem:[#allocation3 + $0x14] sm:$0x1] }
 0x709   : > { %v10395_v8 = vsel %vm15577_vm15, %v10393_v4, %v10394_v48  ;;  %v10402_v59 = vsel %vm15577_vm15, %v10400_v2, %v10401_v31  ;;  %v7132_v42 = vrot.slane %v16622_v55, 5  ;;  %v12092_v45 = vrot.slane %v6989_v57, 9  ;;  %v14522_v55 = vld [vmem:[#allocation3 + $0x18] sm:$0xff]   ;;  %v16838_v21 = vld [vmem:[#allocation3 + $0x20] sm:$0x1]  ;;  %v14542_v36 = vld [vmem:[%s18071_s4 + $0x5b0] sm:$0xff]  }
 0x70a   : > { %v10392_v5 = vsel %vm15577_vm15, %v12362_v16, %v10391_v41  ;;  %v10399_v26 = vsel %vm15577_vm15, %v12363_v63, %v10398_v15  ;;  %v7891_v32 = vshrl.u32 %v7842_v27, 16  ;;  %v7894_v19 = vshll.u32 %v7842_v27, 16  ;;  %v14531_v16 = vld [vmem:[#allocation3 + $0x60] sm:$0xff]  }
 0x70b   : > { %13800 = vmatmul.mubr.bf16.gmra.mrb[116].mxu1 %v12392_v56  ;;  %v12394_v61 = vcombine.low %v10392_v5, %v10395_v8  ;;  %v7133_v51 = vsel %vm15577_vm15, %v7131_v24, %v7132_v42  ;;  %v12395_v28 = vcombine.low %v10399_v26, %v10402_v59  ;;  %v7130_v62 = vsel %vm15577_vm15, %v12092_v45, %v7129_v0  ;;  %v14539_v56 = vld [vmem:[%s18071_s4 + $0x5a8] sm:$0xff]   ;;  %v14544_v42 = vld [vmem:[%s18071_s4 + $0x5b8] sm:$0xff]  }
 0x70c   : > { %13803 = vmatprep.mubr.bf16.mxu1 %v12393_v25  ;;  %v12124_v35 = vcombine.low %v7130_v62, %v7133_v51  ;;  %v7904_v38 = vshrl.u32 %v7843_v40, 16  ;;  %v7915_v44 = vshrl.u32 %v7845_v47, 16  ;;  %v7918_v18 = vshll.u32 %v7845_v47, 16  ;;  %v16835_v25 = vld [vmem:[#allocation3 + $0x28] sm:$0xf]  ;;  %v14532_v8 = vld [vmem:[#allocation3 + $0x6c] sm:$0xff]  }
 0x70d   : > { %13516 = vmatmul.mubr.bf16.gmra.mrb[72].mxu0 %v12122_v52  ;;  %v7893_v13 = vrot.slane %v7891_v32, 4  ;;  %v7896_v41 = vrot.slane %v7894_v19, 5  ;;  %v7924_v22 = vshll.u32 %v7846_v34, 16  ;;  %v7928_v11 = vshrl.u32 %v7846_v34, 16  ;;  %v16859_v5 = vld [vmem:[#allocation3 + $0x2c] sm:$0x1] }
 0x70e   : > { %13519 = vmatprep.mubr.bf16.mxu0 %v12123_v12  ;;  %v7906_v50 = vrot.slane %v7904_v38, 4  ;;  %v7917_v15 = vrot.slane %v7915_v44, 4  ;;  %v7920_v3 = vrot.slane %v7918_v18, 5  ;;  %v7939_v2 = vshrl.u32 %v7848_v1, 16  ;;  %v7851_v12 = vld [vmem:[#allocation3 + $0x30] sm:$0xf] }
 0x70f   : > { %v7897_v0 = vor.u32 %v7896_v41, %v7893_v13  ;;  %v16840_v33 = vrot.slane %v7924_v22, 5  ;;  %v7930_v17 = vrot.slane %v7928_v11, 4  ;;  %v7942_v52 = vshll.u32 %v7848_v1, 16  ;;  %v7857_v47 = vld [vmem:[#allocation3 + $0x48] sm:$0xf]  ;;  %v16885_v32 = vld [vmem:[%s18071_s4 + $0x5c0] sm:$0xff]  }
 0x710   : > { %v7921_v4 = vor.u32 %v7920_v3, %v7917_v15  ;;  %v7910_v60 = vshll.u32 %v16833_v9, 16  ;;  %v7948_v48 = vshll.u32 %v16835_v25, 16  ;;  %v7952_v6 = vshrl.u32 %v16835_v25, 16  ;;  %v16889_v34 = vld [vmem:[#allocation3 + $0x4c] sm:$0xf]  ;;  %v14534_v3 = vld [vmem:[#allocation3 + $0x78] sm:$0xff]  }
 0x711   : > { %v16848_v31 = vrot.slane %v7897_v0, 4  ;;  %v7934_v24 = vshll.u32 %v16838_v21, 16  ;;  %v7931_v59 = vor.u32 %v7930_v17, %v16840_v33  ;;  %v7944_v26 = vrot.slane %v7942_v52, 5  ;;  %v16892_v18 = vld [vmem:[#allocation3 + $0x38] sm:$0x1]  ;;  %v14535_v17 = vld [vmem:[#allocation3 + $0x84] sm:$0xff]  }
 0x712   : > { %v16853_v63 = vrot.slane %v7921_v4, 4  ;;  %v7963_v45 = vshrl.u32 %v7851_v12, 16  ;;  %v16861_v51 = vrot.slane %v7910_v60, 5  ;;  %v7954_v62 = vrot.slane %v7952_v6, 4 }
 0x713   : > { %13804 = vmatmul.mubr.bf16.gmra.mrb[120].mxu1 %v12394_v61  ;;  %v7941_v61 = vrot.slane %v7939_v2, 4  ;;  %v8014_v15 = vshll.u32 %v7857_v47, 16  ;;  %v7982_v4 = vshll.u32 %v16892_v18, 16 }
 0x714   : > { %13807 = vmatprep.mubr.bf16.mxu1 %v12395_v28  ;;  %v16863_v28 = vrot.slane %v7948_v48, 5  ;;  %v7927_v27 = vsel %vm15491_vm13, %v16853_v63, %v16840_v33  ;;  %v7965_v19 = vrot.slane %v7963_v45, 4  ;;  %v7860_v33 = vld [vmem:[#allocation3 + $0x54] sm:$0xf]  ;;  %v16904_v48 = vld [vmem:[#allocation3 + $0x58] sm:$0xf] }
 0x715   : > { %13520 = vmatmul.mubr.bf16.gmra.mrb[76].mxu0 %v12124_v35  ;;  %v16865_v35 = vld [vmem:[#allocation3 + $0x34] sm:$0xf]  ;;  %v8035_v63 = vshrl.u32 %v7860_v33, 16  ;;  %v8048_v45 = vshrl.u32 %v16904_v48, 16 }
 0x716   : > { %13539 = vmatprep.mubr.bf16.mxu0 %v14520_v10  ;;  %v7966_v10 = vshll.u32 %v7851_v12, 16  ;;  %v7976_v38 = vshrl.u32 %v16865_v35, 16  ;;  %v7955_v44 = vor.u32 %v7954_v62, %v16863_v28 }
 0x71d   : > { %13540 = vmatmul.mubr.bf16.vlgmr.msra.gmra.mrb[48].mxu0 %v14522_v55 }
 0x71e   : > { %13543 = vmatprep.mubr.bf16.mxu0 %v14523_v43  ;;  %13572 = vmatpush3.bf16.msra.mxu0 %v16738_v30  ;;  %v7900_v30 = vshll.u32 %v7843_v40, 16  ;;  %v7854_v43 = vld [vmem:[#allocation3 + $0x3c] sm:$0xf]  ;;  %v7932_v40 = vrot.slane %v7931_v59, 4  ;;  %v8038_v59 = vshll.u32 %v7860_v33, 16 }
 0x71f   : > { %13573 = vmatprep.subr.bf16.mxu0 %v14527_v37  ;;  %v7987_v13 = vshrl.u32 %v7854_v43, 16  ;;  %v7990_v41 = vshll.u32 %v7854_v43, 16  ;;  %v7863_v43 = vld [vmem:[#allocation3 + $0x60] sm:$0xf] }
 0x720   : > { %v16828_v39 = vrot.slane %v7900_v30, 5  ;;  %v7972_v30 = vshll.u32 %v16865_v35, 16 }
 0x721   : > { %v7989_v52 = vrot.slane %v7987_v13, 4  ;;  %v7992_v60 = vrot.slane %v7990_v41, 5  ;;  %v8050_v13 = vrot.slane %v8048_v45, 4  ;;  %v8059_v41 = vshrl.u32 %v7863_v43, 16 }
 0x722   : > { %13574 = vmatpush3.bf16.msra.mxu0 %v14527_v37  ;;  %v7907_v49 = vor.u32 %v7906_v50, %v16828_v39  ;;  %v7903_v55 = vsel %vm15491_vm13, %v16848_v31, %v16828_v39  ;;  %v7936_v37 = vrot.slane %v7934_v24, 5  ;;  %v8011_v50 = vshrl.u32 %v7857_v47, 16  ;;  %v16932_v47 = vld [vmem:[#allocation3 + $0x50] sm:$0x1] }
 0x723   : > { %13575 = vmatprep.subr.bf16.mxu0 %v14530_v58  ;;  %v16901_v0 = vrot.slane %v7972_v30, 5  ;;  %v8016_v24 = vrot.slane %v8014_v15, 5  ;;  %v8040_v30 = vrot.slane %v8038_v59, 5 }
 0x724   : > { %v16851_v57 = vrot.slane %v7907_v49, 4  ;;  %v7937_v11 = vsel %vm15491_vm13, %v7932_v40, %v7936_v37  ;;  %v7978_v49 = vrot.slane %v7976_v38, 4  ;;  %v8013_v31 = vrot.slane %v8011_v50, 4  ;;  %v7866_v38 = vld [vmem:[#allocation3 + $0x6c] sm:$0xf] }
 0x725   : > { %13544 = vmatmul.mubr.bf16.gmra.mrb[52].mxu0 %v14525_v29  ;;  %v7958_v29 = vshll.u32 %v16859_v5, 16  ;;  %v16924_v37 = vrot.slane %v7982_v4, 5  ;;  %v8086_v4 = vshll.u32 %v7866_v38, 16 }
 0x726   : > { %13547 = vmatprep.mubr.bf16.mxu0 %v14526_v7  ;;  %13576 = vmatpush3.bf16.msra.mxu0 %v14530_v58  ;;  %v7913_v58 = vsel %vm15491_vm13, %v16851_v57, %v16861_v51  ;;  %v7945_v7 = vor.u32 %v7944_v26, %v7941_v61  ;;  %v16914_v61 = vcombine.low %v7927_v27, %v7937_v11  ;;  %v8044_v26 = vshll.u32 %v16904_v48, 16 }
 0x727   : > { %13577 = vmatprep.subr.bf16.mxu0 %v14533_v53 }
 0x728   : > { %v7946_v1 = vrot.slane %v7945_v7, 4 }
 0x72a   : > { %13578 = vmatpush3.bf16.msra.mxu0 %v14533_v53  ;;  %v16880_v53 = vld [vmem:[#allocation3 + $0x40] sm:$0xf]  ;;  %v7951_v51 = vsel %vm15491_vm13, %v7946_v1, %v16863_v28  ;;  %v8017_v28 = vor.u32 %v8016_v24, %v8013_v31  ;;  %v16944_v1 = vld [vmem:[#allocation3 + $0x70] sm:$0xf] }
 0x72b   : > { %13579 = vmatprep.subr.bf16.mxu0 %v14536_v14  ;;  %v7996_v39 = vshll.u32 %v16880_v53, 16  ;;  %v8000_v22 = vshrl.u32 %v16880_v53, 16  ;;  %v8092_v59 = vshll.u32 %v16944_v1, 16 }
 0x72d   : > { %13548 = vmatmul.mubr.bf16.gmra.mrb[56].mxu0 %v14528_v46  ;;  %v7960_v46 = vrot.slane %v7958_v29, 5  ;;  %v16906_v6 = vrot.slane %v7996_v39, 5  ;;  %v8002_v12 = vrot.slane %v8000_v22, 4  ;;  %v16930_v29 = vld [vmem:[#allocation3 + $0x64] sm:$0xf]  ;;  %v8062_v39 = vshll.u32 %v7863_v43, 16 }
 0x72e   : > { %13551 = vmatprep.mubr.bf16.mxu0 %v14529_v20  ;;  %13580 = vmatpush3.bf16.msra.mxu0 %v14536_v14  ;;  %v7968_v14 = vrot.slane %v7966_v10, 5  ;;  %v8024_v20 = vshrl.u32 %v16889_v34, 16  ;;  %v7979_v10 = vor.u32 %v7978_v49, %v16901_v0  ;;  %v14538_v22 = vld [vmem:[#allocation3 + $0x9c] sm:$0xff]   ;;  %v8068_v11 = vshll.u32 %v16930_v29, 16 }
 0x72f   : > { %13581 = vmatprep.subr.bf16.mxu0 %v14539_v56  ;;  %v8003_v27 = vor.u32 %v8002_v12, %v16906_v6  ;;  %v8083_v49 = vshrl.u32 %v7866_v38, 16  ;;  %v8061_v12 = vrot.slane %v8059_v41, 4  ;;  %v8064_v31 = vrot.slane %v8062_v39, 5  ;;  %v16984_v39 = vld [vmem:[#allocation3 + $0x74] sm:$0x1] }
 0x730   : > { %v7969_v2 = vor.u32 %v7968_v14, %v7965_v19  ;;  %v8026_v57 = vrot.slane %v8024_v20, 4  ;;  %v8037_v19 = vrot.slane %v8035_v63, 4  ;;  %v16935_v14 = vrot.slane %v8044_v26, 5 }
 0x731   : > { %v7980_v15 = vrot.slane %v7979_v10, 4  ;;  %v8030_v20 = vshll.u32 %v16932_v47, 16  ;;  %v8085_v45 = vrot.slane %v8083_v49, 4  ;;  %v16982_v41 = vrot.slane %v8092_v59, 5  ;;  %v14543_v59 = vld [vmem:[#allocation3 + $0xc0] sm:$0xff]  }
 0x732   : > { %13582 = vmatpush3.bf16.msra.mxu0 %v14539_v56  ;;  %v8020_v56 = vshll.u32 %v16889_v34, 16  ;;  %v8721_v49 = vrot.slane %v16984_v39, 5 }
 0x733   : > { %13583 = vmatprep.subr.bf16.mxu0 %v14542_v36  ;;  %v8032_v26 = vrot.slane %v8030_v20, 5  ;;  %v7985_v43 = vsel %vm15491_vm13, %v7980_v15, %v16924_v37  ;;  %v8065_v37 = vor.u32 %v8064_v31, %v8061_v12 }
 0x735   : > { %13552 = vmatmul.mubr.bf16.gmra.mrb[60].mxu0 %v14531_v16  ;;  %v16908_v16 = vld [vmem:[#allocation3 + $0x44] sm:$0x1] }
 0x736   : > { %13555 = vmatprep.mubr.bf16.mxu0 %v14532_v8  ;;  %13584 = vmatpush3.bf16.msra.mxu0 %v14542_v36  ;;  %v7956_v36 = vrot.slane %v7955_v44, 4  ;;  %v16910_v8 = vrot.slane %v8020_v56, 5  ;;  %v8006_v40 = vshll.u32 %v16908_v16, 16  ;;  %v14537_v44 = vld [vmem:[#allocation3 + $0x90] sm:$0xff]  }
 0x737   : > { %13585 = vmatprep.subr.bf16.mxu0 %v14544_v42 }
 0x738   : > { %v7961_v62 = vsel %vm15491_vm13, %v7956_v36, %v7960_v46  ;;  %v8027_v7 = vor.u32 %v8026_v57, %v16910_v8  ;;  %v8072_v46 = vshrl.u32 %v16930_v29, 16  ;;  %v8008_v56 = vrot.slane %v8006_v40, 5  ;;  %v16964_v40 = vld [vmem:[#allocation3 + $0x78] sm:$0xf] }
 0x739   : > { %v16937_v50 = vcombine.low %v7951_v51, %v7961_v62  ;;  %v8018_v36 = vrot.slane %v8017_v28, 4  ;;  %v16948_v57 = vrot.slane %v8068_v11, 5  ;;  %v8088_v51 = vrot.slane %v8086_v4, 5  ;;  %v16966_v28 = vld [vmem:[#allocation3 + $0x7c] sm:$0xf] }
 0x73a   : > { %13586 = vmatpush3.bf16.msra.mxu0 %v14544_v42  ;;  %v16912_v42 = vcombine.low %v7903_v55, %v7913_v58  ;;  %v16926_v55 = vrot.slane %v7969_v2, 4  ;;  %v7993_v58 = vor.u32 %v7992_v60, %v7989_v52  ;;  %v8041_v2 = vor.u32 %v8040_v30, %v8037_v19  ;;  %v14541_v30 = vld [vmem:[#allocation3 + $0xb4] sm:$0xff]   ;;  %v17000_v4 = vld [vmem:[#allocation3 + $0x88] sm:$0xf] }
 0x73b   : > { %13619 = vmatprep.subr.bf16.mxu0 %v16885_v32  ;;  %v8028_v52 = vrot.slane %v8027_v7, 4  ;;  %v8051_v60 = vor.u32 %v8050_v13, %v16935_v14  ;;  %v8074_v63 = vrot.slane %v8072_v46, 4  ;;  %v8096_v62 = vshrl.u32 %v16944_v1, 16  ;;  %v14540_v7 = vld [vmem:[#allocation3 + $0xa8] sm:$0xff]  }
 0x73c   : > { %v7994_v33 = vrot.slane %v7993_v58, 4  ;;  %v7975_v10 = vsel %vm15491_vm13, %v16926_v55, %v16901_v0  ;;  %v8107_v11 = vshrl.u32 %v16964_v40, 16  ;;  %v8116_v46 = vshll.u32 %v16966_v28, 16 }
 0x73d   : > { %13556 = vmatmul.mubr.bf16.gmra.mrb[64].mxu0 %v14534_v3  ;;  %v16939_v3 = vld [vmem:[#allocation3 + $0x5c] sm:$0x1]  ;;  %v8033_v0 = vsel %vm15491_vm13, %v8028_v52, %v8032_v26  ;;  %v16972_v55 = vrot.slane %v8051_v60, 4  ;;  %v8075_v13 = vor.u32 %v8074_v63, %v16948_v57  ;;  %v16986_v15 = vrot.slane %v8096_v62, 4  ;;  %v8598_v52 = vld [vmem:[#allocation3 + $0x24] sm:$0xe] }
 0x73e   : > { %13559 = vmatprep.mubr.bf16.mxu0 %v14535_v17  ;;  %v8004_v17 = vrot.slane %v8003_v27, 4  ;;  %v8054_v24 = vshll.u32 %v16939_v3, 16  ;;  %v7999_v58 = vsel %vm15491_vm13, %v7994_v33, %v16906_v6  ;;  %v16962_v27 = vrot.slane %v8041_v2, 4  ;;  %v8599_v63 = vld [vmem:[#allocation3 + $0x30] sm:$0xe] }
 0x73f   : > { %v8023_v6 = vsel %vm15491_vm13, %v8018_v36, %v16910_v8  ;;  %v16990_v8 = vcombine.low %v7975_v10, %v7985_v43  ;;  %v8120_v2 = vshrl.u32 %v16966_v28, 16  ;;  %v17010_v60 = vrot.slane %v8075_v13, 4 }
 0x740   : > { %v8009_v19 = vsel %vm15491_vm13, %v8004_v17, %v8008_v56  ;;  %v16977_v38 = vrot.slane %v8054_v24, 5  ;;  %v16994_v20 = vcombine.low %v8023_v6, %v8033_v0  ;;  %v17006_v17 = vrot.slane %v8065_v37, 4  ;;  %v8601_v6 = vld [vmem:[#allocation3 + $0x48] sm:$0xe]  ;;  %v17093_v37 = vld [vmem:[#allocation3 + $0x94] sm:$0xf] }
 0x741   : > { %v16992_v56 = vcombine.low %v7999_v58, %v8009_v19  ;;  %v8676_v24 = vrot.slane %v16835_v25, 5  ;;  %v17021_v62 = vrot.slane %v8116_v46, 5  ;;  %v12215_v10 = vrot.slane %v8598_v52, 9  ;;  %v8600_v19 = vld [vmem:[#allocation3 + $0x3c] sm:$0xe] }
 0x742   : > { %v8679_v58 = vrot.slane %v16859_v5, 5  ;;  %v17025_v0 = vrot.slane %v8120_v2, 4  ;;  %v12217_v2 = vrot.slane %v8600_v19, 9  ;;  %v8690_v52 = vrot.slane %v16880_v53, 5  ;;  %v8603_v19 = vld [vmem:[#allocation3 + $0x60] sm:$0xe] }
 0x743   : > { %v8678_v43 = vrot.slane %v8676_v24, 4  ;;  %v17031_v13 = vsel %vm15577_vm15, %v12215_v10, %v8676_v24  ;;  %v8602_v24 = vld [vmem:[#allocation3 + $0x54] sm:$0xe]  ;;  %v8697_v10 = vrot.slane %v16889_v34, 5  ;;  %v8704_v53 = vrot.slane %v16904_v48, 5 }
 0x744   : > { %v8707_v48 = vrot.slane %v16939_v3, 5  ;;  %v8605_v3 = vld [vmem:[#allocation3 + $0x78] sm:$0xe]  ;;  %v8718_v36 = vrot.slane %v16944_v1, 5 }
 0x745   : > { %13560 = vmatmul.mubr.bf16.gmra.mrb[68].mxu0 %v14537_v44  ;;  %v16979_v44 = vld [vmem:[#allocation3 + $0x68] sm:$0x1]  ;;  %v12222_v33 = vrot.slane %v8605_v3, 9  ;;  %v17131_v3 = vld [vmem:[#allocation3 + $0xa4] sm:$0x1] }
 0x746   : > { %13563 = vmatprep.mubr.bf16.mxu0 %v14538_v22  ;;  %v8089_v22 = vor.u32 %v8088_v51, %v8085_v45  ;;  %v17019_v51 = vrot.slane %v8107_v11, 4  ;;  %v17091_v11 = vld [vmem:[#allocation3 + $0x8c] sm:$0x1]  ;;  %v8720_v1 = vrot.slane %v8718_v36, 4 }
 0x748   : > { %v17015_v26 = vrot.slane %v8089_v22, 4  ;;  %v17035_v22 = vsel %vm15577_vm15, %v8678_v43, %v8679_v58  ;;  %v8692_v58 = vrot.slane %v8690_v52, 4  ;;  %v8604_v43 = vld [vmem:[#allocation3 + $0x6c] sm:$0xe]  ;;  %v17145_v31 = vsel %vm15577_vm15, %v8720_v1, %v8721_v49  ;;  %v17163_v1 = vld [vmem:[#allocation3 + $0xbc] sm:$0x1] }
 0x749   : > { %v12221_v12 = vrot.slane %v8604_v43, 9  ;;  %v17122_v43 = vld [vmem:[#allocation3 + $0xa0] sm:$0xf]  ;;  %18120 = vst [vmem:[#allocation14_spill] sm:$0xff] %v17145_v31 }
 0x74d   : > { %13564 = vmatmul.mubr.bf16.gmra.mrb[72].mxu0 %v14540_v7  ;;  %v8683_v7 = vrot.slane %v16865_v35, 5  ;;  %v8686_v35 = vrot.slane %v16892_v18, 5  ;;  %v8693_v18 = vrot.slane %v16908_v16, 5  ;;  %v8699_v16 = vrot.slane %v8697_v10, 4 }
 0x74e   : > { %13567 = vmatprep.mubr.bf16.mxu0 %v14541_v30  ;;  %v12216_v30 = vrot.slane %v8599_v63, 9 }
 0x74f   : > { %v8685_v5 = vrot.slane %v8683_v7, 4 }
 0x750   : > { %v17042_v46 = vsel %vm15577_vm15, %v12216_v30, %v8683_v7  ;;  %v8700_v7 = vrot.slane %v16932_v47, 5  ;;  %v8706_v47 = vrot.slane %v8704_v53, 4 }
 0x751   : > { %v17048_v63 = vsel %vm15577_vm15, %v8685_v5, %v8686_v35  ;;  %v17068_v5 = vsel %vm15577_vm15, %v8692_v58, %v8693_v18  ;;  %v8711_v35 = vrot.slane %v16930_v29, 5  ;;  %v14546_v29 = vld [vmem:[%s18071_s4 + $0x5c8] sm:$0xff]  }
 0x755   : > { %13568 = vmatmul.mubr.bf16.gmra.mrb[76].mxu0 %v14543_v59  ;;  %v12218_v59 = vrot.slane %v8601_v6, 9  ;;  %v12219_v6 = vrot.slane %v8602_v24, 9  ;;  %v17080_v24 = vsel %vm15577_vm15, %v8699_v16, %v8700_v7  ;;  %v17099_v16 = vsel %vm15577_vm15, %v8706_v47, %v8707_v48  ;;  %v8606_v7 = vld [vmem:[#allocation3 + $0x84] sm:$0xe]  ;;  %v17112_v47 = vld [vmem:[#allocation3 + $0x98] sm:$0x1] }
 0x756   : > { %13587 = vmatprep.mubr.bf16.mxu0 %v16912_v42  ;;  %v17058_v42 = vsel %vm15577_vm15, %v12217_v2, %v8690_v52  ;;  %v17074_v52 = vld [vmem:[#allocation3 + $0x80] sm:$0x1]  ;;  %18114 = vst [vmem:[#allocation8_spill] sm:$0xff] %v17099_v16  ;;  %v12223_v45 = vrot.slane %v8606_v7, 9  ;;  %v17161_v7 = vld [vmem:[#allocation3 + $0xb8] sm:$0xf] }
 0x757   : > { %v17062_v30 = vsel %vm15577_vm15, %v12218_v59, %v8697_v10  ;;  %v17084_v18 = vsel %vm15577_vm15, %v12219_v6, %v8704_v53  ;;  %v12220_v10 = vrot.slane %v8603_v19, 9  ;;  %v8713_v53 = vrot.slane %v8711_v35, 4 }
 0x758   : > { %18112 = vst [vmem:[#allocation6_spill] sm:$0xff] %v17084_v18  ;;  %v8714_v19 = vrot.slane %v16979_v44, 5  ;;  %v8725_v59 = vrot.slane %v16966_v28, 5  ;;  %v14547_v28 = vld [vmem:[%s18071_s4 + $0x5d0] sm:$0xff]  }
 0x759   : > { %v17108_v25 = vsel %vm15577_vm15, %v12220_v10, %v8711_v35  ;;  %v8728_v35 = vrot.slane %v17074_v52, 5  ;;  %v8732_v10 = vrot.slane %v17000_v4, 5 }
 0x75a   : > { %v17064_v34 = vpop.f32.mrb[68].mxu1  ;;  %18116 = vst [vmem:[#allocation10_spill] sm:$0xff] %v17108_v25  ;;  %v17116_v48 = vsel %vm15577_vm15, %v8713_v53, %v8714_v19  ;;  %v8607_v53 = vld [vmem:[#allocation3 + $0x90] sm:$0xe]  ;;  %v17141_v19 = vsel %vm15577_vm15, %v12222_v33, %v8725_v59  ;;  %v8746_v25 = vrot.slane %v17122_v43, 5 }
 0x75b   : > { %18110 = vst [vmem:[#allocation4_spill] sm:$0xff] %v17064_v34  ;;  %v17072_v2 = vpop.f32.mrb[69].mxu1  ;;  %18117 = vst [vmem:[#allocation11_spill] sm:$0xff] %v17116_v48  ;;  %v8608_v34 = vld [vmem:[#allocation3 + $0x9c] sm:$0xe]  ;;  %v12224_v49 = vrot.slane %v8607_v53, 9 }
 0x75c   : > { %18111 = vst [vmem:[#allocation5_spill] sm:$0xff] %v17072_v2  ;;  %v17089_v58 = vpop.f32.mrb[70].mxu1  ;;  %18119 = vst [vmem:[#allocation13_spill] sm:$0xff] %v17141_v19  ;;  %v8739_v2 = vrot.slane %v17093_v37, 5  ;;  %v17149_v48 = vld [vmem:[#allocation3 + $0xb0] sm:$0x1] }
 0x75d   : > { %18113 = vst [vmem:[#allocation7_spill] sm:$0xff] %v17089_v58  ;;  %v17102_v6 = vpop.f32.mrb[71].mxu1  ;;  %13588 = vmatmul.mubr.bf16.vlgmr.msra.gmra.mrb[48].mxu0 %v16914_v61  ;;  %v8727_v61 = vrot.slane %v8725_v59, 4  ;;  %v8735_v58 = vrot.slane %v17091_v11, 5  ;;  %v8609_v59 = vld [vmem:[#allocation3 + $0xa8] sm:$0xe] }
 0x75e   : > { %18115 = vst [vmem:[#allocation9_spill] sm:$0xff] %v17102_v6  ;;  %13591 = vmatprep.mubr.bf16.mxu0 %v16937_v50  ;;  %13620 = vmatpush3.bf16.msra.mxu0 %v16885_v32  ;;  %v17133_v50 = vld [vmem:[#allocation3 + $0xac] sm:$0xf]  ;;  %v17137_v32 = vsel %vm15577_vm15, %v12221_v12, %v8718_v36  ;;  %v8734_v6 = vrot.slane %v8732_v10, 4  ;;  %v17159_v12 = vsel %vm15577_vm15, %v12223_v45, %v8732_v10  ;;  %v14548_v45 = vld [vmem:[%s18071_s4 + $0x5d8] sm:$0xff]   ;;  %v12225_v53 = vrot.slane %v8608_v34, 9 }
 0x75f   : > { %13621 = vmatprep.subr.bf16.mxu0 %v14546_v29  ;;  %18118 = vst [vmem:[#allocation12_spill] sm:$0xff] %v17137_v32  ;;  %v17155_v33 = vsel %vm15577_vm15, %v8727_v61, %v8728_v35  ;;  %18122 = vst [vmem:[#allocation16_spill] sm:$0xff] %v17159_v12  ;;  %v8741_v61 = vrot.slane %v8739_v2, 4  ;;  %v8742_v35 = vrot.slane %v17112_v47, 5  ;;  %v17179_v10 = vsel %vm15577_vm15, %v12224_v49, %v8739_v2 }
 0x760   : > { %18121 = vst [vmem:[#allocation15_spill] sm:$0xff] %v17155_v33  ;;  %v17169_v36 = vsel %vm15577_vm15, %v8734_v6, %v8735_v58  ;;  %18124 = vst [vmem:[#allocation18_spill] sm:$0xff] %v17179_v10  ;;  %v8610_v58 = vld [vmem:[#allocation3 + $0xb4] sm:$0xe]  ;;  %v17182_v6 = vld [vmem:[#allocation3 + $0xc4] sm:$0xf] }
 0x761   : > { %18123 = vst [vmem:[#allocation17_spill] sm:$0xff] %v17169_v36  ;;  %v17186_v33 = vsel %vm15577_vm15, %v8741_v61, %v8742_v35  ;;  %v8749_v19 = vrot.slane %v17131_v3, 5  ;;  %v12226_v31 = vrot.slane %v8609_v59, 9  ;;  %v8753_v32 = vrot.slane %v17133_v50, 5  ;;  %v8611_v36 = vld [vmem:[#allocation3 + $0xc0] sm:$0xe] }
 0x762   : > { %13622 = vmatpush3.bf16.msra.mxu0 %v14546_v29  ;;  %18125 = vst [vmem:[#allocation19_spill] sm:$0xff] %v17186_v33  ;;  %v8748_v34 = vrot.slane %v8746_v25, 4  ;;  %v8756_v49 = vrot.slane %v17149_v48, 5  ;;  %v8760_v29 = vrot.slane %v17161_v7, 5  ;;  %v17196_v61 = vld [vmem:[#allocation3 + $0xc8] sm:$0x1]  ;;  %v17200_v59 = vsel %vm15577_vm15, %v12225_v53, %v8746_v25 }
 0x763   : > { %13623 = vmatprep.subr.bf16.mxu0 %v14547_v28  ;;  %18126 = vst [vmem:[#allocation20_spill] sm:$0xff] %v17200_v59  ;;  %v8755_v35 = vrot.slane %v8753_v32, 4  ;;  %v12227_v2 = vrot.slane %v8610_v58, 9  ;;  %v7872_v33 = vld [vmem:[#allocation3 + $0x84] sm:$0xf]  ;;  %v8763_v25 = vrot.slane %v17163_v1, 5 }
 0x764   : > { %v14549_v10 = vld [vmem:[%s18071_s4 + $0x5e0] sm:$0xff]   ;;  %v8767_v53 = vrot.slane %v17182_v6, 5  ;;  %v12228_v12 = vrot.slane %v8611_v36, 9  ;;  %v8770_v18 = vrot.slane %v17196_v61, 5 }
 0x765   : > { %13592 = vmatmul.mubr.bf16.gmra.mrb[52].mxu0 %v16990_v8  ;;  %v17204_v8 = vsel %vm15577_vm15, %v12226_v31, %v8753_v32  ;;  %v17219_v32 = vsel %vm15577_vm15, %v8755_v35, %v8756_v49  ;;  %v17223_v58 = vsel %vm15577_vm15, %v12227_v2, %v8760_v29  ;;  %v18128_v31 = vshll.u32 %v16964_v40, 16  ;;  %v14550_v40 = vld [vmem:[%s18071_s4 + $0x5e8] sm:$0xff]  }
 0x766   : > { %13595 = vmatprep.mubr.bf16.mxu0 %v16992_v56  ;;  %13624 = vmatpush3.bf16.msra.mxu0 %v14547_v28  ;;  %v17211_v56 = vsel %vm15577_vm15, %v8748_v34, %v8749_v19  ;;  %v8762_v28 = vrot.slane %v8760_v29, 4  ;;  %v8769_v16 = vrot.slane %v8767_v53, 4  ;;  %v8131_v35 = vshrl.u32 %v7872_v33, 16 }
 0x767   : > { %13625 = vmatprep.subr.bf16.mxu0 %v14548_v45  ;;  %18127 = vst [vmem:[#allocation21_spill] sm:$0xff] %v17211_v56  ;;  %v8112_v49 = vrot.slane %v18128_v31, 5  ;;  %v8134_v56 = vshll.u32 %v7872_v33, 16  ;;  %v18129_v29 = vor.u32 %v16986_v15, %v16982_v41  ;;  %v17250_v33 = vsel %vm15577_vm15, %v12228_v12, %v8767_v53  ;;  %v7875_v53 = vld [vmem:[#allocation3 + $0x90] sm:$0xf] }
 0x768   : > { %v17229_v34 = vsel %vm15577_vm15, %v8762_v28, %v8763_v25  ;;  %v8123_v28 = vor.u32 %v17025_v0, %v17021_v62  ;;  %v18130_v15 = vsel %vm15491_vm13, %v16972_v55, %v16977_v38  ;;  %v18131_v0 = vsel %vm15491_vm13, %v16962_v27, %v16935_v14 }
 0x769   : > { %v8100_v2 = vrot.slane %v18129_v29, 4  ;;  %v12195_v31 = vcombine.low %v18131_v0, %v18130_v15  ;;  %v18132_v29 = vshll.u32 %v16979_v44, 16  ;;  %v8126_v38 = vshll.u32 %v17074_v52, 16 }
 0x76a   : > { %13626 = vmatpush3.bf16.msra.mxu0 %v14548_v45  ;;  %v17254_v45 = vsel %vm15577_vm15, %v8769_v16, %v8770_v18  ;;  %v18133_v16 = vshll.u32 %v16984_v39, 16  ;;  %v18134_v19 = vshll.u32 %v17000_v4, 16  ;;  %v18135_v27 = vshrl.u32 %v17000_v4, 16 }
 0x76b   : > { %13627 = vmatprep.subr.bf16.mxu0 %v14549_v10  ;;  %v8080_v36 = vrot.slane %v18132_v29, 5  ;;  %v8113_v39 = vor.u32 %v8112_v49, %v17019_v51  ;;  %v8133_v0 = vrot.slane %v8131_v35, 4  ;;  %v8136_v29 = vrot.slane %v8134_v56, 5  ;;  %v7878_v56 = vld [vmem:[#allocation3 + $0x9c] sm:$0xf] }
 0x76c   : > { %v17234_v59 = vpop.f32.mrb[72].mxu1  ;;  %v8104_v55 = vrot.slane %v18133_v16, 5  ;;  %v17278_v14 = vrot.slane %v18134_v19, 5  ;;  %v8146_v44 = vrot.slane %v18135_v27, 4  ;;  %v8095_v4 = vsel %vm15491_vm13, %v17015_v26, %v16982_v41 }
 0x76d   : > { %v17243_v25 = vpop.f32.mrb[73].mxu1  ;;  %13596 = vmatmul.mubr.bf16.gmra.mrb[56].mxu0 %v16994_v20  ;;  %v8071_v20 = vsel %vm15491_vm13, %v17006_v17, %v16948_v57  ;;  %v8081_v52 = vsel %vm15491_vm13, %v17010_v60, %v8080_v36  ;;  %v14551_v57 = vld [vmem:[%s18071_s4 + $0x5f0] sm:$0xff]   ;;  %v8155_v17 = vshrl.u32 %v7875_v53, 16  ;;  %v8158_v51 = vshll.u32 %v7875_v53, 16 }
 0x76e   : > { %v17268_v12 = vpop.f32.mrb[74].mxu1  ;;  %13599 = vmatprep.mubr.bf16.mxu0 %v12195_v31  ;;  %13628 = vmatpush3.bf16.msra.mxu0 %v14549_v10  ;;  %v8105_v19 = vsel %vm15491_vm13, %v8100_v2, %v8104_v55  ;;  %v8124_v31 = vrot.slane %v8123_v28, 4  ;;  %v8164_v10 = vshll.u32 %v17093_v37, 16  ;;  %v8168_v60 = vshrl.u32 %v17093_v37, 16 }
 0x76f   : > { %v17282_v15 = vpop.f32.mrb[75].mxu1  ;;  %13629 = vmatprep.subr.bf16.mxu0 %v14550_v40  ;;  %v8128_v49 = vrot.slane %v8126_v38, 5  ;;  %v8147_v35 = vor.u32 %v8146_v44, %v17278_v14  ;;  %v8188_v41 = vshll.u32 %v17122_v43, 16  ;;  %v8192_v26 = vshrl.u32 %v17122_v43, 16  ;;  %v14552_v38 = vld [vmem:[%s18071_s4 + $0x5f8] sm:$0xff]  }
 0x770   : > { %v12196_v36 = vcombine.low %v8071_v20, %v8081_v52  ;;  %v12197_v2 = vcombine.low %v8095_v4, %v8105_v19  ;;  %v8114_v28 = vrot.slane %v8113_v39, 4  ;;  %v8137_v16 = vor.u32 %v8136_v29, %v8133_v0 }
 0x771   : > { %v8129_v53 = vsel %vm15491_vm13, %v8124_v31, %v8128_v49  ;;  %v8150_v55 = vshll.u32 %v17091_v11, 16  ;;  %v8179_v27 = vshrl.u32 %v7878_v56, 16  ;;  %v8182_v37 = vshll.u32 %v7878_v56, 16  ;;  %v7884_v49 = vld [vmem:[#allocation3 + $0xb4] sm:$0xf] }
 0x772   : > { %13630 = vmatpush3.bf16.msra.mxu0 %v14550_v40  ;;  %v8157_v44 = vrot.slane %v8155_v17, 4  ;;  %v8160_v18 = vrot.slane %v8158_v51, 5  ;;  %v17312_v43 = vrot.slane %v8164_v10, 5  ;;  %v8170_v20 = vrot.slane %v8168_v60, 4  ;;  %v7881_v17 = vld [vmem:[#allocation3 + $0xa8] sm:$0xf] }
 0x773   : > { %13631 = vmatprep.subr.bf16.mxu0 %v14551_v57  ;;  %v8148_v39 = vrot.slane %v8147_v35, 4  ;;  %v17314_v40 = vrot.slane %v8188_v41, 5  ;;  %v8194_v0 = vrot.slane %v8192_v26, 4  ;;  %v8119_v11 = vsel %vm15491_vm13, %v8114_v28, %v17021_v62  ;;  %v17322_v51 = vld [vmem:[%s18071_s4 + $0x600] sm:$0xff]  }
 0x774   : > { %v8138_v29 = vrot.slane %v8137_v16, 4  ;;  %v12198_v52 = vcombine.low %v8119_v11, %v8129_v53  ;;  %v8152_v4 = vrot.slane %v8150_v55, 5  ;;  %v8181_v19 = vrot.slane %v8179_v27, 4 }
 0x775   : > { %13600 = vmatmul.mubr.bf16.gmra.mrb[60].mxu0 %v12196_v36  ;;  %v8184_v31 = vrot.slane %v8182_v37, 5  ;;  %v8161_v10 = vor.u32 %v8160_v18, %v8157_v44  ;;  %v8171_v60 = vor.u32 %v8170_v20, %v17312_v43  ;;  %v8212_v56 = vshll.u32 %v17133_v50, 16 }
 0x776   : > { %13603 = vmatprep.mubr.bf16.mxu0 %v12197_v2  ;;  %13632 = vmatpush3.bf16.msra.mxu0 %v14551_v57  ;;  %v8216_v62 = vshrl.u32 %v17133_v50, 16  ;;  %v8153_v57 = vsel %vm15491_vm13, %v8148_v39, %v8152_v4  ;;  %v8195_v35 = vor.u32 %v8194_v0, %v17314_v40  ;;  %v8236_v41 = vshll.u32 %v17161_v7, 16 }
 0x777   : > { %13633 = vmatprep.subr.bf16.mxu0 %v14552_v38  ;;  %v8240_v26 = vshrl.u32 %v17161_v7, 16  ;;  %v8143_v18 = vsel %vm15491_vm13, %v8138_v29, %v17278_v14  ;;  %v8174_v36 = vshll.u32 %v17112_v47, 16  ;;  %v8203_v2 = vshrl.u32 %v7881_v17, 16 }
 0x778   : > { %v8206_v28 = vshll.u32 %v7881_v17, 16  ;;  %v8185_v50 = vor.u32 %v8184_v31, %v8181_v19  ;;  %v8198_v16 = vshll.u32 %v17131_v3, 16  ;;  %v8227_v55 = vshrl.u32 %v7884_v49, 16 }
 0x779   : > { %v8230_v27 = vshll.u32 %v7884_v49, 16  ;;  %v12199_v37 = vcombine.low %v8143_v18, %v8153_v57  ;;  %v8172_v7 = vrot.slane %v8171_v60, 4  ;;  %v8214_v20 = vrot.slane %v8212_v56, 5  ;;  %v7887_v57 = vld [vmem:[#allocation3 + $0xc0] sm:$0xf] }
 0x77a   : > { %13634 = vmatpush3.bf16.msra.mxu0 %v14552_v38  ;;  %v8218_v14 = vrot.slane %v8216_v62, 4  ;;  %v8162_v47 = vrot.slane %v8161_v10, 4  ;;  %v8196_v39 = vrot.slane %v8195_v35, 4  ;;  %v8238_v38 = vrot.slane %v8236_v41, 5 }
 0x77b   : > { %13667 = vmatprep.subr.bf16.mxu0 %v17322_v51  ;;  %v8242_v11 = vrot.slane %v8240_v26, 4  ;;  %v8176_v3 = vrot.slane %v8174_v36, 5  ;;  %v8205_v4 = vrot.slane %v8203_v2, 4  ;;  %v8208_v19 = vrot.slane %v8206_v28, 5 }
 0x77c   : > { %v8186_v31 = vrot.slane %v8185_v50, 4  ;;  %v8200_v17 = vrot.slane %v8198_v16, 5  ;;  %v8229_v60 = vrot.slane %v8227_v55, 4  ;;  %v8232_v49 = vrot.slane %v8230_v27, 5 }
 0x77d   : > { %v17337_v53 = vpop.f32.mrb[76].mxu1  ;;  %13604 = vmatmul.mubr.bf16.gmra.mrb[64].mxu0 %v12198_v52  ;;  %v8177_v52 = vsel %vm15491_vm13, %v8172_v7, %v8176_v3  ;;  %v8219_v10 = vor.u32 %v8218_v14, %v8214_v20  ;;  %v8260_v56 = vshll.u32 %v17182_v6, 16  ;;  %v8264_v62 = vshrl.u32 %v17182_v6, 16 }
 0x77e   : > { %v17340_v44 = vpop.f32.mrb[77].mxu1  ;;  %13607 = vmatprep.mubr.bf16.mxu0 %v12199_v37  ;;  %v8167_v35 = vsel %vm15491_vm13, %v8162_v47, %v17312_v43  ;;  %v8201_v41 = vsel %vm15491_vm13, %v8196_v39, %v8200_v17  ;;  %v8243_v26 = vor.u32 %v8242_v11, %v8238_v38  ;;  %v8209_v18 = vor.u32 %v8208_v19, %v8205_v4 }
 0x77f   : > { %v17342_v0 = vpop.f32.mrb[78].mxu1  ;;  %v8222_v36 = vshll.u32 %v17149_v48, 16  ;;  %v8251_v2 = vshrl.u32 %v7887_v57, 16  ;;  %v8254_v28 = vshll.u32 %v7887_v57, 16  ;;  %v12200_v50 = vcombine.low %v8167_v35, %v8177_v52 }
 0x780   : > { %v17344_v29 = vpop.f32.mrb[79].mxu1  ;;  %v8191_v16 = vsel %vm15491_vm13, %v8186_v31, %v17314_v40  ;;  %v8233_v55 = vor.u32 %v8232_v49, %v8229_v60  ;;  %v8246_v6 = vshll.u32 %v17163_v1, 16  ;;  %v8220_v37 = vrot.slane %v8219_v10, 4  ;;  %v14601_v31 = vld [vmem:[#allocation3 + $0x10] sm:$0xf] }
 0x781   : > { %v12201_v27 = vcombine.low %v8191_v16, %v8201_v41  ;;  %v8262_v43 = vrot.slane %v8260_v56, 5  ;;  %v8266_v7 = vrot.slane %v8264_v62, 4  ;;  %v8244_v14 = vrot.slane %v8243_v26, 4 }
 0x782   : > { %v8210_v47 = vrot.slane %v8209_v18, 4  ;;  %v8224_v39 = vrot.slane %v8222_v36, 5  ;;  %v8253_v48 = vrot.slane %v8251_v2, 4  ;;  %v8256_v11 = vrot.slane %v8254_v28, 5  ;;  %v8596_v28 = vld [vmem:[#allocation3 + $0xc] sm:$0xe] }
 0x783   : > { %v8234_v3 = vrot.slane %v8233_v55, 4  ;;  %v8248_v4 = vrot.slane %v8246_v6, 5  ;;  %v8267_v40 = vor.u32 %v8266_v7, %v8262_v43  ;;  %v8662_v17 = vrot.slane %v14601_v31, 5 }
 0x784   : > { %v8225_v19 = vsel %vm15491_vm13, %v8220_v37, %v8224_v39  ;;  %v8215_v60 = vsel %vm15491_vm13, %v8210_v47, %v8214_v20  ;;  %v8257_v57 = vor.u32 %v8256_v11, %v8253_v48  ;;  %v8270_v52 = vshll.u32 %v17196_v61, 16 }
 0x785   : > { %13608 = vmatmul.mubr.bf16.gmra.mrb[68].mxu0 %v12200_v50  ;;  %v8249_v1 = vsel %vm15491_vm13, %v8244_v14, %v8248_v4  ;;  %v12202_v10 = vcombine.low %v8215_v60, %v8225_v19  ;;  %v8239_v56 = vsel %vm15491_vm13, %v8234_v3, %v8238_v38  ;;  %v8268_v26 = vrot.slane %v8267_v40, 4  ;;  %v14602_v38 = vld [vmem:[#allocation3 + $0x1c] sm:$0xf] }
 0x786   : > { %13611 = vmatprep.mubr.bf16.mxu0 %v12201_v27  ;;  %v12203_v35 = vcombine.low %v8239_v56, %v8249_v1  ;;  %v8664_v36 = vrot.slane %v8662_v17, 4  ;;  %v8258_v20 = vrot.slane %v8257_v57, 4  ;;  %v8272_v2 = vrot.slane %v8270_v52, 5  ;;  %v14554_v1 = vld [vmem:[%s18071_s4 + $0x608] sm:$0xff]   ;;  %v14556_v60 = vld [vmem:[%s18071_s4 + $0x618] sm:$0xff]  }
 0x787   : > { %v8665_v61 = vrot.slane %v16833_v9, 5  ;;  %v8669_v16 = vrot.slane %v14602_v38, 5  ;;  %v12213_v55 = vrot.slane %v8596_v28, 9  ;;  %v8597_v9 = vld [vmem:[#allocation3 + $0x18] sm:$0xe]  ;;  %v8672_v39 = vrot.slane %v16838_v21, 5 }
 0x788   : > { %v8273_v50 = vsel %vm15491_vm13, %v8268_v26, %v8272_v2  ;;  %v8263_v27 = vsel %vm15491_vm13, %v8258_v20, %v8262_v43  ;;  %v12214_v48 = vrot.slane %v8597_v9, 9  ;;  %v18141_v21 = vcombine.low %v17031_v13, %v17035_v22  ;;  %v17414_v52 = vld [vmem:[#allocation3 + $0x1c] sm:$0xf]  ;;  %v17426_v56 = vld [vmem:[#allocation3 + $0x20] sm:$0x1]  ;;  %v18151_v9 = vld [vmem:[#allocation6_spill] sm:$0xff] }
 0x789   : > { %v8666_v6 = vsel %vm15577_vm15, %v8664_v36, %v8665_v61  ;;  %v12204_v37 = vcombine.low %v8263_v27, %v8273_v50  ;;  %v8663_v7 = vsel %vm15577_vm15, %v12213_v55, %v8662_v17  ;;  %v8671_v47 = vrot.slane %v8669_v16, 4  ;;  %v14555_v17 = vld [vmem:[%s18071_s4 + $0x610] sm:$0xff]   ;;  %v14557_v36 = vld [vmem:[%s18071_s4 + $0x620] sm:$0xff]   ;;  %v17433_v20 = vld [vmem:[#allocation3 + $0x28] sm:$0xf] }
 0x78a   : > { %v12245_v14 = vcombine.low %v8663_v7, %v8666_v6  ;;  %v8670_v43 = vsel %vm15577_vm15, %v12214_v48, %v8669_v16  ;;  %v18144_v13 = vcombine.low %v17042_v46, %v17048_v63  ;;  %v10300_v46 = vrot.slane %v17414_v52, 5  ;;  %v10235_v28 = vld [vmem:[#allocation3 + $0x24] sm:$0xe]  ;;  %v14558_v50 = vld [vmem:[%s18071_s4 + $0x628] sm:$0xff]  }
 0x78b   : > { %v17366_v49 = vpop.f32.mrb[80].mxu1  ;;  %v8673_v11 = vsel %vm15577_vm15, %v8671_v47, %v8672_v39  ;;  %v10307_v61 = vrot.slane %v17433_v20, 5  ;;  %v18149_v27 = vcombine.low %v17062_v30, %v17080_v24  ;;  %v18152_v39 = vld [vmem:[#allocation8_spill] sm:$0xff] }
 0x78c   : > { %v17371_v62 = vpop.f32.mrb[81].mxu1  ;;  %v12246_v40 = vcombine.low %v8670_v43, %v8673_v11  ;;  %v10302_v2 = vrot.slane %v10300_v46, 4  ;;  %v18153_v48 = vcombine.low %v18151_v9, %v18152_v39  ;;  %v14559_v43 = vld [vmem:[%s18071_s4 + $0x630] sm:$0xff]   ;;  %v18170_v9 = vld [vmem:[#allocation17_spill] sm:$0xff] }
 0x78d   : > { %v17373_v41 = vpop.f32.mrb[82].mxu1  ;;  %13612 = vmatmul.mubr.bf16.gmra.mrb[72].mxu0 %v12202_v10  ;;  %v10309_v7 = vrot.slane %v10307_v61, 4 }
 0x78e   : > { %v17375_v18 = vpop.f32.mrb[83].mxu1  ;;  %13615 = vmatprep.mubr.bf16.mxu0 %v12203_v35  ;;  %v10234_v35 = vld [vmem:[#allocation3 + $0x18] sm:$0xe] }
 0x78f   : > { %18136 = vst [vmem:[#allocation22_spill] sm:$0xff] %v17375_v18  ;;  %v12349_v63 = vrot.slane %v10234_v35, 9 }
 0x791   : > { %v17445_v38 = vsel %vm15577_vm15, %v12349_v63, %v10300_v46  ;;  %v18162_v46 = vld [vmem:[#allocation14_spill] sm:$0xff] }
 0x795   : > { %13616 = vmatmul.mubr.bf16.gmra.mrb[76].mxu0 %v12204_v37  ;;  %v12350_v37 = vrot.slane %v10235_v28, 9 }
 0x796   : > { %13635 = vmatprep.mubr.bf16.mxu0 %v12245_v14 }
 0x797   : > { %v17471_v30 = vsel %vm15577_vm15, %v12350_v37, %v10307_v61 }
 0x79a   : > { %v17389_v3 = vpop.f32.mrb[84].mxu1 }
 0x79b   : > { %18137 = vst [vmem:[#allocation23_spill] sm:$0xff] %v17389_v3  ;;  %v17391_v4 = vpop.f32.mrb[85].mxu1 }
 0x79c   : > { %18138 = vst [vmem:[#allocation24_spill] sm:$0xff] %v17391_v4  ;;  %v17395_v19 = vpop.f32.mrb[86].mxu1 }
 0x79d   : > { %18139 = vst [vmem:[#allocation25_spill] sm:$0xff] %v17395_v19  ;;  %v17400_v31 = vpop.f32.mrb[87].mxu1  ;;  %13636 = vmatmul.mubr.bf16.vlgmr.msra.gmra.mrb[48].mxu0 %v12246_v40  ;;  %v14581_v19 = vld [vmem:[#allocation3 + $0xc0] sm:$0xff]  }
 0x79e   : > { %18140 = vst [vmem:[#allocation26_spill] sm:$0xff] %v17400_v31  ;;  %13639 = vmatprep.mubr.bf16.mxu0 %v18141_v21  ;;  %13668 = vmatpush3.bf16.msra.mxu0 %v17322_v51  ;;  %v18146_v51 = vcombine.low %v17058_v42, %v17068_v5  ;;  %v10303_v42 = vrot.slane %v17426_v56, 5  ;;  %v17437_v5 = vld [vmem:[#allocation3 + $0x2c] sm:$0x1]  ;;  %v14561_v21 = vld [vmem:[%s18071_s4 + $0x638] sm:$0xff]  }
 0x79f   : > { %13669 = vmatprep.subr.bf16.mxu0 %v14554_v1  ;;  %v10310_v14 = vrot.slane %v17437_v5, 5  ;;  %v9489_v31 = vld [vmem:[#allocation3 + $0x3c] sm:$0xf] }
 0x7a0   : > { %v17449_v16 = vsel %vm15577_vm15, %v10302_v2, %v10303_v42  ;;  %v17499_v42 = vld [vmem:[%s18071_s4 + $0x640] sm:$0xff]  }
 0x7a1   : > { %v17475_v24 = vsel %vm15577_vm15, %v10309_v7, %v10310_v14  ;;  %v18169_v14 = vld [vmem:[#allocation16_spill] sm:$0xff] }
 0x7a2   : > { %13670 = vmatpush3.bf16.msra.mxu0 %v14554_v1  ;;  %v18171_v39 = vcombine.low %v18169_v14, %v18170_v9  ;;  %v18178_v9 = vcombine.low %v17204_v8, %v17219_v32 }
 0x7a3   : > { %13671 = vmatprep.subr.bf16.mxu0 %v14555_v17 }
 0x7a5   : > { %v17412_v57 = vpop.f32.mrb[88].mxu1  ;;  %13640 = vmatmul.mubr.bf16.gmra.mrb[52].mxu0 %v18144_v13  ;;  %v18158_v13 = vld [vmem:[#allocation11_spill] sm:$0xff] }
 0x7a6   : > { %18142 = vst [vmem:[#allocation27_spill] sm:$0xff] %v17412_v57  ;;  %v17416_v10 = vpop.f32.mrb[89].mxu1  ;;  %13643 = vmatprep.mubr.bf16.mxu0 %v18146_v51  ;;  %13672 = vmatpush3.bf16.msra.mxu0 %v14555_v17 }
 0x7a7   : > { %18143 = vst [vmem:[#allocation28_spill] sm:$0xff] %v17416_v10  ;;  %v17421_v22 = vpop.f32.mrb[90].mxu1  ;;  %13673 = vmatprep.subr.bf16.mxu0 %v14556_v60  ;;  %v14604_v10 = vld [vmem:[#allocation3 + $0x34] sm:$0xf] }
 0x7a8   : > { %18145 = vst [vmem:[#allocation29_spill] sm:$0xff] %v17421_v22  ;;  %v17428_v26 = vpop.f32.mrb[91].mxu1  ;;  %v10249_v22 = vld [vmem:[#allocation3 + $0xcc] sm:$0xe]  ;;  %v9586_v57 = vshll.u32 %v14604_v10, 16 }
 0x7a9   : > { %18147 = vst [vmem:[#allocation30_spill] sm:$0xff] %v17428_v26 }
 0x7aa   : > { %13674 = vmatpush3.bf16.msra.mxu0 %v14556_v60  ;;  %v18157_v60 = vld [vmem:[#allocation10_spill] sm:$0xff] }
 0x7ab   : > { %13675 = vmatprep.subr.bf16.mxu0 %v14557_v36  ;;  %v18159_v51 = vcombine.low %v18157_v60, %v18158_v13  ;;  %v18173_v13 = vld [vmem:[#allocation19_spill] sm:$0xff] }
 0x7ad   : > { %13644 = vmatmul.mubr.bf16.gmra.mrb[56].mxu0 %v18149_v27  ;;  %v18167_v27 = vld [vmem:[#allocation15_spill] sm:$0xff] }
 0x7ae   : > { %v17453_v6 = vpop.f32.mrb[92].mxu1  ;;  %13647 = vmatprep.mubr.bf16.mxu0 %v18153_v48  ;;  %13676 = vmatpush3.bf16.msra.mxu0 %v14557_v36  ;;  %v18161_v36 = vld [vmem:[#allocation12_spill] sm:$0xff] }
 0x7af   : > { %18148 = vst [vmem:[#allocation31_spill] sm:$0xff] %v17453_v6  ;;  %v17459_v47 = vpop.f32.mrb[93].mxu1  ;;  %13677 = vmatprep.subr.bf16.mxu0 %v14558_v50  ;;  %v18163_v63 = vcombine.low %v18161_v36, %v18162_v46  ;;  %v18175_v46 = vld [vmem:[#allocation20_spill] sm:$0xff] }
 0x7b0   : > { %18150 = vst [vmem:[#allocation32_spill] sm:$0xff] %v17459_v47  ;;  %v17464_v11 = vpop.f32.mrb[94].mxu1  ;;  %v18183_v47 = vcombine.low %v17250_v33, %v17254_v45 }
 0x7b1   : > { %18154 = vst [vmem:[#allocation6_spill] sm:$0xff] %v17464_v11  ;;  %v17477_v40 = vpop.f32.mrb[95].mxu1  ;;  %v14560_v11 = vld [vmem:[#allocation3 + $0x18] sm:$0xff]  }
 0x7b2   : > { %18155 = vst [vmem:[#allocation8_spill] sm:$0xff] %v17477_v40  ;;  %13678 = vmatpush3.bf16.msra.mxu0 %v14558_v50  ;;  %v18166_v50 = vld [vmem:[#allocation13_spill] sm:$0xff] }
 0x7b3   : > { %13679 = vmatprep.subr.bf16.mxu0 %v14559_v43  ;;  %v18168_v37 = vcombine.low %v18166_v50, %v18167_v27 }
 0x7b5   : > { %13648 = vmatmul.mubr.bf16.gmra.mrb[60].mxu0 %v18159_v51 }
 0x7b6   : > { %v17484_v17 = vpop.f32.mrb[96].mxu1  ;;  %13651 = vmatprep.mubr.bf16.mxu0 %v18163_v63  ;;  %13680 = vmatpush3.bf16.msra.mxu0 %v14559_v43  ;;  %v18176_v63 = vld [vmem:[#allocation21_spill] sm:$0xff] }
 0x7b7   : > { %18156 = vst [vmem:[#allocation33_spill] sm:$0xff] %v17484_v17  ;;  %v17489_v35 = vpop.f32.mrb[97].mxu1  ;;  %13681 = vmatprep.subr.bf16.mxu0 %v14561_v21  ;;  %v18177_v50 = vcombine.low %v18175_v46, %v18176_v63  ;;  %v9527_v63 = vld [vmem:[#allocation3 + $0xd4] sm:$0x1] }
 0x7b8   : > { %18160 = vst [vmem:[#allocation10_spill] sm:$0xff] %v17489_v35  ;;  %v17494_v2 = vpop.f32.mrb[98].mxu1  ;;  %v9908_v35 = vshll.u32 %v9527_v63, 16 }
 0x7b9   : > { %18164 = vst [vmem:[#allocation11_spill] sm:$0xff] %v17494_v2  ;;  %v17501_v28 = vpop.f32.mrb[99].mxu1 }
 0x7ba   : > { %18165 = vst [vmem:[#allocation12_spill] sm:$0xff] %v17501_v28  ;;  %13682 = vmatpush3.bf16.msra.mxu0 %v14561_v21  ;;  %v18172_v21 = vld [vmem:[#allocation18_spill] sm:$0xff] }
 0x7bb   : > { %13715 = vmatprep.subr.bf16.mxu0 %v17499_v42  ;;  %v18174_v51 = vcombine.low %v18172_v21, %v18173_v13  ;;  %v18179_v21 = vcombine.low %v17223_v58, %v17229_v34  ;;  %v9525_v13 = vld [vmem:[#allocation3 + $0xcc] sm:$0xf]  ;;  %v9910_v34 = vrot.slane %v9908_v35, 5  ;;  %v12364_v35 = vrot.slane %v10249_v22, 9 }
 0x7bc   : > { %v9892_v1 = vshll.u32 %v9525_v13, 16 }
 0x7bd   : > { %13652 = vmatmul.mubr.bf16.gmra.mrb[64].mxu0 %v18168_v37 }
 0x7be   : > { %v17504_v61 = vpop.f32.mrb[100].mxu1  ;;  %13655 = vmatprep.mubr.bf16.mxu0 %v18171_v39  ;;  %v9894_v32 = vrot.slane %v9892_v1, 5  ;;  %v10408_v1 = vrot.slane %v9527_v63, 5  ;;  %v14567_v63 = vld [vmem:[%s18071_s4 + $0x648] sm:$0xff]  }
 0x7bf   : > { %v17509_v7 = vpop.f32.mrb[101].mxu1 }
 0x7c0   : > { %v17514_v48 = vpop.f32.mrb[102].mxu1 }
 0x7c1   : > { %v17516_v43 = vpop.f32.mrb[103].mxu1 }
 0x7c5   : > { %13656 = vmatmul.mubr.bf16.gmra.mrb[68].mxu0 %v18174_v51  ;;  %v9526_v51 = vld [vmem:[#allocation3 + $0xd0] sm:$0xf] }
 0x7c6   : > { %v17518_v60 = vpop.f32.mrb[104].mxu1  ;;  %13659 = vmatprep.mubr.bf16.mxu0 %v18177_v50  ;;  %v9889_v50 = vshrl.u32 %v9525_v13, 16  ;;  %v9898_v55 = vshll.u32 %v9526_v51, 16  ;;  %v9902_v2 = vshrl.u32 %v9526_v51, 16 }
 0x7c7   : > { %v17523_v36 = vpop.f32.mrb[105].mxu1 }
 0x7c8   : > { %v17528_v27 = vpop.f32.mrb[106].mxu1  ;;  %v9891_v8 = vrot.slane %v9889_v50, 4  ;;  %v9904_v17 = vrot.slane %v9902_v2, 4  ;;  %v10405_v50 = vrot.slane %v9526_v51, 5  ;;  %v14562_v51 = vld [vmem:[#allocation3 + $0x24] sm:$0xff]  }
 0x7c9   : > { %v17530_v37 = vpop.f32.mrb[107].mxu1 }
 0x7ca   : > { %v9895_v40 = vor.u32 %v9894_v32, %v9891_v8  ;;  %v10407_v45 = vrot.slane %v10405_v50, 4  ;;  %v14563_v8 = vld [vmem:[#allocation3 + $0x30] sm:$0xff]  }
 0x7cc   : > { %v9896_v13 = vrot.slane %v9895_v40, 4  ;;  %v10409_v40 = vsel %vm15577_vm15, %v10407_v45, %v10408_v1  ;;  %v14568_v45 = vld [vmem:[#allocation3 + $0x54] sm:$0xff]  }
 0x7cd   : > { %13660 = vmatmul.mubr.bf16.gmra.mrb[72].mxu0 %v18178_v9  ;;  %v9900_v9 = vrot.slane %v9898_v55, 5 }
 0x7ce   : > { %v17532_v14 = vpop.f32.mrb[108].mxu1  ;;  %13663 = vmatprep.mubr.bf16.mxu0 %v18179_v21 }
 0x7cf   : > { %v17537_v39 = vpop.f32.mrb[109].mxu1  ;;  %v9905_v58 = vor.u32 %v9904_v17, %v9900_v9  ;;  %v9901_v17 = vsel %vm15491_vm13, %v9896_v13, %v9900_v9  ;;  %v14573_v13 = vld [vmem:[%s18071_s4 + $0x658] sm:$0xff]  }
 0x7d0   : > { %v17542_v46 = vpop.f32.mrb[110].mxu1 }
 0x7d1   : > { %18180 = vst [vmem:[#allocation14_spill] sm:$0xff] %v17542_v46  ;;  %v17544_v28 = vpop.f32.mrb[111].mxu1  ;;  %v9906_v26 = vrot.slane %v9905_v58, 4 }
 0x7d2   : > { %18181 = vst [vmem:[#allocation13_spill] sm:$0xff] %v17544_v28 }
 0x7d3   : > { %v9911_v33 = vsel %vm15491_vm13, %v9906_v26, %v9910_v34  ;;  %v14565_v34 = vld [vmem:[#allocation3 + $0x3c] sm:$0xff]  }
 0x7d5   : > { %13664 = vmatmul.mubr.bf16.gmra.mrb[76].mxu0 %v18183_v47  ;;  %v17561_v47 = vcombine.low %v9901_v17, %v9911_v33 }
 0x7d6   : > { %v17546_v21 = vpop.f32.mrb[112].mxu1  ;;  %13683 = vmatprep.mubr.bf16.mxu0 %v14560_v11  ;;  %v10406_v11 = vsel %vm15577_vm15, %v12364_v35, %v10405_v50  ;;  %v14566_v50 = vld [vmem:[#allocation3 + $0x48] sm:$0xff]   ;;  %v14576_v35 = vld [vmem:[%s18071_s4 + $0x660] sm:$0xff]  }
 0x7d7   : > { %18182 = vst [vmem:[#allocation15_spill] sm:$0xff] %v17546_v21  ;;  %v17551_v6 = vpop.f32.mrb[113].mxu1  ;;  %v12396_v22 = vcombine.low %v10406_v11, %v10409_v40  ;;  %v14579_v11 = vld [vmem:[%s18071_s4 + $0x668] sm:$0xff]   ;;  %v14569_v40 = vld [vmem:[#allocation3 + $0x60] sm:$0xff]  }
 0x7d8   : > { %18184 = vst [vmem:[#allocation16_spill] sm:$0xff] %v17551_v6  ;;  %v17553_v55 = vpop.f32.mrb[114].mxu1  ;;  %v14580_v6 = vld [vmem:[#allocation3 + $0xb4] sm:$0xff]  }
 0x7d9   : > { %18185 = vst [vmem:[#allocation17_spill] sm:$0xff] %v17553_v55  ;;  %v17557_v2 = vpop.f32.mrb[115].mxu1  ;;  %13808 = vmatmul.mubr.bf16.gmra.mrb[124].mxu1 %v12396_v22  ;;  %v14584_v22 = vld [vmem:[%s18071_s4 + $0x678] sm:$0xff]  }
 0x7da   : > { %18186 = vst [vmem:[#allocation18_spill] sm:$0xff] %v17557_v2  ;;  %v9590_v2 = vshrl.u32 %v14604_v10, 16  ;;  %v9572_v10 = vshll.u32 %v17437_v5, 16 }
 0x7dd   : > { %13684 = vmatmul.mubr.bf16.vlgmr.msra.gmra.mrb[48].mxu0 %v14562_v51  ;;  %v14582_v51 = vld [vmem:[%s18071_s4 + $0x670] sm:$0xff]  }
 0x7de   : > { %v17570_v32 = vpop.f32.mrb[116].mxu1  ;;  %13687 = vmatprep.mubr.bf16.mxu0 %v14563_v8  ;;  %13716 = vmatpush3.bf16.msra.mxu0 %v17499_v42  ;;  %v14572_v8 = vld [vmem:[#allocation3 + $0x78] sm:$0xff]  }
 0x7df   : > { %18187 = vst [vmem:[#allocation19_spill] sm:$0xff] %v17570_v32  ;;  %v17572_v26 = vpop.f32.mrb[117].mxu1  ;;  %13717 = vmatprep.subr.bf16.mxu0 %v14567_v63 }
 0x7e0   : > { %18188 = vst [vmem:[#allocation20_spill] sm:$0xff] %v17572_v26  ;;  %v17575_v9 = vpop.f32.mrb[118].mxu1 }
 0x7e1   : > { %18189 = vst [vmem:[#allocation21_spill] sm:$0xff] %v17575_v9  ;;  %v17580_v58 = vpop.f32.mrb[119].mxu1 }
 0x7e2   : > { %18190 = vst [vmem:[#allocation34_spill] sm:$0xff] %v17580_v58  ;;  %13718 = vmatpush3.bf16.msra.mxu0 %v14567_v63  ;;  %v14571_v63 = vld [vmem:[#allocation3 + $0x6c] sm:$0xff]  }
 0x7e3   : > { %13719 = vmatprep.subr.bf16.mxu0 %v14570_v23  ;;  %v14578_v58 = vld [vmem:[#allocation3 + $0xa8] sm:$0xff]  }
 0x7e5   : > { %13688 = vmatmul.mubr.bf16.gmra.mrb[52].mxu0 %v14565_v34  ;;  %v17608_v34 = vld [vmem:[%s18071_s4 + $0x680] sm:$0xff]  }
 0x7e6   : > { %v17585_v1 = vpop.f32.mrb[120].mxu1  ;;  %13691 = vmatprep.mubr.bf16.mxu0 %v14566_v50  ;;  %13720 = vmatpush3.bf16.msra.mxu0 %v14570_v23  ;;  %v14574_v23 = vld [vmem:[#allocation3 + $0x84] sm:$0xff]   ;;  %v9480_v50 = vld [vmem:[#allocation3 + $0x18] sm:$0xf] }
 0x7e7   : > { %18191 = vst [vmem:[#allocation35_spill] sm:$0xff] %v17585_v1  ;;  %v17587_v42 = vpop.f32.mrb[121].mxu1  ;;  %13721 = vmatprep.subr.bf16.mxu0 %v14573_v13  ;;  %v9486_v1 = vld [vmem:[#allocation3 + $0x30] sm:$0xf] }
 0x7e8   : > { %18192 = vst [vmem:[#allocation36_spill] sm:$0xff] %v17587_v42  ;;  %v17589_v17 = vpop.f32.mrb[122].mxu1  ;;  %v9566_v42 = vshrl.u32 %v17433_v20, 16 }
 0x7e9   : > { %18193 = vst [vmem:[#allocation37_spill] sm:$0xff] %v17589_v17  ;;  %v17594_v33 = vpop.f32.mrb[123].mxu1  ;;  %v9562_v17 = vshll.u32 %v17433_v20, 16  ;;  %v9548_v20 = vshll.u32 %v17426_v56, 16  ;;  %v9492_v56 = vld [vmem:[#allocation3 + $0x48] sm:$0xf] }
 0x7ea   : > { %18194 = vst [vmem:[#allocation38_spill] sm:$0xff] %v17594_v33  ;;  %13722 = vmatpush3.bf16.msra.mxu0 %v14573_v13  ;;  %v14575_v13 = vld [vmem:[#allocation3 + $0x90] sm:$0xff]   ;;  %v9628_v5 = vshll.u32 %v9492_v56, 16 }
 0x7eb   : > { %13723 = vmatprep.subr.bf16.mxu0 %v14576_v35 }
 0x7ed   : > { %13692 = vmatmul.mubr.bf16.gmra.mrb[56].mxu0 %v14568_v45  ;;  %v9542_v45 = vshrl.u32 %v17414_v52, 16 }
 0x7ee   : > { %13695 = vmatprep.mubr.bf16.mxu0 %v14569_v40  ;;  %13724 = vmatpush3.bf16.msra.mxu0 %v14576_v35  ;;  %v9538_v35 = vshll.u32 %v17414_v52, 16  ;;  %v9529_v40 = vshrl.u32 %v9480_v50, 16 }
 0x7ef   : > { %13725 = vmatprep.subr.bf16.mxu0 %v14579_v11 }
 0x7f0   : > { %v9531_v9 = vrot.slane %v9529_v40, 4 }
 0x7f2   : > { %13726 = vmatpush3.bf16.msra.mxu0 %v14579_v11  ;;  %v9483_v11 = vld [vmem:[#allocation3 + $0x24] sm:$0xf] }
 0x7f3   : > { %13727 = vmatprep.subr.bf16.mxu0 %v14582_v51  ;;  %v9556_v33 = vshll.u32 %v9483_v11, 16 }
 0x7f5   : > { %13696 = vmatmul.mubr.bf16.gmra.mrb[60].mxu0 %v14571_v63  ;;  %v9553_v63 = vshrl.u32 %v9483_v11, 16  ;;  %v9580_v11 = vshll.u32 %v9486_v1, 16 }
 0x7f6   : > { %13699 = vmatprep.mubr.bf16.mxu0 %v14572_v8  ;;  %13728 = vmatpush3.bf16.msra.mxu0 %v14582_v51  ;;  %v9532_v51 = vshll.u32 %v9480_v50, 16  ;;  %v9544_v8 = vrot.slane %v9542_v45, 4  ;;  %v17618_v50 = vrot.slane %v9562_v17, 5  ;;  %v9568_v45 = vrot.slane %v9566_v42, 4 }
 0x7f7   : > { %13729 = vmatprep.subr.bf16.mxu0 %v14584_v22  ;;  %v9555_v32 = vrot.slane %v9553_v63, 4  ;;  %v9592_v17 = vrot.slane %v9590_v2, 4  ;;  %v9601_v42 = vshrl.u32 %v9489_v31, 16 }
 0x7f8   : > { %v9534_v26 = vrot.slane %v9532_v51, 5 }
 0x7fa   : > { %13730 = vmatpush3.bf16.msra.mxu0 %v14584_v22  ;;  %v17613_v22 = vrot.slane %v9538_v35, 5  ;;  %v9577_v35 = vshrl.u32 %v9486_v1, 16  ;;  %v9535_v55 = vor.u32 %v9534_v26, %v9531_v9  ;;  %v9604_v1 = vshll.u32 %v9489_v31, 16  ;;  %v14605_v9 = vld [vmem:[#allocation3 + $0x40] sm:$0xf] }
 0x7fb   : > { %13763 = vmatprep.subr.bf16.mxu0 %v17608_v34 }
 0x7fc   : > { %v9545_v52 = vor.u32 %v9544_v8, %v17613_v22  ;;  %v9579_v63 = vrot.slane %v9577_v35, 4  ;;  %v9582_v8 = vrot.slane %v9580_v11, 5  ;;  %v9536_v21 = vrot.slane %v9535_v55, 4 }
 0x7fd   : > { %13700 = vmatmul.mubr.bf16.gmra.mrb[64].mxu0 %v14574_v23  ;;  %v14577_v23 = vld [vmem:[#allocation3 + $0x9c] sm:$0xff]   ;;  %v9603_v11 = vrot.slane %v9601_v42, 4  ;;  %v9606_v55 = vrot.slane %v9604_v1, 5 }
 0x7fe   : > { %13703 = vmatprep.mubr.bf16.mxu0 %v14575_v13  ;;  %v9558_v13 = vrot.slane %v9556_v33, 5  ;;  %v9546_v40 = vrot.slane %v9545_v52, 4  ;;  %v17622_v33 = vrot.slane %v9586_v57, 5  ;;  %v9610_v52 = vshll.u32 %v14605_v9, 16 }
 0x7ff   : > { %v9583_v2 = vor.u32 %v9582_v8, %v9579_v63  ;;  %v9495_v8 = vld [vmem:[#allocation3 + $0x54] sm:$0xf] }
 0x800   : > { %v9559_v51 = vor.u32 %v9558_v13, %v9555_v32  ;;  %v9614_v13 = vshrl.u32 %v14605_v9, 16  ;;  %v9593_v35 = vor.u32 %v9592_v17, %v17622_v33  ;;  %v14583_v9 = vld [vmem:[#allocation3 + $0xcc] sm:$0xff]  }
 0x801   : > { %v9584_v1 = vrot.slane %v9583_v2, 4 }
 0x802   : > { %v9560_v26 = vrot.slane %v9559_v51, 4  ;;  %v14607_v51 = vld [vmem:[#allocation3 + $0x4c] sm:$0xf]  ;;  %v9616_v63 = vrot.slane %v9614_v13, 4  ;;  %v9652_v13 = vshll.u32 %v9495_v8, 16 }
 0x803   : > { %v9638_v4 = vshrl.u32 %v14607_v51, 16 }
 0x804   : > { %v9565_v17 = vsel %vm15491_vm13, %v9560_v26, %v17618_v50 }
 0x805   : > { %13704 = vmatmul.mubr.bf16.gmra.mrb[68].mxu0 %v14577_v23  ;;  %v9569_v23 = vor.u32 %v9568_v45, %v17618_v50  ;;  %v14606_v45 = vld [vmem:[#allocation3 + $0x38] sm:$0x1] }
 0x806   : > { %13707 = vmatprep.mubr.bf16.mxu0 %v14578_v58  ;;  %v9550_v58 = vrot.slane %v9548_v20, 5  ;;  %v9596_v31 = vshll.u32 %v14606_v45, 16  ;;  %v9625_v20 = vshrl.u32 %v9492_v56, 16  ;;  %v9630_v45 = vrot.slane %v9628_v5, 5  ;;  %v14608_v50 = vld [vmem:[#allocation3 + $0x58] sm:$0xf] }
 0x807   : > { %v9570_v57 = vrot.slane %v9569_v23, 4  ;;  %v17631_v23 = vrot.slane %v9610_v52, 5  ;;  %v9649_v52 = vshrl.u32 %v9495_v8, 16  ;;  %v9658_v26 = vshll.u32 %v14608_v50, 16  ;;  %v14610_v5 = vld [vmem:[#allocation3 + $0x44] sm:$0x1] }
 0x808   : > { %v9551_v32 = vsel %vm15491_vm13, %v9546_v40, %v9550_v58  ;;  %v9574_v40 = vrot.slane %v9572_v10, 5  ;;  %v9634_v58 = vshll.u32 %v14607_v51, 16  ;;  %v9598_v56 = vrot.slane %v9596_v31, 5  ;;  %v9498_v51 = vld [vmem:[#allocation3 + $0x60] sm:$0xf] }
 0x809   : > { %v9627_v10 = vrot.slane %v9625_v20, 4  ;;  %v9617_v28 = vor.u32 %v9616_v63, %v17631_v23  ;;  %v9662_v46 = vshrl.u32 %v14608_v50, 16  ;;  %v9676_v2 = vshll.u32 %v9498_v51, 16 }
 0x80a   : > { %v9575_v42 = vsel %vm15491_vm13, %v9570_v57, %v9574_v40  ;;  %v17638_v3 = vrot.slane %v9634_v58, 5  ;;  %v9673_v57 = vshrl.u32 %v9498_v51, 16  ;;  %v9620_v40 = vshll.u32 %v14610_v5, 16  ;;  %v14612_v5 = vld [vmem:[#allocation3 + $0x70] sm:$0xf] }
 0x80b   : > { %v9631_v58 = vor.u32 %v9630_v45, %v9627_v10  ;;  %v9651_v63 = vrot.slane %v9649_v52, 4  ;;  %v9618_v8 = vrot.slane %v9617_v28, 4  ;;  %v17647_v51 = vrot.slane %v9658_v26, 5 }
 0x80c   : > { %v9664_v50 = vrot.slane %v9662_v46, 4  ;;  %v9678_v18 = vrot.slane %v9676_v2, 5  ;;  %v9706_v10 = vshll.u32 %v14612_v5, 16  ;;  %v9710_v45 = vshrl.u32 %v14612_v5, 16  ;;  %v14613_v2 = vld [vmem:[#allocation3 + $0x5c] sm:$0x1] }
 0x80d   : > { %13708 = vmatmul.mubr.bf16.gmra.mrb[72].mxu0 %v14580_v6  ;;  %v9541_v6 = vsel %vm15491_vm13, %v9536_v21, %v17613_v22  ;;  %v9594_v21 = vrot.slane %v9593_v35, 4  ;;  %v9607_v22 = vor.u32 %v9606_v55, %v9603_v11  ;;  %v14609_v35 = vld [vmem:[#allocation3 + $0x64] sm:$0xf]  ;;  %v9589_v55 = vsel %vm15491_vm13, %v9584_v1, %v17622_v33 }
 0x80e   : > { %13711 = vmatprep.mubr.bf16.mxu0 %v14581_v19  ;;  %v12325_v19 = vcombine.low %v9541_v6, %v9551_v32  ;;  %v9640_v32 = vrot.slane %v9638_v4, 4  ;;  %v12326_v6 = vcombine.low %v9565_v17, %v9575_v42  ;;  %v9682_v31 = vshll.u32 %v14609_v35, 16  ;;  %v14611_v17 = vld [vmem:[#allocation3 + $0x50] sm:$0x1] }
 0x80f   : > { %v9686_v11 = vshrl.u32 %v14609_v35, 16  ;;  %v9599_v4 = vsel %vm15491_vm13, %v9594_v21, %v9598_v56  ;;  %v9608_v20 = vrot.slane %v9607_v22, 4  ;;  %v9644_v42 = vshll.u32 %v14611_v17, 16  ;;  %v9501_v22 = vld [vmem:[#allocation3 + $0x6c] sm:$0xf] }
 0x810   : > { %v9675_v35 = vrot.slane %v9673_v57, 4  ;;  %v17649_v33 = vrot.slane %v9682_v31, 5  ;;  %v12327_v56 = vcombine.low %v9589_v55, %v9599_v4  ;;  %v9622_v21 = vrot.slane %v9620_v40, 5 }
 0x811   : > { %v9688_v1 = vrot.slane %v9686_v11, 4  ;;  %v9613_v28 = vsel %vm15491_vm13, %v9608_v20, %v17631_v23  ;;  %v9646_v26 = vrot.slane %v9644_v42, 5  ;;  %v9665_v57 = vor.u32 %v9664_v50, %v17647_v51  ;;  %v9504_v20 = vld [vmem:[#allocation3 + $0x78] sm:$0xf]  ;;  %v14616_v50 = vld [vmem:[#allocation3 + $0x68] sm:$0x1] }
 0x812   : > { %v9623_v46 = vsel %vm15491_vm13, %v9618_v8, %v9622_v21  ;;  %v9668_v31 = vshll.u32 %v14613_v2, 16  ;;  %v9679_v11 = vor.u32 %v9678_v18, %v9675_v35  ;;  %v9697_v4 = vshrl.u32 %v9501_v22, 16 }
 0x813   : > { %v9689_v55 = vor.u32 %v9688_v1, %v17649_v33  ;;  %v9700_v23 = vshll.u32 %v9501_v22, 16  ;;  %v17662_v40 = vrot.slane %v9706_v10, 5  ;;  %v12328_v8 = vcombine.low %v9613_v28, %v9623_v46  ;;  %v14617_v28 = vld [vmem:[%s18071_s4 + $0x690] sm:$0xff]  }
 0x814   : > { %v9666_v42 = vrot.slane %v9665_v57, 4  ;;  %v9692_v35 = vshll.u32 %v14616_v50, 16  ;;  %v9721_v1 = vshrl.u32 %v9504_v20, 16  ;;  %v9670_v21 = vrot.slane %v9668_v31, 5  ;;  %v14618_v57 = vld [vmem:[#allocation3 + $0x88] sm:$0xf] }
 0x815   : > { %13712 = vmatmul.mubr.bf16.gmra.mrb[76].mxu0 %v14583_v9  ;;  %v9641_v9 = vor.u32 %v9640_v32, %v17638_v3  ;;  %v9632_v32 = vrot.slane %v9631_v58, 4  ;;  %v9712_v58 = vrot.slane %v9710_v45, 4  ;;  %v9680_v22 = vrot.slane %v9679_v11, 4 }
 0x816   : > { %13731 = vmatprep.mubr.bf16.mxu0 %v12325_v19  ;;  %v9654_v19 = vrot.slane %v9652_v13, 5  ;;  %v9699_v5 = vrot.slane %v9697_v4, 4  ;;  %v9702_v10 = vrot.slane %v9700_v23, 5  ;;  %v9690_v45 = vrot.slane %v9689_v55, 4 }
 0x817   : > { %v9642_v52 = vrot.slane %v9641_v9, 4  ;;  %v14615_v9 = vld [vmem:[#allocation3 + $0x7c] sm:$0xf]  ;;  %v9637_v18 = vsel %vm15491_vm13, %v9632_v32, %v17638_v3  ;;  %v9713_v3 = vor.u32 %v9712_v58, %v17662_v40  ;;  %v9754_v2 = vshll.u32 %v14618_v57, 16  ;;  %v14619_v58 = vld [vmem:[#allocation3 + $0x74] sm:$0x1] }
 0x818   : > { %v9655_v13 = vor.u32 %v9654_v19, %v9651_v63  ;;  %v9730_v63 = vshll.u32 %v14615_v9, 16  ;;  %v9734_v19 = vshrl.u32 %v14615_v9, 16  ;;  %v9758_v31 = vshrl.u32 %v14618_v57, 16 }
 0x819   : > { %v9671_v11 = vsel %vm15491_vm13, %v9666_v42, %v9670_v21  ;;  %v9694_v55 = vrot.slane %v9692_v35, 5  ;;  %v9723_v4 = vrot.slane %v9721_v1, 4  ;;  %v9716_v9 = vshll.u32 %v14619_v58, 16  ;;  %v14621_v21 = vld [vmem:[#allocation3 + $0x80] sm:$0x1] }
 0x81a   : > { %v9656_v17 = vrot.slane %v9655_v13, 4  ;;  %v17673_v32 = vrot.slane %v9730_v63, 5  ;;  %v9507_v13 = vld [vmem:[#allocation3 + $0x84] sm:$0xf]  ;;  %v17689_v42 = vrot.slane %v9754_v2, 5  ;;  %v9760_v50 = vrot.slane %v9758_v31, 4 }
 0x81b   : > { %v9745_v63 = vshrl.u32 %v9507_v13, 16  ;;  %v14623_v2 = vld [vmem:[%s18071_s4 + $0x6a0] sm:$0xff]  }
 0x81d   : > { %13732 = vmatmul.mubr.bf16.vlgmr.msra.gmra.mrb[48].mxu0 %v12326_v6  ;;  %v14614_v6 = vld [vmem:[%s18071_s4 + $0x688] sm:$0xff]  }
 0x81e   : > { %13735 = vmatprep.mubr.bf16.mxu0 %v12327_v56  ;;  %13764 = vmatpush3.bf16.msra.mxu0 %v17608_v34  ;;  %v9647_v34 = vsel %vm15491_vm13, %v9642_v52, %v9646_v26  ;;  %v9724_v56 = vshll.u32 %v9504_v20, 16  ;;  %v9736_v52 = vrot.slane %v9734_v19, 4  ;;  %v9661_v26 = vsel %vm15491_vm13, %v9656_v17, %v17647_v51  ;;  %v9510_v20 = vld [vmem:[#allocation3 + $0x90] sm:$0xf]  ;;  %v14620_v17 = vld [vmem:[%s18071_s4 + $0x698] sm:$0xff]  }
 0x81f   : > { %13765 = vmatprep.subr.bf16.mxu0 %v14614_v6  ;;  %v12329_v46 = vcombine.low %v9637_v18, %v9647_v34  ;;  %v9748_v19 = vshll.u32 %v9507_v13, 16  ;;  %v9685_v51 = vsel %vm15491_vm13, %v9680_v22, %v17649_v33  ;;  %v9714_v18 = vrot.slane %v9713_v3, 4  ;;  %v14622_v33 = vld [vmem:[#allocation3 + $0x94] sm:$0xf] }
 0x820   : > { %v9726_v23 = vrot.slane %v9724_v56, 5  ;;  %v9737_v34 = vor.u32 %v9736_v52, %v17673_v32  ;;  %v9769_v35 = vshrl.u32 %v9510_v20, 16  ;;  %v9772_v1 = vshll.u32 %v9510_v20, 16 }
 0x821   : > { %v9778_v22 = vshll.u32 %v14622_v33, 16  ;;  %v9747_v3 = vrot.slane %v9745_v63, 4  ;;  %v9750_v52 = vrot.slane %v9748_v19, 5  ;;  %v12330_v13 = vcombine.low %v9661_v26, %v9671_v11  ;;  %v14624_v63 = vld [vmem:[#allocation3 + $0x8c] sm:$0x1] }
 0x822   : > { %13766 = vmatpush3.bf16.msra.mxu0 %v14614_v6  ;;  %v9703_v6 = vor.u32 %v9702_v10, %v9699_v5  ;;  %v9727_v56 = vor.u32 %v9726_v23, %v9723_v4  ;;  %v9740_v5 = vshll.u32 %v14621_v21, 16  ;;  %v9782_v10 = vshrl.u32 %v14622_v33, 16  ;;  %v14627_v33 = vld [vmem:[#allocation3 + $0xac] sm:$0xf] }
 0x823   : > { %13767 = vmatprep.subr.bf16.mxu0 %v14617_v28  ;;  %v9738_v57 = vrot.slane %v9737_v34, 4  ;;  %v9771_v4 = vrot.slane %v9769_v35, 4  ;;  %v9774_v23 = vrot.slane %v9772_v1, 5  ;;  %v17697_v58 = vrot.slane %v9778_v22, 5  ;;  %v14625_v34 = vld [vmem:[%s18071_s4 + $0x6a8] sm:$0xff]  }
 0x824   : > { %v9728_v20 = vrot.slane %v9727_v56, 4  ;;  %v9784_v26 = vrot.slane %v9782_v10, 4  ;;  %v9764_v19 = vshll.u32 %v14624_v63, 16  ;;  %v14626_v35 = vld [vmem:[#allocation3 + $0xa0] sm:$0xf]  ;;  %v9826_v22 = vshll.u32 %v14627_v33, 16 }
 0x825   : > { %13736 = vmatmul.mubr.bf16.gmra.mrb[52].mxu0 %v12328_v8  ;;  %v9695_v8 = vsel %vm15491_vm13, %v9690_v45, %v9694_v55  ;;  %v9704_v45 = vrot.slane %v9703_v6, 4  ;;  %v9761_v55 = vor.u32 %v9760_v50, %v17689_v42  ;;  %v9742_v6 = vrot.slane %v9740_v5, 5 }
 0x826   : > { %13739 = vmatprep.mubr.bf16.mxu0 %v12329_v46  ;;  %13768 = vmatpush3.bf16.msra.mxu0 %v14617_v28  ;;  %v9718_v28 = vrot.slane %v9716_v9, 5  ;;  %v12331_v46 = vcombine.low %v9685_v51, %v9695_v8  ;;  %v9751_v9 = vor.u32 %v9750_v52, %v9747_v3  ;;  %v9775_v50 = vor.u32 %v9774_v23, %v9771_v4 }
 0x827   : > { %13769 = vmatprep.subr.bf16.mxu0 %v14620_v17  ;;  %v9709_v11 = vsel %vm15491_vm13, %v9704_v45, %v17662_v40  ;;  %v9743_v8 = vsel %vm15491_vm13, %v9738_v57, %v9742_v6  ;;  %v9802_v1 = vshll.u32 %v14626_v35, 16  ;;  %v9806_v56 = vshrl.u32 %v14626_v35, 16  ;;  %v9516_v40 = vld [vmem:[#allocation3 + $0xa8] sm:$0xf] }
 0x828   : > { %v9719_v31 = vsel %vm15491_vm13, %v9714_v18, %v9718_v28  ;;  %v9513_v18 = vld [vmem:[#allocation3 + $0x9c] sm:$0xf]  ;;  %v9733_v21 = vsel %vm15491_vm13, %v9728_v20, %v17673_v32  ;;  %v9785_v5 = vor.u32 %v9784_v26, %v17697_v58  ;;  %v9830_v10 = vshrl.u32 %v14627_v33, 16 }
 0x829   : > { %v12332_v51 = vcombine.low %v9709_v11, %v9719_v31  ;;  %v9752_v45 = vrot.slane %v9751_v9, 4  ;;  %v9766_v28 = vrot.slane %v9764_v19, 5  ;;  %v9793_v3 = vshrl.u32 %v9513_v18, 16 }
 0x82a   : > { %13770 = vmatpush3.bf16.msra.mxu0 %v14620_v17  ;;  %v9762_v17 = vrot.slane %v9761_v55, 4  ;;  %v9796_v52 = vshll.u32 %v9513_v18, 16  ;;  %v9820_v31 = vshll.u32 %v9516_v40, 16  ;;  %v14629_v55 = vld [vmem:[%s18071_s4 + $0x6b0] sm:$0xff]   ;;  %v9776_v4 = vrot.slane %v9775_v50, 4 }
 0x82b   : > { %13771 = vmatprep.subr.bf16.mxu0 %v14623_v2  ;;  %v17716_v23 = vrot.slane %v9802_v1, 5  ;;  %v9808_v20 = vrot.slane %v9806_v56, 4  ;;  %v9786_v6 = vrot.slane %v9785_v5, 4  ;;  %v17718_v26 = vrot.slane %v9826_v22, 5  ;;  %v9519_v50 = vld [vmem:[#allocation3 + $0xb4] sm:$0xf] }
 0x82c   : > { %v9767_v32 = vsel %vm15491_vm13, %v9762_v17, %v9766_v28  ;;  %v9832_v11 = vrot.slane %v9830_v10, 4  ;;  %v9757_v9 = vsel %vm15491_vm13, %v9752_v45, %v17689_v42  ;;  %v9795_v63 = vrot.slane %v9793_v3, 4  ;;  %v14631_v42 = vld [vmem:[#allocation3 + $0xb8] sm:$0xf]  ;;  %v14632_v22 = vld [vmem:[#allocation3 + $0xc4] sm:$0xf] }
 0x82d   : > { %13740 = vmatmul.mubr.bf16.gmra.mrb[56].mxu0 %v12330_v13  ;;  %v12333_v13 = vcombine.low %v9733_v21, %v9743_v8  ;;  %v9798_v19 = vrot.slane %v9796_v52, 5  ;;  %v12334_v8 = vcombine.low %v9757_v9, %v9767_v32  ;;  %v9822_v17 = vrot.slane %v9820_v31, 5  ;;  %v9522_v21 = vld [vmem:[#allocation3 + $0xc0] sm:$0xf]  ;;  %v14633_v3 = vld [vmem:[#allocation3 + $0xa4] sm:$0x1] }
 0x82e   : > { %13743 = vmatprep.mubr.bf16.mxu0 %v12331_v46  ;;  %13772 = vmatpush3.bf16.msra.mxu0 %v14623_v2  ;;  %v14628_v46 = vld [vmem:[#allocation3 + $0x98] sm:$0x1]  ;;  %v9817_v2 = vshrl.u32 %v9516_v40, 16  ;;  %v9781_v35 = vsel %vm15491_vm13, %v9776_v4, %v17697_v58  ;;  %v9809_v1 = vor.u32 %v9808_v20, %v17716_v23  ;;  %v9850_v56 = vshll.u32 %v14631_v42, 16 }
 0x82f   : > { %13773 = vmatprep.subr.bf16.mxu0 %v14625_v34  ;;  %v9788_v57 = vshll.u32 %v14628_v46, 16  ;;  %v9854_v40 = vshrl.u32 %v14631_v42, 16  ;;  %v9833_v33 = vor.u32 %v9832_v11, %v17718_v26  ;;  %v9874_v10 = vshll.u32 %v14632_v22, 16 }
 0x830   : > { %v9878_v45 = vshrl.u32 %v14632_v22, 16  ;;  %v9799_v28 = vor.u32 %v9798_v19, %v9795_v63  ;;  %v9812_v52 = vshll.u32 %v14633_v3, 16  ;;  %v9844_v46 = vshll.u32 %v9519_v50, 16  ;;  %v14636_v3 = vld [vmem:[#allocation3 + $0xc8] sm:$0x1] }
 0x831   : > { %v9790_v18 = vrot.slane %v9788_v57, 5  ;;  %v14634_v57 = vld [vmem:[#allocation3 + $0xb0] sm:$0x1]  ;;  %v9865_v31 = vshrl.u32 %v9522_v21, 16  ;;  %v9810_v4 = vrot.slane %v9809_v1, 4  ;;  %v9852_v20 = vrot.slane %v9850_v56, 5 }
 0x832   : > { %13774 = vmatpush3.bf16.msra.mxu0 %v14625_v34  ;;  %v9819_v34 = vrot.slane %v9817_v2, 4  ;;  %v9836_v2 = vshll.u32 %v14634_v57, 16  ;;  %v9834_v11 = vrot.slane %v9833_v33, 4  ;;  %v9876_v9 = vrot.slane %v9874_v10, 5 }
 0x833   : > { %13775 = vmatprep.subr.bf16.mxu0 %v14629_v55  ;;  %v9791_v5 = vsel %vm15491_vm13, %v9786_v6, %v9790_v18  ;;  %v9856_v6 = vrot.slane %v9854_v40, 4  ;;  %v9880_v18 = vrot.slane %v9878_v45, 4  ;;  %v9800_v63 = vrot.slane %v9799_v28, 4 }
 0x834   : > { %v9823_v58 = vor.u32 %v9822_v17, %v9819_v34  ;;  %v12335_v32 = vcombine.low %v9781_v35, %v9791_v5  ;;  %v9814_v19 = vrot.slane %v9812_v52, 5  ;;  %v9846_v22 = vrot.slane %v9844_v46, 5  ;;  %v14635_v5 = vld [vmem:[#allocation3 + $0xbc] sm:$0x1] }
 0x835   : > { %13744 = vmatmul.mubr.bf16.gmra.mrb[60].mxu0 %v12332_v51  ;;  %v14630_v51 = vld [vmem:[%s18071_s4 + $0x6b8] sm:$0xff]   ;;  %v9867_v34 = vrot.slane %v9865_v31, 4  ;;  %v9857_v35 = vor.u32 %v9856_v6, %v9852_v20  ;;  %v9805_v56 = vsel %vm15491_vm13, %v9800_v63, %v17716_v23  ;;  %v9860_v33 = vshll.u32 %v14635_v5, 16 }
 0x836   : > { %13747 = vmatprep.mubr.bf16.mxu0 %v12333_v13  ;;  %13776 = vmatpush3.bf16.msra.mxu0 %v14629_v55  ;;  %v9841_v13 = vshrl.u32 %v9519_v50, 16  ;;  %v9868_v55 = vshll.u32 %v9522_v21, 16  ;;  %v9824_v50 = vrot.slane %v9823_v58, 4  ;;  %v9815_v21 = vsel %vm15491_vm13, %v9810_v4, %v9814_v19  ;;  %v14590_v19 = vld [vmem:[%s18073_s6 + $0x28] sm:$0xff]  }
 0x837   : > { %13777 = vmatprep.subr.bf16.mxu0 %v14630_v51  ;;  %v12336_v10 = vcombine.low %v9805_v56, %v9815_v21  ;;  %v9884_v52 = vshll.u32 %v14636_v3, 16  ;;  %v9858_v46 = vrot.slane %v9857_v35, 4  ;;  %v18196_v63 = vcombine.low %v17471_v30, %v17475_v24  ;;  %v14589_v30 = vld [vmem:[%s18073_s6 + $0x20] sm:$0xff]  }
 0x838   : > { %v9843_v42 = vrot.slane %v9841_v13, 4  ;;  %v9870_v17 = vrot.slane %v9868_v55, 5  ;;  %v9829_v45 = vsel %vm15491_vm13, %v9824_v50, %v17718_v26  ;;  %v14592_v50 = vld [vmem:[%s18073_s6 + $0x38] sm:$0xff]   ;;  %v17794_v21 = vld [vmem:[%s18072_s5 + $0x2] ss:$0 sm:$0xff] }
 0x839   : > { %v9886_v23 = vrot.slane %v9884_v52, 5 }
 0x83a   : > { %13778 = vmatpush3.bf16.msra.mxu0 %v14630_v51  ;;  %v9838_v51 = vrot.slane %v9836_v2, 5  ;;  %v9847_v40 = vor.u32 %v9846_v22, %v9843_v42  ;;  %v9871_v28 = vor.u32 %v9870_v17, %v9867_v34  ;;  %v9862_v2 = vrot.slane %v9860_v33, 5  ;;  %v14591_v22 = vld [vmem:[%s18073_s6 + $0x30] sm:$0xff]  }
 0x83c   : > { %v9839_v1 = vsel %vm15491_vm13, %v9834_v11, %v9838_v51  ;;  %v9848_v57 = vrot.slane %v9847_v40, 4  ;;  %v9872_v31 = vrot.slane %v9871_v28, 4  ;;  %v9863_v55 = vsel %vm15491_vm13, %v9858_v46, %v9862_v2 }
 0x83d   : > { %13748 = vmatmul.mubr.bf16.gmra.mrb[64].mxu0 %v12334_v8  ;;  %v9881_v8 = vor.u32 %v9880_v18, %v9876_v9  ;;  %v12337_v13 = vcombine.low %v9829_v45, %v9839_v1  ;;  %v18195_v18 = vcombine.low %v17445_v38, %v17449_v16  ;;  %v14587_v38 = vld [vmem:[%s18073_s6 + $0x10] sm:$0xff]   ;;  %v14588_v16 = vld [vmem:[%s18073_s6 + $0x18] sm:$0xff]  }
 0x83e   : > { %13751 = vmatprep.mubr.bf16.mxu0 %v12335_v32  ;;  %v9853_v26 = vsel %vm15491_vm13, %v9848_v57, %v9852_v20  ;;  %v9877_v6 = vsel %vm15491_vm13, %v9872_v31, %v9876_v9  ;;  %v14585_v20 = vld [vmem:[%s18073_s6] sm:$0xff]  }
 0x83f   : > { %v9882_v58 = vrot.slane %v9881_v8, 4  ;;  %v12338_v4 = vcombine.low %v9853_v26, %v9863_v55  ;;  %13811 = vmatprep.subr.bf16.mxu1 %v14585_v20 }
 0x840   : > { %13812 = vmatpush3.bf16.msra.mxu1 %v14585_v20 }
 0x841   : > { %v9887_v32 = vsel %vm15491_vm13, %v9882_v58, %v9886_v23  ;;  %13813 = vmatprep.subr.bf16.mxu1 %v14586_v54 }
 0x842   : > { %v12339_v11 = vcombine.low %v9877_v6, %v9887_v32 }
 0x844   : > { %13814 = vmatpush3.bf16.msra.mxu1 %v14586_v54 }
 0x845   : > { %13752 = vmatmul.mubr.bf16.gmra.mrb[68].mxu0 %v12336_v10  ;;  %13815 = vmatprep.subr.bf16.mxu1 %v14587_v38 }
 0x846   : > { %13755 = vmatprep.mubr.bf16.mxu0 %v12337_v13 }
 0x848   : > { %13816 = vmatpush3.bf16.msra.mxu1 %v14587_v38 }
 0x849   : > { %13817 = vmatprep.subr.bf16.mxu1 %v14588_v16 }
 0x84c   : > { %13818 = vmatpush3.bf16.msra.mxu1 %v14588_v16 }
 0x84d   : > { %13756 = vmatmul.mubr.bf16.gmra.mrb[72].mxu0 %v12338_v4  ;;  %13819 = vmatprep.subr.bf16.mxu1 %v14589_v30 }
 0x84e   : > { %13759 = vmatprep.mubr.bf16.mxu0 %v12339_v11 }
 0x850   : > { %13820 = vmatpush3.bf16.msra.mxu1 %v14589_v30 }
 0x851   : > { %13821 = vmatprep.subr.bf16.mxu1 %v14590_v19 }
 0x854   : > { %13822 = vmatpush3.bf16.msra.mxu1 %v14590_v19 }
 0x855   : > { %13760 = vmatmul.mubr.bf16.gmra.mrb[76].mxu0 %v17561_v47  ;;  %13823 = vmatprep.subr.bf16.mxu1 %v14591_v22 }
 0x856   : > { %13779 = vmatprep.mubr.bf16.mxu0 %v18195_v18 }
 0x858   : > { %13824 = vmatpush3.bf16.msra.mxu1 %v14591_v22 }
 0x859   : > { %13825 = vmatprep.subr.bf16.mxu1 %v14592_v50 }
 0x85c   : > { %13826 = vmatpush3.bf16.msra.mxu1 %v14592_v50 }
 0x85d   : > { %13780 = vmatmul.mubr.bf16.vlgmr.msra.gmra.mrb[48].mxu0 %v18196_v63 }
 0x8ac   : > { %v17773_v24 = vpop.f32.mrb[124].mxu1 }
 0x8ad   : > { %v17775_v47 = vpop.f32.mrb[125].mxu1 }
 0x8ae   : > { %v17777_v9 = vpop.f32.mrb[126].mxu1 }
 0x8af   : > { %v17782_v42 = vpop.f32.mrb[127].mxu1 }
 0x8f8   : > { %v13737_v51 = vpop.f32.mrb[52].mxu0 }
 0x8f9   : > { %v13879_v34 = vadd.f32 %v13737_v51, %v17234_v59  ;;  %v10091_v17 = vpop.f32.mrb[53].mxu0 }
 0x8fa   : > { %v13881_v35 = vadd.f32 %v10091_v17, %v17243_v25  ;;  %v13738_v1 = vpop.f32.mrb[54].mxu0 }
 0x8fb   : > { %v13880_v8 = vadd.f32 %v13879_v34, %v17504_v61  ;;  %v13883_v56 = vadd.f32 %v13738_v1, %v17268_v12  ;;  %v10094_v40 = vpop.f32.mrb[55].mxu0 }
 0x8fc   : > { %v13882_v5 = vadd.f32 %v13881_v35, %v17509_v7  ;;  %v13885_v33 = vadd.f32 %v10094_v40, %v17282_v15 }
 0x8fd   : > { %v10746_v59 = vadd.f32 %v13880_v8, %v17794_v21  ;;  %v13884_v10 = vadd.f32 %v13883_v56, %v17514_v48 }
 0x8fe   : > { %v10744_v45 = vadd.f32 %v13882_v5, %v17794_v21  ;;  %v13886_v28 = vadd.f32 %v13885_v33, %v17516_v43 }
 0x8ff   : > { %v10810_v3 = vmul.f32 0.2, %v10746_v59  ;;  %v10747_v25 = vadd.f32 %v13884_v10, %v17794_v21  ;;  %vm10778_vm6 = vcmp.ge.f32.partialorder %v10746_v59, 0.0 }
 0x900   : > { %v10808_v61 = vmul.f32 0.2, %v10744_v45  ;;  %v10745_v12 = vadd.f32 %v13886_v28, %v17794_v21  ;;  %v13741_v52 = vpop.f32.mrb[56].mxu0  ;;  %vm10776_vm9 = vcmp.ge.f32.partialorder %v10744_v45, 0.0 }
 0x901   : > { %v10811_v7 = vmul.f32 0.2, %v10747_v25  ;;  %v13887_v15 = vadd.f32 %v13741_v52, %v17337_v53  ;;  %v10107_v13 = vpop.f32.mrb[57].mxu0  ;;  %vm10779_vm11 = vcmp.ge.f32.partialorder %v10747_v25, 0.0  ;;  %v10842_v46 = vsel %vm10778_vm6, %v10746_v59, %v10810_v3 }
 0x902   : > { %v10809_v48 = vmul.f32 0.2, %v10745_v12  ;;  %v13889_v58 = vadd.f32 %v10107_v13, %v17340_v44  ;;  %v13742_v57 = vpop.f32.mrb[58].mxu0  ;;  %vm10777_vm13 = vcmp.ge.f32.partialorder %v10745_v12, 0.0  ;;  %v10840_v43 = vsel %vm10776_vm9, %v10744_v45, %v10808_v61  ;;  %v18198_v45 = vld [vmem:[#allocation14_spill] sm:$0xff] }
 0x903   : > { %v13888_v2 = vadd.f32 %v13887_v15, %v17518_v60  ;;  %v13891_v31 = vadd.f32 %v13742_v57, %v17342_v0  ;;  %v10110_v23 = vpop.f32.mrb[59].mxu0  ;;  %v17811_v55 = vmul.f32 1.4142135, %v10840_v43  ;;  %v10843_v32 = vsel %vm10779_vm11, %v10747_v25, %v10811_v7  ;;  %v18199_v25 = vld [vmem:[#allocation13_spill] sm:$0xff] }
 0x904   : > { %v13890_v26 = vadd.f32 %v13889_v58, %v17523_v36  ;;  %v13893_v53 = vadd.f32 %v10110_v23, %v17344_v29  ;;  %v10841_v4 = vsel %vm10777_vm13, %v10745_v12, %v10809_v48  ;;  %v17815_v6 = vmul.f32 1.4142135, %v10842_v46  ;;  %v18200_v58 = vld [vmem:[#allocation23_spill] sm:$0xff]  ;;  %v18201_v23 = vld [vmem:[#allocation24_spill] sm:$0xff] }
 0x905   : > { %v10750_v44 = vadd.f32 %v13888_v2, %v17794_v21  ;;  %v13892_v11 = vadd.f32 %v13891_v31, %v17528_v27  ;;  %v17819_v18 = vmul.f32 1.4142135, %v10841_v4  ;;  %v17821_v60 = vmul.f32 1.4142135, %v10843_v32  ;;  %v18202_v4 = vld [vmem:[#allocation15_spill] sm:$0xff] }
 0x906   : > { %v10748_v0 = vadd.f32 %v13890_v26, %v17794_v21  ;;  %v13894_v63 = vadd.f32 %v13893_v53, %v17530_v37 }
 0x907   : > { %v10814_v20 = vmul.f32 0.2, %v10750_v44  ;;  %v10751_v36 = vadd.f32 %v13892_v11, %v17794_v21  ;;  %v10966_v29 = vpack.c.bf16 %v17819_v18, %v17811_v55  ;;  %v10967_v54 = vpack.c.bf16 %v17821_v60, %v17815_v6  ;;  %v18203_v11 = vld [vmem:[#allocation25_spill] sm:$0xff] }
 0x908   : > { %v10812_v38 = vmul.f32 0.2, %v10748_v0  ;;  %v10749_v27 = vadd.f32 %v13894_v63, %v17794_v21  ;;  %v13745_v16 = vpop.f32.mrb[60].mxu0  ;;  %vm10780_vm15 = vcmp.ge.f32.partialorder %v10748_v0, 0.0  ;;  %vm10782_vm1 = vcmp.ge.f32.partialorder %v10750_v44, 0.0 }
 0x909   : > { %v10815_v30 = vmul.f32 0.2, %v10751_v36  ;;  %v13895_v19 = vadd.f32 %v13745_v16, %v17366_v49  ;;  %v10123_v22 = vpop.f32.mrb[61].mxu0  ;;  %vm10783_vm2 = vcmp.ge.f32.partialorder %v10751_v36, 0.0  ;;  %v10846_v37 = vsel %vm10782_vm1, %v10750_v44, %v10814_v20  ;;  %v18197_v49 = vld [vmem:[#allocation22_spill] sm:$0xff] }
 0x90a   : > { %v10813_v50 = vmul.f32 0.2, %v10749_v27  ;;  %v13897_v51 = vadd.f32 %v10123_v22, %v17371_v62  ;;  %v13746_v34 = vpop.f32.mrb[62].mxu0  ;;  %vm10781_vm3 = vcmp.ge.f32.partialorder %v10749_v27, 0.0  ;;  %v10844_v17 = vsel %vm10780_vm15, %v10748_v0, %v10812_v38  ;;  %v18204_v38 = vld [vmem:[#allocation16_spill] sm:$0xff]  ;;  %v18205_v16 = vld [vmem:[#allocation26_spill] sm:$0xff] }
 0x90b   : > { %v13896_v35 = vadd.f32 %v13895_v19, %v17532_v14  ;;  %v13899_v1 = vadd.f32 %v13746_v34, %v17373_v41  ;;  %v10126_v8 = vpop.f32.mrb[63].mxu0  ;;  %v17835_v56 = vmul.f32 1.4142135, %v10844_v17  ;;  %v10847_v40 = vsel %vm10783_vm2, %v10751_v36, %v10815_v30 }
 0x90c   : > { %v13898_v5 = vadd.f32 %v13897_v51, %v17537_v39  ;;  %v13901_v33 = vadd.f32 %v10126_v8, %v18197_v49  ;;  %v10845_v59 = vsel %vm10781_vm3, %v10749_v27, %v10813_v50  ;;  %v17839_v10 = vmul.f32 1.4142135, %v10846_v37  ;;  %v18206_v50 = vld [vmem:[#allocation17_spill] sm:$0xff] }
 0x90d   : > { %v10754_v62 = vadd.f32 %v13896_v35, %v17794_v21  ;;  %v13900_v28 = vadd.f32 %v13899_v1, %v18198_v45  ;;  %v17843_v3 = vmul.f32 1.4142135, %v10845_v59  ;;  %v17845_v14 = vmul.f32 1.4142135, %v10847_v40  ;;  %v18207_v1 = vld [vmem:[#allocation18_spill] sm:$0xff] }
 0x90e   : > { %v10752_v41 = vadd.f32 %v13898_v5, %v17794_v21  ;;  %v13902_v61 = vadd.f32 %v13901_v33, %v18199_v25 }
 0x90f   : > { %v10818_v12 = vmul.f32 0.2, %v10754_v62  ;;  %v10755_v39 = vadd.f32 %v13900_v28, %v17794_v21  ;;  %v10968_v52 = vpack.c.bf16 %v17843_v3, %v17835_v56  ;;  %v10969_v7 = vpack.c.bf16 %v17845_v14, %v17839_v10 }
 0x910   : > { %v10816_v15 = vmul.f32 0.2, %v10752_v41  ;;  %v10753_v13 = vadd.f32 %v13902_v61, %v17794_v21  ;;  %v13749_v46 = vpop.f32.mrb[64].mxu0  ;;  %vm10784_vm0 = vcmp.ge.f32.partialorder %v10752_v41, 0.0  ;;  %vm10786_vm4 = vcmp.ge.f32.partialorder %v10754_v62, 0.0 }
 0x911   : > { %v10819_v48 = vmul.f32 0.2, %v10755_v39  ;;  %v13903_v57 = vadd.f32 %v13749_v46, %v18200_v58  ;;  %v10139_v43 = vpop.f32.mrb[65].mxu0  ;;  %vm10787_vm5 = vcmp.ge.f32.partialorder %v10755_v39, 0.0  ;;  %v10850_v2 = vsel %vm10786_vm4, %v10754_v62, %v10818_v12  ;;  %v18210_v58 = vld [vmem:[#allocation19_spill] sm:$0xff] }
 0x912   : > { %v10817_v31 = vmul.f32 0.2, %v10753_v13  ;;  %v13905_v32 = vadd.f32 %v10139_v43, %v18201_v23  ;;  %v13750_v26 = vpop.f32.mrb[66].mxu0  ;;  %vm10785_vm7 = vcmp.ge.f32.partialorder %v10753_v13, 0.0  ;;  %v10848_v53 = vsel %vm10784_vm0, %v10752_v41, %v10816_v15  ;;  %v18208_v41 = vld [vmem:[#allocation27_spill] sm:$0xff]  ;;  %v18209_v15 = vld [vmem:[#allocation28_spill] sm:$0xff] }
 0x913   : > { %v13904_v44 = vadd.f32 %v13903_v57, %v18202_v4  ;;  %v13907_v0 = vadd.f32 %v13750_v26, %v18203_v11  ;;  %v10142_v63 = vpop.f32.mrb[67].mxu0  ;;  %v17859_v20 = vmul.f32 1.4142135, %v10848_v53  ;;  %v10851_v36 = vsel %vm10787_vm5, %v10755_v39, %v10819_v48  ;;  %v18211_v43 = vld [vmem:[#allocation29_spill] sm:$0xff]  ;;  %v18212_v26 = vld [vmem:[#allocation20_spill] sm:$0xff]  ;;  %v18213_v4 = vld [vmem:[#allocation30_spill] sm:$0xff] }
 0x914   : > { %v13906_v27 = vadd.f32 %v13905_v32, %v18204_v38  ;;  %v13909_v30 = vadd.f32 %v10142_v63, %v18205_v16  ;;  %v10849_v19 = vsel %vm10785_vm7, %v10753_v13, %v10817_v31  ;;  %v17863_v22 = vmul.f32 1.4142135, %v10850_v2 }
 0x915   : > { %v10758_v37 = vadd.f32 %v13904_v44, %v17794_v21  ;;  %v13908_v51 = vadd.f32 %v13907_v0, %v18206_v50  ;;  %v17867_v34 = vmul.f32 1.4142135, %v10849_v19  ;;  %v17869_v17 = vmul.f32 1.4142135, %v10851_v36  ;;  %v18214_v36 = vld [vmem:[#allocation21_spill] sm:$0xff]  ;;  %v18215_v19 = vld [vmem:[#allocation34_spill] sm:$0xff] }
 0x916   : > { %v10756_v35 = vadd.f32 %v13906_v27, %v17794_v21  ;;  %v13910_v8 = vadd.f32 %v13909_v30, %v18207_v1 }
 0x917   : > { %v10822_v40 = vmul.f32 0.2, %v10758_v37  ;;  %v10759_v5 = vadd.f32 %v13908_v51, %v17794_v21  ;;  %v10970_v49 = vpack.c.bf16 %v17867_v34, %v17859_v20  ;;  %v10971_v33 = vpack.c.bf16 %v17869_v17, %v17863_v22 }
 0x918   : > { %v10820_v59 = vmul.f32 0.2, %v10756_v35  ;;  %v10757_v62 = vadd.f32 %v13910_v8, %v17794_v21  ;;  %v13753_v45 = vpop.f32.mrb[68].mxu0  ;;  %vm10788_vm8 = vcmp.ge.f32.partialorder %v10756_v35, 0.0  ;;  %vm10790_vm10 = vcmp.ge.f32.partialorder %v10758_v37, 0.0 }
 0x919   : > { %v10823_v28 = vmul.f32 0.2, %v10759_v5  ;;  %v13911_v25 = vadd.f32 %v13753_v45, %v18208_v41  ;;  %v10155_v61 = vpop.f32.mrb[69].mxu0  ;;  %vm10791_vm12 = vcmp.ge.f32.partialorder %v10759_v5, 0.0  ;;  %v10854_v12 = vsel %vm10790_vm10, %v10758_v37, %v10822_v40 }
 0x91a   : > { %v10821_v39 = vmul.f32 0.2, %v10757_v62  ;;  %v13913_v13 = vadd.f32 %v10155_v61, %v18209_v15  ;;  %v13754_v46 = vpop.f32.mrb[70].mxu0  ;;  %vm10789_vm14 = vcmp.ge.f32.partialorder %v10757_v62, 0.0  ;;  %v10852_v48 = vsel %vm10788_vm8, %v10756_v35, %v10820_v59  ;;  %v18217_v61 = vld [vmem:[#allocation32_spill] sm:$0xff] }
 0x91b   : > { %v13912_v57 = vadd.f32 %v13911_v25, %v18210_v58  ;;  %v13915_v2 = vadd.f32 %v13754_v46, %v18211_v43  ;;  %v10158_v31 = vpop.f32.mrb[71].mxu0  ;;  %v17883_v23 = vmul.f32 1.4142135, %v10852_v48  ;;  %v10855_v32 = vsel %vm10791_vm12, %v10759_v5, %v10823_v28  ;;  %v18219_v48 = vld [vmem:[#allocation6_spill] sm:$0xff] }
 0x91c   : > { %v13914_v53 = vadd.f32 %v13913_v13, %v18212_v26  ;;  %v13917_v44 = vadd.f32 %v10158_v31, %v18213_v4  ;;  %v10853_v11 = vsel %vm10789_vm14, %v10757_v62, %v10821_v39  ;;  %v17887_v0 = vmul.f32 1.4142135, %v10854_v12  ;;  %v18216_v62 = vld [vmem:[#allocation31_spill] sm:$0xff]  ;;  %v18220_v31 = vld [vmem:[#allocation36_spill] sm:$0xff] }
 0x91d   : > { %v10762_v63 = vadd.f32 %v13912_v57, %v17794_v21  ;;  %v13916_v38 = vadd.f32 %v13915_v2, %v18214_v36  ;;  %v17891_v27 = vmul.f32 1.4142135, %v10853_v11  ;;  %v17893_v16 = vmul.f32 1.4142135, %v10855_v32  ;;  %v18218_v13 = vld [vmem:[#allocation35_spill] sm:$0xff]  ;;  %v18221_v26 = vld [vmem:[#allocation8_spill] sm:$0xff] }
 0x91e   : > { %v10760_v30 = vadd.f32 %v13914_v53, %v17794_v21  ;;  %v13918_v37 = vadd.f32 %v13917_v44, %v18215_v19 }
 0x91f   : > { %v10826_v50 = vmul.f32 0.2, %v10762_v63  ;;  %v10763_v51 = vadd.f32 %v13916_v38, %v17794_v21  ;;  %v10972_v35 = vpack.c.bf16 %v17891_v27, %v17883_v23  ;;  %v10973_v1 = vpack.c.bf16 %v17893_v16, %v17887_v0 }
 0x920   : > { %v10824_v8 = vmul.f32 0.2, %v10760_v30  ;;  %v10761_v40 = vadd.f32 %v13918_v37, %v17794_v21  ;;  %v13757_v5 = vpop.f32.mrb[72].mxu0  ;;  %vm10792_vm6 = vcmp.ge.f32.partialorder %v10760_v30, 0.0  ;;  %vm10794_vm9 = vcmp.ge.f32.partialorder %v10762_v63, 0.0  ;;  %v18223_v37 = vld [vmem:[#allocation38_spill] sm:$0xff] }
 0x921   : > { %v10827_v59 = vmul.f32 0.2, %v10763_v51  ;;  %v13919_v45 = vadd.f32 %v13757_v5, %v18216_v62  ;;  %v10171_v28 = vpop.f32.mrb[73].mxu0  ;;  %vm10795_vm11 = vcmp.ge.f32.partialorder %v10763_v51, 0.0  ;;  %v10858_v41 = vsel %vm10794_vm9, %v10762_v63, %v10826_v50  ;;  %v18222_v63 = vld [vmem:[#allocation37_spill] sm:$0xff] }
 0x922   : > { %v10825_v25 = vmul.f32 0.2, %v10761_v40  ;;  %v13921_v12 = vadd.f32 %v10171_v28, %v18217_v61  ;;  %v13758_v39 = vpop.f32.mrb[74].mxu0  ;;  %vm10793_vm13 = vcmp.ge.f32.partialorder %v10761_v40, 0.0  ;;  %v10856_v15 = vsel %vm10792_vm6, %v10760_v30, %v10824_v8 }
 0x923   : > { %v13920_v46 = vadd.f32 %v13919_v45, %v18218_v13  ;;  %v13923_v58 = vadd.f32 %v13758_v39, %v18219_v48  ;;  %v10174_v57 = vpop.f32.mrb[75].mxu0  ;;  %v17907_v43 = vmul.f32 1.4142135, %v10856_v15  ;;  %v10859_v2 = vsel %vm10795_vm11, %v10763_v51, %v10827_v59  ;;  %v18225_v39 = vld [vmem:[#allocation10_spill] sm:$0xff]  ;;  %v18226_v48 = vld [vmem:[#allocation11_spill] sm:$0xff] }
 0x924   : > { %v13922_v32 = vadd.f32 %v13921_v12, %v18220_v31  ;;  %v13925_v53 = vadd.f32 %v10174_v57, %v18221_v26  ;;  %v10857_v4 = vsel %vm10793_vm13, %v10761_v40, %v10825_v25  ;;  %v17911_v44 = vmul.f32 1.4142135, %v10858_v41  ;;  %v18224_v41 = vld [vmem:[#allocation33_spill] sm:$0xff]  ;;  %v18227_v26 = vld [vmem:[#allocation12_spill] sm:$0xff] }
 0x925   : > { %v10766_v11 = vadd.f32 %v13920_v46, %v17794_v21  ;;  %v13924_v36 = vadd.f32 %v13923_v58, %v18222_v63  ;;  %v17915_v38 = vmul.f32 1.4142135, %v10857_v4  ;;  %v17917_v30 = vmul.f32 1.4142135, %v10859_v2 }
 0x926   : > { %v10764_v19 = vadd.f32 %v13922_v32, %v17794_v21  ;;  %v13926_v50 = vadd.f32 %v13925_v53, %v18223_v37 }
 0x927   : > { %v10830_v51 = vmul.f32 0.2, %v10766_v11  ;;  %v10767_v8 = vadd.f32 %v13924_v36, %v17794_v21  ;;  %v10974_v40 = vpack.c.bf16 %v17915_v38, %v17907_v43  ;;  %v10975_v5 = vpack.c.bf16 %v17917_v30, %v17911_v44 }
 0x928   : > { %v10828_v59 = vmul.f32 0.2, %v10764_v19  ;;  %v10765_v62 = vadd.f32 %v13926_v50, %v17794_v21  ;;  %v13761_v45 = vpop.f32.mrb[76].mxu0  ;;  %vm10796_vm15 = vcmp.ge.f32.partialorder %v10764_v19, 0.0  ;;  %vm10798_vm1 = vcmp.ge.f32.partialorder %v10766_v11, 0.0 }
 0x929   : > { %v10831_v28 = vmul.f32 0.2, %v10767_v8  ;;  %v13927_v25 = vadd.f32 %v13761_v45, %v18224_v41  ;;  %v10187_v61 = vpop.f32.mrb[77].mxu0  ;;  %vm10799_vm2 = vcmp.ge.f32.partialorder %v10767_v8, 0.0  ;;  %v10862_v31 = vsel %vm10798_vm1, %v10766_v11, %v10830_v51 }
 0x92a   : > { %v10829_v12 = vmul.f32 0.2, %v10765_v62  ;;  %v13929_v15 = vadd.f32 %v10187_v61, %v18225_v39  ;;  %v13762_v13 = vpop.f32.mrb[78].mxu0  ;;  %vm10797_vm3 = vcmp.ge.f32.partialorder %v10765_v62, 0.0  ;;  %v10860_v46 = vsel %vm10796_vm15, %v10764_v19, %v10828_v59 }
 0x92b   : > { %v13931_v58 = vadd.f32 %v13762_v13, %v18226_v48  ;;  %v13928_v57 = vadd.f32 %v13927_v25, %v17773_v24  ;;  %v10190_v2 = vpop.f32.mrb[79].mxu0  ;;  %v10863_v32 = vsel %vm10799_vm2, %v10767_v8, %v10831_v28  ;;  %v17933_v36 = vmul.f32 1.4142135, %v10860_v46  ;;  %v18229_v13 = vld [vmem:[#allocation5_spill] sm:$0xff] }
 0x92c   : > { %v13933_v53 = vadd.f32 %v10190_v2, %v18227_v26  ;;  %v13930_v4 = vadd.f32 %v13929_v15, %v17775_v47  ;;  %v10861_v63 = vsel %vm10797_vm3, %v10765_v62, %v10829_v12  ;;  %v17939_v19 = vmul.f32 1.4142135, %v10863_v32  ;;  %v18230_v2 = vld [vmem:[#allocation7_spill] sm:$0xff] }
 0x92d   : > { %v10770_v37 = vadd.f32 %v13928_v57, %v17794_v21  ;;  %v13932_v50 = vadd.f32 %v13931_v58, %v17777_v9  ;;  %v17937_v45 = vmul.f32 1.4142135, %v10861_v63  ;;  %v17943_v51 = vmul.f32 1.4142135, %v10862_v31  ;;  %v18231_v63 = vld [vmem:[#allocation9_spill] sm:$0xff] }
 0x92e   : > { %v10768_v24 = vadd.f32 %v13930_v4, %v17794_v21  ;;  %v13934_v11 = vadd.f32 %v13933_v53, %v17782_v42  ;;  %v18228_v42 = vld [vmem:[#allocation4_spill] sm:$0xff] }
 0x92f   : > { %vm10802_vm0 = vcmp.ge.f32.partialorder %v10770_v37, 0.0  ;;  %v10834_v8 = vmul.f32 0.2, %v10770_v37  ;;  %v10771_v47 = vadd.f32 %v13932_v50, %v17794_v21  ;;  %v10976_v59 = vpack.c.bf16 %v17937_v45, %v17933_v36 }
 0x930   : > { %vm10800_vm4 = vcmp.ge.f32.partialorder %v10768_v24, 0.0  ;;  %v10832_v62 = vmul.f32 0.2, %v10768_v24  ;;  %v10769_v9 = vadd.f32 %v13934_v11, %v17794_v21  ;;  %v13781_v28 = vpop.f32.mrb[48].mxu0  ;;  %v10977_v41 = vpack.c.bf16 %v17939_v19, %v17943_v51 }
 0x931   : > { %vm10803_vm5 = vcmp.ge.f32.partialorder %v10771_v47, 0.0  ;;  %v10835_v25 = vmul.f32 0.2, %v10771_v47  ;;  %v13875_v61 = vadd.f32 %v13781_v28, %v18228_v42  ;;  %v10573_v12 = vpop.f32.mrb[49].mxu0  ;;  %v10866_v39 = vsel %vm10802_vm0, %v10770_v37, %v10834_v8 }
 0x932   : > { %vm10801_vm7 = vcmp.ge.f32.partialorder %v10769_v9, 0.0  ;;  %v10833_v15 = vmul.f32 0.2, %v10769_v9  ;;  %v13876_v46 = vadd.f32 %v10573_v12, %v18229_v13  ;;  %v13782_v48 = vpop.f32.mrb[50].mxu0  ;;  %v10864_v58 = vsel %vm10800_vm4, %v10768_v24, %v10832_v62 }
 0x933   : > { %v10742_v57 = vadd.f32 %v13875_v61, %v17794_v21  ;;  %v13877_v31 = vadd.f32 %v13782_v48, %v18230_v2  ;;  %v10576_v32 = vpop.f32.mrb[51].mxu0  ;;  %v10896_v26 = vmul.f32 1.4142135, %v10864_v58  ;;  %v10867_v53 = vsel %vm10803_vm5, %v10771_v47, %v10835_v25 }
 0x934   : > { %v10740_v4 = vadd.f32 %v13876_v46, %v17794_v21  ;;  %v13878_v36 = vadd.f32 %v10576_v32, %v18231_v63  ;;  %v10865_v50 = vsel %vm10801_vm7, %v10769_v9, %v10833_v15  ;;  %v10898_v45 = vmul.f32 1.4142135, %v10866_v39 }
 0x935   : > { %vm10774_vm8 = vcmp.ge.f32.partialorder %v10742_v57, 0.0  ;;  %v10806_v37 = vmul.f32 0.2, %v10742_v57  ;;  %v10743_v19 = vadd.f32 %v13877_v31, %v17794_v21  ;;  %v10897_v11 = vmul.f32 1.4142135, %v10865_v50 }
 0x936   : > { %vm10772_vm10 = vcmp.ge.f32.partialorder %v10740_v4, 0.0  ;;  %v10804_v24 = vmul.f32 0.2, %v10740_v4  ;;  %v10741_v51 = vadd.f32 %v13878_v36, %v17794_v21  ;;  %v10899_v8 = vmul.f32 1.4142135, %v10867_v53 }
 0x937   : > { %v10838_v62 = vsel %vm10774_vm8, %v10742_v57, %v10806_v37  ;;  %vm10775_vm12 = vcmp.ge.f32.partialorder %v10743_v19, 0.0  ;;  %v10807_v28 = vmul.f32 0.2, %v10743_v19  ;;  %v10978_v47 = vpack.c.bf16 %v10897_v11, %v10896_v26  ;;  %v17993_v21 = vld [vmem:[%s18074_s7] ss:$0 sm:$0xff] }
 0x938   : > { %vm10773_vm14 = vcmp.ge.f32.partialorder %v10741_v51, 0.0  ;;  %v10805_v25 = vmul.f32 0.2, %v10741_v51  ;;  %v10836_v42 = vsel %vm10772_vm10, %v10740_v4, %v10804_v24  ;;  %v10979_v9 = vpack.c.bf16 %v10899_v8, %v10898_v45 }
 0x939   : > { %v10839_v61 = vsel %vm10775_vm12, %v10743_v19, %v10807_v28  ;;  %v10870_v12 = vmul.f32 1.4142135, %v10838_v62  ;;  %v10868_v13 = vmul.f32 1.4142135, %v10836_v42 }
 0x93a   : > { %v10871_v39 = vmul.f32 1.4142135, %v10839_v61  ;;  %v10837_v15 = vsel %vm10773_vm14, %v10741_v51, %v10805_v25 }
 0x93b   : > { %v10869_v46 = vmul.f32 1.4142135, %v10837_v15 }
 0x93c   : > { %v10965_v48 = vpack.c.bf16 %v10871_v39, %v10870_v12 }
 0x93d   : > { %v10964_v58 = vpack.c.bf16 %v10869_v46, %v10868_v13 }
 0x93f   : > { %13827 = vmatprep.mubr.bf16.mxu1 %v10964_v58 }
 0x940   : > { %13828 = vmatmul.mubr.bf16.vlgmr.msra.gmra.mrb[128].mxu1 %v10965_v48 }
 0x941   : > { %13831 = vmatprep.mubr.bf16.mxu1 %v10966_v29 }
 0x948   : > { %13832 = vmatmul.mubr.bf16.gmra.mrb[132].mxu1 %v10967_v54 }
 0x949   : > { %13835 = vmatprep.mubr.bf16.mxu1 %v10968_v52 }
 0x950   : > { %13836 = vmatmul.mubr.bf16.gmra.mrb[136].mxu1 %v10969_v7 }
 0x951   : > { %13839 = vmatprep.mubr.bf16.mxu1 %v10970_v49 }
 0x958   : > { %13840 = vmatmul.mubr.bf16.gmra.mrb[140].mxu1 %v10971_v33 }
 0x959   : > { %13843 = vmatprep.mubr.bf16.mxu1 %v10972_v35 }
 0x960   : > { %13844 = vmatmul.mubr.bf16.gmra.mrb[144].mxu1 %v10973_v1 }
 0x961   : > { %13847 = vmatprep.mubr.bf16.mxu1 %v10974_v40 }
 0x968   : > { %13848 = vmatmul.mubr.bf16.gmra.mrb[148].mxu1 %v10975_v5 }
 0x969   : > { %13851 = vmatprep.mubr.bf16.mxu1 %v10976_v59 }
 0x970   : > { %13852 = vmatmul.mubr.bf16.gmra.mrb[152].mxu1 %v10977_v41 }
 0x971   : > { %13855 = vmatprep.mubr.bf16.mxu1 %v10978_v47 }
 0x978   : > { %13856 = vmatmul.mubr.bf16.gmra.mrb[156].mxu1 %v10979_v9 }
 0xa13   : > { %v13829_v55 = vpop.f32.mrb[128].mxu1 }
 0xa14   : > { %v11094_v6 = vadd.f32 %v13829_v55, %v17993_v21  ;;  %v11085_v18 = vpop.f32.mrb[129].mxu1 }
 0xa15   : > { %v11086_v60 = vadd.f32 %v17993_v21, %v11085_v18  ;;  %v13830_v29 = vpop.f32.mrb[130].mxu1 }
 0xa16   : > { %11214 = vst [vmem:[%s17998_s18 + $0x10] sm:$0xff] %v11094_v6  ;;  %v11097_v54 = vadd.f32 %v13830_v29, %v17993_v21  ;;  %v11088_v56 = vpop.f32.mrb[131].mxu1 }
 0xa17   : > { %11212 = vst [vmem:[%s17998_s18] sm:$0xff] %v11086_v60  ;;  %v11089_v10 = vadd.f32 %v17993_v21, %v11088_v56 }
 0xa18   : > { %11215 = vst [vmem:[%s17998_s18 + $0x18] sm:$0xff] %v11097_v54 }
 0xa19   : > { %11213 = vst [vmem:[%s17998_s18 + $0x8] sm:$0xff] %v11089_v10 }
 0xa1b   : > { %v13833_v3 = vpop.f32.mrb[132].mxu1 }
 0xa1c   : > { %v11110_v14 = vadd.f32 %v13833_v3, %v17993_v21  ;;  %v11101_v52 = vpop.f32.mrb[133].mxu1 }
 0xa1d   : > { %v11102_v7 = vadd.f32 %v17993_v21, %v11101_v52  ;;  %v13834_v20 = vpop.f32.mrb[134].mxu1 }
 0xa1e   : > { %11218 = vst [vmem:[%s17998_s18 + $0x30] sm:$0xff] %v11110_v14  ;;  %v11113_v22 = vadd.f32 %v13834_v20, %v17993_v21  ;;  %v11104_v34 = vpop.f32.mrb[135].mxu1 }
 0xa1f   : > { %11216 = vst [vmem:[%s17998_s18 + $0x20] sm:$0xff] %v11102_v7  ;;  %v11105_v17 = vadd.f32 %v17993_v21, %v11104_v34 }
 0xa20   : > { %11219 = vst [vmem:[%s17998_s18 + $0x38] sm:$0xff] %v11113_v22 }
 0xa21   : > { %11217 = vst [vmem:[%s17998_s18 + $0x28] sm:$0xff] %v11105_v17 }
 0xa23   : > { %v13837_v49 = vpop.f32.mrb[136].mxu1 }
 0xa24   : > { %v11126_v33 = vadd.f32 %v13837_v49, %v17993_v21  ;;  %v11117_v23 = vpop.f32.mrb[137].mxu1 }
 0xa25   : > { %v11118_v0 = vadd.f32 %v17993_v21, %v11117_v23  ;;  %v13838_v27 = vpop.f32.mrb[138].mxu1 }
 0xa26   : > { %11222 = vst [vmem:[%s17998_s18 + $0x50] sm:$0xff] %v11126_v33  ;;  %v11129_v16 = vadd.f32 %v13838_v27, %v17993_v21  ;;  %v11120_v35 = vpop.f32.mrb[139].mxu1 }
 0xa27   : > { %11220 = vst [vmem:[%s17998_s18 + $0x40] sm:$0xff] %v11118_v0  ;;  %v11121_v1 = vadd.f32 %v17993_v21, %v11120_v35 }
 0xa28   : > { %11223 = vst [vmem:[%s17998_s18 + $0x58] sm:$0xff] %v11129_v16 }
 0xa29   : > { %11221 = vst [vmem:[%s17998_s18 + $0x48] sm:$0xff] %v11121_v1 }
 0xa2b   : > { %v13841_v43 = vpop.f32.mrb[140].mxu1 }
 0xa2c   : > { %v11142_v44 = vadd.f32 %v13841_v43, %v17993_v21  ;;  %v11133_v38 = vpop.f32.mrb[141].mxu1 }
 0xa2d   : > { %v11134_v30 = vadd.f32 %v17993_v21, %v11133_v38  ;;  %v13842_v40 = vpop.f32.mrb[142].mxu1 }
 0xa2e   : > { %11226 = vst [vmem:[%s17998_s18 + $0x70] sm:$0xff] %v11142_v44  ;;  %v11145_v5 = vadd.f32 %v13842_v40, %v17993_v21  ;;  %v11136_v59 = vpop.f32.mrb[143].mxu1 }
 0xa2f   : > { %11224 = vst [vmem:[%s17998_s18 + $0x60] sm:$0xff] %v11134_v30  ;;  %v11137_v41 = vadd.f32 %v17993_v21, %v11136_v59 }
 0xa30   : > { %11227 = vst [vmem:[%s17998_s18 + $0x78] sm:$0xff] %v11145_v5 }
 0xa31   : > { %11225 = vst [vmem:[%s17998_s18 + $0x68] sm:$0xff] %v11137_v41 }
 0xa33   : > { %v13845_v57 = vpop.f32.mrb[144].mxu1 }
 0xa34   : > { %v11158_v2 = vadd.f32 %v13845_v57, %v17993_v21  ;;  %v11149_v31 = vpop.f32.mrb[145].mxu1 }
 0xa35   : > { %v11150_v32 = vadd.f32 %v17993_v21, %v11149_v31  ;;  %v13846_v26 = vpop.f32.mrb[146].mxu1 }
 0xa36   : > { %11230 = vst [vmem:[%s17998_s18 + $0x90] sm:$0xff] %v11158_v2  ;;  %v11161_v53 = vadd.f32 %v13846_v26, %v17993_v21  ;;  %v11152_v4 = vpop.f32.mrb[147].mxu1 }
 0xa37   : > { %11228 = vst [vmem:[%s17998_s18 + $0x80] sm:$0xff] %v11150_v32  ;;  %v11153_v63 = vadd.f32 %v17993_v21, %v11152_v4 }
 0xa38   : > { %11231 = vst [vmem:[%s17998_s18 + $0x98] sm:$0xff] %v11161_v53 }
 0xa39   : > { %11229 = vst [vmem:[%s17998_s18 + $0x88] sm:$0xff] %v11153_v63 }
 0xa3b   : > { %v13849_v36 = vpop.f32.mrb[148].mxu1 }
 0xa3c   : > { %v11174_v50 = vadd.f32 %v13849_v36, %v17993_v21  ;;  %v11165_v45 = vpop.f32.mrb[149].mxu1 }
 0xa3d   : > { %v11166_v37 = vadd.f32 %v17993_v21, %v11165_v45  ;;  %v13850_v19 = vpop.f32.mrb[150].mxu1 }
 0xa3e   : > { %11234 = vst [vmem:[%s17998_s18 + $0xb0] sm:$0xff] %v11174_v50  ;;  %v11177_v11 = vadd.f32 %v13850_v19, %v17993_v21  ;;  %v11168_v24 = vpop.f32.mrb[151].mxu1 }
 0xa3f   : > { %11232 = vst [vmem:[%s17998_s18 + $0xa0] sm:$0xff] %v11166_v37  ;;  %v11169_v51 = vadd.f32 %v17993_v21, %v11168_v24 }
 0xa40   : > { %11235 = vst [vmem:[%s17998_s18 + $0xb8] sm:$0xff] %v11177_v11 }
 0xa41   : > { %11233 = vst [vmem:[%s17998_s18 + $0xa8] sm:$0xff] %v11169_v51 }
 0xa43   : > { %v13853_v8 = vpop.f32.mrb[152].mxu1 }
 0xa44   : > { %v11190_v62 = vadd.f32 %v13853_v8, %v17993_v21  ;;  %v11181_v28 = vpop.f32.mrb[153].mxu1 }
 0xa45   : > { %v11182_v47 = vadd.f32 %v17993_v21, %v11181_v28  ;;  %v13854_v25 = vpop.f32.mrb[154].mxu1 }
 0xa46   : > { %11238 = vst [vmem:[%s17998_s18 + $0xd0] sm:$0xff] %v11190_v62  ;;  %v11193_v42 = vadd.f32 %v13854_v25, %v17993_v21  ;;  %v11184_v61 = vpop.f32.mrb[155].mxu1 }
 0xa47   : > { %11236 = vst [vmem:[%s17998_s18 + $0xc0] sm:$0xff] %v11182_v47  ;;  %v11185_v9 = vadd.f32 %v17993_v21, %v11184_v61 }
 0xa48   : > { %11239 = vst [vmem:[%s17998_s18 + $0xd8] sm:$0xff] %v11193_v42 }
 0xa49   : > { %11237 = vst [vmem:[%s17998_s18 + $0xc8] sm:$0xff] %v11185_v9 }
 0xa4b   : > { %v13857_v12 = vpop.f32.mrb[156].mxu1 }
 0xa4c   : > { %v11206_v39 = vadd.f32 %v13857_v12, %v17993_v21  ;;  %v11197_v15 = vpop.f32.mrb[157].mxu1 }
 0xa4d   : > { %v11198_v13 = vadd.f32 %v17993_v21, %v11197_v15  ;;  %v13858_v46 = vpop.f32.mrb[158].mxu1 }
 0xa4e   : > { %11242 = vst [vmem:[%s17998_s18 + $0xf0] sm:$0xff] %v11206_v39  ;;  %v11209_v48 = vadd.f32 %v13858_v46, %v17993_v21  ;;  %v11200_v58 = vpop.f32.mrb[159].mxu1 }
 0xa4f   : > { %11240 = vst [vmem:[%s17998_s18 + $0xe0] sm:$0xff] %v11198_v13  ;;  %v11201_v55 = vadd.f32 %v17993_v21, %v11200_v58 }
 0xa50   : > { %11243 = vst [vmem:[%s17998_s18 + $0xf8] sm:$0xff] %v11209_v48 }
 0xa51   : > { %11241 = vst [vmem:[%s17998_s18 + $0xe8] sm:$0xff] %v11201_v55 }
 0xa52 PF: > { %s20_s13 = sadd.s32 1, %s14643_s13  }
 0xa53   : > { %p17_p4 = scmp.ge.s32.totalorder %s20_s13, 4  }
 0xa55   :  { %19 = sbr.rel (!%p17_p4) target bundleno = 1 (0x1), region = 124 }

</bundles_post_ra>
